<compile_context>
chip_gen: v7x
topology: tpu7x:2x2x1
jax: 0.10.0
libtpu: 0.0.40
codegen_flags: <defaults>
</compile_context>

<pallas_src>
import functools
import math

import jax
import jax.numpy as jnp
from jax import lax
from jax.experimental import pallas as pl
from jax.experimental.pallas import tpu as pltpu


# ----------------------------------------------------------------------------
# Fused per-EncoderLayer kernel (one grid step == one batch element)
# ----------------------------------------------------------------------------

def _encoder_layer_kernel(
        x_ref, adj_ref, rw_ref, rb_ref,
        wqkv0_ref, bqkv0_ref, wo0_ref, bo0_ref,
        cw_ref, cb_ref, bns_ref, bnt_ref,
        wqkv1_ref, bqkv1_ref, wo1_ref, bo1_ref,
        lng_ref, lnb_ref, gw_ref, gb_ref,
        o_ref, *, N, L, D, H, alpha):
    L2 = L // 2
    Dh = D // H
    scale = 1.0 / math.sqrt(Dh)

    x3 = x_ref[0]                            # [N, L, D]
    x2 = x3.reshape(N * L, D)

    # ---- residual = Linear(L -> L/2) over the seq axis, contracted in-kernel:
    #      res[n, m, d] = sum_l W[m, l] * x[n, l, d] + b[m]
    res_rows = []
    for n in range(N):
        res_rows.append(
            jnp.dot(rw_ref[...], x3[n], preferred_element_type=jnp.float32)
            + rb_ref[...])
    res2 = jnp.concatenate(res_rows, axis=0)                 # [N*L2, D]

    def mha(h2, n_rows, seq, wqkv_ref, bqkv_ref, wo_ref, bo_ref):
        """Fused-QKV projection + per-head softmax attention + output proj."""
        qkv = (jnp.dot(h2, wqkv_ref[...], preferred_element_type=jnp.float32)
               + bqkv_ref[...])                              # [n_rows, 3*D]
        out = None
        for hh in range(H):
            q = qkv[:, hh * Dh:(hh + 1) * Dh].reshape(N, seq, Dh)
            k = qkv[:, D + hh * Dh:D + (hh + 1) * Dh].reshape(N, seq, Dh)
            v = qkv[:, 2 * D + hh * Dh:2 * D + (hh + 1) * Dh].reshape(N, seq, Dh)
            s = jnp.einsum('nle,nme->nlm', q, k,
                           preferred_element_type=jnp.float32) * scale
            s = s - jnp.max(s, axis=-1, keepdims=True)
            p = jnp.exp(s)
            p = p * pl.reciprocal(jnp.sum(p, axis=-1, keepdims=True), approx=True)
            oh = jnp.einsum('nlm,nme->nle', p, v,
                            preferred_element_type=jnp.float32).reshape(n_rows, Dh)
            # concat(o_h) @ Wo  ==  sum_h  o_h @ Wo[h*Dh:(h+1)*Dh, :]
            contrib = jnp.dot(oh, wo_ref[hh * Dh:(hh + 1) * Dh, :],
                              preferred_element_type=jnp.float32)
            out = contrib if out is None else out + contrib
        return out + bo_ref[...]

    # ---- ET: MHA -> ConvLayer -> MHA -> LayerNorm -------------------------
    h2 = mha(x2, N * L, L, wqkv0_ref, bqkv0_ref, wo0_ref, bo0_ref)   # [N*L, D]

    # Conv1d(k=3, pad=1) over the seq axis as three shifted matmuls; the shift
    # is done on the flattened rows with cross-sample taps masked to zero.
    NL = N * L
    zrow = jnp.zeros((1, D), jnp.float32)
    h_prev = jnp.concatenate([zrow, h2[:NL - 1, :]], axis=0)
    h_next = jnp.concatenate([h2[1:, :], zrow], axis=0)
    rowid = lax.broadcasted_iota(jnp.int32, (NL, 1), 0)
    h_prev = jnp.where(rowid % L == 0, 0.0, h_prev)
    h_next = jnp.where(rowid % L == (L - 1), 0.0, h_next)
    y = (jnp.dot(h_prev, cw_ref[0], preferred_element_type=jnp.float32)
         + jnp.dot(h2, cw_ref[1], preferred_element_type=jnp.float32)
         + jnp.dot(h_next, cw_ref[2], preferred_element_type=jnp.float32)
         + cb_ref[...])
    y = y * bns_ref[...] + bnt_ref[...]                      # eval-mode BatchNorm1d
    y = jnp.where(y > 0.0, y, jnp.exp(jnp.minimum(y, 0.0)) - 1.0)   # ELU

    # MaxPool1d(kernel=3, stride=2, padding=1) unrolled in VMEM (no HBM glue).
    pool_rows = []
    for n in range(N):
        for m in range(L2):
            best = None
            for t in (-1, 0, 1):
                idx = 2 * m + t
                if 0 <= idx < L:
                    r = y[n * L + idx:n * L + idx + 1, :]
                    best = r if best is None else jnp.maximum(best, r)
            pool_rows.append(best)
    p2 = jnp.concatenate(pool_rows, axis=0)                  # [N*L2, D]

    h2 = mha(p2, N * L2, L2, wqkv1_ref, bqkv1_ref, wo1_ref, bo1_ref)

    mu = jnp.mean(h2, axis=-1, keepdims=True)                # LayerNorm(d_model)
    xc = h2 - mu
    var = jnp.mean(xc * xc, axis=-1, keepdims=True)
    et2 = xc * lax.rsqrt(var + 1e-5) * lng_ref[...] + lnb_ref[...]   # [N*L2, D]

    # ---- ES: 1-layer GCN  relu(adj @ et @ W + b) --------------------------
    adj = adj_ref[...]                                       # [N, N]
    mix_rows = []
    for n in range(N):
        acc = None
        for m in range(N):
            term = adj[n:n + 1, m:m + 1] * et2[m * L2:(m + 1) * L2, :]
            acc = term if acc is None else acc + term
        mix_rows.append(acc)
    mixed2 = jnp.concatenate(mix_rows, axis=0)               # [N*L2, D]
    es2 = jnp.maximum(
        jnp.dot(mixed2, gw_ref[...], preferred_element_type=jnp.float32) + gb_ref[...],
        0.0)

    # ---- blend + residual, single store per batch element -----------------
    out2 = alpha * et2 + (1.0 - alpha) * es2 + res2
    o_ref[0] = out2.reshape(N, L2, D)


def encoder_layer_fused(x, adj, lp, *, alpha, n_heads):
    B, N, L, D = x.shape
    L2 = L // 2

    def bcast(a):
        zeros = (0,) * a.ndim
        return pl.BlockSpec(a.shape, lambda b: zeros)

    args = (adj, lp["res_w"], lp["res_b"],
            lp["attn0"]["wqkv"], lp["attn0"]["bqkv"], lp["attn0"]["wo"], lp["attn0"]["bo"],
            lp["conv"]["w"], lp["conv"]["b"], lp["conv"]["bn_scale"], lp["conv"]["bn_shift"],
            lp["attn1"]["wqkv"], lp["attn1"]["bqkv"], lp["attn1"]["wo"], lp["attn1"]["bo"],
            lp["ln"]["g"], lp["ln"]["b"], lp["gcn"]["w"], lp["gcn"]["b"])

    in_specs = [pl.BlockSpec((1, N, L, D), lambda b: (b, 0, 0, 0))]
    in_specs += [bcast(a) for a in args]

    kern = functools.partial(_encoder_layer_kernel, N=N, L=L, D=D, H=n_heads,
                             alpha=float(alpha))
    return pl.pallas_call(
        kern,
        out_shape=jax.ShapeDtypeStruct((B, N, L2, D), jnp.float32),
        grid=(B,),
        in_specs=in_specs,
        out_specs=pl.BlockSpec((1, N, L2, D), lambda b: (b, 0, 0, 0)),
        compiler_params=pltpu.CompilerParams(dimension_semantics=("parallel",)),
    )(x, *args)


def encoder_forward(x, adj, params, alpha, n_heads):
    for lp in params["layers"]:
        x = encoder_layer_fused(x, adj, lp, alpha=alpha, n_heads=n_heads)
    return x


# ----------------------------------------------------------------------------
# Deterministic parameter init (synthetic, not a checkpoint)
# ----------------------------------------------------------------------------

def _dense_init(key, fan_in, fan_out):
    kw, kb = jax.random.split(key)
    w = jax.random.normal(kw, (fan_in, fan_out), jnp.float32) * (1.0 / math.sqrt(fan_in))
    b = jax.random.normal(kb, (1, fan_out), jnp.float32) * 0.01
    return w, b


def _attn_init(key, d_model):
    ks = jax.random.split(key, 4)
    wq, bq = _dense_init(ks[0], d_model, d_model)
    wk, bk = _dense_init(ks[1], d_model, d_model)
    wv, bv = _dense_init(ks[2], d_model, d_model)
    wo, bo = _dense_init(ks[3], d_model, d_model)
    return dict(wqkv=jnp.concatenate([wq, wk, wv], axis=1),
                bqkv=jnp.concatenate([bq, bk, bv], axis=1),
                wo=wo, bo=bo)


def init_params(key, d_model, seq_in, e_layers):
    D = d_model
    layers = []
    for i in range(e_layers):
        L_i = int(seq_in * 2 ** (-i))
        L2 = L_i // 2
        key, k0, k1, k2, k3, k4, k5 = jax.random.split(key, 7)
        conv_w = jax.random.normal(k2, (3, D, D), jnp.float32) * (1.0 / math.sqrt(3 * D))
        conv_b = jax.random.normal(jax.random.fold_in(k2, 1), (1, D), jnp.float32) * 0.01
        bn_scale = jnp.full((1, D), 1.0 / math.sqrt(1.0 + 1e-5), jnp.float32)
        bn_shift = jnp.zeros((1, D), jnp.float32)
        gcn_w, gcn_b = _dense_init(k3, D, D)
        # residual Linear(L_i -> L_i/2): stored as PyTorch-style [out, in] weight.
        res_w = jax.random.normal(k4, (L2, L_i), jnp.float32) * (1.0 / math.sqrt(L_i))
        res_b = jax.random.normal(k5, (L2, 1), jnp.float32) * 0.01
        layers.append(dict(
            attn0=_attn_init(k0, D),
            attn1=_attn_init(k1, D),
            conv=dict(w=conv_w, b=conv_b, bn_scale=bn_scale, bn_shift=bn_shift),
            ln=dict(g=jnp.ones((1, D), jnp.float32),
                    b=jnp.zeros((1, D), jnp.float32)),
            gcn=dict(w=gcn_w, b=gcn_b),
            res_w=res_w, res_b=res_b,
        ))
    return dict(layers=layers)


# ----------------------------------------------------------------------------
# Demo
# ----------------------------------------------------------------------------

if __name__ == "__main__":
    B, N, L, D, H, E = 2, 4, 8, 32, 4, 2   # batch, nodes, seq_in, d_model, n_heads, e_layers
    ALPHA = 0.5                            # args.alpha

    key = jax.random.PRNGKey(0)
    kx, ka, kp = jax.random.split(key, 3)
    x = jax.random.normal(kx, (B, N, L, D), jnp.float32)
    adj = jnp.abs(jax.random.normal(ka, (N, N), jnp.float32)) + jnp.eye(N, dtype=jnp.float32)
    adj = adj / jnp.sum(adj, axis=-1, keepdims=True)
    params = init_params(kp, D, L, E)

    fwd = jax.jit(functools.partial(encoder_forward, alpha=ALPHA, n_heads=H))
    out = fwd(x, adj, params)
    jax.block_until_ready(out)
    assert out.shape == (B, N, L // (2 ** E), D), out.shape
    assert bool(jnp.all(jnp.isfinite(out)))
    print("KERNEL_OK")
</pallas_src>

<mosaic_0001>
module attributes {stable_mosaic.version = 11 : i64} {
  func.func @_encoder_layer_kernel(%arg0: i32, %arg1: memref<1x4x4x32xf32, #tpu.memory_space<vmem>>, %arg2: memref<4x4xf32, #tpu.memory_space<vmem>>, %arg3: memref<2x4xf32, #tpu.memory_space<vmem>>, %arg4: memref<2x1xf32, #tpu.memory_space<vmem>>, %arg5: memref<32x96xf32, #tpu.memory_space<vmem>>, %arg6: memref<1x96xf32, #tpu.memory_space<vmem>>, %arg7: memref<32x32xf32, #tpu.memory_space<vmem>>, %arg8: memref<1x32xf32, #tpu.memory_space<vmem>>, %arg9: memref<3x32x32xf32, #tpu.memory_space<vmem>>, %arg10: memref<1x32xf32, #tpu.memory_space<vmem>>, %arg11: memref<1x32xf32, #tpu.memory_space<vmem>>, %arg12: memref<1x32xf32, #tpu.memory_space<vmem>>, %arg13: memref<32x96xf32, #tpu.memory_space<vmem>>, %arg14: memref<1x96xf32, #tpu.memory_space<vmem>>, %arg15: memref<32x32xf32, #tpu.memory_space<vmem>>, %arg16: memref<1x32xf32, #tpu.memory_space<vmem>>, %arg17: memref<1x32xf32, #tpu.memory_space<vmem>>, %arg18: memref<1x32xf32, #tpu.memory_space<vmem>>, %arg19: memref<32x32xf32, #tpu.memory_space<vmem>>, %arg20: memref<1x32xf32, #tpu.memory_space<vmem>>, %arg21: memref<1x4x2x32xf32, #tpu.memory_space<vmem>>) attributes {dimension_semantics = [#tpu.dimension_semantics<parallel>], iteration_bounds = array<i64: 2>, scalar_prefetch = 0 : i64, scratch_operands = 0 : i64, tpu.core_type = #tpu.core_type<tc>, window_params = [{transform_indices = @transform_0, window_bounds = array<i64: 1, 4, 4, 32>}, {pipeline_mode = #tpu.pipeline_mode<synchronous>, transform_indices = @transform_1, window_bounds = array<i64: 4, 4>}, {pipeline_mode = #tpu.pipeline_mode<synchronous>, transform_indices = @transform_2, window_bounds = array<i64: 2, 4>}, {pipeline_mode = #tpu.pipeline_mode<synchronous>, transform_indices = @transform_3, window_bounds = array<i64: 2, 1>}, {pipeline_mode = #tpu.pipeline_mode<synchronous>, transform_indices = @transform_4, window_bounds = array<i64: 32, 96>}, {pipeline_mode = #tpu.pipeline_mode<synchronous>, transform_indices = @transform_5, window_bounds = array<i64: 1, 96>}, {pipeline_mode = #tpu.pipeline_mode<synchronous>, transform_indices = @transform_6, window_bounds = array<i64: 32, 32>}, {pipeline_mode = #tpu.pipeline_mode<synchronous>, transform_indices = @transform_7, window_bounds = array<i64: 1, 32>}, {pipeline_mode = #tpu.pipeline_mode<synchronous>, transform_indices = @transform_8, window_bounds = array<i64: 3, 32, 32>}, {pipeline_mode = #tpu.pipeline_mode<synchronous>, transform_indices = @transform_9, window_bounds = array<i64: 1, 32>}, {pipeline_mode = #tpu.pipeline_mode<synchronous>, transform_indices = @transform_10, window_bounds = array<i64: 1, 32>}, {pipeline_mode = #tpu.pipeline_mode<synchronous>, transform_indices = @transform_11, window_bounds = array<i64: 1, 32>}, {pipeline_mode = #tpu.pipeline_mode<synchronous>, transform_indices = @transform_12, window_bounds = array<i64: 32, 96>}, {pipeline_mode = #tpu.pipeline_mode<synchronous>, transform_indices = @transform_13, window_bounds = array<i64: 1, 96>}, {pipeline_mode = #tpu.pipeline_mode<synchronous>, transform_indices = @transform_14, window_bounds = array<i64: 32, 32>}, {pipeline_mode = #tpu.pipeline_mode<synchronous>, transform_indices = @transform_15, window_bounds = array<i64: 1, 32>}, {pipeline_mode = #tpu.pipeline_mode<synchronous>, transform_indices = @transform_16, window_bounds = array<i64: 1, 32>}, {pipeline_mode = #tpu.pipeline_mode<synchronous>, transform_indices = @transform_17, window_bounds = array<i64: 1, 32>}, {pipeline_mode = #tpu.pipeline_mode<synchronous>, transform_indices = @transform_18, window_bounds = array<i64: 32, 32>}, {pipeline_mode = #tpu.pipeline_mode<synchronous>, transform_indices = @transform_19, window_bounds = array<i64: 1, 32>}, {transform_indices = @transform_20, window_bounds = array<i64: 1, 4, 2, 32>}]} {
    %c0 = arith.constant 0 : index
    %c0_0 = arith.constant 0 : index
    %c0_1 = arith.constant 0 : index
    %c0_2 = arith.constant 0 : index
    %0 = vector.load %arg1[%c0, %c0_0, %c0_1, %c0_2] : memref<1x4x4x32xf32, #tpu.memory_space<vmem>>, vector<1x4x4x32xf32>
    %1 = vector.shape_cast %0 : vector<1x4x4x32xf32> to vector<4x4x32xf32>
    %2 = vector.shape_cast %1 : vector<4x4x32xf32> to vector<16x32xf32>
    %c0_3 = arith.constant 0 : index
    %c0_4 = arith.constant 0 : index
    %3 = vector.load %arg3[%c0_3, %c0_4] : memref<2x4xf32, #tpu.memory_space<vmem>>, vector<2x4xf32>
    %4 = vector.extract_strided_slice %1 {offsets = [0, 0, 0], sizes = [1, 4, 32], strides = [1, 1, 1]} : vector<4x4x32xf32> to vector<1x4x32xf32>
    %5 = vector.shape_cast %4 : vector<1x4x32xf32> to vector<4x32xf32>
    %cst = arith.constant dense<0.000000e+00> : vector<2x32xf32>
    %6 = tpu.matmul %3, %5, %cst {dimension_numbers = #tpu.dot_dimension_numbers<[1], [0], [0], [1], [0, 0, 1, 1], [], []>} : vector<2x4xf32>, vector<4x32xf32>, vector<2x32xf32> -> vector<2x32xf32>
    %c0_5 = arith.constant 0 : index
    %c0_6 = arith.constant 0 : index
    %7 = vector.load %arg4[%c0_5, %c0_6] : memref<2x1xf32, #tpu.memory_space<vmem>>, vector<2x1xf32>
    %8 = vector.broadcast %7 : vector<2x1xf32> to vector<2x32xf32>
    %9 = arith.addf %6, %8 : vector<2x32xf32>
    %c0_7 = arith.constant 0 : index
    %c0_8 = arith.constant 0 : index
    %10 = vector.load %arg3[%c0_7, %c0_8] : memref<2x4xf32, #tpu.memory_space<vmem>>, vector<2x4xf32>
    %11 = vector.extract_strided_slice %1 {offsets = [1, 0, 0], sizes = [1, 4, 32], strides = [1, 1, 1]} : vector<4x4x32xf32> to vector<1x4x32xf32>
    %12 = vector.shape_cast %11 : vector<1x4x32xf32> to vector<4x32xf32>
    %cst_9 = arith.constant dense<0.000000e+00> : vector<2x32xf32>
    %13 = tpu.matmul %10, %12, %cst_9 {dimension_numbers = #tpu.dot_dimension_numbers<[1], [0], [0], [1], [0, 0, 1, 1], [], []>} : vector<2x4xf32>, vector<4x32xf32>, vector<2x32xf32> -> vector<2x32xf32>
    %c0_10 = arith.constant 0 : index
    %c0_11 = arith.constant 0 : index
    %14 = vector.load %arg4[%c0_10, %c0_11] : memref<2x1xf32, #tpu.memory_space<vmem>>, vector<2x1xf32>
    %15 = vector.broadcast %14 : vector<2x1xf32> to vector<2x32xf32>
    %16 = arith.addf %13, %15 : vector<2x32xf32>
    %c0_12 = arith.constant 0 : index
    %c0_13 = arith.constant 0 : index
    %17 = vector.load %arg3[%c0_12, %c0_13] : memref<2x4xf32, #tpu.memory_space<vmem>>, vector<2x4xf32>
    %18 = vector.extract_strided_slice %1 {offsets = [2, 0, 0], sizes = [1, 4, 32], strides = [1, 1, 1]} : vector<4x4x32xf32> to vector<1x4x32xf32>
    %19 = vector.shape_cast %18 : vector<1x4x32xf32> to vector<4x32xf32>
    %cst_14 = arith.constant dense<0.000000e+00> : vector<2x32xf32>
    %20 = tpu.matmul %17, %19, %cst_14 {dimension_numbers = #tpu.dot_dimension_numbers<[1], [0], [0], [1], [0, 0, 1, 1], [], []>} : vector<2x4xf32>, vector<4x32xf32>, vector<2x32xf32> -> vector<2x32xf32>
    %c0_15 = arith.constant 0 : index
    %c0_16 = arith.constant 0 : index
    %21 = vector.load %arg4[%c0_15, %c0_16] : memref<2x1xf32, #tpu.memory_space<vmem>>, vector<2x1xf32>
    %22 = vector.broadcast %21 : vector<2x1xf32> to vector<2x32xf32>
    %23 = arith.addf %20, %22 : vector<2x32xf32>
    %c0_17 = arith.constant 0 : index
    %c0_18 = arith.constant 0 : index
    %24 = vector.load %arg3[%c0_17, %c0_18] : memref<2x4xf32, #tpu.memory_space<vmem>>, vector<2x4xf32>
    %25 = vector.extract_strided_slice %1 {offsets = [3, 0, 0], sizes = [1, 4, 32], strides = [1, 1, 1]} : vector<4x4x32xf32> to vector<1x4x32xf32>
    %26 = vector.shape_cast %25 : vector<1x4x32xf32> to vector<4x32xf32>
    %cst_19 = arith.constant dense<0.000000e+00> : vector<2x32xf32>
    %27 = tpu.matmul %24, %26, %cst_19 {dimension_numbers = #tpu.dot_dimension_numbers<[1], [0], [0], [1], [0, 0, 1, 1], [], []>} : vector<2x4xf32>, vector<4x32xf32>, vector<2x32xf32> -> vector<2x32xf32>
    %c0_20 = arith.constant 0 : index
    %c0_21 = arith.constant 0 : index
    %28 = vector.load %arg4[%c0_20, %c0_21] : memref<2x1xf32, #tpu.memory_space<vmem>>, vector<2x1xf32>
    %29 = vector.broadcast %28 : vector<2x1xf32> to vector<2x32xf32>
    %30 = arith.addf %27, %29 : vector<2x32xf32>
    %31 = tpu.concatenate %9, %16, %23, %30 in 0 : vector<2x32xf32>, vector<2x32xf32>, vector<2x32xf32>, vector<2x32xf32> -> vector<8x32xf32>
    %c0_22 = arith.constant 0 : index
    %c0_23 = arith.constant 0 : index
    %32 = vector.load %arg5[%c0_22, %c0_23] : memref<32x96xf32, #tpu.memory_space<vmem>>, vector<32x96xf32>
    %cst_24 = arith.constant dense<0.000000e+00> : vector<16x96xf32>
    %33 = tpu.matmul %2, %32, %cst_24 {dimension_numbers = #tpu.dot_dimension_numbers<[1], [0], [0], [1], [0, 0, 1, 1], [], []>} : vector<16x32xf32>, vector<32x96xf32>, vector<16x96xf32> -> vector<16x96xf32>
    %c0_25 = arith.constant 0 : index
    %c0_26 = arith.constant 0 : index
    %34 = vector.load %arg6[%c0_25, %c0_26] : memref<1x96xf32, #tpu.memory_space<vmem>>, vector<1x96xf32>
    %35 = vector.broadcast %34 : vector<1x96xf32> to vector<16x96xf32>
    %36 = arith.addf %33, %35 : vector<16x96xf32>
    %37 = vector.extract_strided_slice %36 {offsets = [0, 0], sizes = [16, 8], strides = [1, 1]} : vector<16x96xf32> to vector<16x8xf32>
    %38 = vector.shape_cast %37 : vector<16x8xf32> to vector<4x4x8xf32>
    %39 = vector.extract_strided_slice %36 {offsets = [0, 32], sizes = [16, 8], strides = [1, 1]} : vector<16x96xf32> to vector<16x8xf32>
    %40 = vector.shape_cast %39 : vector<16x8xf32> to vector<4x4x8xf32>
    %41 = vector.extract_strided_slice %36 {offsets = [0, 64], sizes = [16, 8], strides = [1, 1]} : vector<16x96xf32> to vector<16x8xf32>
    %42 = vector.shape_cast %41 : vector<16x8xf32> to vector<4x4x8xf32>
    "tpu.trace_start"() <{level = 10 : i32, message = "nle,nme->nlm"}> : () -> ()
    %cst_27 = arith.constant dense<0.000000e+00> : vector<4x4x4xf32>
    %43 = tpu.matmul %38, %40, %cst_27 {dimension_numbers = #tpu.dot_dimension_numbers<[2], [2], [1], [1], [0, 0, 0, 1, 1, 1], [0], [0]>} : vector<4x4x8xf32>, vector<4x4x8xf32>, vector<4x4x4xf32> -> vector<4x4x4xf32>
    "tpu.trace_stop"() : () -> ()
    %cst_28 = arith.constant 0.353553385 : f32
    %44 = vector.broadcast %cst_28 : f32 to vector<4x4x4xf32>
    %45 = arith.mulf %43, %44 : vector<4x4x4xf32>
    %cst_29 = arith.constant dense<0xFF800000> : vector<4x4xf32>
    %46 = vector.multi_reduction <maximumf>, %45, %cst_29 [2] : vector<4x4x4xf32> to vector<4x4xf32>
    %47 = vector.shape_cast %46 : vector<4x4xf32> to vector<4x4x1xf32>
    %48 = vector.broadcast %47 : vector<4x4x1xf32> to vector<4x4x4xf32>
    %49 = arith.subf %45, %48 : vector<4x4x4xf32>
    %50 = math.exp %49 : vector<4x4x4xf32>
    %cst_30 = arith.constant dense<0.000000e+00> : vector<4x4xf32>
    %51 = vector.multi_reduction <add>, %50, %cst_30 [2] : vector<4x4x4xf32> to vector<4x4xf32>
    %52 = vector.shape_cast %51 : vector<4x4xf32> to vector<4x4x1xf32>
    %53 = tpu.reciprocal %52 {approx = true} : vector<4x4x1xf32> -> vector<4x4x1xf32>
    %54 = vector.broadcast %53 : vector<4x4x1xf32> to vector<4x4x4xf32>
    %55 = arith.mulf %50, %54 : vector<4x4x4xf32>
    "tpu.trace_start"() <{level = 10 : i32, message = "nlm,nme->nle"}> : () -> ()
    %cst_31 = arith.constant dense<0.000000e+00> : vector<4x4x8xf32>
    %56 = tpu.matmul %55, %42, %cst_31 {dimension_numbers = #tpu.dot_dimension_numbers<[2], [1], [1], [2], [0, 0, 0, 1, 1, 2], [0], [0]>} : vector<4x4x4xf32>, vector<4x4x8xf32>, vector<4x4x8xf32> -> vector<4x4x8xf32>
    "tpu.trace_stop"() : () -> ()
    %57 = vector.shape_cast %56 : vector<4x4x8xf32> to vector<16x8xf32>
    %c0_32 = arith.constant 0 : index
    %c0_33 = arith.constant 0 : index
    %58 = vector.load %arg7[%c0_32, %c0_33] : memref<32x32xf32, #tpu.memory_space<vmem>>, vector<8x32xf32>
    %cst_34 = arith.constant dense<0.000000e+00> : vector<16x32xf32>
    %59 = tpu.matmul %57, %58, %cst_34 {dimension_numbers = #tpu.dot_dimension_numbers<[1], [0], [0], [1], [0, 0, 1, 1], [], []>} : vector<16x8xf32>, vector<8x32xf32>, vector<16x32xf32> -> vector<16x32xf32>
    %60 = vector.extract_strided_slice %36 {offsets = [0, 8], sizes = [16, 8], strides = [1, 1]} : vector<16x96xf32> to vector<16x8xf32>
    %61 = vector.shape_cast %60 : vector<16x8xf32> to vector<4x4x8xf32>
    %62 = vector.extract_strided_slice %36 {offsets = [0, 40], sizes = [16, 8], strides = [1, 1]} : vector<16x96xf32> to vector<16x8xf32>
    %63 = vector.shape_cast %62 : vector<16x8xf32> to vector<4x4x8xf32>
    %64 = vector.extract_strided_slice %36 {offsets = [0, 72], sizes = [16, 8], strides = [1, 1]} : vector<16x96xf32> to vector<16x8xf32>
    %65 = vector.shape_cast %64 : vector<16x8xf32> to vector<4x4x8xf32>
    "tpu.trace_start"() <{level = 10 : i32, message = "nle,nme->nlm"}> : () -> ()
    %cst_35 = arith.constant dense<0.000000e+00> : vector<4x4x4xf32>
    %66 = tpu.matmul %61, %63, %cst_35 {dimension_numbers = #tpu.dot_dimension_numbers<[2], [2], [1], [1], [0, 0, 0, 1, 1, 1], [0], [0]>} : vector<4x4x8xf32>, vector<4x4x8xf32>, vector<4x4x4xf32> -> vector<4x4x4xf32>
    "tpu.trace_stop"() : () -> ()
    %cst_36 = arith.constant 0.353553385 : f32
    %67 = vector.broadcast %cst_36 : f32 to vector<4x4x4xf32>
    %68 = arith.mulf %66, %67 : vector<4x4x4xf32>
    %cst_37 = arith.constant dense<0xFF800000> : vector<4x4xf32>
    %69 = vector.multi_reduction <maximumf>, %68, %cst_37 [2] : vector<4x4x4xf32> to vector<4x4xf32>
    %70 = vector.shape_cast %69 : vector<4x4xf32> to vector<4x4x1xf32>
    %71 = vector.broadcast %70 : vector<4x4x1xf32> to vector<4x4x4xf32>
    %72 = arith.subf %68, %71 : vector<4x4x4xf32>
    %73 = math.exp %72 : vector<4x4x4xf32>
    %cst_38 = arith.constant dense<0.000000e+00> : vector<4x4xf32>
    %74 = vector.multi_reduction <add>, %73, %cst_38 [2] : vector<4x4x4xf32> to vector<4x4xf32>
    %75 = vector.shape_cast %74 : vector<4x4xf32> to vector<4x4x1xf32>
    %76 = tpu.reciprocal %75 {approx = true} : vector<4x4x1xf32> -> vector<4x4x1xf32>
    %77 = vector.broadcast %76 : vector<4x4x1xf32> to vector<4x4x4xf32>
    %78 = arith.mulf %73, %77 : vector<4x4x4xf32>
    "tpu.trace_start"() <{level = 10 : i32, message = "nlm,nme->nle"}> : () -> ()
    %cst_39 = arith.constant dense<0.000000e+00> : vector<4x4x8xf32>
    %79 = tpu.matmul %78, %65, %cst_39 {dimension_numbers = #tpu.dot_dimension_numbers<[2], [1], [1], [2], [0, 0, 0, 1, 1, 2], [0], [0]>} : vector<4x4x4xf32>, vector<4x4x8xf32>, vector<4x4x8xf32> -> vector<4x4x8xf32>
    "tpu.trace_stop"() : () -> ()
    %80 = vector.shape_cast %79 : vector<4x4x8xf32> to vector<16x8xf32>
    %c8 = arith.constant 8 : index
    %c0_40 = arith.constant 0 : index
    %81 = vector.load %arg7[%c8, %c0_40] : memref<32x32xf32, #tpu.memory_space<vmem>>, vector<8x32xf32>
    %cst_41 = arith.constant dense<0.000000e+00> : vector<16x32xf32>
    %82 = tpu.matmul %80, %81, %cst_41 {dimension_numbers = #tpu.dot_dimension_numbers<[1], [0], [0], [1], [0, 0, 1, 1], [], []>} : vector<16x8xf32>, vector<8x32xf32>, vector<16x32xf32> -> vector<16x32xf32>
    %83 = arith.addf %59, %82 : vector<16x32xf32>
    %84 = vector.extract_strided_slice %36 {offsets = [0, 16], sizes = [16, 8], strides = [1, 1]} : vector<16x96xf32> to vector<16x8xf32>
    %85 = vector.shape_cast %84 : vector<16x8xf32> to vector<4x4x8xf32>
    %86 = vector.extract_strided_slice %36 {offsets = [0, 48], sizes = [16, 8], strides = [1, 1]} : vector<16x96xf32> to vector<16x8xf32>
    %87 = vector.shape_cast %86 : vector<16x8xf32> to vector<4x4x8xf32>
    %88 = vector.extract_strided_slice %36 {offsets = [0, 80], sizes = [16, 8], strides = [1, 1]} : vector<16x96xf32> to vector<16x8xf32>
    %89 = vector.shape_cast %88 : vector<16x8xf32> to vector<4x4x8xf32>
    "tpu.trace_start"() <{level = 10 : i32, message = "nle,nme->nlm"}> : () -> ()
    %cst_42 = arith.constant dense<0.000000e+00> : vector<4x4x4xf32>
    %90 = tpu.matmul %85, %87, %cst_42 {dimension_numbers = #tpu.dot_dimension_numbers<[2], [2], [1], [1], [0, 0, 0, 1, 1, 1], [0], [0]>} : vector<4x4x8xf32>, vector<4x4x8xf32>, vector<4x4x4xf32> -> vector<4x4x4xf32>
    "tpu.trace_stop"() : () -> ()
    %cst_43 = arith.constant 0.353553385 : f32
    %91 = vector.broadcast %cst_43 : f32 to vector<4x4x4xf32>
    %92 = arith.mulf %90, %91 : vector<4x4x4xf32>
    %cst_44 = arith.constant dense<0xFF800000> : vector<4x4xf32>
    %93 = vector.multi_reduction <maximumf>, %92, %cst_44 [2] : vector<4x4x4xf32> to vector<4x4xf32>
    %94 = vector.shape_cast %93 : vector<4x4xf32> to vector<4x4x1xf32>
    %95 = vector.broadcast %94 : vector<4x4x1xf32> to vector<4x4x4xf32>
    %96 = arith.subf %92, %95 : vector<4x4x4xf32>
    %97 = math.exp %96 : vector<4x4x4xf32>
    %cst_45 = arith.constant dense<0.000000e+00> : vector<4x4xf32>
    %98 = vector.multi_reduction <add>, %97, %cst_45 [2] : vector<4x4x4xf32> to vector<4x4xf32>
    %99 = vector.shape_cast %98 : vector<4x4xf32> to vector<4x4x1xf32>
    %100 = tpu.reciprocal %99 {approx = true} : vector<4x4x1xf32> -> vector<4x4x1xf32>
    %101 = vector.broadcast %100 : vector<4x4x1xf32> to vector<4x4x4xf32>
    %102 = arith.mulf %97, %101 : vector<4x4x4xf32>
    "tpu.trace_start"() <{level = 10 : i32, message = "nlm,nme->nle"}> : () -> ()
    %cst_46 = arith.constant dense<0.000000e+00> : vector<4x4x8xf32>
    %103 = tpu.matmul %102, %89, %cst_46 {dimension_numbers = #tpu.dot_dimension_numbers<[2], [1], [1], [2], [0, 0, 0, 1, 1, 2], [0], [0]>} : vector<4x4x4xf32>, vector<4x4x8xf32>, vector<4x4x8xf32> -> vector<4x4x8xf32>
    "tpu.trace_stop"() : () -> ()
    %104 = vector.shape_cast %103 : vector<4x4x8xf32> to vector<16x8xf32>
    %c16 = arith.constant 16 : index
    %c0_47 = arith.constant 0 : index
    %105 = vector.load %arg7[%c16, %c0_47] : memref<32x32xf32, #tpu.memory_space<vmem>>, vector<8x32xf32>
    %cst_48 = arith.constant dense<0.000000e+00> : vector<16x32xf32>
    %106 = tpu.matmul %104, %105, %cst_48 {dimension_numbers = #tpu.dot_dimension_numbers<[1], [0], [0], [1], [0, 0, 1, 1], [], []>} : vector<16x8xf32>, vector<8x32xf32>, vector<16x32xf32> -> vector<16x32xf32>
    %107 = arith.addf %83, %106 : vector<16x32xf32>
    %108 = vector.extract_strided_slice %36 {offsets = [0, 24], sizes = [16, 8], strides = [1, 1]} : vector<16x96xf32> to vector<16x8xf32>
    %109 = vector.shape_cast %108 : vector<16x8xf32> to vector<4x4x8xf32>
    %110 = vector.extract_strided_slice %36 {offsets = [0, 56], sizes = [16, 8], strides = [1, 1]} : vector<16x96xf32> to vector<16x8xf32>
    %111 = vector.shape_cast %110 : vector<16x8xf32> to vector<4x4x8xf32>
    %112 = vector.extract_strided_slice %36 {offsets = [0, 88], sizes = [16, 8], strides = [1, 1]} : vector<16x96xf32> to vector<16x8xf32>
    %113 = vector.shape_cast %112 : vector<16x8xf32> to vector<4x4x8xf32>
    "tpu.trace_start"() <{level = 10 : i32, message = "nle,nme->nlm"}> : () -> ()
    %cst_49 = arith.constant dense<0.000000e+00> : vector<4x4x4xf32>
    %114 = tpu.matmul %109, %111, %cst_49 {dimension_numbers = #tpu.dot_dimension_numbers<[2], [2], [1], [1], [0, 0, 0, 1, 1, 1], [0], [0]>} : vector<4x4x8xf32>, vector<4x4x8xf32>, vector<4x4x4xf32> -> vector<4x4x4xf32>
    "tpu.trace_stop"() : () -> ()
    %cst_50 = arith.constant 0.353553385 : f32
    %115 = vector.broadcast %cst_50 : f32 to vector<4x4x4xf32>
    %116 = arith.mulf %114, %115 : vector<4x4x4xf32>
    %cst_51 = arith.constant dense<0xFF800000> : vector<4x4xf32>
    %117 = vector.multi_reduction <maximumf>, %116, %cst_51 [2] : vector<4x4x4xf32> to vector<4x4xf32>
    %118 = vector.shape_cast %117 : vector<4x4xf32> to vector<4x4x1xf32>
    %119 = vector.broadcast %118 : vector<4x4x1xf32> to vector<4x4x4xf32>
    %120 = arith.subf %116, %119 : vector<4x4x4xf32>
    %121 = math.exp %120 : vector<4x4x4xf32>
    %cst_52 = arith.constant dense<0.000000e+00> : vector<4x4xf32>
    %122 = vector.multi_reduction <add>, %121, %cst_52 [2] : vector<4x4x4xf32> to vector<4x4xf32>
    %123 = vector.shape_cast %122 : vector<4x4xf32> to vector<4x4x1xf32>
    %124 = tpu.reciprocal %123 {approx = true} : vector<4x4x1xf32> -> vector<4x4x1xf32>
    %125 = vector.broadcast %124 : vector<4x4x1xf32> to vector<4x4x4xf32>
    %126 = arith.mulf %121, %125 : vector<4x4x4xf32>
    "tpu.trace_start"() <{level = 10 : i32, message = "nlm,nme->nle"}> : () -> ()
    %cst_53 = arith.constant dense<0.000000e+00> : vector<4x4x8xf32>
    %127 = tpu.matmul %126, %113, %cst_53 {dimension_numbers = #tpu.dot_dimension_numbers<[2], [1], [1], [2], [0, 0, 0, 1, 1, 2], [0], [0]>} : vector<4x4x4xf32>, vector<4x4x8xf32>, vector<4x4x8xf32> -> vector<4x4x8xf32>
    "tpu.trace_stop"() : () -> ()
    %128 = vector.shape_cast %127 : vector<4x4x8xf32> to vector<16x8xf32>
    %c24 = arith.constant 24 : index
    %c0_54 = arith.constant 0 : index
    %129 = vector.load %arg7[%c24, %c0_54] : memref<32x32xf32, #tpu.memory_space<vmem>>, vector<8x32xf32>
    %cst_55 = arith.constant dense<0.000000e+00> : vector<16x32xf32>
    %130 = tpu.matmul %128, %129, %cst_55 {dimension_numbers = #tpu.dot_dimension_numbers<[1], [0], [0], [1], [0, 0, 1, 1], [], []>} : vector<16x8xf32>, vector<8x32xf32>, vector<16x32xf32> -> vector<16x32xf32>
    %131 = arith.addf %107, %130 : vector<16x32xf32>
    %c0_56 = arith.constant 0 : index
    %c0_57 = arith.constant 0 : index
    %132 = vector.load %arg8[%c0_56, %c0_57] : memref<1x32xf32, #tpu.memory_space<vmem>>, vector<1x32xf32>
    %133 = vector.broadcast %132 : vector<1x32xf32> to vector<16x32xf32>
    %134 = arith.addf %131, %133 : vector<16x32xf32>
    %cst_58 = arith.constant 0.000000e+00 : f32
    %135 = vector.broadcast %cst_58 : f32 to vector<1x32xf32>
    %136 = vector.extract_strided_slice %134 {offsets = [0, 0], sizes = [15, 32], strides = [1, 1]} : vector<16x32xf32> to vector<15x32xf32>
    %137 = tpu.concatenate %135, %136 in 0 : vector<1x32xf32>, vector<15x32xf32> -> vector<16x32xf32>
    %138 = vector.extract_strided_slice %134 {offsets = [1, 0], sizes = [15, 32], strides = [1, 1]} : vector<16x32xf32> to vector<15x32xf32>
    %139 = tpu.concatenate %138, %135 in 0 : vector<15x32xf32>, vector<1x32xf32> -> vector<16x32xf32>
    %140 = tpu.iota {dimensions = array<i32: 0>} : vector<16x1xi32>
    %c4_i32 = arith.constant 4 : i32
    %c0_i32 = arith.constant 0 : i32
    %141 = arith.cmpi eq, %c4_i32, %c0_i32 : i32
    %c1_i32 = arith.constant 1 : i32
    %142 = arith.select %141, %c1_i32, %c4_i32 : i32
    %143 = vector.broadcast %142 : i32 to vector<16x1xi32>
    %144 = arith.remsi %140, %143 : vector<16x1xi32>
    %c0_i32_59 = arith.constant 0 : i32
    %145 = vector.broadcast %c0_i32_59 : i32 to vector<16x1xi32>
    %146 = arith.cmpi ne, %144, %145 : vector<16x1xi32>
    %c0_i32_60 = arith.constant 0 : i32
    %147 = vector.broadcast %c0_i32_60 : i32 to vector<16x1xi32>
    %148 = arith.cmpi slt, %144, %147 : vector<16x1xi32>
    %c0_i32_61 = arith.constant 0 : i32
    %149 = arith.cmpi slt, %142, %c0_i32_61 : i32
    %150 = vector.broadcast %149 : i1 to vector<16x1xi1>
    %151 = vector.broadcast %150 : vector<16x1xi1> to vector<16x1xi1>
    %152 = arith.xori %148, %151 : vector<16x1xi1>
    %153 = arith.andi %152, %146 : vector<16x1xi1>
    %154 = vector.broadcast %142 : i32 to vector<16x1xi32>
    %155 = arith.addi %144, %154 : vector<16x1xi32>
    %156 = arith.select %153, %155, %144 : vector<16x1xi1>, vector<16x1xi32>
    %c0_i32_62 = arith.constant 0 : i32
    %157 = vector.broadcast %c0_i32_62 : i32 to vector<16x1xi32>
    %158 = arith.cmpi eq, %156, %157 : vector<16x1xi32>
    %cst_63 = arith.constant 0.000000e+00 : f32
    %159 = vector.shape_cast %158 : vector<16x1xi1> to vector<16x1xi1>
    %160 = vector.broadcast %159 : vector<16x1xi1> to vector<16x32xi1>
    %161 = vector.broadcast %cst_63 : f32 to vector<16x32xf32>
    %162 = arith.select %160, %161, %137 : vector<16x32xi1>, vector<16x32xf32>
    %c4_i32_64 = arith.constant 4 : i32
    %c0_i32_65 = arith.constant 0 : i32
    %163 = arith.cmpi eq, %c4_i32_64, %c0_i32_65 : i32
    %c1_i32_66 = arith.constant 1 : i32
    %164 = arith.select %163, %c1_i32_66, %c4_i32_64 : i32
    %165 = vector.broadcast %164 : i32 to vector<16x1xi32>
    %166 = arith.remsi %140, %165 : vector<16x1xi32>
    %c0_i32_67 = arith.constant 0 : i32
    %167 = vector.broadcast %c0_i32_67 : i32 to vector<16x1xi32>
    %168 = arith.cmpi ne, %166, %167 : vector<16x1xi32>
    %c0_i32_68 = arith.constant 0 : i32
    %169 = vector.broadcast %c0_i32_68 : i32 to vector<16x1xi32>
    %170 = arith.cmpi slt, %166, %169 : vector<16x1xi32>
    %c0_i32_69 = arith.constant 0 : i32
    %171 = arith.cmpi slt, %164, %c0_i32_69 : i32
    %172 = vector.broadcast %171 : i1 to vector<16x1xi1>
    %173 = vector.broadcast %172 : vector<16x1xi1> to vector<16x1xi1>
    %174 = arith.xori %170, %173 : vector<16x1xi1>
    %175 = arith.andi %174, %168 : vector<16x1xi1>
    %176 = vector.broadcast %164 : i32 to vector<16x1xi32>
    %177 = arith.addi %166, %176 : vector<16x1xi32>
    %178 = arith.select %175, %177, %166 : vector<16x1xi1>, vector<16x1xi32>
    %c3_i32 = arith.constant 3 : i32
    %179 = vector.broadcast %c3_i32 : i32 to vector<16x1xi32>
    %180 = arith.cmpi eq, %178, %179 : vector<16x1xi32>
    %cst_70 = arith.constant 0.000000e+00 : f32
    %181 = vector.shape_cast %180 : vector<16x1xi1> to vector<16x1xi1>
    %182 = vector.broadcast %181 : vector<16x1xi1> to vector<16x32xi1>
    %183 = vector.broadcast %cst_70 : f32 to vector<16x32xf32>
    %184 = arith.select %182, %183, %139 : vector<16x32xi1>, vector<16x32xf32>
    %c0_71 = arith.constant 0 : index
    %c0_72 = arith.constant 0 : index
    %c0_73 = arith.constant 0 : index
    %185 = vector.load %arg9[%c0_71, %c0_72, %c0_73] : memref<3x32x32xf32, #tpu.memory_space<vmem>>, vector<1x32x32xf32>
    %186 = vector.shape_cast %185 : vector<1x32x32xf32> to vector<32x32xf32>
    %cst_74 = arith.constant dense<0.000000e+00> : vector<16x32xf32>
    %187 = tpu.matmul %162, %186, %cst_74 {dimension_numbers = #tpu.dot_dimension_numbers<[1], [0], [0], [1], [0, 0, 1, 1], [], []>} : vector<16x32xf32>, vector<32x32xf32>, vector<16x32xf32> -> vector<16x32xf32>
    %c1 = arith.constant 1 : index
    %c0_75 = arith.constant 0 : index
    %c0_76 = arith.constant 0 : index
    %188 = vector.load %arg9[%c1, %c0_75, %c0_76] : memref<3x32x32xf32, #tpu.memory_space<vmem>>, vector<1x32x32xf32>
    %189 = vector.shape_cast %188 : vector<1x32x32xf32> to vector<32x32xf32>
    %cst_77 = arith.constant dense<0.000000e+00> : vector<16x32xf32>
    %190 = tpu.matmul %134, %189, %cst_77 {dimension_numbers = #tpu.dot_dimension_numbers<[1], [0], [0], [1], [0, 0, 1, 1], [], []>} : vector<16x32xf32>, vector<32x32xf32>, vector<16x32xf32> -> vector<16x32xf32>
    %191 = arith.addf %187, %190 : vector<16x32xf32>
    %c2 = arith.constant 2 : index
    %c0_78 = arith.constant 0 : index
    %c0_79 = arith.constant 0 : index
    %192 = vector.load %arg9[%c2, %c0_78, %c0_79] : memref<3x32x32xf32, #tpu.memory_space<vmem>>, vector<1x32x32xf32>
    %193 = vector.shape_cast %192 : vector<1x32x32xf32> to vector<32x32xf32>
    %cst_80 = arith.constant dense<0.000000e+00> : vector<16x32xf32>
    %194 = tpu.matmul %184, %193, %cst_80 {dimension_numbers = #tpu.dot_dimension_numbers<[1], [0], [0], [1], [0, 0, 1, 1], [], []>} : vector<16x32xf32>, vector<32x32xf32>, vector<16x32xf32> -> vector<16x32xf32>
    %195 = arith.addf %191, %194 : vector<16x32xf32>
    %c0_81 = arith.constant 0 : index
    %c0_82 = arith.constant 0 : index
    %196 = vector.load %arg10[%c0_81, %c0_82] : memref<1x32xf32, #tpu.memory_space<vmem>>, vector<1x32xf32>
    %197 = vector.broadcast %196 : vector<1x32xf32> to vector<16x32xf32>
    %198 = arith.addf %195, %197 : vector<16x32xf32>
    %c0_83 = arith.constant 0 : index
    %c0_84 = arith.constant 0 : index
    %199 = vector.load %arg11[%c0_83, %c0_84] : memref<1x32xf32, #tpu.memory_space<vmem>>, vector<1x32xf32>
    %200 = vector.broadcast %199 : vector<1x32xf32> to vector<16x32xf32>
    %201 = arith.mulf %198, %200 : vector<16x32xf32>
    %c0_85 = arith.constant 0 : index
    %c0_86 = arith.constant 0 : index
    %202 = vector.load %arg12[%c0_85, %c0_86] : memref<1x32xf32, #tpu.memory_space<vmem>>, vector<1x32xf32>
    %203 = vector.broadcast %202 : vector<1x32xf32> to vector<16x32xf32>
    %204 = arith.addf %201, %203 : vector<16x32xf32>
    %cst_87 = arith.constant 0.000000e+00 : f32
    %205 = vector.broadcast %cst_87 : f32 to vector<16x32xf32>
    %206 = arith.cmpf ogt, %204, %205 : vector<16x32xf32>
    %cst_88 = arith.constant 0.000000e+00 : f32
    %207 = vector.broadcast %cst_88 : f32 to vector<16x32xf32>
    %208 = arith.minimumf %204, %207 : vector<16x32xf32>
    %209 = math.exp %208 : vector<16x32xf32>
    %cst_89 = arith.constant 1.000000e+00 : f32
    %210 = vector.broadcast %cst_89 : f32 to vector<16x32xf32>
    %211 = arith.subf %209, %210 : vector<16x32xf32>
    %212 = arith.select %206, %204, %211 : vector<16x32xi1>, vector<16x32xf32>
    %213 = vector.extract_strided_slice %212 {offsets = [0, 0], sizes = [1, 32], strides = [1, 1]} : vector<16x32xf32> to vector<1x32xf32>
    %214 = vector.extract_strided_slice %212 {offsets = [1, 0], sizes = [1, 32], strides = [1, 1]} : vector<16x32xf32> to vector<1x32xf32>
    %215 = arith.maximumf %213, %214 : vector<1x32xf32>
    %216 = vector.extract_strided_slice %212 {offsets = [1, 0], sizes = [1, 32], strides = [1, 1]} : vector<16x32xf32> to vector<1x32xf32>
    %217 = vector.extract_strided_slice %212 {offsets = [2, 0], sizes = [1, 32], strides = [1, 1]} : vector<16x32xf32> to vector<1x32xf32>
    %218 = arith.maximumf %216, %217 : vector<1x32xf32>
    %219 = vector.extract_strided_slice %212 {offsets = [3, 0], sizes = [1, 32], strides = [1, 1]} : vector<16x32xf32> to vector<1x32xf32>
    %220 = arith.maximumf %218, %219 : vector<1x32xf32>
    %221 = vector.extract_strided_slice %212 {offsets = [4, 0], sizes = [1, 32], strides = [1, 1]} : vector<16x32xf32> to vector<1x32xf32>
    %222 = vector.extract_strided_slice %212 {offsets = [5, 0], sizes = [1, 32], strides = [1, 1]} : vector<16x32xf32> to vector<1x32xf32>
    %223 = arith.maximumf %221, %222 : vector<1x32xf32>
    %224 = vector.extract_strided_slice %212 {offsets = [5, 0], sizes = [1, 32], strides = [1, 1]} : vector<16x32xf32> to vector<1x32xf32>
    %225 = vector.extract_strided_slice %212 {offsets = [6, 0], sizes = [1, 32], strides = [1, 1]} : vector<16x32xf32> to vector<1x32xf32>
    %226 = arith.maximumf %224, %225 : vector<1x32xf32>
    %227 = vector.extract_strided_slice %212 {offsets = [7, 0], sizes = [1, 32], strides = [1, 1]} : vector<16x32xf32> to vector<1x32xf32>
    %228 = arith.maximumf %226, %227 : vector<1x32xf32>
    %229 = vector.extract_strided_slice %212 {offsets = [8, 0], sizes = [1, 32], strides = [1, 1]} : vector<16x32xf32> to vector<1x32xf32>
    %230 = vector.extract_strided_slice %212 {offsets = [9, 0], sizes = [1, 32], strides = [1, 1]} : vector<16x32xf32> to vector<1x32xf32>
    %231 = arith.maximumf %229, %230 : vector<1x32xf32>
    %232 = vector.extract_strided_slice %212 {offsets = [9, 0], sizes = [1, 32], strides = [1, 1]} : vector<16x32xf32> to vector<1x32xf32>
    %233 = vector.extract_strided_slice %212 {offsets = [10, 0], sizes = [1, 32], strides = [1, 1]} : vector<16x32xf32> to vector<1x32xf32>
    %234 = arith.maximumf %232, %233 : vector<1x32xf32>
    %235 = vector.extract_strided_slice %212 {offsets = [11, 0], sizes = [1, 32], strides = [1, 1]} : vector<16x32xf32> to vector<1x32xf32>
    %236 = arith.maximumf %234, %235 : vector<1x32xf32>
    %237 = vector.extract_strided_slice %212 {offsets = [12, 0], sizes = [1, 32], strides = [1, 1]} : vector<16x32xf32> to vector<1x32xf32>
    %238 = vector.extract_strided_slice %212 {offsets = [13, 0], sizes = [1, 32], strides = [1, 1]} : vector<16x32xf32> to vector<1x32xf32>
    %239 = arith.maximumf %237, %238 : vector<1x32xf32>
    %240 = vector.extract_strided_slice %212 {offsets = [13, 0], sizes = [1, 32], strides = [1, 1]} : vector<16x32xf32> to vector<1x32xf32>
    %241 = vector.extract_strided_slice %212 {offsets = [14, 0], sizes = [1, 32], strides = [1, 1]} : vector<16x32xf32> to vector<1x32xf32>
    %242 = arith.maximumf %240, %241 : vector<1x32xf32>
    %243 = vector.extract_strided_slice %212 {offsets = [15, 0], sizes = [1, 32], strides = [1, 1]} : vector<16x32xf32> to vector<1x32xf32>
    %244 = arith.maximumf %242, %243 : vector<1x32xf32>
    %245 = tpu.concatenate %215, %220, %223, %228, %231, %236, %239, %244 in 0 : vector<1x32xf32>, vector<1x32xf32>, vector<1x32xf32>, vector<1x32xf32>, vector<1x32xf32>, vector<1x32xf32>, vector<1x32xf32>, vector<1x32xf32> -> vector<8x32xf32>
    %c0_90 = arith.constant 0 : index
    %c0_91 = arith.constant 0 : index
    %246 = vector.load %arg13[%c0_90, %c0_91] : memref<32x96xf32, #tpu.memory_space<vmem>>, vector<32x96xf32>
    %cst_92 = arith.constant dense<0.000000e+00> : vector<8x96xf32>
    %247 = tpu.matmul %245, %246, %cst_92 {dimension_numbers = #tpu.dot_dimension_numbers<[1], [0], [0], [1], [0, 0, 1, 1], [], []>} : vector<8x32xf32>, vector<32x96xf32>, vector<8x96xf32> -> vector<8x96xf32>
    %c0_93 = arith.constant 0 : index
    %c0_94 = arith.constant 0 : index
    %248 = vector.load %arg14[%c0_93, %c0_94] : memref<1x96xf32, #tpu.memory_space<vmem>>, vector<1x96xf32>
    %249 = vector.broadcast %248 : vector<1x96xf32> to vector<8x96xf32>
    %250 = arith.addf %247, %249 : vector<8x96xf32>
    %251 = vector.extract_strided_slice %250 {offsets = [0, 0], sizes = [8, 8], strides = [1, 1]} : vector<8x96xf32> to vector<8x8xf32>
    %252 = vector.shape_cast %251 : vector<8x8xf32> to vector<4x2x8xf32>
    %253 = vector.extract_strided_slice %250 {offsets = [0, 32], sizes = [8, 8], strides = [1, 1]} : vector<8x96xf32> to vector<8x8xf32>
    %254 = vector.shape_cast %253 : vector<8x8xf32> to vector<4x2x8xf32>
    %255 = vector.extract_strided_slice %250 {offsets = [0, 64], sizes = [8, 8], strides = [1, 1]} : vector<8x96xf32> to vector<8x8xf32>
    %256 = vector.shape_cast %255 : vector<8x8xf32> to vector<4x2x8xf32>
    "tpu.trace_start"() <{level = 10 : i32, message = "nle,nme->nlm"}> : () -> ()
    %cst_95 = arith.constant dense<0.000000e+00> : vector<4x2x2xf32>
    %257 = tpu.matmul %252, %254, %cst_95 {dimension_numbers = #tpu.dot_dimension_numbers<[2], [2], [1], [1], [0, 0, 0, 1, 1, 1], [0], [0]>} : vector<4x2x8xf32>, vector<4x2x8xf32>, vector<4x2x2xf32> -> vector<4x2x2xf32>
    "tpu.trace_stop"() : () -> ()
    %cst_96 = arith.constant 0.353553385 : f32
    %258 = vector.broadcast %cst_96 : f32 to vector<4x2x2xf32>
    %259 = arith.mulf %257, %258 : vector<4x2x2xf32>
    %cst_97 = arith.constant dense<0xFF800000> : vector<4x2xf32>
    %260 = vector.multi_reduction <maximumf>, %259, %cst_97 [2] : vector<4x2x2xf32> to vector<4x2xf32>
    %261 = vector.shape_cast %260 : vector<4x2xf32> to vector<4x2x1xf32>
    %262 = vector.broadcast %261 : vector<4x2x1xf32> to vector<4x2x2xf32>
    %263 = arith.subf %259, %262 : vector<4x2x2xf32>
    %264 = math.exp %263 : vector<4x2x2xf32>
    %cst_98 = arith.constant dense<0.000000e+00> : vector<4x2xf32>
    %265 = vector.multi_reduction <add>, %264, %cst_98 [2] : vector<4x2x2xf32> to vector<4x2xf32>
    %266 = vector.shape_cast %265 : vector<4x2xf32> to vector<4x2x1xf32>
    %267 = tpu.reciprocal %266 {approx = true} : vector<4x2x1xf32> -> vector<4x2x1xf32>
    %268 = vector.broadcast %267 : vector<4x2x1xf32> to vector<4x2x2xf32>
    %269 = arith.mulf %264, %268 : vector<4x2x2xf32>
    "tpu.trace_start"() <{level = 10 : i32, message = "nlm,nme->nle"}> : () -> ()
    %cst_99 = arith.constant dense<0.000000e+00> : vector<4x2x8xf32>
    %270 = tpu.matmul %269, %256, %cst_99 {dimension_numbers = #tpu.dot_dimension_numbers<[2], [1], [1], [2], [0, 0, 0, 1, 1, 2], [0], [0]>} : vector<4x2x2xf32>, vector<4x2x8xf32>, vector<4x2x8xf32> -> vector<4x2x8xf32>
    "tpu.trace_stop"() : () -> ()
    %271 = vector.shape_cast %270 : vector<4x2x8xf32> to vector<8x8xf32>
    %c0_100 = arith.constant 0 : index
    %c0_101 = arith.constant 0 : index
    %272 = vector.load %arg15[%c0_100, %c0_101] : memref<32x32xf32, #tpu.memory_space<vmem>>, vector<8x32xf32>
    %cst_102 = arith.constant dense<0.000000e+00> : vector<8x32xf32>
    %273 = tpu.matmul %271, %272, %cst_102 {dimension_numbers = #tpu.dot_dimension_numbers<[1], [0], [0], [1], [0, 0, 1, 1], [], []>} : vector<8x8xf32>, vector<8x32xf32>, vector<8x32xf32> -> vector<8x32xf32>
    %274 = vector.extract_strided_slice %250 {offsets = [0, 8], sizes = [8, 8], strides = [1, 1]} : vector<8x96xf32> to vector<8x8xf32>
    %275 = vector.shape_cast %274 : vector<8x8xf32> to vector<4x2x8xf32>
    %276 = vector.extract_strided_slice %250 {offsets = [0, 40], sizes = [8, 8], strides = [1, 1]} : vector<8x96xf32> to vector<8x8xf32>
    %277 = vector.shape_cast %276 : vector<8x8xf32> to vector<4x2x8xf32>
    %278 = vector.extract_strided_slice %250 {offsets = [0, 72], sizes = [8, 8], strides = [1, 1]} : vector<8x96xf32> to vector<8x8xf32>
    %279 = vector.shape_cast %278 : vector<8x8xf32> to vector<4x2x8xf32>
    "tpu.trace_start"() <{level = 10 : i32, message = "nle,nme->nlm"}> : () -> ()
    %cst_103 = arith.constant dense<0.000000e+00> : vector<4x2x2xf32>
    %280 = tpu.matmul %275, %277, %cst_103 {dimension_numbers = #tpu.dot_dimension_numbers<[2], [2], [1], [1], [0, 0, 0, 1, 1, 1], [0], [0]>} : vector<4x2x8xf32>, vector<4x2x8xf32>, vector<4x2x2xf32> -> vector<4x2x2xf32>
    "tpu.trace_stop"() : () -> ()
    %cst_104 = arith.constant 0.353553385 : f32
    %281 = vector.broadcast %cst_104 : f32 to vector<4x2x2xf32>
    %282 = arith.mulf %280, %281 : vector<4x2x2xf32>
    %cst_105 = arith.constant dense<0xFF800000> : vector<4x2xf32>
    %283 = vector.multi_reduction <maximumf>, %282, %cst_105 [2] : vector<4x2x2xf32> to vector<4x2xf32>
    %284 = vector.shape_cast %283 : vector<4x2xf32> to vector<4x2x1xf32>
    %285 = vector.broadcast %284 : vector<4x2x1xf32> to vector<4x2x2xf32>
    %286 = arith.subf %282, %285 : vector<4x2x2xf32>
    %287 = math.exp %286 : vector<4x2x2xf32>
    %cst_106 = arith.constant dense<0.000000e+00> : vector<4x2xf32>
    %288 = vector.multi_reduction <add>, %287, %cst_106 [2] : vector<4x2x2xf32> to vector<4x2xf32>
    %289 = vector.shape_cast %288 : vector<4x2xf32> to vector<4x2x1xf32>
    %290 = tpu.reciprocal %289 {approx = true} : vector<4x2x1xf32> -> vector<4x2x1xf32>
    %291 = vector.broadcast %290 : vector<4x2x1xf32> to vector<4x2x2xf32>
    %292 = arith.mulf %287, %291 : vector<4x2x2xf32>
    "tpu.trace_start"() <{level = 10 : i32, message = "nlm,nme->nle"}> : () -> ()
    %cst_107 = arith.constant dense<0.000000e+00> : vector<4x2x8xf32>
    %293 = tpu.matmul %292, %279, %cst_107 {dimension_numbers = #tpu.dot_dimension_numbers<[2], [1], [1], [2], [0, 0, 0, 1, 1, 2], [0], [0]>} : vector<4x2x2xf32>, vector<4x2x8xf32>, vector<4x2x8xf32> -> vector<4x2x8xf32>
    "tpu.trace_stop"() : () -> ()
    %294 = vector.shape_cast %293 : vector<4x2x8xf32> to vector<8x8xf32>
    %c8_108 = arith.constant 8 : index
    %c0_109 = arith.constant 0 : index
    %295 = vector.load %arg15[%c8_108, %c0_109] : memref<32x32xf32, #tpu.memory_space<vmem>>, vector<8x32xf32>
    %cst_110 = arith.constant dense<0.000000e+00> : vector<8x32xf32>
    %296 = tpu.matmul %294, %295, %cst_110 {dimension_numbers = #tpu.dot_dimension_numbers<[1], [0], [0], [1], [0, 0, 1, 1], [], []>} : vector<8x8xf32>, vector<8x32xf32>, vector<8x32xf32> -> vector<8x32xf32>
    %297 = arith.addf %273, %296 : vector<8x32xf32>
    %298 = vector.extract_strided_slice %250 {offsets = [0, 16], sizes = [8, 8], strides = [1, 1]} : vector<8x96xf32> to vector<8x8xf32>
    %299 = vector.shape_cast %298 : vector<8x8xf32> to vector<4x2x8xf32>
    %300 = vector.extract_strided_slice %250 {offsets = [0, 48], sizes = [8, 8], strides = [1, 1]} : vector<8x96xf32> to vector<8x8xf32>
    %301 = vector.shape_cast %300 : vector<8x8xf32> to vector<4x2x8xf32>
    %302 = vector.extract_strided_slice %250 {offsets = [0, 80], sizes = [8, 8], strides = [1, 1]} : vector<8x96xf32> to vector<8x8xf32>
    %303 = vector.shape_cast %302 : vector<8x8xf32> to vector<4x2x8xf32>
    "tpu.trace_start"() <{level = 10 : i32, message = "nle,nme->nlm"}> : () -> ()
    %cst_111 = arith.constant dense<0.000000e+00> : vector<4x2x2xf32>
    %304 = tpu.matmul %299, %301, %cst_111 {dimension_numbers = #tpu.dot_dimension_numbers<[2], [2], [1], [1], [0, 0, 0, 1, 1, 1], [0], [0]>} : vector<4x2x8xf32>, vector<4x2x8xf32>, vector<4x2x2xf32> -> vector<4x2x2xf32>
    "tpu.trace_stop"() : () -> ()
    %cst_112 = arith.constant 0.353553385 : f32
    %305 = vector.broadcast %cst_112 : f32 to vector<4x2x2xf32>
    %306 = arith.mulf %304, %305 : vector<4x2x2xf32>
    %cst_113 = arith.constant dense<0xFF800000> : vector<4x2xf32>
    %307 = vector.multi_reduction <maximumf>, %306, %cst_113 [2] : vector<4x2x2xf32> to vector<4x2xf32>
    %308 = vector.shape_cast %307 : vector<4x2xf32> to vector<4x2x1xf32>
    %309 = vector.broadcast %308 : vector<4x2x1xf32> to vector<4x2x2xf32>
    %310 = arith.subf %306, %309 : vector<4x2x2xf32>
    %311 = math.exp %310 : vector<4x2x2xf32>
    %cst_114 = arith.constant dense<0.000000e+00> : vector<4x2xf32>
    %312 = vector.multi_reduction <add>, %311, %cst_114 [2] : vector<4x2x2xf32> to vector<4x2xf32>
    %313 = vector.shape_cast %312 : vector<4x2xf32> to vector<4x2x1xf32>
    %314 = tpu.reciprocal %313 {approx = true} : vector<4x2x1xf32> -> vector<4x2x1xf32>
    %315 = vector.broadcast %314 : vector<4x2x1xf32> to vector<4x2x2xf32>
    %316 = arith.mulf %311, %315 : vector<4x2x2xf32>
    "tpu.trace_start"() <{level = 10 : i32, message = "nlm,nme->nle"}> : () -> ()
    %cst_115 = arith.constant dense<0.000000e+00> : vector<4x2x8xf32>
    %317 = tpu.matmul %316, %303, %cst_115 {dimension_numbers = #tpu.dot_dimension_numbers<[2], [1], [1], [2], [0, 0, 0, 1, 1, 2], [0], [0]>} : vector<4x2x2xf32>, vector<4x2x8xf32>, vector<4x2x8xf32> -> vector<4x2x8xf32>
    "tpu.trace_stop"() : () -> ()
    %318 = vector.shape_cast %317 : vector<4x2x8xf32> to vector<8x8xf32>
    %c16_116 = arith.constant 16 : index
    %c0_117 = arith.constant 0 : index
    %319 = vector.load %arg15[%c16_116, %c0_117] : memref<32x32xf32, #tpu.memory_space<vmem>>, vector<8x32xf32>
    %cst_118 = arith.constant dense<0.000000e+00> : vector<8x32xf32>
    %320 = tpu.matmul %318, %319, %cst_118 {dimension_numbers = #tpu.dot_dimension_numbers<[1], [0], [0], [1], [0, 0, 1, 1], [], []>} : vector<8x8xf32>, vector<8x32xf32>, vector<8x32xf32> -> vector<8x32xf32>
    %321 = arith.addf %297, %320 : vector<8x32xf32>
    %322 = vector.extract_strided_slice %250 {offsets = [0, 24], sizes = [8, 8], strides = [1, 1]} : vector<8x96xf32> to vector<8x8xf32>
    %323 = vector.shape_cast %322 : vector<8x8xf32> to vector<4x2x8xf32>
    %324 = vector.extract_strided_slice %250 {offsets = [0, 56], sizes = [8, 8], strides = [1, 1]} : vector<8x96xf32> to vector<8x8xf32>
    %325 = vector.shape_cast %324 : vector<8x8xf32> to vector<4x2x8xf32>
    %326 = vector.extract_strided_slice %250 {offsets = [0, 88], sizes = [8, 8], strides = [1, 1]} : vector<8x96xf32> to vector<8x8xf32>
    %327 = vector.shape_cast %326 : vector<8x8xf32> to vector<4x2x8xf32>
    "tpu.trace_start"() <{level = 10 : i32, message = "nle,nme->nlm"}> : () -> ()
    %cst_119 = arith.constant dense<0.000000e+00> : vector<4x2x2xf32>
    %328 = tpu.matmul %323, %325, %cst_119 {dimension_numbers = #tpu.dot_dimension_numbers<[2], [2], [1], [1], [0, 0, 0, 1, 1, 1], [0], [0]>} : vector<4x2x8xf32>, vector<4x2x8xf32>, vector<4x2x2xf32> -> vector<4x2x2xf32>
    "tpu.trace_stop"() : () -> ()
    %cst_120 = arith.constant 0.353553385 : f32
    %329 = vector.broadcast %cst_120 : f32 to vector<4x2x2xf32>
    %330 = arith.mulf %328, %329 : vector<4x2x2xf32>
    %cst_121 = arith.constant dense<0xFF800000> : vector<4x2xf32>
    %331 = vector.multi_reduction <maximumf>, %330, %cst_121 [2] : vector<4x2x2xf32> to vector<4x2xf32>
    %332 = vector.shape_cast %331 : vector<4x2xf32> to vector<4x2x1xf32>
    %333 = vector.broadcast %332 : vector<4x2x1xf32> to vector<4x2x2xf32>
    %334 = arith.subf %330, %333 : vector<4x2x2xf32>
    %335 = math.exp %334 : vector<4x2x2xf32>
    %cst_122 = arith.constant dense<0.000000e+00> : vector<4x2xf32>
    %336 = vector.multi_reduction <add>, %335, %cst_122 [2] : vector<4x2x2xf32> to vector<4x2xf32>
    %337 = vector.shape_cast %336 : vector<4x2xf32> to vector<4x2x1xf32>
    %338 = tpu.reciprocal %337 {approx = true} : vector<4x2x1xf32> -> vector<4x2x1xf32>
    %339 = vector.broadcast %338 : vector<4x2x1xf32> to vector<4x2x2xf32>
    %340 = arith.mulf %335, %339 : vector<4x2x2xf32>
    "tpu.trace_start"() <{level = 10 : i32, message = "nlm,nme->nle"}> : () -> ()
    %cst_123 = arith.constant dense<0.000000e+00> : vector<4x2x8xf32>
    %341 = tpu.matmul %340, %327, %cst_123 {dimension_numbers = #tpu.dot_dimension_numbers<[2], [1], [1], [2], [0, 0, 0, 1, 1, 2], [0], [0]>} : vector<4x2x2xf32>, vector<4x2x8xf32>, vector<4x2x8xf32> -> vector<4x2x8xf32>
    "tpu.trace_stop"() : () -> ()
    %342 = vector.shape_cast %341 : vector<4x2x8xf32> to vector<8x8xf32>
    %c24_124 = arith.constant 24 : index
    %c0_125 = arith.constant 0 : index
    %343 = vector.load %arg15[%c24_124, %c0_125] : memref<32x32xf32, #tpu.memory_space<vmem>>, vector<8x32xf32>
    %cst_126 = arith.constant dense<0.000000e+00> : vector<8x32xf32>
    %344 = tpu.matmul %342, %343, %cst_126 {dimension_numbers = #tpu.dot_dimension_numbers<[1], [0], [0], [1], [0, 0, 1, 1], [], []>} : vector<8x8xf32>, vector<8x32xf32>, vector<8x32xf32> -> vector<8x32xf32>
    %345 = arith.addf %321, %344 : vector<8x32xf32>
    %c0_127 = arith.constant 0 : index
    %c0_128 = arith.constant 0 : index
    %346 = vector.load %arg16[%c0_127, %c0_128] : memref<1x32xf32, #tpu.memory_space<vmem>>, vector<1x32xf32>
    %347 = vector.broadcast %346 : vector<1x32xf32> to vector<8x32xf32>
    %348 = arith.addf %345, %347 : vector<8x32xf32>
    %cst_129 = arith.constant dense<0.000000e+00> : vector<8xf32>
    %349 = vector.multi_reduction <add>, %348, %cst_129 [1] : vector<8x32xf32> to vector<8xf32>
    %350 = vector.shape_cast %349 : vector<8xf32> to vector<8x1xf32>
    %cst_130 = arith.constant 3.200000e+01 : f32
    %351 = vector.broadcast %cst_130 : f32 to vector<8x1xf32>
    %352 = arith.divf %350, %351 : vector<8x1xf32>
    %353 = vector.broadcast %352 : vector<8x1xf32> to vector<8x32xf32>
    %354 = arith.subf %348, %353 : vector<8x32xf32>
    %355 = arith.mulf %354, %354 : vector<8x32xf32>
    %cst_131 = arith.constant dense<0.000000e+00> : vector<8xf32>
    %356 = vector.multi_reduction <add>, %355, %cst_131 [1] : vector<8x32xf32> to vector<8xf32>
    %357 = vector.shape_cast %356 : vector<8xf32> to vector<8x1xf32>
    %cst_132 = arith.constant 3.200000e+01 : f32
    %358 = vector.broadcast %cst_132 : f32 to vector<8x1xf32>
    %359 = arith.divf %357, %358 : vector<8x1xf32>
    %cst_133 = arith.constant 9.99999974E-6 : f32
    %360 = vector.broadcast %cst_133 : f32 to vector<8x1xf32>
    %361 = arith.addf %359, %360 : vector<8x1xf32>
    %362 = math.rsqrt %361 : vector<8x1xf32>
    %363 = vector.broadcast %362 : vector<8x1xf32> to vector<8x32xf32>
    %364 = arith.mulf %354, %363 : vector<8x32xf32>
    %c0_134 = arith.constant 0 : index
    %c0_135 = arith.constant 0 : index
    %365 = vector.load %arg17[%c0_134, %c0_135] : memref<1x32xf32, #tpu.memory_space<vmem>>, vector<1x32xf32>
    %366 = vector.broadcast %365 : vector<1x32xf32> to vector<8x32xf32>
    %367 = arith.mulf %364, %366 : vector<8x32xf32>
    %c0_136 = arith.constant 0 : index
    %c0_137 = arith.constant 0 : index
    %368 = vector.load %arg18[%c0_136, %c0_137] : memref<1x32xf32, #tpu.memory_space<vmem>>, vector<1x32xf32>
    %369 = vector.broadcast %368 : vector<1x32xf32> to vector<8x32xf32>
    %370 = arith.addf %367, %369 : vector<8x32xf32>
    %c0_138 = arith.constant 0 : index
    %c0_139 = arith.constant 0 : index
    %371 = vector.load %arg2[%c0_138, %c0_139] : memref<4x4xf32, #tpu.memory_space<vmem>>, vector<4x4xf32>
    %372 = vector.extract_strided_slice %371 {offsets = [0, 0], sizes = [1, 1], strides = [1, 1]} : vector<4x4xf32> to vector<1x1xf32>
    %373 = vector.extract_strided_slice %370 {offsets = [0, 0], sizes = [2, 32], strides = [1, 1]} : vector<8x32xf32> to vector<2x32xf32>
    %374 = vector.broadcast %372 : vector<1x1xf32> to vector<2x32xf32>
    %375 = arith.mulf %374, %373 : vector<2x32xf32>
    %376 = vector.extract_strided_slice %371 {offsets = [0, 1], sizes = [1, 1], strides = [1, 1]} : vector<4x4xf32> to vector<1x1xf32>
    %377 = vector.extract_strided_slice %370 {offsets = [2, 0], sizes = [2, 32], strides = [1, 1]} : vector<8x32xf32> to vector<2x32xf32>
    %378 = vector.broadcast %376 : vector<1x1xf32> to vector<2x32xf32>
    %379 = arith.mulf %378, %377 : vector<2x32xf32>
    %380 = arith.addf %375, %379 : vector<2x32xf32>
    %381 = vector.extract_strided_slice %371 {offsets = [0, 2], sizes = [1, 1], strides = [1, 1]} : vector<4x4xf32> to vector<1x1xf32>
    %382 = vector.extract_strided_slice %370 {offsets = [4, 0], sizes = [2, 32], strides = [1, 1]} : vector<8x32xf32> to vector<2x32xf32>
    %383 = vector.broadcast %381 : vector<1x1xf32> to vector<2x32xf32>
    %384 = arith.mulf %383, %382 : vector<2x32xf32>
    %385 = arith.addf %380, %384 : vector<2x32xf32>
    %386 = vector.extract_strided_slice %371 {offsets = [0, 3], sizes = [1, 1], strides = [1, 1]} : vector<4x4xf32> to vector<1x1xf32>
    %387 = vector.extract_strided_slice %370 {offsets = [6, 0], sizes = [2, 32], strides = [1, 1]} : vector<8x32xf32> to vector<2x32xf32>
    %388 = vector.broadcast %386 : vector<1x1xf32> to vector<2x32xf32>
    %389 = arith.mulf %388, %387 : vector<2x32xf32>
    %390 = arith.addf %385, %389 : vector<2x32xf32>
    %391 = vector.extract_strided_slice %371 {offsets = [1, 0], sizes = [1, 1], strides = [1, 1]} : vector<4x4xf32> to vector<1x1xf32>
    %392 = vector.extract_strided_slice %370 {offsets = [0, 0], sizes = [2, 32], strides = [1, 1]} : vector<8x32xf32> to vector<2x32xf32>
    %393 = vector.broadcast %391 : vector<1x1xf32> to vector<2x32xf32>
    %394 = arith.mulf %393, %392 : vector<2x32xf32>
    %395 = vector.extract_strided_slice %371 {offsets = [1, 1], sizes = [1, 1], strides = [1, 1]} : vector<4x4xf32> to vector<1x1xf32>
    %396 = vector.extract_strided_slice %370 {offsets = [2, 0], sizes = [2, 32], strides = [1, 1]} : vector<8x32xf32> to vector<2x32xf32>
    %397 = vector.broadcast %395 : vector<1x1xf32> to vector<2x32xf32>
    %398 = arith.mulf %397, %396 : vector<2x32xf32>
    %399 = arith.addf %394, %398 : vector<2x32xf32>
    %400 = vector.extract_strided_slice %371 {offsets = [1, 2], sizes = [1, 1], strides = [1, 1]} : vector<4x4xf32> to vector<1x1xf32>
    %401 = vector.extract_strided_slice %370 {offsets = [4, 0], sizes = [2, 32], strides = [1, 1]} : vector<8x32xf32> to vector<2x32xf32>
    %402 = vector.broadcast %400 : vector<1x1xf32> to vector<2x32xf32>
    %403 = arith.mulf %402, %401 : vector<2x32xf32>
    %404 = arith.addf %399, %403 : vector<2x32xf32>
    %405 = vector.extract_strided_slice %371 {offsets = [1, 3], sizes = [1, 1], strides = [1, 1]} : vector<4x4xf32> to vector<1x1xf32>
    %406 = vector.extract_strided_slice %370 {offsets = [6, 0], sizes = [2, 32], strides = [1, 1]} : vector<8x32xf32> to vector<2x32xf32>
    %407 = vector.broadcast %405 : vector<1x1xf32> to vector<2x32xf32>
    %408 = arith.mulf %407, %406 : vector<2x32xf32>
    %409 = arith.addf %404, %408 : vector<2x32xf32>
    %410 = vector.extract_strided_slice %371 {offsets = [2, 0], sizes = [1, 1], strides = [1, 1]} : vector<4x4xf32> to vector<1x1xf32>
    %411 = vector.extract_strided_slice %370 {offsets = [0, 0], sizes = [2, 32], strides = [1, 1]} : vector<8x32xf32> to vector<2x32xf32>
    %412 = vector.broadcast %410 : vector<1x1xf32> to vector<2x32xf32>
    %413 = arith.mulf %412, %411 : vector<2x32xf32>
    %414 = vector.extract_strided_slice %371 {offsets = [2, 1], sizes = [1, 1], strides = [1, 1]} : vector<4x4xf32> to vector<1x1xf32>
    %415 = vector.extract_strided_slice %370 {offsets = [2, 0], sizes = [2, 32], strides = [1, 1]} : vector<8x32xf32> to vector<2x32xf32>
    %416 = vector.broadcast %414 : vector<1x1xf32> to vector<2x32xf32>
    %417 = arith.mulf %416, %415 : vector<2x32xf32>
    %418 = arith.addf %413, %417 : vector<2x32xf32>
    %419 = vector.extract_strided_slice %371 {offsets = [2, 2], sizes = [1, 1], strides = [1, 1]} : vector<4x4xf32> to vector<1x1xf32>
    %420 = vector.extract_strided_slice %370 {offsets = [4, 0], sizes = [2, 32], strides = [1, 1]} : vector<8x32xf32> to vector<2x32xf32>
    %421 = vector.broadcast %419 : vector<1x1xf32> to vector<2x32xf32>
    %422 = arith.mulf %421, %420 : vector<2x32xf32>
    %423 = arith.addf %418, %422 : vector<2x32xf32>
    %424 = vector.extract_strided_slice %371 {offsets = [2, 3], sizes = [1, 1], strides = [1, 1]} : vector<4x4xf32> to vector<1x1xf32>
    %425 = vector.extract_strided_slice %370 {offsets = [6, 0], sizes = [2, 32], strides = [1, 1]} : vector<8x32xf32> to vector<2x32xf32>
    %426 = vector.broadcast %424 : vector<1x1xf32> to vector<2x32xf32>
    %427 = arith.mulf %426, %425 : vector<2x32xf32>
    %428 = arith.addf %423, %427 : vector<2x32xf32>
    %429 = vector.extract_strided_slice %371 {offsets = [3, 0], sizes = [1, 1], strides = [1, 1]} : vector<4x4xf32> to vector<1x1xf32>
    %430 = vector.extract_strided_slice %370 {offsets = [0, 0], sizes = [2, 32], strides = [1, 1]} : vector<8x32xf32> to vector<2x32xf32>
    %431 = vector.broadcast %429 : vector<1x1xf32> to vector<2x32xf32>
    %432 = arith.mulf %431, %430 : vector<2x32xf32>
    %433 = vector.extract_strided_slice %371 {offsets = [3, 1], sizes = [1, 1], strides = [1, 1]} : vector<4x4xf32> to vector<1x1xf32>
    %434 = vector.extract_strided_slice %370 {offsets = [2, 0], sizes = [2, 32], strides = [1, 1]} : vector<8x32xf32> to vector<2x32xf32>
    %435 = vector.broadcast %433 : vector<1x1xf32> to vector<2x32xf32>
    %436 = arith.mulf %435, %434 : vector<2x32xf32>
    %437 = arith.addf %432, %436 : vector<2x32xf32>
    %438 = vector.extract_strided_slice %371 {offsets = [3, 2], sizes = [1, 1], strides = [1, 1]} : vector<4x4xf32> to vector<1x1xf32>
    %439 = vector.extract_strided_slice %370 {offsets = [4, 0], sizes = [2, 32], strides = [1, 1]} : vector<8x32xf32> to vector<2x32xf32>
    %440 = vector.broadcast %438 : vector<1x1xf32> to vector<2x32xf32>
    %441 = arith.mulf %440, %439 : vector<2x32xf32>
    %442 = arith.addf %437, %441 : vector<2x32xf32>
    %443 = vector.extract_strided_slice %371 {offsets = [3, 3], sizes = [1, 1], strides = [1, 1]} : vector<4x4xf32> to vector<1x1xf32>
    %444 = vector.extract_strided_slice %370 {offsets = [6, 0], sizes = [2, 32], strides = [1, 1]} : vector<8x32xf32> to vector<2x32xf32>
    %445 = vector.broadcast %443 : vector<1x1xf32> to vector<2x32xf32>
    %446 = arith.mulf %445, %444 : vector<2x32xf32>
    %447 = arith.addf %442, %446 : vector<2x32xf32>
    %448 = tpu.concatenate %390, %409, %428, %447 in 0 : vector<2x32xf32>, vector<2x32xf32>, vector<2x32xf32>, vector<2x32xf32> -> vector<8x32xf32>
    %c0_140 = arith.constant 0 : index
    %c0_141 = arith.constant 0 : index
    %449 = vector.load %arg19[%c0_140, %c0_141] : memref<32x32xf32, #tpu.memory_space<vmem>>, vector<32x32xf32>
    %cst_142 = arith.constant dense<0.000000e+00> : vector<8x32xf32>
    %450 = tpu.matmul %448, %449, %cst_142 {dimension_numbers = #tpu.dot_dimension_numbers<[1], [0], [0], [1], [0, 0, 1, 1], [], []>} : vector<8x32xf32>, vector<32x32xf32>, vector<8x32xf32> -> vector<8x32xf32>
    %c0_143 = arith.constant 0 : index
    %c0_144 = arith.constant 0 : index
    %451 = vector.load %arg20[%c0_143, %c0_144] : memref<1x32xf32, #tpu.memory_space<vmem>>, vector<1x32xf32>
    %452 = vector.broadcast %451 : vector<1x32xf32> to vector<8x32xf32>
    %453 = arith.addf %450, %452 : vector<8x32xf32>
    %cst_145 = arith.constant 0.000000e+00 : f32
    %454 = vector.broadcast %cst_145 : f32 to vector<8x32xf32>
    %455 = arith.maximumf %453, %454 : vector<8x32xf32>
    %cst_146 = arith.constant 5.000000e-01 : f32
    %456 = vector.broadcast %cst_146 : f32 to vector<8x32xf32>
    %457 = arith.mulf %456, %370 : vector<8x32xf32>
    %cst_147 = arith.constant 5.000000e-01 : f32
    %458 = vector.broadcast %cst_147 : f32 to vector<8x32xf32>
    %459 = arith.mulf %458, %455 : vector<8x32xf32>
    %460 = arith.addf %457, %459 : vector<8x32xf32>
    %461 = arith.addf %460, %31 : vector<8x32xf32>
    %462 = vector.shape_cast %461 : vector<8x32xf32> to vector<4x2x32xf32>
    %c0_148 = arith.constant 0 : index
    %c0_149 = arith.constant 0 : index
    %c0_150 = arith.constant 0 : index
    %c0_151 = arith.constant 0 : index
    %463 = vector.load %arg21[%c0_148, %c0_149, %c0_150, %c0_151] : memref<1x4x2x32xf32, #tpu.memory_space<vmem>>, vector<1x4x2x32xf32>
    %464 = vector.shape_cast %463 : vector<1x4x2x32xf32> to vector<4x2x32xf32>
    %465 = vector.shape_cast %462 : vector<4x2x32xf32> to vector<1x4x2x32xf32>
    tpu.vector_store %arg21[%c0_148, %c0_149, %c0_150, %c0_151], %465 {strides = array<i32>} : memref<1x4x2x32xf32, #tpu.memory_space<vmem>>, vector<1x4x2x32xf32>,
    return
  }
  func.func @transform_0(%arg0: i32) -> (i32, i32, i32, i32) {
    %c0_i32 = arith.constant 0 : i32
    %c0_i32_0 = arith.constant 0 : i32
    %c0_i32_1 = arith.constant 0 : i32
    %c0_i32_2 = arith.constant 0 : i32
    return %arg0, %c0_i32, %c0_i32_0, %c0_i32_1 : i32, i32, i32, i32
  }
  func.func @transform_1(%arg0: i32) -> (i32, i32) {
    %c0_i32 = arith.constant 0 : i32
    %c0_i32_0 = arith.constant 0 : i32
    %c0_i32_1 = arith.constant 0 : i32
    return %c0_i32, %c0_i32_0 : i32, i32
  }
  func.func @transform_2(%arg0: i32) -> (i32, i32) {
    %c0_i32 = arith.constant 0 : i32
    %c0_i32_0 = arith.constant 0 : i32
    %c0_i32_1 = arith.constant 0 : i32
    return %c0_i32, %c0_i32_0 : i32, i32
  }
  func.func @transform_3(%arg0: i32) -> (i32, i32) {
    %c0_i32 = arith.constant 0 : i32
    %c0_i32_0 = arith.constant 0 : i32
    %c0_i32_1 = arith.constant 0 : i32
    return %c0_i32, %c0_i32_0 : i32, i32
  }
  func.func @transform_4(%arg0: i32) -> (i32, i32) {
    %c0_i32 = arith.constant 0 : i32
    %c0_i32_0 = arith.constant 0 : i32
    %c0_i32_1 = arith.constant 0 : i32
    return %c0_i32, %c0_i32_0 : i32, i32
  }
  func.func @transform_5(%arg0: i32) -> (i32, i32) {
    %c0_i32 = arith.constant 0 : i32
    %c0_i32_0 = arith.constant 0 : i32
    %c0_i32_1 = arith.constant 0 : i32
    return %c0_i32, %c0_i32_0 : i32, i32
  }
  func.func @transform_6(%arg0: i32) -> (i32, i32) {
    %c0_i32 = arith.constant 0 : i32
    %c0_i32_0 = arith.constant 0 : i32
    %c0_i32_1 = arith.constant 0 : i32
    return %c0_i32, %c0_i32_0 : i32, i32
  }
  func.func @transform_7(%arg0: i32) -> (i32, i32) {
    %c0_i32 = arith.constant 0 : i32
    %c0_i32_0 = arith.constant 0 : i32
    %c0_i32_1 = arith.constant 0 : i32
    return %c0_i32, %c0_i32_0 : i32, i32
  }
  func.func @transform_8(%arg0: i32) -> (i32, i32, i32) {
    %c0_i32 = arith.constant 0 : i32
    %c0_i32_0 = arith.constant 0 : i32
    %c0_i32_1 = arith.constant 0 : i32
    %c0_i32_2 = arith.constant 0 : i32
    return %c0_i32, %c0_i32_0, %c0_i32_1 : i32, i32, i32
  }
  func.func @transform_9(%arg0: i32) -> (i32, i32) {
    %c0_i32 = arith.constant 0 : i32
    %c0_i32_0 = arith.constant 0 : i32
    %c0_i32_1 = arith.constant 0 : i32
    return %c0_i32, %c0_i32_0 : i32, i32
  }
  func.func @transform_10(%arg0: i32) -> (i32, i32) {
    %c0_i32 = arith.constant 0 : i32
    %c0_i32_0 = arith.constant 0 : i32
    %c0_i32_1 = arith.constant 0 : i32
    return %c0_i32, %c0_i32_0 : i32, i32
  }
  func.func @transform_11(%arg0: i32) -> (i32, i32) {
    %c0_i32 = arith.constant 0 : i32
    %c0_i32_0 = arith.constant 0 : i32
    %c0_i32_1 = arith.constant 0 : i32
    return %c0_i32, %c0_i32_0 : i32, i32
  }
  func.func @transform_12(%arg0: i32) -> (i32, i32) {
    %c0_i32 = arith.constant 0 : i32
    %c0_i32_0 = arith.constant 0 : i32
    %c0_i32_1 = arith.constant 0 : i32
    return %c0_i32, %c0_i32_0 : i32, i32
  }
  func.func @transform_13(%arg0: i32) -> (i32, i32) {
    %c0_i32 = arith.constant 0 : i32
    %c0_i32_0 = arith.constant 0 : i32
    %c0_i32_1 = arith.constant 0 : i32
    return %c0_i32, %c0_i32_0 : i32, i32
  }
  func.func @transform_14(%arg0: i32) -> (i32, i32) {
    %c0_i32 = arith.constant 0 : i32
    %c0_i32_0 = arith.constant 0 : i32
    %c0_i32_1 = arith.constant 0 : i32
    return %c0_i32, %c0_i32_0 : i32, i32
  }
  func.func @transform_15(%arg0: i32) -> (i32, i32) {
    %c0_i32 = arith.constant 0 : i32
    %c0_i32_0 = arith.constant 0 : i32
    %c0_i32_1 = arith.constant 0 : i32
    return %c0_i32, %c0_i32_0 : i32, i32
  }
  func.func @transform_16(%arg0: i32) -> (i32, i32) {
    %c0_i32 = arith.constant 0 : i32
    %c0_i32_0 = arith.constant 0 : i32
    %c0_i32_1 = arith.constant 0 : i32
    return %c0_i32, %c0_i32_0 : i32, i32
  }
  func.func @transform_17(%arg0: i32) -> (i32, i32) {
    %c0_i32 = arith.constant 0 : i32
    %c0_i32_0 = arith.constant 0 : i32
    %c0_i32_1 = arith.constant 0 : i32
    return %c0_i32, %c0_i32_0 : i32, i32
  }
  func.func @transform_18(%arg0: i32) -> (i32, i32) {
    %c0_i32 = arith.constant 0 : i32
    %c0_i32_0 = arith.constant 0 : i32
    %c0_i32_1 = arith.constant 0 : i32
    return %c0_i32, %c0_i32_0 : i32, i32
  }
  func.func @transform_19(%arg0: i32) -> (i32, i32) {
    %c0_i32 = arith.constant 0 : i32
    %c0_i32_0 = arith.constant 0 : i32
    %c0_i32_1 = arith.constant 0 : i32
    return %c0_i32, %c0_i32_0 : i32, i32
  }
  func.func @transform_20(%arg0: i32) -> (i32, i32, i32, i32) {
    %c0_i32 = arith.constant 0 : i32
    %c0_i32_0 = arith.constant 0 : i32
    %c0_i32_1 = arith.constant 0 : i32
    %c0_i32_2 = arith.constant 0 : i32
    return %arg0, %c0_i32, %c0_i32_0, %c0_i32_1 : i32, i32, i32, i32
  }
}

module attributes {stable_mosaic.version = 11 : i64} {
  func.func @_encoder_layer_kernel(%arg0: i32, %arg1: memref<1x4x8x32xf32, #tpu.memory_space<vmem>>, %arg2: memref<4x4xf32, #tpu.memory_space<vmem>>, %arg3: memref<4x8xf32, #tpu.memory_space<vmem>>, %arg4: memref<4x1xf32, #tpu.memory_space<vmem>>, %arg5: memref<32x96xf32, #tpu.memory_space<vmem>>, %arg6: memref<1x96xf32, #tpu.memory_space<vmem>>, %arg7: memref<32x32xf32, #tpu.memory_space<vmem>>, %arg8: memref<1x32xf32, #tpu.memory_space<vmem>>, %arg9: memref<3x32x32xf32, #tpu.memory_space<vmem>>, %arg10: memref<1x32xf32, #tpu.memory_space<vmem>>, %arg11: memref<1x32xf32, #tpu.memory_space<vmem>>, %arg12: memref<1x32xf32, #tpu.memory_space<vmem>>, %arg13: memref<32x96xf32, #tpu.memory_space<vmem>>, %arg14: memref<1x96xf32, #tpu.memory_space<vmem>>, %arg15: memref<32x32xf32, #tpu.memory_space<vmem>>, %arg16: memref<1x32xf32, #tpu.memory_space<vmem>>, %arg17: memref<1x32xf32, #tpu.memory_space<vmem>>, %arg18: memref<1x32xf32, #tpu.memory_space<vmem>>, %arg19: memref<32x32xf32, #tpu.memory_space<vmem>>, %arg20: memref<1x32xf32, #tpu.memory_space<vmem>>, %arg21: memref<1x4x4x32xf32, #tpu.memory_space<vmem>>) attributes {dimension_semantics = [#tpu.dimension_semantics<parallel>], iteration_bounds = array<i64: 2>, scalar_prefetch = 0 : i64, scratch_operands = 0 : i64, tpu.core_type = #tpu.core_type<tc>, window_params = [{transform_indices = @transform_0, window_bounds = array<i64: 1, 4, 8, 32>}, {pipeline_mode = #tpu.pipeline_mode<synchronous>, transform_indices = @transform_1, window_bounds = array<i64: 4, 4>}, {pipeline_mode = #tpu.pipeline_mode<synchronous>, transform_indices = @transform_2, window_bounds = array<i64: 4, 8>}, {pipeline_mode = #tpu.pipeline_mode<synchronous>, transform_indices = @transform_3, window_bounds = array<i64: 4, 1>}, {pipeline_mode = #tpu.pipeline_mode<synchronous>, transform_indices = @transform_4, window_bounds = array<i64: 32, 96>}, {pipeline_mode = #tpu.pipeline_mode<synchronous>, transform_indices = @transform_5, window_bounds = array<i64: 1, 96>}, {pipeline_mode = #tpu.pipeline_mode<synchronous>, transform_indices = @transform_6, window_bounds = array<i64: 32, 32>}, {pipeline_mode = #tpu.pipeline_mode<synchronous>, transform_indices = @transform_7, window_bounds = array<i64: 1, 32>}, {pipeline_mode = #tpu.pipeline_mode<synchronous>, transform_indices = @transform_8, window_bounds = array<i64: 3, 32, 32>}, {pipeline_mode = #tpu.pipeline_mode<synchronous>, transform_indices = @transform_9, window_bounds = array<i64: 1, 32>}, {pipeline_mode = #tpu.pipeline_mode<synchronous>, transform_indices = @transform_10, window_bounds = array<i64: 1, 32>}, {pipeline_mode = #tpu.pipeline_mode<synchronous>, transform_indices = @transform_11, window_bounds = array<i64: 1, 32>}, {pipeline_mode = #tpu.pipeline_mode<synchronous>, transform_indices = @transform_12, window_bounds = array<i64: 32, 96>}, {pipeline_mode = #tpu.pipeline_mode<synchronous>, transform_indices = @transform_13, window_bounds = array<i64: 1, 96>}, {pipeline_mode = #tpu.pipeline_mode<synchronous>, transform_indices = @transform_14, window_bounds = array<i64: 32, 32>}, {pipeline_mode = #tpu.pipeline_mode<synchronous>, transform_indices = @transform_15, window_bounds = array<i64: 1, 32>}, {pipeline_mode = #tpu.pipeline_mode<synchronous>, transform_indices = @transform_16, window_bounds = array<i64: 1, 32>}, {pipeline_mode = #tpu.pipeline_mode<synchronous>, transform_indices = @transform_17, window_bounds = array<i64: 1, 32>}, {pipeline_mode = #tpu.pipeline_mode<synchronous>, transform_indices = @transform_18, window_bounds = array<i64: 32, 32>}, {pipeline_mode = #tpu.pipeline_mode<synchronous>, transform_indices = @transform_19, window_bounds = array<i64: 1, 32>}, {transform_indices = @transform_20, window_bounds = array<i64: 1, 4, 4, 32>}]} {
    %c0 = arith.constant 0 : index
    %c0_0 = arith.constant 0 : index
    %c0_1 = arith.constant 0 : index
    %c0_2 = arith.constant 0 : index
    %0 = vector.load %arg1[%c0, %c0_0, %c0_1, %c0_2] : memref<1x4x8x32xf32, #tpu.memory_space<vmem>>, vector<1x4x8x32xf32>
    %1 = vector.shape_cast %0 : vector<1x4x8x32xf32> to vector<4x8x32xf32>
    %2 = vector.shape_cast %1 : vector<4x8x32xf32> to vector<32x32xf32>
    %c0_3 = arith.constant 0 : index
    %c0_4 = arith.constant 0 : index
    %3 = vector.load %arg3[%c0_3, %c0_4] : memref<4x8xf32, #tpu.memory_space<vmem>>, vector<4x8xf32>
    %4 = vector.extract_strided_slice %1 {offsets = [0, 0, 0], sizes = [1, 8, 32], strides = [1, 1, 1]} : vector<4x8x32xf32> to vector<1x8x32xf32>
    %5 = vector.shape_cast %4 : vector<1x8x32xf32> to vector<8x32xf32>
    %cst = arith.constant dense<0.000000e+00> : vector<4x32xf32>
    %6 = tpu.matmul %3, %5, %cst {dimension_numbers = #tpu.dot_dimension_numbers<[1], [0], [0], [1], [0, 0, 1, 1], [], []>} : vector<4x8xf32>, vector<8x32xf32>, vector<4x32xf32> -> vector<4x32xf32>
    %c0_5 = arith.constant 0 : index
    %c0_6 = arith.constant 0 : index
    %7 = vector.load %arg4[%c0_5, %c0_6] : memref<4x1xf32, #tpu.memory_space<vmem>>, vector<4x1xf32>
    %8 = vector.broadcast %7 : vector<4x1xf32> to vector<4x32xf32>
    %9 = arith.addf %6, %8 : vector<4x32xf32>
    %c0_7 = arith.constant 0 : index
    %c0_8 = arith.constant 0 : index
    %10 = vector.load %arg3[%c0_7, %c0_8] : memref<4x8xf32, #tpu.memory_space<vmem>>, vector<4x8xf32>
    %11 = vector.extract_strided_slice %1 {offsets = [1, 0, 0], sizes = [1, 8, 32], strides = [1, 1, 1]} : vector<4x8x32xf32> to vector<1x8x32xf32>
    %12 = vector.shape_cast %11 : vector<1x8x32xf32> to vector<8x32xf32>
    %cst_9 = arith.constant dense<0.000000e+00> : vector<4x32xf32>
    %13 = tpu.matmul %10, %12, %cst_9 {dimension_numbers = #tpu.dot_dimension_numbers<[1], [0], [0], [1], [0, 0, 1, 1], [], []>} : vector<4x8xf32>, vector<8x32xf32>, vector<4x32xf32> -> vector<4x32xf32>
    %c0_10 = arith.constant 0 : index
    %c0_11 = arith.constant 0 : index
    %14 = vector.load %arg4[%c0_10, %c0_11] : memref<4x1xf32, #tpu.memory_space<vmem>>, vector<4x1xf32>
    %15 = vector.broadcast %14 : vector<4x1xf32> to vector<4x32xf32>
    %16 = arith.addf %13, %15 : vector<4x32xf32>
    %c0_12 = arith.constant 0 : index
    %c0_13 = arith.constant 0 : index
    %17 = vector.load %arg3[%c0_12, %c0_13] : memref<4x8xf32, #tpu.memory_space<vmem>>, vector<4x8xf32>
    %18 = vector.extract_strided_slice %1 {offsets = [2, 0, 0], sizes = [1, 8, 32], strides = [1, 1, 1]} : vector<4x8x32xf32> to vector<1x8x32xf32>
    %19 = vector.shape_cast %18 : vector<1x8x32xf32> to vector<8x32xf32>
    %cst_14 = arith.constant dense<0.000000e+00> : vector<4x32xf32>
    %20 = tpu.matmul %17, %19, %cst_14 {dimension_numbers = #tpu.dot_dimension_numbers<[1], [0], [0], [1], [0, 0, 1, 1], [], []>} : vector<4x8xf32>, vector<8x32xf32>, vector<4x32xf32> -> vector<4x32xf32>
    %c0_15 = arith.constant 0 : index
    %c0_16 = arith.constant 0 : index
    %21 = vector.load %arg4[%c0_15, %c0_16] : memref<4x1xf32, #tpu.memory_space<vmem>>, vector<4x1xf32>
    %22 = vector.broadcast %21 : vector<4x1xf32> to vector<4x32xf32>
    %23 = arith.addf %20, %22 : vector<4x32xf32>
    %c0_17 = arith.constant 0 : index
    %c0_18 = arith.constant 0 : index
    %24 = vector.load %arg3[%c0_17, %c0_18] : memref<4x8xf32, #tpu.memory_space<vmem>>, vector<4x8xf32>
    %25 = vector.extract_strided_slice %1 {offsets = [3, 0, 0], sizes = [1, 8, 32], strides = [1, 1, 1]} : vector<4x8x32xf32> to vector<1x8x32xf32>
    %26 = vector.shape_cast %25 : vector<1x8x32xf32> to vector<8x32xf32>
    %cst_19 = arith.constant dense<0.000000e+00> : vector<4x32xf32>
    %27 = tpu.matmul %24, %26, %cst_19 {dimension_numbers = #tpu.dot_dimension_numbers<[1], [0], [0], [1], [0, 0, 1, 1], [], []>} : vector<4x8xf32>, vector<8x32xf32>, vector<4x32xf32> -> vector<4x32xf32>
    %c0_20 = arith.constant 0 : index
    %c0_21 = arith.constant 0 : index
    %28 = vector.load %arg4[%c0_20, %c0_21] : memref<4x1xf32, #tpu.memory_space<vmem>>, vector<4x1xf32>
    %29 = vector.broadcast %28 : vector<4x1xf32> to vector<4x32xf32>
    %30 = arith.addf %27, %29 : vector<4x32xf32>
    %31 = tpu.concatenate %9, %16, %23, %30 in 0 : vector<4x32xf32>, vector<4x32xf32>, vector<4x32xf32>, vector<4x32xf32> -> vector<16x32xf32>
    %c0_22 = arith.constant 0 : index
    %c0_23 = arith.constant 0 : index
    %32 = vector.load %arg5[%c0_22, %c0_23] : memref<32x96xf32, #tpu.memory_space<vmem>>, vector<32x96xf32>
    %cst_24 = arith.constant dense<0.000000e+00> : vector<32x96xf32>
    %33 = tpu.matmul %2, %32, %cst_24 {dimension_numbers = #tpu.dot_dimension_numbers<[1], [0], [0], [1], [0, 0, 1, 1], [], []>} : vector<32x32xf32>, vector<32x96xf32>, vector<32x96xf32> -> vector<32x96xf32>
    %c0_25 = arith.constant 0 : index
    %c0_26 = arith.constant 0 : index
    %34 = vector.load %arg6[%c0_25, %c0_26] : memref<1x96xf32, #tpu.memory_space<vmem>>, vector<1x96xf32>
    %35 = vector.broadcast %34 : vector<1x96xf32> to vector<32x96xf32>
    %36 = arith.addf %33, %35 : vector<32x96xf32>
    %37 = vector.extract_strided_slice %36 {offsets = [0, 0], sizes = [32, 8], strides = [1, 1]} : vector<32x96xf32> to vector<32x8xf32>
    %38 = vector.shape_cast %37 : vector<32x8xf32> to vector<4x8x8xf32>
    %39 = vector.extract_strided_slice %36 {offsets = [0, 32], sizes = [32, 8], strides = [1, 1]} : vector<32x96xf32> to vector<32x8xf32>
    %40 = vector.shape_cast %39 : vector<32x8xf32> to vector<4x8x8xf32>
    %41 = vector.extract_strided_slice %36 {offsets = [0, 64], sizes = [32, 8], strides = [1, 1]} : vector<32x96xf32> to vector<32x8xf32>
    %42 = vector.shape_cast %41 : vector<32x8xf32> to vector<4x8x8xf32>
    "tpu.trace_start"() <{level = 10 : i32, message = "nle,nme->nlm"}> : () -> ()
    %cst_27 = arith.constant dense<0.000000e+00> : vector<4x8x8xf32>
    %43 = tpu.matmul %38, %40, %cst_27 {dimension_numbers = #tpu.dot_dimension_numbers<[2], [2], [1], [1], [0, 0, 0, 1, 1, 1], [0], [0]>} : vector<4x8x8xf32>, vector<4x8x8xf32>, vector<4x8x8xf32> -> vector<4x8x8xf32>
    "tpu.trace_stop"() : () -> ()
    %cst_28 = arith.constant 0.353553385 : f32
    %44 = vector.broadcast %cst_28 : f32 to vector<4x8x8xf32>
    %45 = arith.mulf %43, %44 : vector<4x8x8xf32>
    %cst_29 = arith.constant dense<0xFF800000> : vector<4x8xf32>
    %46 = vector.multi_reduction <maximumf>, %45, %cst_29 [2] : vector<4x8x8xf32> to vector<4x8xf32>
    %47 = vector.shape_cast %46 : vector<4x8xf32> to vector<4x8x1xf32>
    %48 = vector.broadcast %47 : vector<4x8x1xf32> to vector<4x8x8xf32>
    %49 = arith.subf %45, %48 : vector<4x8x8xf32>
    %50 = math.exp %49 : vector<4x8x8xf32>
    %cst_30 = arith.constant dense<0.000000e+00> : vector<4x8xf32>
    %51 = vector.multi_reduction <add>, %50, %cst_30 [2] : vector<4x8x8xf32> to vector<4x8xf32>
    %52 = vector.shape_cast %51 : vector<4x8xf32> to vector<4x8x1xf32>
    %53 = tpu.reciprocal %52 {approx = true} : vector<4x8x1xf32> -> vector<4x8x1xf32>
    %54 = vector.broadcast %53 : vector<4x8x1xf32> to vector<4x8x8xf32>
    %55 = arith.mulf %50, %54 : vector<4x8x8xf32>
    "tpu.trace_start"() <{level = 10 : i32, message = "nlm,nme->nle"}> : () -> ()
    %cst_31 = arith.constant dense<0.000000e+00> : vector<4x8x8xf32>
    %56 = tpu.matmul %55, %42, %cst_31 {dimension_numbers = #tpu.dot_dimension_numbers<[2], [1], [1], [2], [0, 0, 0, 1, 1, 2], [0], [0]>} : vector<4x8x8xf32>, vector<4x8x8xf32>, vector<4x8x8xf32> -> vector<4x8x8xf32>
    "tpu.trace_stop"() : () -> ()
    %57 = vector.shape_cast %56 : vector<4x8x8xf32> to vector<32x8xf32>
    %c0_32 = arith.constant 0 : index
    %c0_33 = arith.constant 0 : index
    %58 = vector.load %arg7[%c0_32, %c0_33] : memref<32x32xf32, #tpu.memory_space<vmem>>, vector<8x32xf32>
    %cst_34 = arith.constant dense<0.000000e+00> : vector<32x32xf32>
    %59 = tpu.matmul %57, %58, %cst_34 {dimension_numbers = #tpu.dot_dimension_numbers<[1], [0], [0], [1], [0, 0, 1, 1], [], []>} : vector<32x8xf32>, vector<8x32xf32>, vector<32x32xf32> -> vector<32x32xf32>
    %60 = vector.extract_strided_slice %36 {offsets = [0, 8], sizes = [32, 8], strides = [1, 1]} : vector<32x96xf32> to vector<32x8xf32>
    %61 = vector.shape_cast %60 : vector<32x8xf32> to vector<4x8x8xf32>
    %62 = vector.extract_strided_slice %36 {offsets = [0, 40], sizes = [32, 8], strides = [1, 1]} : vector<32x96xf32> to vector<32x8xf32>
    %63 = vector.shape_cast %62 : vector<32x8xf32> to vector<4x8x8xf32>
    %64 = vector.extract_strided_slice %36 {offsets = [0, 72], sizes = [32, 8], strides = [1, 1]} : vector<32x96xf32> to vector<32x8xf32>
    %65 = vector.shape_cast %64 : vector<32x8xf32> to vector<4x8x8xf32>
    "tpu.trace_start"() <{level = 10 : i32, message = "nle,nme->nlm"}> : () -> ()
    %cst_35 = arith.constant dense<0.000000e+00> : vector<4x8x8xf32>
    %66 = tpu.matmul %61, %63, %cst_35 {dimension_numbers = #tpu.dot_dimension_numbers<[2], [2], [1], [1], [0, 0, 0, 1, 1, 1], [0], [0]>} : vector<4x8x8xf32>, vector<4x8x8xf32>, vector<4x8x8xf32> -> vector<4x8x8xf32>
    "tpu.trace_stop"() : () -> ()
    %cst_36 = arith.constant 0.353553385 : f32
    %67 = vector.broadcast %cst_36 : f32 to vector<4x8x8xf32>
    %68 = arith.mulf %66, %67 : vector<4x8x8xf32>
    %cst_37 = arith.constant dense<0xFF800000> : vector<4x8xf32>
    %69 = vector.multi_reduction <maximumf>, %68, %cst_37 [2] : vector<4x8x8xf32> to vector<4x8xf32>
    %70 = vector.shape_cast %69 : vector<4x8xf32> to vector<4x8x1xf32>
    %71 = vector.broadcast %70 : vector<4x8x1xf32> to vector<4x8x8xf32>
    %72 = arith.subf %68, %71 : vector<4x8x8xf32>
    %73 = math.exp %72 : vector<4x8x8xf32>
    %cst_38 = arith.constant dense<0.000000e+00> : vector<4x8xf32>
    %74 = vector.multi_reduction <add>, %73, %cst_38 [2] : vector<4x8x8xf32> to vector<4x8xf32>
    %75 = vector.shape_cast %74 : vector<4x8xf32> to vector<4x8x1xf32>
    %76 = tpu.reciprocal %75 {approx = true} : vector<4x8x1xf32> -> vector<4x8x1xf32>
    %77 = vector.broadcast %76 : vector<4x8x1xf32> to vector<4x8x8xf32>
    %78 = arith.mulf %73, %77 : vector<4x8x8xf32>
    "tpu.trace_start"() <{level = 10 : i32, message = "nlm,nme->nle"}> : () -> ()
    %cst_39 = arith.constant dense<0.000000e+00> : vector<4x8x8xf32>
    %79 = tpu.matmul %78, %65, %cst_39 {dimension_numbers = #tpu.dot_dimension_numbers<[2], [1], [1], [2], [0, 0, 0, 1, 1, 2], [0], [0]>} : vector<4x8x8xf32>, vector<4x8x8xf32>, vector<4x8x8xf32> -> vector<4x8x8xf32>
    "tpu.trace_stop"() : () -> ()
    %80 = vector.shape_cast %79 : vector<4x8x8xf32> to vector<32x8xf32>
    %c8 = arith.constant 8 : index
    %c0_40 = arith.constant 0 : index
    %81 = vector.load %arg7[%c8, %c0_40] : memref<32x32xf32, #tpu.memory_space<vmem>>, vector<8x32xf32>
    %cst_41 = arith.constant dense<0.000000e+00> : vector<32x32xf32>
    %82 = tpu.matmul %80, %81, %cst_41 {dimension_numbers = #tpu.dot_dimension_numbers<[1], [0], [0], [1], [0, 0, 1, 1], [], []>} : vector<32x8xf32>, vector<8x32xf32>, vector<32x32xf32> -> vector<32x32xf32>
    %83 = arith.addf %59, %82 : vector<32x32xf32>
    %84 = vector.extract_strided_slice %36 {offsets = [0, 16], sizes = [32, 8], strides = [1, 1]} : vector<32x96xf32> to vector<32x8xf32>
    %85 = vector.shape_cast %84 : vector<32x8xf32> to vector<4x8x8xf32>
    %86 = vector.extract_strided_slice %36 {offsets = [0, 48], sizes = [32, 8], strides = [1, 1]} : vector<32x96xf32> to vector<32x8xf32>
    %87 = vector.shape_cast %86 : vector<32x8xf32> to vector<4x8x8xf32>
    %88 = vector.extract_strided_slice %36 {offsets = [0, 80], sizes = [32, 8], strides = [1, 1]} : vector<32x96xf32> to vector<32x8xf32>
    %89 = vector.shape_cast %88 : vector<32x8xf32> to vector<4x8x8xf32>
    "tpu.trace_start"() <{level = 10 : i32, message = "nle,nme->nlm"}> : () -> ()
    %cst_42 = arith.constant dense<0.000000e+00> : vector<4x8x8xf32>
    %90 = tpu.matmul %85, %87, %cst_42 {dimension_numbers = #tpu.dot_dimension_numbers<[2], [2], [1], [1], [0, 0, 0, 1, 1, 1], [0], [0]>} : vector<4x8x8xf32>, vector<4x8x8xf32>, vector<4x8x8xf32> -> vector<4x8x8xf32>
    "tpu.trace_stop"() : () -> ()
    %cst_43 = arith.constant 0.353553385 : f32
    %91 = vector.broadcast %cst_43 : f32 to vector<4x8x8xf32>
    %92 = arith.mulf %90, %91 : vector<4x8x8xf32>
    %cst_44 = arith.constant dense<0xFF800000> : vector<4x8xf32>
    %93 = vector.multi_reduction <maximumf>, %92, %cst_44 [2] : vector<4x8x8xf32> to vector<4x8xf32>
    %94 = vector.shape_cast %93 : vector<4x8xf32> to vector<4x8x1xf32>
    %95 = vector.broadcast %94 : vector<4x8x1xf32> to vector<4x8x8xf32>
    %96 = arith.subf %92, %95 : vector<4x8x8xf32>
    %97 = math.exp %96 : vector<4x8x8xf32>
    %cst_45 = arith.constant dense<0.000000e+00> : vector<4x8xf32>
    %98 = vector.multi_reduction <add>, %97, %cst_45 [2] : vector<4x8x8xf32> to vector<4x8xf32>
    %99 = vector.shape_cast %98 : vector<4x8xf32> to vector<4x8x1xf32>
    %100 = tpu.reciprocal %99 {approx = true} : vector<4x8x1xf32> -> vector<4x8x1xf32>
    %101 = vector.broadcast %100 : vector<4x8x1xf32> to vector<4x8x8xf32>
    %102 = arith.mulf %97, %101 : vector<4x8x8xf32>
    "tpu.trace_start"() <{level = 10 : i32, message = "nlm,nme->nle"}> : () -> ()
    %cst_46 = arith.constant dense<0.000000e+00> : vector<4x8x8xf32>
    %103 = tpu.matmul %102, %89, %cst_46 {dimension_numbers = #tpu.dot_dimension_numbers<[2], [1], [1], [2], [0, 0, 0, 1, 1, 2], [0], [0]>} : vector<4x8x8xf32>, vector<4x8x8xf32>, vector<4x8x8xf32> -> vector<4x8x8xf32>
    "tpu.trace_stop"() : () -> ()
    %104 = vector.shape_cast %103 : vector<4x8x8xf32> to vector<32x8xf32>
    %c16 = arith.constant 16 : index
    %c0_47 = arith.constant 0 : index
    %105 = vector.load %arg7[%c16, %c0_47] : memref<32x32xf32, #tpu.memory_space<vmem>>, vector<8x32xf32>
    %cst_48 = arith.constant dense<0.000000e+00> : vector<32x32xf32>
    %106 = tpu.matmul %104, %105, %cst_48 {dimension_numbers = #tpu.dot_dimension_numbers<[1], [0], [0], [1], [0, 0, 1, 1], [], []>} : vector<32x8xf32>, vector<8x32xf32>, vector<32x32xf32> -> vector<32x32xf32>
    %107 = arith.addf %83, %106 : vector<32x32xf32>
    %108 = vector.extract_strided_slice %36 {offsets = [0, 24], sizes = [32, 8], strides = [1, 1]} : vector<32x96xf32> to vector<32x8xf32>
    %109 = vector.shape_cast %108 : vector<32x8xf32> to vector<4x8x8xf32>
    %110 = vector.extract_strided_slice %36 {offsets = [0, 56], sizes = [32, 8], strides = [1, 1]} : vector<32x96xf32> to vector<32x8xf32>
    %111 = vector.shape_cast %110 : vector<32x8xf32> to vector<4x8x8xf32>
    %112 = vector.extract_strided_slice %36 {offsets = [0, 88], sizes = [32, 8], strides = [1, 1]} : vector<32x96xf32> to vector<32x8xf32>
    %113 = vector.shape_cast %112 : vector<32x8xf32> to vector<4x8x8xf32>
    "tpu.trace_start"() <{level = 10 : i32, message = "nle,nme->nlm"}> : () -> ()
    %cst_49 = arith.constant dense<0.000000e+00> : vector<4x8x8xf32>
    %114 = tpu.matmul %109, %111, %cst_49 {dimension_numbers = #tpu.dot_dimension_numbers<[2], [2], [1], [1], [0, 0, 0, 1, 1, 1], [0], [0]>} : vector<4x8x8xf32>, vector<4x8x8xf32>, vector<4x8x8xf32> -> vector<4x8x8xf32>
    "tpu.trace_stop"() : () -> ()
    %cst_50 = arith.constant 0.353553385 : f32
    %115 = vector.broadcast %cst_50 : f32 to vector<4x8x8xf32>
    %116 = arith.mulf %114, %115 : vector<4x8x8xf32>
    %cst_51 = arith.constant dense<0xFF800000> : vector<4x8xf32>
    %117 = vector.multi_reduction <maximumf>, %116, %cst_51 [2] : vector<4x8x8xf32> to vector<4x8xf32>
    %118 = vector.shape_cast %117 : vector<4x8xf32> to vector<4x8x1xf32>
    %119 = vector.broadcast %118 : vector<4x8x1xf32> to vector<4x8x8xf32>
    %120 = arith.subf %116, %119 : vector<4x8x8xf32>
    %121 = math.exp %120 : vector<4x8x8xf32>
    %cst_52 = arith.constant dense<0.000000e+00> : vector<4x8xf32>
    %122 = vector.multi_reduction <add>, %121, %cst_52 [2] : vector<4x8x8xf32> to vector<4x8xf32>
    %123 = vector.shape_cast %122 : vector<4x8xf32> to vector<4x8x1xf32>
    %124 = tpu.reciprocal %123 {approx = true} : vector<4x8x1xf32> -> vector<4x8x1xf32>
    %125 = vector.broadcast %124 : vector<4x8x1xf32> to vector<4x8x8xf32>
    %126 = arith.mulf %121, %125 : vector<4x8x8xf32>
    "tpu.trace_start"() <{level = 10 : i32, message = "nlm,nme->nle"}> : () -> ()
    %cst_53 = arith.constant dense<0.000000e+00> : vector<4x8x8xf32>
    %127 = tpu.matmul %126, %113, %cst_53 {dimension_numbers = #tpu.dot_dimension_numbers<[2], [1], [1], [2], [0, 0, 0, 1, 1, 2], [0], [0]>} : vector<4x8x8xf32>, vector<4x8x8xf32>, vector<4x8x8xf32> -> vector<4x8x8xf32>
    "tpu.trace_stop"() : () -> ()
    %128 = vector.shape_cast %127 : vector<4x8x8xf32> to vector<32x8xf32>
    %c24 = arith.constant 24 : index
    %c0_54 = arith.constant 0 : index
    %129 = vector.load %arg7[%c24, %c0_54] : memref<32x32xf32, #tpu.memory_space<vmem>>, vector<8x32xf32>
    %cst_55 = arith.constant dense<0.000000e+00> : vector<32x32xf32>
    %130 = tpu.matmul %128, %129, %cst_55 {dimension_numbers = #tpu.dot_dimension_numbers<[1], [0], [0], [1], [0, 0, 1, 1], [], []>} : vector<32x8xf32>, vector<8x32xf32>, vector<32x32xf32> -> vector<32x32xf32>
    %131 = arith.addf %107, %130 : vector<32x32xf32>
    %c0_56 = arith.constant 0 : index
    %c0_57 = arith.constant 0 : index
    %132 = vector.load %arg8[%c0_56, %c0_57] : memref<1x32xf32, #tpu.memory_space<vmem>>, vector<1x32xf32>
    %133 = vector.broadcast %132 : vector<1x32xf32> to vector<32x32xf32>
    %134 = arith.addf %131, %133 : vector<32x32xf32>
    %cst_58 = arith.constant 0.000000e+00 : f32
    %135 = vector.broadcast %cst_58 : f32 to vector<1x32xf32>
    %136 = vector.extract_strided_slice %134 {offsets = [0, 0], sizes = [31, 32], strides = [1, 1]} : vector<32x32xf32> to vector<31x32xf32>
    %137 = tpu.concatenate %135, %136 in 0 : vector<1x32xf32>, vector<31x32xf32> -> vector<32x32xf32>
    %138 = vector.extract_strided_slice %134 {offsets = [1, 0], sizes = [31, 32], strides = [1, 1]} : vector<32x32xf32> to vector<31x32xf32>
    %139 = tpu.concatenate %138, %135 in 0 : vector<31x32xf32>, vector<1x32xf32> -> vector<32x32xf32>
    %140 = tpu.iota {dimensions = array<i32: 0>} : vector<32x1xi32>
    %c8_i32 = arith.constant 8 : i32
    %c0_i32 = arith.constant 0 : i32
    %141 = arith.cmpi eq, %c8_i32, %c0_i32 : i32
    %c1_i32 = arith.constant 1 : i32
    %142 = arith.select %141, %c1_i32, %c8_i32 : i32
    %143 = vector.broadcast %142 : i32 to vector<32x1xi32>
    %144 = arith.remsi %140, %143 : vector<32x1xi32>
    %c0_i32_59 = arith.constant 0 : i32
    %145 = vector.broadcast %c0_i32_59 : i32 to vector<32x1xi32>
    %146 = arith.cmpi ne, %144, %145 : vector<32x1xi32>
    %c0_i32_60 = arith.constant 0 : i32
    %147 = vector.broadcast %c0_i32_60 : i32 to vector<32x1xi32>
    %148 = arith.cmpi slt, %144, %147 : vector<32x1xi32>
    %c0_i32_61 = arith.constant 0 : i32
    %149 = arith.cmpi slt, %142, %c0_i32_61 : i32
    %150 = vector.broadcast %149 : i1 to vector<32x1xi1>
    %151 = vector.broadcast %150 : vector<32x1xi1> to vector<32x1xi1>
    %152 = arith.xori %148, %151 : vector<32x1xi1>
    %153 = arith.andi %152, %146 : vector<32x1xi1>
    %154 = vector.broadcast %142 : i32 to vector<32x1xi32>
    %155 = arith.addi %144, %154 : vector<32x1xi32>
    %156 = arith.select %153, %155, %144 : vector<32x1xi1>, vector<32x1xi32>
    %c0_i32_62 = arith.constant 0 : i32
    %157 = vector.broadcast %c0_i32_62 : i32 to vector<32x1xi32>
    %158 = arith.cmpi eq, %156, %157 : vector<32x1xi32>
    %cst_63 = arith.constant 0.000000e+00 : f32
    %159 = vector.shape_cast %158 : vector<32x1xi1> to vector<32x1xi1>
    %160 = vector.broadcast %159 : vector<32x1xi1> to vector<32x32xi1>
    %161 = vector.broadcast %cst_63 : f32 to vector<32x32xf32>
    %162 = arith.select %160, %161, %137 : vector<32x32xi1>, vector<32x32xf32>
    %c8_i32_64 = arith.constant 8 : i32
    %c0_i32_65 = arith.constant 0 : i32
    %163 = arith.cmpi eq, %c8_i32_64, %c0_i32_65 : i32
    %c1_i32_66 = arith.constant 1 : i32
    %164 = arith.select %163, %c1_i32_66, %c8_i32_64 : i32
    %165 = vector.broadcast %164 : i32 to vector<32x1xi32>
    %166 = arith.remsi %140, %165 : vector<32x1xi32>
    %c0_i32_67 = arith.constant 0 : i32
    %167 = vector.broadcast %c0_i32_67 : i32 to vector<32x1xi32>
    %168 = arith.cmpi ne, %166, %167 : vector<32x1xi32>
    %c0_i32_68 = arith.constant 0 : i32
    %169 = vector.broadcast %c0_i32_68 : i32 to vector<32x1xi32>
    %170 = arith.cmpi slt, %166, %169 : vector<32x1xi32>
    %c0_i32_69 = arith.constant 0 : i32
    %171 = arith.cmpi slt, %164, %c0_i32_69 : i32
    %172 = vector.broadcast %171 : i1 to vector<32x1xi1>
    %173 = vector.broadcast %172 : vector<32x1xi1> to vector<32x1xi1>
    %174 = arith.xori %170, %173 : vector<32x1xi1>
    %175 = arith.andi %174, %168 : vector<32x1xi1>
    %176 = vector.broadcast %164 : i32 to vector<32x1xi32>
    %177 = arith.addi %166, %176 : vector<32x1xi32>
    %178 = arith.select %175, %177, %166 : vector<32x1xi1>, vector<32x1xi32>
    %c7_i32 = arith.constant 7 : i32
    %179 = vector.broadcast %c7_i32 : i32 to vector<32x1xi32>
    %180 = arith.cmpi eq, %178, %179 : vector<32x1xi32>
    %cst_70 = arith.constant 0.000000e+00 : f32
    %181 = vector.shape_cast %180 : vector<32x1xi1> to vector<32x1xi1>
    %182 = vector.broadcast %181 : vector<32x1xi1> to vector<32x32xi1>
    %183 = vector.broadcast %cst_70 : f32 to vector<32x32xf32>
    %184 = arith.select %182, %183, %139 : vector<32x32xi1>, vector<32x32xf32>
    %c0_71 = arith.constant 0 : index
    %c0_72 = arith.constant 0 : index
    %c0_73 = arith.constant 0 : index
    %185 = vector.load %arg9[%c0_71, %c0_72, %c0_73] : memref<3x32x32xf32, #tpu.memory_space<vmem>>, vector<1x32x32xf32>
    %186 = vector.shape_cast %185 : vector<1x32x32xf32> to vector<32x32xf32>
    %cst_74 = arith.constant dense<0.000000e+00> : vector<32x32xf32>
    %187 = tpu.matmul %162, %186, %cst_74 {dimension_numbers = #tpu.dot_dimension_numbers<[1], [0], [0], [1], [0, 0, 1, 1], [], []>} : vector<32x32xf32>, vector<32x32xf32>, vector<32x32xf32> -> vector<32x32xf32>
    %c1 = arith.constant 1 : index
    %c0_75 = arith.constant 0 : index
    %c0_76 = arith.constant 0 : index
    %188 = vector.load %arg9[%c1, %c0_75, %c0_76] : memref<3x32x32xf32, #tpu.memory_space<vmem>>, vector<1x32x32xf32>
    %189 = vector.shape_cast %188 : vector<1x32x32xf32> to vector<32x32xf32>
    %cst_77 = arith.constant dense<0.000000e+00> : vector<32x32xf32>
    %190 = tpu.matmul %134, %189, %cst_77 {dimension_numbers = #tpu.dot_dimension_numbers<[1], [0], [0], [1], [0, 0, 1, 1], [], []>} : vector<32x32xf32>, vector<32x32xf32>, vector<32x32xf32> -> vector<32x32xf32>
    %191 = arith.addf %187, %190 : vector<32x32xf32>
    %c2 = arith.constant 2 : index
    %c0_78 = arith.constant 0 : index
    %c0_79 = arith.constant 0 : index
    %192 = vector.load %arg9[%c2, %c0_78, %c0_79] : memref<3x32x32xf32, #tpu.memory_space<vmem>>, vector<1x32x32xf32>
    %193 = vector.shape_cast %192 : vector<1x32x32xf32> to vector<32x32xf32>
    %cst_80 = arith.constant dense<0.000000e+00> : vector<32x32xf32>
    %194 = tpu.matmul %184, %193, %cst_80 {dimension_numbers = #tpu.dot_dimension_numbers<[1], [0], [0], [1], [0, 0, 1, 1], [], []>} : vector<32x32xf32>, vector<32x32xf32>, vector<32x32xf32> -> vector<32x32xf32>
    %195 = arith.addf %191, %194 : vector<32x32xf32>
    %c0_81 = arith.constant 0 : index
    %c0_82 = arith.constant 0 : index
    %196 = vector.load %arg10[%c0_81, %c0_82] : memref<1x32xf32, #tpu.memory_space<vmem>>, vector<1x32xf32>
    %197 = vector.broadcast %196 : vector<1x32xf32> to vector<32x32xf32>
    %198 = arith.addf %195, %197 : vector<32x32xf32>
    %c0_83 = arith.constant 0 : index
    %c0_84 = arith.constant 0 : index
    %199 = vector.load %arg11[%c0_83, %c0_84] : memref<1x32xf32, #tpu.memory_space<vmem>>, vector<1x32xf32>
    %200 = vector.broadcast %199 : vector<1x32xf32> to vector<32x32xf32>
    %201 = arith.mulf %198, %200 : vector<32x32xf32>
    %c0_85 = arith.constant 0 : index
    %c0_86 = arith.constant 0 : index
    %202 = vector.load %arg12[%c0_85, %c0_86] : memref<1x32xf32, #tpu.memory_space<vmem>>, vector<1x32xf32>
    %203 = vector.broadcast %202 : vector<1x32xf32> to vector<32x32xf32>
    %204 = arith.addf %201, %203 : vector<32x32xf32>
    %cst_87 = arith.constant 0.000000e+00 : f32
    %205 = vector.broadcast %cst_87 : f32 to vector<32x32xf32>
    %206 = arith.cmpf ogt, %204, %205 : vector<32x32xf32>
    %cst_88 = arith.constant 0.000000e+00 : f32
    %207 = vector.broadcast %cst_88 : f32 to vector<32x32xf32>
    %208 = arith.minimumf %204, %207 : vector<32x32xf32>
    %209 = math.exp %208 : vector<32x32xf32>
    %cst_89 = arith.constant 1.000000e+00 : f32
    %210 = vector.broadcast %cst_89 : f32 to vector<32x32xf32>
    %211 = arith.subf %209, %210 : vector<32x32xf32>
    %212 = arith.select %206, %204, %211 : vector<32x32xi1>, vector<32x32xf32>
    %213 = vector.extract_strided_slice %212 {offsets = [0, 0], sizes = [1, 32], strides = [1, 1]} : vector<32x32xf32> to vector<1x32xf32>
    %214 = vector.extract_strided_slice %212 {offsets = [1, 0], sizes = [1, 32], strides = [1, 1]} : vector<32x32xf32> to vector<1x32xf32>
    %215 = arith.maximumf %213, %214 : vector<1x32xf32>
    %216 = vector.extract_strided_slice %212 {offsets = [1, 0], sizes = [1, 32], strides = [1, 1]} : vector<32x32xf32> to vector<1x32xf32>
    %217 = vector.extract_strided_slice %212 {offsets = [2, 0], sizes = [1, 32], strides = [1, 1]} : vector<32x32xf32> to vector<1x32xf32>
    %218 = arith.maximumf %216, %217 : vector<1x32xf32>
    %219 = vector.extract_strided_slice %212 {offsets = [3, 0], sizes = [1, 32], strides = [1, 1]} : vector<32x32xf32> to vector<1x32xf32>
    %220 = arith.maximumf %218, %219 : vector<1x32xf32>
    %221 = vector.extract_strided_slice %212 {offsets = [3, 0], sizes = [1, 32], strides = [1, 1]} : vector<32x32xf32> to vector<1x32xf32>
    %222 = vector.extract_strided_slice %212 {offsets = [4, 0], sizes = [1, 32], strides = [1, 1]} : vector<32x32xf32> to vector<1x32xf32>
    %223 = arith.maximumf %221, %222 : vector<1x32xf32>
    %224 = vector.extract_strided_slice %212 {offsets = [5, 0], sizes = [1, 32], strides = [1, 1]} : vector<32x32xf32> to vector<1x32xf32>
    %225 = arith.maximumf %223, %224 : vector<1x32xf32>
    %226 = vector.extract_strided_slice %212 {offsets = [5, 0], sizes = [1, 32], strides = [1, 1]} : vector<32x32xf32> to vector<1x32xf32>
    %227 = vector.extract_strided_slice %212 {offsets = [6, 0], sizes = [1, 32], strides = [1, 1]} : vector<32x32xf32> to vector<1x32xf32>
    %228 = arith.maximumf %226, %227 : vector<1x32xf32>
    %229 = vector.extract_strided_slice %212 {offsets = [7, 0], sizes = [1, 32], strides = [1, 1]} : vector<32x32xf32> to vector<1x32xf32>
    %230 = arith.maximumf %228, %229 : vector<1x32xf32>
    %231 = vector.extract_strided_slice %212 {offsets = [8, 0], sizes = [1, 32], strides = [1, 1]} : vector<32x32xf32> to vector<1x32xf32>
    %232 = vector.extract_strided_slice %212 {offsets = [9, 0], sizes = [1, 32], strides = [1, 1]} : vector<32x32xf32> to vector<1x32xf32>
    %233 = arith.maximumf %231, %232 : vector<1x32xf32>
    %234 = vector.extract_strided_slice %212 {offsets = [9, 0], sizes = [1, 32], strides = [1, 1]} : vector<32x32xf32> to vector<1x32xf32>
    %235 = vector.extract_strided_slice %212 {offsets = [10, 0], sizes = [1, 32], strides = [1, 1]} : vector<32x32xf32> to vector<1x32xf32>
    %236 = arith.maximumf %234, %235 : vector<1x32xf32>
    %237 = vector.extract_strided_slice %212 {offsets = [11, 0], sizes = [1, 32], strides = [1, 1]} : vector<32x32xf32> to vector<1x32xf32>
    %238 = arith.maximumf %236, %237 : vector<1x32xf32>
    %239 = vector.extract_strided_slice %212 {offsets = [11, 0], sizes = [1, 32], strides = [1, 1]} : vector<32x32xf32> to vector<1x32xf32>
    %240 = vector.extract_strided_slice %212 {offsets = [12, 0], sizes = [1, 32], strides = [1, 1]} : vector<32x32xf32> to vector<1x32xf32>
    %241 = arith.maximumf %239, %240 : vector<1x32xf32>
    %242 = vector.extract_strided_slice %212 {offsets = [13, 0], sizes = [1, 32], strides = [1, 1]} : vector<32x32xf32> to vector<1x32xf32>
    %243 = arith.maximumf %241, %242 : vector<1x32xf32>
    %244 = vector.extract_strided_slice %212 {offsets = [13, 0], sizes = [1, 32], strides = [1, 1]} : vector<32x32xf32> to vector<1x32xf32>
    %245 = vector.extract_strided_slice %212 {offsets = [14, 0], sizes = [1, 32], strides = [1, 1]} : vector<32x32xf32> to vector<1x32xf32>
    %246 = arith.maximumf %244, %245 : vector<1x32xf32>
    %247 = vector.extract_strided_slice %212 {offsets = [15, 0], sizes = [1, 32], strides = [1, 1]} : vector<32x32xf32> to vector<1x32xf32>
    %248 = arith.maximumf %246, %247 : vector<1x32xf32>
    %249 = vector.extract_strided_slice %212 {offsets = [16, 0], sizes = [1, 32], strides = [1, 1]} : vector<32x32xf32> to vector<1x32xf32>
    %250 = vector.extract_strided_slice %212 {offsets = [17, 0], sizes = [1, 32], strides = [1, 1]} : vector<32x32xf32> to vector<1x32xf32>
    %251 = arith.maximumf %249, %250 : vector<1x32xf32>
    %252 = vector.extract_strided_slice %212 {offsets = [17, 0], sizes = [1, 32], strides = [1, 1]} : vector<32x32xf32> to vector<1x32xf32>
    %253 = vector.extract_strided_slice %212 {offsets = [18, 0], sizes = [1, 32], strides = [1, 1]} : vector<32x32xf32> to vector<1x32xf32>
    %254 = arith.maximumf %252, %253 : vector<1x32xf32>
    %255 = vector.extract_strided_slice %212 {offsets = [19, 0], sizes = [1, 32], strides = [1, 1]} : vector<32x32xf32> to vector<1x32xf32>
    %256 = arith.maximumf %254, %255 : vector<1x32xf32>
    %257 = vector.extract_strided_slice %212 {offsets = [19, 0], sizes = [1, 32], strides = [1, 1]} : vector<32x32xf32> to vector<1x32xf32>
    %258 = vector.extract_strided_slice %212 {offsets = [20, 0], sizes = [1, 32], strides = [1, 1]} : vector<32x32xf32> to vector<1x32xf32>
    %259 = arith.maximumf %257, %258 : vector<1x32xf32>
    %260 = vector.extract_strided_slice %212 {offsets = [21, 0], sizes = [1, 32], strides = [1, 1]} : vector<32x32xf32> to vector<1x32xf32>
    %261 = arith.maximumf %259, %260 : vector<1x32xf32>
    %262 = vector.extract_strided_slice %212 {offsets = [21, 0], sizes = [1, 32], strides = [1, 1]} : vector<32x32xf32> to vector<1x32xf32>
    %263 = vector.extract_strided_slice %212 {offsets = [22, 0], sizes = [1, 32], strides = [1, 1]} : vector<32x32xf32> to vector<1x32xf32>
    %264 = arith.maximumf %262, %263 : vector<1x32xf32>
    %265 = vector.extract_strided_slice %212 {offsets = [23, 0], sizes = [1, 32], strides = [1, 1]} : vector<32x32xf32> to vector<1x32xf32>
    %266 = arith.maximumf %264, %265 : vector<1x32xf32>
    %267 = vector.extract_strided_slice %212 {offsets = [24, 0], sizes = [1, 32], strides = [1, 1]} : vector<32x32xf32> to vector<1x32xf32>
    %268 = vector.extract_strided_slice %212 {offsets = [25, 0], sizes = [1, 32], strides = [1, 1]} : vector<32x32xf32> to vector<1x32xf32>
    %269 = arith.maximumf %267, %268 : vector<1x32xf32>
    %270 = vector.extract_strided_slice %212 {offsets = [25, 0], sizes = [1, 32], strides = [1, 1]} : vector<32x32xf32> to vector<1x32xf32>
    %271 = vector.extract_strided_slice %212 {offsets = [26, 0], sizes = [1, 32], strides = [1, 1]} : vector<32x32xf32> to vector<1x32xf32>
    %272 = arith.maximumf %270, %271 : vector<1x32xf32>
    %273 = vector.extract_strided_slice %212 {offsets = [27, 0], sizes = [1, 32], strides = [1, 1]} : vector<32x32xf32> to vector<1x32xf32>
    %274 = arith.maximumf %272, %273 : vector<1x32xf32>
    %275 = vector.extract_strided_slice %212 {offsets = [27, 0], sizes = [1, 32], strides = [1, 1]} : vector<32x32xf32> to vector<1x32xf32>
    %276 = vector.extract_strided_slice %212 {offsets = [28, 0], sizes = [1, 32], strides = [1, 1]} : vector<32x32xf32> to vector<1x32xf32>
    %277 = arith.maximumf %275, %276 : vector<1x32xf32>
    %278 = vector.extract_strided_slice %212 {offsets = [29, 0], sizes = [1, 32], strides = [1, 1]} : vector<32x32xf32> to vector<1x32xf32>
    %279 = arith.maximumf %277, %278 : vector<1x32xf32>
    %280 = vector.extract_strided_slice %212 {offsets = [29, 0], sizes = [1, 32], strides = [1, 1]} : vector<32x32xf32> to vector<1x32xf32>
    %281 = vector.extract_strided_slice %212 {offsets = [30, 0], sizes = [1, 32], strides = [1, 1]} : vector<32x32xf32> to vector<1x32xf32>
    %282 = arith.maximumf %280, %281 : vector<1x32xf32>
    %283 = vector.extract_strided_slice %212 {offsets = [31, 0], sizes = [1, 32], strides = [1, 1]} : vector<32x32xf32> to vector<1x32xf32>
    %284 = arith.maximumf %282, %283 : vector<1x32xf32>
    %285 = tpu.concatenate %215, %220, %225, %230, %233, %238, %243, %248, %251, %256, %261, %266, %269, %274, %279, %284 in 0 : vector<1x32xf32>, vector<1x32xf32>, vector<1x32xf32>, vector<1x32xf32>, vector<1x32xf32>, vector<1x32xf32>, vector<1x32xf32>, vector<1x32xf32>, vector<1x32xf32>, vector<1x32xf32>, vector<1x32xf32>, vector<1x32xf32>, vector<1x32xf32>, vector<1x32xf32>, vector<1x32xf32>, vector<1x32xf32> -> vector<16x32xf32>
    %c0_90 = arith.constant 0 : index
    %c0_91 = arith.constant 0 : index
    %286 = vector.load %arg13[%c0_90, %c0_91] : memref<32x96xf32, #tpu.memory_space<vmem>>, vector<32x96xf32>
    %cst_92 = arith.constant dense<0.000000e+00> : vector<16x96xf32>
    %287 = tpu.matmul %285, %286, %cst_92 {dimension_numbers = #tpu.dot_dimension_numbers<[1], [0], [0], [1], [0, 0, 1, 1], [], []>} : vector<16x32xf32>, vector<32x96xf32>, vector<16x96xf32> -> vector<16x96xf32>
    %c0_93 = arith.constant 0 : index
    %c0_94 = arith.constant 0 : index
    %288 = vector.load %arg14[%c0_93, %c0_94] : memref<1x96xf32, #tpu.memory_space<vmem>>, vector<1x96xf32>
    %289 = vector.broadcast %288 : vector<1x96xf32> to vector<16x96xf32>
    %290 = arith.addf %287, %289 : vector<16x96xf32>
    %291 = vector.extract_strided_slice %290 {offsets = [0, 0], sizes = [16, 8], strides = [1, 1]} : vector<16x96xf32> to vector<16x8xf32>
    %292 = vector.shape_cast %291 : vector<16x8xf32> to vector<4x4x8xf32>
    %293 = vector.extract_strided_slice %290 {offsets = [0, 32], sizes = [16, 8], strides = [1, 1]} : vector<16x96xf32> to vector<16x8xf32>
    %294 = vector.shape_cast %293 : vector<16x8xf32> to vector<4x4x8xf32>
    %295 = vector.extract_strided_slice %290 {offsets = [0, 64], sizes = [16, 8], strides = [1, 1]} : vector<16x96xf32> to vector<16x8xf32>
    %296 = vector.shape_cast %295 : vector<16x8xf32> to vector<4x4x8xf32>
    "tpu.trace_start"() <{level = 10 : i32, message = "nle,nme->nlm"}> : () -> ()
    %cst_95 = arith.constant dense<0.000000e+00> : vector<4x4x4xf32>
    %297 = tpu.matmul %292, %294, %cst_95 {dimension_numbers = #tpu.dot_dimension_numbers<[2], [2], [1], [1], [0, 0, 0, 1, 1, 1], [0], [0]>} : vector<4x4x8xf32>, vector<4x4x8xf32>, vector<4x4x4xf32> -> vector<4x4x4xf32>
    "tpu.trace_stop"() : () -> ()
    %cst_96 = arith.constant 0.353553385 : f32
    %298 = vector.broadcast %cst_96 : f32 to vector<4x4x4xf32>
    %299 = arith.mulf %297, %298 : vector<4x4x4xf32>
    %cst_97 = arith.constant dense<0xFF800000> : vector<4x4xf32>
    %300 = vector.multi_reduction <maximumf>, %299, %cst_97 [2] : vector<4x4x4xf32> to vector<4x4xf32>
    %301 = vector.shape_cast %300 : vector<4x4xf32> to vector<4x4x1xf32>
    %302 = vector.broadcast %301 : vector<4x4x1xf32> to vector<4x4x4xf32>
    %303 = arith.subf %299, %302 : vector<4x4x4xf32>
    %304 = math.exp %303 : vector<4x4x4xf32>
    %cst_98 = arith.constant dense<0.000000e+00> : vector<4x4xf32>
    %305 = vector.multi_reduction <add>, %304, %cst_98 [2] : vector<4x4x4xf32> to vector<4x4xf32>
    %306 = vector.shape_cast %305 : vector<4x4xf32> to vector<4x4x1xf32>
    %307 = tpu.reciprocal %306 {approx = true} : vector<4x4x1xf32> -> vector<4x4x1xf32>
    %308 = vector.broadcast %307 : vector<4x4x1xf32> to vector<4x4x4xf32>
    %309 = arith.mulf %304, %308 : vector<4x4x4xf32>
    "tpu.trace_start"() <{level = 10 : i32, message = "nlm,nme->nle"}> : () -> ()
    %cst_99 = arith.constant dense<0.000000e+00> : vector<4x4x8xf32>
    %310 = tpu.matmul %309, %296, %cst_99 {dimension_numbers = #tpu.dot_dimension_numbers<[2], [1], [1], [2], [0, 0, 0, 1, 1, 2], [0], [0]>} : vector<4x4x4xf32>, vector<4x4x8xf32>, vector<4x4x8xf32> -> vector<4x4x8xf32>
    "tpu.trace_stop"() : () -> ()
    %311 = vector.shape_cast %310 : vector<4x4x8xf32> to vector<16x8xf32>
    %c0_100 = arith.constant 0 : index
    %c0_101 = arith.constant 0 : index
    %312 = vector.load %arg15[%c0_100, %c0_101] : memref<32x32xf32, #tpu.memory_space<vmem>>, vector<8x32xf32>
    %cst_102 = arith.constant dense<0.000000e+00> : vector<16x32xf32>
    %313 = tpu.matmul %311, %312, %cst_102 {dimension_numbers = #tpu.dot_dimension_numbers<[1], [0], [0], [1], [0, 0, 1, 1], [], []>} : vector<16x8xf32>, vector<8x32xf32>, vector<16x32xf32> -> vector<16x32xf32>
    %314 = vector.extract_strided_slice %290 {offsets = [0, 8], sizes = [16, 8], strides = [1, 1]} : vector<16x96xf32> to vector<16x8xf32>
    %315 = vector.shape_cast %314 : vector<16x8xf32> to vector<4x4x8xf32>
    %316 = vector.extract_strided_slice %290 {offsets = [0, 40], sizes = [16, 8], strides = [1, 1]} : vector<16x96xf32> to vector<16x8xf32>
    %317 = vector.shape_cast %316 : vector<16x8xf32> to vector<4x4x8xf32>
    %318 = vector.extract_strided_slice %290 {offsets = [0, 72], sizes = [16, 8], strides = [1, 1]} : vector<16x96xf32> to vector<16x8xf32>
    %319 = vector.shape_cast %318 : vector<16x8xf32> to vector<4x4x8xf32>
    "tpu.trace_start"() <{level = 10 : i32, message = "nle,nme->nlm"}> : () -> ()
    %cst_103 = arith.constant dense<0.000000e+00> : vector<4x4x4xf32>
    %320 = tpu.matmul %315, %317, %cst_103 {dimension_numbers = #tpu.dot_dimension_numbers<[2], [2], [1], [1], [0, 0, 0, 1, 1, 1], [0], [0]>} : vector<4x4x8xf32>, vector<4x4x8xf32>, vector<4x4x4xf32> -> vector<4x4x4xf32>
    "tpu.trace_stop"() : () -> ()
    %cst_104 = arith.constant 0.353553385 : f32
    %321 = vector.broadcast %cst_104 : f32 to vector<4x4x4xf32>
    %322 = arith.mulf %320, %321 : vector<4x4x4xf32>
    %cst_105 = arith.constant dense<0xFF800000> : vector<4x4xf32>
    %323 = vector.multi_reduction <maximumf>, %322, %cst_105 [2] : vector<4x4x4xf32> to vector<4x4xf32>
    %324 = vector.shape_cast %323 : vector<4x4xf32> to vector<4x4x1xf32>
    %325 = vector.broadcast %324 : vector<4x4x1xf32> to vector<4x4x4xf32>
    %326 = arith.subf %322, %325 : vector<4x4x4xf32>
    %327 = math.exp %326 : vector<4x4x4xf32>
    %cst_106 = arith.constant dense<0.000000e+00> : vector<4x4xf32>
    %328 = vector.multi_reduction <add>, %327, %cst_106 [2] : vector<4x4x4xf32> to vector<4x4xf32>
    %329 = vector.shape_cast %328 : vector<4x4xf32> to vector<4x4x1xf32>
    %330 = tpu.reciprocal %329 {approx = true} : vector<4x4x1xf32> -> vector<4x4x1xf32>
    %331 = vector.broadcast %330 : vector<4x4x1xf32> to vector<4x4x4xf32>
    %332 = arith.mulf %327, %331 : vector<4x4x4xf32>
    "tpu.trace_start"() <{level = 10 : i32, message = "nlm,nme->nle"}> : () -> ()
    %cst_107 = arith.constant dense<0.000000e+00> : vector<4x4x8xf32>
    %333 = tpu.matmul %332, %319, %cst_107 {dimension_numbers = #tpu.dot_dimension_numbers<[2], [1], [1], [2], [0, 0, 0, 1, 1, 2], [0], [0]>} : vector<4x4x4xf32>, vector<4x4x8xf32>, vector<4x4x8xf32> -> vector<4x4x8xf32>
    "tpu.trace_stop"() : () -> ()
    %334 = vector.shape_cast %333 : vector<4x4x8xf32> to vector<16x8xf32>
    %c8_108 = arith.constant 8 : index
    %c0_109 = arith.constant 0 : index
    %335 = vector.load %arg15[%c8_108, %c0_109] : memref<32x32xf32, #tpu.memory_space<vmem>>, vector<8x32xf32>
    %cst_110 = arith.constant dense<0.000000e+00> : vector<16x32xf32>
    %336 = tpu.matmul %334, %335, %cst_110 {dimension_numbers = #tpu.dot_dimension_numbers<[1], [0], [0], [1], [0, 0, 1, 1], [], []>} : vector<16x8xf32>, vector<8x32xf32>, vector<16x32xf32> -> vector<16x32xf32>
    %337 = arith.addf %313, %336 : vector<16x32xf32>
    %338 = vector.extract_strided_slice %290 {offsets = [0, 16], sizes = [16, 8], strides = [1, 1]} : vector<16x96xf32> to vector<16x8xf32>
    %339 = vector.shape_cast %338 : vector<16x8xf32> to vector<4x4x8xf32>
    %340 = vector.extract_strided_slice %290 {offsets = [0, 48], sizes = [16, 8], strides = [1, 1]} : vector<16x96xf32> to vector<16x8xf32>
    %341 = vector.shape_cast %340 : vector<16x8xf32> to vector<4x4x8xf32>
    %342 = vector.extract_strided_slice %290 {offsets = [0, 80], sizes = [16, 8], strides = [1, 1]} : vector<16x96xf32> to vector<16x8xf32>
    %343 = vector.shape_cast %342 : vector<16x8xf32> to vector<4x4x8xf32>
    "tpu.trace_start"() <{level = 10 : i32, message = "nle,nme->nlm"}> : () -> ()
    %cst_111 = arith.constant dense<0.000000e+00> : vector<4x4x4xf32>
    %344 = tpu.matmul %339, %341, %cst_111 {dimension_numbers = #tpu.dot_dimension_numbers<[2], [2], [1], [1], [0, 0, 0, 1, 1, 1], [0], [0]>} : vector<4x4x8xf32>, vector<4x4x8xf32>, vector<4x4x4xf32> -> vector<4x4x4xf32>
    "tpu.trace_stop"() : () -> ()
    %cst_112 = arith.constant 0.353553385 : f32
    %345 = vector.broadcast %cst_112 : f32 to vector<4x4x4xf32>
    %346 = arith.mulf %344, %345 : vector<4x4x4xf32>
    %cst_113 = arith.constant dense<0xFF800000> : vector<4x4xf32>
    %347 = vector.multi_reduction <maximumf>, %346, %cst_113 [2] : vector<4x4x4xf32> to vector<4x4xf32>
    %348 = vector.shape_cast %347 : vector<4x4xf32> to vector<4x4x1xf32>
    %349 = vector.broadcast %348 : vector<4x4x1xf32> to vector<4x4x4xf32>
    %350 = arith.subf %346, %349 : vector<4x4x4xf32>
    %351 = math.exp %350 : vector<4x4x4xf32>
    %cst_114 = arith.constant dense<0.000000e+00> : vector<4x4xf32>
    %352 = vector.multi_reduction <add>, %351, %cst_114 [2] : vector<4x4x4xf32> to vector<4x4xf32>
    %353 = vector.shape_cast %352 : vector<4x4xf32> to vector<4x4x1xf32>
    %354 = tpu.reciprocal %353 {approx = true} : vector<4x4x1xf32> -> vector<4x4x1xf32>
    %355 = vector.broadcast %354 : vector<4x4x1xf32> to vector<4x4x4xf32>
    %356 = arith.mulf %351, %355 : vector<4x4x4xf32>
    "tpu.trace_start"() <{level = 10 : i32, message = "nlm,nme->nle"}> : () -> ()
    %cst_115 = arith.constant dense<0.000000e+00> : vector<4x4x8xf32>
    %357 = tpu.matmul %356, %343, %cst_115 {dimension_numbers = #tpu.dot_dimension_numbers<[2], [1], [1], [2], [0, 0, 0, 1, 1, 2], [0], [0]>} : vector<4x4x4xf32>, vector<4x4x8xf32>, vector<4x4x8xf32> -> vector<4x4x8xf32>
    "tpu.trace_stop"() : () -> ()
    %358 = vector.shape_cast %357 : vector<4x4x8xf32> to vector<16x8xf32>
    %c16_116 = arith.constant 16 : index
    %c0_117 = arith.constant 0 : index
    %359 = vector.load %arg15[%c16_116, %c0_117] : memref<32x32xf32, #tpu.memory_space<vmem>>, vector<8x32xf32>
    %cst_118 = arith.constant dense<0.000000e+00> : vector<16x32xf32>
    %360 = tpu.matmul %358, %359, %cst_118 {dimension_numbers = #tpu.dot_dimension_numbers<[1], [0], [0], [1], [0, 0, 1, 1], [], []>} : vector<16x8xf32>, vector<8x32xf32>, vector<16x32xf32> -> vector<16x32xf32>
    %361 = arith.addf %337, %360 : vector<16x32xf32>
    %362 = vector.extract_strided_slice %290 {offsets = [0, 24], sizes = [16, 8], strides = [1, 1]} : vector<16x96xf32> to vector<16x8xf32>
    %363 = vector.shape_cast %362 : vector<16x8xf32> to vector<4x4x8xf32>
    %364 = vector.extract_strided_slice %290 {offsets = [0, 56], sizes = [16, 8], strides = [1, 1]} : vector<16x96xf32> to vector<16x8xf32>
    %365 = vector.shape_cast %364 : vector<16x8xf32> to vector<4x4x8xf32>
    %366 = vector.extract_strided_slice %290 {offsets = [0, 88], sizes = [16, 8], strides = [1, 1]} : vector<16x96xf32> to vector<16x8xf32>
    %367 = vector.shape_cast %366 : vector<16x8xf32> to vector<4x4x8xf32>
    "tpu.trace_start"() <{level = 10 : i32, message = "nle,nme->nlm"}> : () -> ()
    %cst_119 = arith.constant dense<0.000000e+00> : vector<4x4x4xf32>
    %368 = tpu.matmul %363, %365, %cst_119 {dimension_numbers = #tpu.dot_dimension_numbers<[2], [2], [1], [1], [0, 0, 0, 1, 1, 1], [0], [0]>} : vector<4x4x8xf32>, vector<4x4x8xf32>, vector<4x4x4xf32> -> vector<4x4x4xf32>
    "tpu.trace_stop"() : () -> ()
    %cst_120 = arith.constant 0.353553385 : f32
    %369 = vector.broadcast %cst_120 : f32 to vector<4x4x4xf32>
    %370 = arith.mulf %368, %369 : vector<4x4x4xf32>
    %cst_121 = arith.constant dense<0xFF800000> : vector<4x4xf32>
    %371 = vector.multi_reduction <maximumf>, %370, %cst_121 [2] : vector<4x4x4xf32> to vector<4x4xf32>
    %372 = vector.shape_cast %371 : vector<4x4xf32> to vector<4x4x1xf32>
    %373 = vector.broadcast %372 : vector<4x4x1xf32> to vector<4x4x4xf32>
    %374 = arith.subf %370, %373 : vector<4x4x4xf32>
    %375 = math.exp %374 : vector<4x4x4xf32>
    %cst_122 = arith.constant dense<0.000000e+00> : vector<4x4xf32>
    %376 = vector.multi_reduction <add>, %375, %cst_122 [2] : vector<4x4x4xf32> to vector<4x4xf32>
    %377 = vector.shape_cast %376 : vector<4x4xf32> to vector<4x4x1xf32>
    %378 = tpu.reciprocal %377 {approx = true} : vector<4x4x1xf32> -> vector<4x4x1xf32>
    %379 = vector.broadcast %378 : vector<4x4x1xf32> to vector<4x4x4xf32>
    %380 = arith.mulf %375, %379 : vector<4x4x4xf32>
    "tpu.trace_start"() <{level = 10 : i32, message = "nlm,nme->nle"}> : () -> ()
    %cst_123 = arith.constant dense<0.000000e+00> : vector<4x4x8xf32>
    %381 = tpu.matmul %380, %367, %cst_123 {dimension_numbers = #tpu.dot_dimension_numbers<[2], [1], [1], [2], [0, 0, 0, 1, 1, 2], [0], [0]>} : vector<4x4x4xf32>, vector<4x4x8xf32>, vector<4x4x8xf32> -> vector<4x4x8xf32>
    "tpu.trace_stop"() : () -> ()
    %382 = vector.shape_cast %381 : vector<4x4x8xf32> to vector<16x8xf32>
    %c24_124 = arith.constant 24 : index
    %c0_125 = arith.constant 0 : index
    %383 = vector.load %arg15[%c24_124, %c0_125] : memref<32x32xf32, #tpu.memory_space<vmem>>, vector<8x32xf32>
    %cst_126 = arith.constant dense<0.000000e+00> : vector<16x32xf32>
    %384 = tpu.matmul %382, %383, %cst_126 {dimension_numbers = #tpu.dot_dimension_numbers<[1], [0], [0], [1], [0, 0, 1, 1], [], []>} : vector<16x8xf32>, vector<8x32xf32>, vector<16x32xf32> -> vector<16x32xf32>
    %385 = arith.addf %361, %384 : vector<16x32xf32>
    %c0_127 = arith.constant 0 : index
    %c0_128 = arith.constant 0 : index
    %386 = vector.load %arg16[%c0_127, %c0_128] : memref<1x32xf32, #tpu.memory_space<vmem>>, vector<1x32xf32>
    %387 = vector.broadcast %386 : vector<1x32xf32> to vector<16x32xf32>
    %388 = arith.addf %385, %387 : vector<16x32xf32>
    %cst_129 = arith.constant dense<0.000000e+00> : vector<16xf32>
    %389 = vector.multi_reduction <add>, %388, %cst_129 [1] : vector<16x32xf32> to vector<16xf32>
    %390 = vector.shape_cast %389 : vector<16xf32> to vector<16x1xf32>
    %cst_130 = arith.constant 3.200000e+01 : f32
    %391 = vector.broadcast %cst_130 : f32 to vector<16x1xf32>
    %392 = arith.divf %390, %391 : vector<16x1xf32>
    %393 = vector.broadcast %392 : vector<16x1xf32> to vector<16x32xf32>
    %394 = arith.subf %388, %393 : vector<16x32xf32>
    %395 = arith.mulf %394, %394 : vector<16x32xf32>
    %cst_131 = arith.constant dense<0.000000e+00> : vector<16xf32>
    %396 = vector.multi_reduction <add>, %395, %cst_131 [1] : vector<16x32xf32> to vector<16xf32>
    %397 = vector.shape_cast %396 : vector<16xf32> to vector<16x1xf32>
    %cst_132 = arith.constant 3.200000e+01 : f32
    %398 = vector.broadcast %cst_132 : f32 to vector<16x1xf32>
    %399 = arith.divf %397, %398 : vector<16x1xf32>
    %cst_133 = arith.constant 9.99999974E-6 : f32
    %400 = vector.broadcast %cst_133 : f32 to vector<16x1xf32>
    %401 = arith.addf %399, %400 : vector<16x1xf32>
    %402 = math.rsqrt %401 : vector<16x1xf32>
    %403 = vector.broadcast %402 : vector<16x1xf32> to vector<16x32xf32>
    %404 = arith.mulf %394, %403 : vector<16x32xf32>
    %c0_134 = arith.constant 0 : index
    %c0_135 = arith.constant 0 : index
    %405 = vector.load %arg17[%c0_134, %c0_135] : memref<1x32xf32, #tpu.memory_space<vmem>>, vector<1x32xf32>
    %406 = vector.broadcast %405 : vector<1x32xf32> to vector<16x32xf32>
    %407 = arith.mulf %404, %406 : vector<16x32xf32>
    %c0_136 = arith.constant 0 : index
    %c0_137 = arith.constant 0 : index
    %408 = vector.load %arg18[%c0_136, %c0_137] : memref<1x32xf32, #tpu.memory_space<vmem>>, vector<1x32xf32>
    %409 = vector.broadcast %408 : vector<1x32xf32> to vector<16x32xf32>
    %410 = arith.addf %407, %409 : vector<16x32xf32>
    %c0_138 = arith.constant 0 : index
    %c0_139 = arith.constant 0 : index
    %411 = vector.load %arg2[%c0_138, %c0_139] : memref<4x4xf32, #tpu.memory_space<vmem>>, vector<4x4xf32>
    %412 = vector.extract_strided_slice %411 {offsets = [0, 0], sizes = [1, 1], strides = [1, 1]} : vector<4x4xf32> to vector<1x1xf32>
    %413 = vector.extract_strided_slice %410 {offsets = [0, 0], sizes = [4, 32], strides = [1, 1]} : vector<16x32xf32> to vector<4x32xf32>
    %414 = vector.broadcast %412 : vector<1x1xf32> to vector<4x32xf32>
    %415 = arith.mulf %414, %413 : vector<4x32xf32>
    %416 = vector.extract_strided_slice %411 {offsets = [0, 1], sizes = [1, 1], strides = [1, 1]} : vector<4x4xf32> to vector<1x1xf32>
    %417 = vector.extract_strided_slice %410 {offsets = [4, 0], sizes = [4, 32], strides = [1, 1]} : vector<16x32xf32> to vector<4x32xf32>
    %418 = vector.broadcast %416 : vector<1x1xf32> to vector<4x32xf32>
    %419 = arith.mulf %418, %417 : vector<4x32xf32>
    %420 = arith.addf %415, %419 : vector<4x32xf32>
    %421 = vector.extract_strided_slice %411 {offsets = [0, 2], sizes = [1, 1], strides = [1, 1]} : vector<4x4xf32> to vector<1x1xf32>
    %422 = vector.extract_strided_slice %410 {offsets = [8, 0], sizes = [4, 32], strides = [1, 1]} : vector<16x32xf32> to vector<4x32xf32>
    %423 = vector.broadcast %421 : vector<1x1xf32> to vector<4x32xf32>
    %424 = arith.mulf %423, %422 : vector<4x32xf32>
    %425 = arith.addf %420, %424 : vector<4x32xf32>
    %426 = vector.extract_strided_slice %411 {offsets = [0, 3], sizes = [1, 1], strides = [1, 1]} : vector<4x4xf32> to vector<1x1xf32>
    %427 = vector.extract_strided_slice %410 {offsets = [12, 0], sizes = [4, 32], strides = [1, 1]} : vector<16x32xf32> to vector<4x32xf32>
    %428 = vector.broadcast %426 : vector<1x1xf32> to vector<4x32xf32>
    %429 = arith.mulf %428, %427 : vector<4x32xf32>
    %430 = arith.addf %425, %429 : vector<4x32xf32>
    %431 = vector.extract_strided_slice %411 {offsets = [1, 0], sizes = [1, 1], strides = [1, 1]} : vector<4x4xf32> to vector<1x1xf32>
    %432 = vector.extract_strided_slice %410 {offsets = [0, 0], sizes = [4, 32], strides = [1, 1]} : vector<16x32xf32> to vector<4x32xf32>
    %433 = vector.broadcast %431 : vector<1x1xf32> to vector<4x32xf32>
    %434 = arith.mulf %433, %432 : vector<4x32xf32>
    %435 = vector.extract_strided_slice %411 {offsets = [1, 1], sizes = [1, 1], strides = [1, 1]} : vector<4x4xf32> to vector<1x1xf32>
    %436 = vector.extract_strided_slice %410 {offsets = [4, 0], sizes = [4, 32], strides = [1, 1]} : vector<16x32xf32> to vector<4x32xf32>
    %437 = vector.broadcast %435 : vector<1x1xf32> to vector<4x32xf32>
    %438 = arith.mulf %437, %436 : vector<4x32xf32>
    %439 = arith.addf %434, %438 : vector<4x32xf32>
    %440 = vector.extract_strided_slice %411 {offsets = [1, 2], sizes = [1, 1], strides = [1, 1]} : vector<4x4xf32> to vector<1x1xf32>
    %441 = vector.extract_strided_slice %410 {offsets = [8, 0], sizes = [4, 32], strides = [1, 1]} : vector<16x32xf32> to vector<4x32xf32>
    %442 = vector.broadcast %440 : vector<1x1xf32> to vector<4x32xf32>
    %443 = arith.mulf %442, %441 : vector<4x32xf32>
    %444 = arith.addf %439, %443 : vector<4x32xf32>
    %445 = vector.extract_strided_slice %411 {offsets = [1, 3], sizes = [1, 1], strides = [1, 1]} : vector<4x4xf32> to vector<1x1xf32>
    %446 = vector.extract_strided_slice %410 {offsets = [12, 0], sizes = [4, 32], strides = [1, 1]} : vector<16x32xf32> to vector<4x32xf32>
    %447 = vector.broadcast %445 : vector<1x1xf32> to vector<4x32xf32>
    %448 = arith.mulf %447, %446 : vector<4x32xf32>
    %449 = arith.addf %444, %448 : vector<4x32xf32>
    %450 = vector.extract_strided_slice %411 {offsets = [2, 0], sizes = [1, 1], strides = [1, 1]} : vector<4x4xf32> to vector<1x1xf32>
    %451 = vector.extract_strided_slice %410 {offsets = [0, 0], sizes = [4, 32], strides = [1, 1]} : vector<16x32xf32> to vector<4x32xf32>
    %452 = vector.broadcast %450 : vector<1x1xf32> to vector<4x32xf32>
    %453 = arith.mulf %452, %451 : vector<4x32xf32>
    %454 = vector.extract_strided_slice %411 {offsets = [2, 1], sizes = [1, 1], strides = [1, 1]} : vector<4x4xf32> to vector<1x1xf32>
    %455 = vector.extract_strided_slice %410 {offsets = [4, 0], sizes = [4, 32], strides = [1, 1]} : vector<16x32xf32> to vector<4x32xf32>
    %456 = vector.broadcast %454 : vector<1x1xf32> to vector<4x32xf32>
    %457 = arith.mulf %456, %455 : vector<4x32xf32>
    %458 = arith.addf %453, %457 : vector<4x32xf32>
    %459 = vector.extract_strided_slice %411 {offsets = [2, 2], sizes = [1, 1], strides = [1, 1]} : vector<4x4xf32> to vector<1x1xf32>
    %460 = vector.extract_strided_slice %410 {offsets = [8, 0], sizes = [4, 32], strides = [1, 1]} : vector<16x32xf32> to vector<4x32xf32>
    %461 = vector.broadcast %459 : vector<1x1xf32> to vector<4x32xf32>
    %462 = arith.mulf %461, %460 : vector<4x32xf32>
    %463 = arith.addf %458, %462 : vector<4x32xf32>
    %464 = vector.extract_strided_slice %411 {offsets = [2, 3], sizes = [1, 1], strides = [1, 1]} : vector<4x4xf32> to vector<1x1xf32>
    %465 = vector.extract_strided_slice %410 {offsets = [12, 0], sizes = [4, 32], strides = [1, 1]} : vector<16x32xf32> to vector<4x32xf32>
    %466 = vector.broadcast %464 : vector<1x1xf32> to vector<4x32xf32>
    %467 = arith.mulf %466, %465 : vector<4x32xf32>
    %468 = arith.addf %463, %467 : vector<4x32xf32>
    %469 = vector.extract_strided_slice %411 {offsets = [3, 0], sizes = [1, 1], strides = [1, 1]} : vector<4x4xf32> to vector<1x1xf32>
    %470 = vector.extract_strided_slice %410 {offsets = [0, 0], sizes = [4, 32], strides = [1, 1]} : vector<16x32xf32> to vector<4x32xf32>
    %471 = vector.broadcast %469 : vector<1x1xf32> to vector<4x32xf32>
    %472 = arith.mulf %471, %470 : vector<4x32xf32>
    %473 = vector.extract_strided_slice %411 {offsets = [3, 1], sizes = [1, 1], strides = [1, 1]} : vector<4x4xf32> to vector<1x1xf32>
    %474 = vector.extract_strided_slice %410 {offsets = [4, 0], sizes = [4, 32], strides = [1, 1]} : vector<16x32xf32> to vector<4x32xf32>
    %475 = vector.broadcast %473 : vector<1x1xf32> to vector<4x32xf32>
    %476 = arith.mulf %475, %474 : vector<4x32xf32>
    %477 = arith.addf %472, %476 : vector<4x32xf32>
    %478 = vector.extract_strided_slice %411 {offsets = [3, 2], sizes = [1, 1], strides = [1, 1]} : vector<4x4xf32> to vector<1x1xf32>
    %479 = vector.extract_strided_slice %410 {offsets = [8, 0], sizes = [4, 32], strides = [1, 1]} : vector<16x32xf32> to vector<4x32xf32>
    %480 = vector.broadcast %478 : vector<1x1xf32> to vector<4x32xf32>
    %481 = arith.mulf %480, %479 : vector<4x32xf32>
    %482 = arith.addf %477, %481 : vector<4x32xf32>
    %483 = vector.extract_strided_slice %411 {offsets = [3, 3], sizes = [1, 1], strides = [1, 1]} : vector<4x4xf32> to vector<1x1xf32>
    %484 = vector.extract_strided_slice %410 {offsets = [12, 0], sizes = [4, 32], strides = [1, 1]} : vector<16x32xf32> to vector<4x32xf32>
    %485 = vector.broadcast %483 : vector<1x1xf32> to vector<4x32xf32>
    %486 = arith.mulf %485, %484 : vector<4x32xf32>
    %487 = arith.addf %482, %486 : vector<4x32xf32>
    %488 = tpu.concatenate %430, %449, %468, %487 in 0 : vector<4x32xf32>, vector<4x32xf32>, vector<4x32xf32>, vector<4x32xf32> -> vector<16x32xf32>
    %c0_140 = arith.constant 0 : index
    %c0_141 = arith.constant 0 : index
    %489 = vector.load %arg19[%c0_140, %c0_141] : memref<32x32xf32, #tpu.memory_space<vmem>>, vector<32x32xf32>
    %cst_142 = arith.constant dense<0.000000e+00> : vector<16x32xf32>
    %490 = tpu.matmul %488, %489, %cst_142 {dimension_numbers = #tpu.dot_dimension_numbers<[1], [0], [0], [1], [0, 0, 1, 1], [], []>} : vector<16x32xf32>, vector<32x32xf32>, vector<16x32xf32> -> vector<16x32xf32>
    %c0_143 = arith.constant 0 : index
    %c0_144 = arith.constant 0 : index
    %491 = vector.load %arg20[%c0_143, %c0_144] : memref<1x32xf32, #tpu.memory_space<vmem>>, vector<1x32xf32>
    %492 = vector.broadcast %491 : vector<1x32xf32> to vector<16x32xf32>
    %493 = arith.addf %490, %492 : vector<16x32xf32>
    %cst_145 = arith.constant 0.000000e+00 : f32
    %494 = vector.broadcast %cst_145 : f32 to vector<16x32xf32>
    %495 = arith.maximumf %493, %494 : vector<16x32xf32>
    %cst_146 = arith.constant 5.000000e-01 : f32
    %496 = vector.broadcast %cst_146 : f32 to vector<16x32xf32>
    %497 = arith.mulf %496, %410 : vector<16x32xf32>
    %cst_147 = arith.constant 5.000000e-01 : f32
    %498 = vector.broadcast %cst_147 : f32 to vector<16x32xf32>
    %499 = arith.mulf %498, %495 : vector<16x32xf32>
    %500 = arith.addf %497, %499 : vector<16x32xf32>
    %501 = arith.addf %500, %31 : vector<16x32xf32>
    %502 = vector.shape_cast %501 : vector<16x32xf32> to vector<4x4x32xf32>
    %c0_148 = arith.constant 0 : index
    %c0_149 = arith.constant 0 : index
    %c0_150 = arith.constant 0 : index
    %c0_151 = arith.constant 0 : index
    %503 = vector.load %arg21[%c0_148, %c0_149, %c0_150, %c0_151] : memref<1x4x4x32xf32, #tpu.memory_space<vmem>>, vector<1x4x4x32xf32>
    %504 = vector.shape_cast %503 : vector<1x4x4x32xf32> to vector<4x4x32xf32>
    %505 = vector.shape_cast %502 : vector<4x4x32xf32> to vector<1x4x4x32xf32>
    tpu.vector_store %arg21[%c0_148, %c0_149, %c0_150, %c0_151], %505 {strides = array<i32>} : memref<1x4x4x32xf32, #tpu.memory_space<vmem>>, vector<1x4x4x32xf32>,
    return
  }
  func.func @transform_0(%arg0: i32) -> (i32, i32, i32, i32) {
    %c0_i32 = arith.constant 0 : i32
    %c0_i32_0 = arith.constant 0 : i32
    %c0_i32_1 = arith.constant 0 : i32
    %c0_i32_2 = arith.constant 0 : i32
    return %arg0, %c0_i32, %c0_i32_0, %c0_i32_1 : i32, i32, i32, i32
  }
  func.func @transform_1(%arg0: i32) -> (i32, i32) {
    %c0_i32 = arith.constant 0 : i32
    %c0_i32_0 = arith.constant 0 : i32
    %c0_i32_1 = arith.constant 0 : i32
    return %c0_i32, %c0_i32_0 : i32, i32
  }
  func.func @transform_2(%arg0: i32) -> (i32, i32) {
    %c0_i32 = arith.constant 0 : i32
    %c0_i32_0 = arith.constant 0 : i32
    %c0_i32_1 = arith.constant 0 : i32
    return %c0_i32, %c0_i32_0 : i32, i32
  }
  func.func @transform_3(%arg0: i32) -> (i32, i32) {
    %c0_i32 = arith.constant 0 : i32
    %c0_i32_0 = arith.constant 0 : i32
    %c0_i32_1 = arith.constant 0 : i32
    return %c0_i32, %c0_i32_0 : i32, i32
  }
  func.func @transform_4(%arg0: i32) -> (i32, i32) {
    %c0_i32 = arith.constant 0 : i32
    %c0_i32_0 = arith.constant 0 : i32
    %c0_i32_1 = arith.constant 0 : i32
    return %c0_i32, %c0_i32_0 : i32, i32
  }
  func.func @transform_5(%arg0: i32) -> (i32, i32) {
    %c0_i32 = arith.constant 0 : i32
    %c0_i32_0 = arith.constant 0 : i32
    %c0_i32_1 = arith.constant 0 : i32
    return %c0_i32, %c0_i32_0 : i32, i32
  }
  func.func @transform_6(%arg0: i32) -> (i32, i32) {
    %c0_i32 = arith.constant 0 : i32
    %c0_i32_0 = arith.constant 0 : i32
    %c0_i32_1 = arith.constant 0 : i32
    return %c0_i32, %c0_i32_0 : i32, i32
  }
  func.func @transform_7(%arg0: i32) -> (i32, i32) {
    %c0_i32 = arith.constant 0 : i32
    %c0_i32_0 = arith.constant 0 : i32
    %c0_i32_1 = arith.constant 0 : i32
    return %c0_i32, %c0_i32_0 : i32, i32
  }
  func.func @transform_8(%arg0: i32) -> (i32, i32, i32) {
    %c0_i32 = arith.constant 0 : i32
    %c0_i32_0 = arith.constant 0 : i32
    %c0_i32_1 = arith.constant 0 : i32
    %c0_i32_2 = arith.constant 0 : i32
    return %c0_i32, %c0_i32_0, %c0_i32_1 : i32, i32, i32
  }
  func.func @transform_9(%arg0: i32) -> (i32, i32) {
    %c0_i32 = arith.constant 0 : i32
    %c0_i32_0 = arith.constant 0 : i32
    %c0_i32_1 = arith.constant 0 : i32
    return %c0_i32, %c0_i32_0 : i32, i32
  }
  func.func @transform_10(%arg0: i32) -> (i32, i32) {
    %c0_i32 = arith.constant 0 : i32
    %c0_i32_0 = arith.constant 0 : i32
    %c0_i32_1 = arith.constant 0 : i32
    return %c0_i32, %c0_i32_0 : i32, i32
  }
  func.func @transform_11(%arg0: i32) -> (i32, i32) {
    %c0_i32 = arith.constant 0 : i32
    %c0_i32_0 = arith.constant 0 : i32
    %c0_i32_1 = arith.constant 0 : i32
    return %c0_i32, %c0_i32_0 : i32, i32
  }
  func.func @transform_12(%arg0: i32) -> (i32, i32) {
    %c0_i32 = arith.constant 0 : i32
    %c0_i32_0 = arith.constant 0 : i32
    %c0_i32_1 = arith.constant 0 : i32
    return %c0_i32, %c0_i32_0 : i32, i32
  }
  func.func @transform_13(%arg0: i32) -> (i32, i32) {
    %c0_i32 = arith.constant 0 : i32
    %c0_i32_0 = arith.constant 0 : i32
    %c0_i32_1 = arith.constant 0 : i32
    return %c0_i32, %c0_i32_0 : i32, i32
  }
  func.func @transform_14(%arg0: i32) -> (i32, i32) {
    %c0_i32 = arith.constant 0 : i32
    %c0_i32_0 = arith.constant 0 : i32
    %c0_i32_1 = arith.constant 0 : i32
    return %c0_i32, %c0_i32_0 : i32, i32
  }
  func.func @transform_15(%arg0: i32) -> (i32, i32) {
    %c0_i32 = arith.constant 0 : i32
    %c0_i32_0 = arith.constant 0 : i32
    %c0_i32_1 = arith.constant 0 : i32
    return %c0_i32, %c0_i32_0 : i32, i32
  }
  func.func @transform_16(%arg0: i32) -> (i32, i32) {
    %c0_i32 = arith.constant 0 : i32
    %c0_i32_0 = arith.constant 0 : i32
    %c0_i32_1 = arith.constant 0 : i32
    return %c0_i32, %c0_i32_0 : i32, i32
  }
  func.func @transform_17(%arg0: i32) -> (i32, i32) {
    %c0_i32 = arith.constant 0 : i32
    %c0_i32_0 = arith.constant 0 : i32
    %c0_i32_1 = arith.constant 0 : i32
    return %c0_i32, %c0_i32_0 : i32, i32
  }
  func.func @transform_18(%arg0: i32) -> (i32, i32) {
    %c0_i32 = arith.constant 0 : i32
    %c0_i32_0 = arith.constant 0 : i32
    %c0_i32_1 = arith.constant 0 : i32
    return %c0_i32, %c0_i32_0 : i32, i32
  }
  func.func @transform_19(%arg0: i32) -> (i32, i32) {
    %c0_i32 = arith.constant 0 : i32
    %c0_i32_0 = arith.constant 0 : i32
    %c0_i32_1 = arith.constant 0 : i32
    return %c0_i32, %c0_i32_0 : i32, i32
  }
  func.func @transform_20(%arg0: i32) -> (i32, i32, i32, i32) {
    %c0_i32 = arith.constant 0 : i32
    %c0_i32_0 = arith.constant 0 : i32
    %c0_i32_1 = arith.constant 0 : i32
    %c0_i32_2 = arith.constant 0 : i32
    return %arg0, %c0_i32, %c0_i32_0, %c0_i32_1 : i32, i32, i32, i32
  }
}

</mosaic_0001>

<bundles_post_ra>
// kernel: encoder_forward.2
= control target key start
LH: loop header
LB: loop body
LE: loop exit
PB: predicated region body
PF: predicated region fallthrough
CT: control target
= control target key end

     0   :  { %s11241_s0 = inlined_call_operand.hbm [shape: f32[2,4,8,32], index: 0, kind: input, shape index: {}]   ;;  %s11242_s1 = inlined_call_operand.vmem [shape: f32[4,4], index: 1, kind: input, shape index: {}]   ;;  %s11243_s2 = inlined_call_operand.vmem [shape: f32[4,8], index: 2, kind: input, shape index: {}]   ;;  %s11244_s3 = inlined_call_operand.vmem [shape: f32[4,1], index: 3, kind: input, shape index: {}]   ;;  %s11245_s4 = inlined_call_operand.hbm [shape: f32[32,96], index: 4, kind: input, shape index: {}]   ;;  %s11246_s5 = inlined_call_operand.vmem [shape: f32[1,96], index: 5, kind: input, shape index: {}]   ;;  %s11247_s6 = inlined_call_operand.hbm [shape: f32[32,32], index: 6, kind: input, shape index: {}]   ;;  %s11248_s7 = inlined_call_operand.vmem [shape: f32[1,32], index: 7, kind: input, shape index: {}]   ;;  %s11249_s8 = inlined_call_operand.hbm [shape: f32[3,32,32], index: 8, kind: input, shape index: {}]   ;;  %s11250_s9 = inlined_call_operand.hbm [shape: f32[1,32], index: 9, kind: input, shape index: {}]   ;;  %s11251_s10 = inlined_call_operand.vmem [shape: f32[1,32], index: 10, kind: input, shape index: {}]   ;;  %s11252_s11 = inlined_call_operand.vmem [shape: f32[1,32], index: 11, kind: input, shape index: {}]   ;;  %s11253_s12 = inlined_call_operand.vmem [shape: f32[32,96], index: 12, kind: input, shape index: {}]   ;;  %s11254_s13 = inlined_call_operand.hbm [shape: f32[1,96], index: 13, kind: input, shape index: {}]   ;;  %s11255_s14 = inlined_call_operand.hbm [shape: f32[32,32], index: 14, kind: input, shape index: {}]   ;;  %s11256_s15 = inlined_call_operand.hbm [shape: f32[1,32], index: 15, kind: input, shape index: {}]   ;;  %s11257_s16 = inlined_call_operand.vmem [shape: f32[1,32], index: 16, kind: input, shape index: {}]   ;;  %s11258_s17 = inlined_call_operand.vmem [shape: f32[1,32], index: 17, kind: input, shape index: {}]   ;;  %s11259_s18 = inlined_call_operand.hbm [shape: f32[32,32], index: 18, kind: input, shape index: {}]   ;;  %s11260_s19 = inlined_call_operand.vmem [shape: f32[1,32], index: 19, kind: input, shape index: {}]   ;;  %s11261_s20 = inlined_call_operand.vmem [shape: f32[2,4,4,32], index: 20, kind: output, shape index: {}]  }
   0x1   :  { %11276 = sst [smem:[#allocation21_spill]] %s11241_s0 }
   0x2   :  { %11277 = sst [smem:[#allocation22_spill]] %s11242_s1 }
   0x3   :  { %11278 = sst [smem:[#allocation23_spill]] %s11243_s2 }
   0x4   :  { %11279 = sst [smem:[#allocation24_spill]] %s11244_s3 }
   0x5   :  { %11280 = sst [smem:[#allocation25_spill]] %s11245_s4 }
   0x6   :  { %11281 = sst [smem:[#allocation26_spill]] %s11246_s5 }
   0x7   :  { %11282 = sst [smem:[#allocation27_spill]] %s11247_s6 }
   0x8   :  { %11283 = sst [smem:[#allocation28_spill]] %s11248_s7 }
   0x9   :  { %11284 = sst [smem:[#allocation29_spill]] %s11249_s8 }
   0xa   :  { %11285 = sst [smem:[#allocation30_spill]] %s11250_s9 }
   0xb   :  { %11286 = sst [smem:[#allocation31_spill]] %s11251_s10 }
   0xc   :  { %11287 = sst [smem:[#allocation32_spill]] %s11252_s11 }
   0xd   :  { %11288 = sst [smem:[#allocation33_spill]] %s11253_s12 }
   0xe   :  { %11289 = sst [smem:[#allocation34_spill]] %s11257_s16 }
   0xf   :  { %11290 = sst [smem:[#allocation35_spill]] %s11258_s17 }
  0x10   :  { %11291 = sst [smem:[#allocation36_spill]] %s11260_s19 }
  0x11   :  { %11292 = sst [smem:[#allocation37_spill]] %s11261_s20 }
  0x12   :  { %25 = vsyncpa [#allocation3], 0 }
  0x13   :  { %27 = vsyncpa [#allocation3 + $0x1], 0 }
  0x14   :  { %28 = vsyncpa [#allocation5], 0 }
  0x15   :  { %29 = vsyncpa [#allocation8], 0 }
  0x16   :  { %30 = vsyncpa [#allocation11], 0 }
  0x17   :  { %31 = vsyncpa [#allocation14], 0  ;;  %s10057_s1 = smov 0   ;;  %s10059_s22 = smov 0  }
  0x18   :  { %s10061_s23 = smov 0   ;;  %s10063_s24 = smov 0  }
  0x19 LB: > { %s9924_s2 = smov [#allocation4]   ;;  %s10078_s3 = sadd.s32 4294967295, %s9922_s24   ;;  %s9922_s24 = sphi %s10063_s24, %s11332_s24   ;;  %s9918_s23 = sphi %s10061_s23, %s11331_s23   ;;  %s9914_s22 = sphi %s10059_s22, %s11330_s22   ;;  %s9910_s1 = sphi %s10057_s1, %s11329_s1  }
  0x1a   : > { %s514_s25 = sshll.u32 %s9924_s2, 4  ;;  %p8347_p0 = scmp.ge.s32.totalorder %s9922_s24, 1  ;;  %s10083_s25 = int_to_ptr.vmem [resolvable:$true] %s514_s25 }
  0x1b   : > { %p11267_p1 = scmp.eq.s32.totalorder %s10078_s3, 0  ;;  %p493_p2 = scmp.lt.s32.totalorder %s9922_s24, 3 }
  0x1c   : > { %s9925_s27 = smov [#allocation7]   ;;  %s9926_s29 = smov [#allocation10]  }
  0x1d   : > { %p10085_p3 = pnand %p8347_p0, %p493_p2  ;;  %s546_s28 = sshll.u32 %s9925_s27, 4  ;;  %s10097_s28 = int_to_ptr.vmem [resolvable:$true] %s546_s28 }
  0x1e   : > { %s580_s30 = sshll.u32 %s9926_s29, 4  ;;  %s11295_s2 = sld [smem:[#allocation25_spill]]  ;;  %s10099_s30 = int_to_ptr.vmem [resolvable:$true] %s580_s30 }
  0x1f   : > { %s11293_s26 = scalar_select %p10085_p3, 1, 0 }
  0x20   : > { %p9372_p4 = pneg %p10085_p3 }
  0x22   : > { %p10093_p5 = pnand %p9372_p4, %p11267_p1 }
  0x24   : > { %s9618_s20 = scalar_lea.hbm %s11295_s2, 512  ;;  %p10109_p7 = pneg %p10093_p5 }
  0x25   : > { %p9619_p6 = scmp.ne.s32.totalorder %s11295_s2, %s9618_s20  ;;  %p9625_p10 = scmp.lt.u32.totalorder %s9618_s20, %s11295_s2 }
  0x27   : > { %p9621_p8 = pnand %p10109_p7, %p9619_p6 }
  0x29   : > { %p9622_p9 = pneg %p9621_p8 }
  0x2b   : > { %p9627_p11 = pnand %p9625_p10, %p9622_p9 }
  0x2d   : > { %9630 = shalt.err (!%p9627_p11)
}
  0x2e   : > { %s9631_s17 = scalar_lea.vmem %s10083_s25, 512  ;;  %p9639_p2 = scmp.lt.s32.totalorder %s10083_s25, %s10083_s25 }
  0x2f   : > { %p9632_p12 = scmp.ne.s32.totalorder %s10083_s25, %s9631_s17  ;;  %p9640_p4 = scmp.lt.s32.totalorder %s9631_s17, %s9631_s17 }
  0x31   : > { %p9634_p13 = pnand %p9632_p12, %p10109_p7  ;;  %p9641_p6 = por %p9640_p4, %p9639_p2 }
  0x33   : > { %p9635_p0 = pneg %p9634_p13 }
  0x35   : > { %p9642_p8 = pnand %p9641_p6, %p9635_p0 }
  0x37   : > { %9645 = shalt.err (!%p9642_p8)
}
  0x38   : > { %s11265_s19 = smov 128   ;;  %s9928_s16 = smov 8  }
  0x39   : > { %9375 = dma.hbm_to_vmem [thread:$0]  (!%p10093_p5), %s11295_s2, 512, %s10083_s25, [#allocation5], %s11265_s19, %s11265_s19, %s9928_s16  }
  0x3a   : > { %s11297_s8 = sld [smem:[#allocation29_spill]] }
  0x40   : > { %s9646_s17 = scalar_lea.hbm %s11297_s8, 1536 }
  0x41   : > { %p9647_p9 = scmp.ne.s32.totalorder %s11297_s8, %s9646_s17  ;;  %p9653_p12 = scmp.lt.u32.totalorder %s9646_s17, %s11297_s8 }
  0x43   : > { %p9649_p10 = pnand %p9647_p9, %p10109_p7 }
  0x45   : > { %p9650_p11 = pneg %p9649_p10 }
  0x47   : > { %p9655_p13 = pnand %p9653_p12, %p9650_p11 }
  0x49   : > { %9658 = shalt.err (!%p9655_p13)
}
  0x4a   : > { %s9659_s25 = scalar_lea.vmem %s10097_s28, 1536  ;;  %p9667_p6 = scmp.lt.s32.totalorder %s10097_s28, %s10097_s28 }
  0x4b   : > { %p9660_p0 = scmp.ne.s32.totalorder %s10097_s28, %s9659_s25  ;;  %p9668_p8 = scmp.lt.s32.totalorder %s9659_s25, %s9659_s25 }
  0x4d   : > { %p9662_p2 = pnand %p9660_p0, %p10109_p7  ;;  %p9669_p9 = por %p9668_p8, %p9667_p6 }
  0x4f   : > { %p9663_p4 = pneg %p9662_p2 }
  0x51   : > { %p9670_p10 = pnand %p9669_p9, %p9663_p4 }
  0x53   : > { %9673 = shalt.err (!%p9670_p10)
}
  0x54   : > { %9381 = dma.hbm_to_vmem [thread:$0]  (!%p10093_p5), %s11297_s8, 1536, %s10097_s28, [#allocation8], %s11265_s19, %s11265_s19, %s9928_s16  }
  0x55   : > { %s9674_s20 = scalar_lea.hbm %s11254_s13, 16 }
  0x56   : > { %p9675_p11 = scmp.ne.s32.totalorder %s11254_s13, %s9674_s20  ;;  %p9681_p0 = scmp.lt.u32.totalorder %s9674_s20, %s11254_s13 }
  0x58   : > { %p9677_p12 = pnand %p9675_p11, %p10109_p7 }
  0x5a   : > { %p9678_p13 = pneg %p9677_p12 }
  0x5c   : > { %p9683_p2 = pnand %p9681_p0, %p9678_p13 }
  0x5e   : > { %9686 = shalt.err (!%p9683_p2)
}
  0x5f   : > { %s9687_s28 = scalar_lea.vmem %s10099_s30, 16  ;;  %s9694_s25 = scalar_lea.vmem %s10099_s30, 32 }
  0x60   : > { %p9688_p4 = scmp.ne.s32.totalorder %s10099_s30, %s9687_s28  ;;  %p9695_p9 = scmp.lt.s32.totalorder %s10099_s30, %s10099_s30 }
  0x61   : > { %p9696_p10 = scmp.lt.s32.totalorder %s9694_s25, %s9687_s28 }
  0x62   : > { %p9690_p6 = pnand %p9688_p4, %p10109_p7 }
  0x63   : > { %p9697_p11 = por %p9696_p10, %p9695_p9 }
  0x64   : > { %p9691_p8 = pneg %p9690_p6 }
  0x66   : > { %p9698_p12 = pnand %p9697_p11, %p9691_p8 }
  0x68   : > { %9701 = shalt.err (!%p9698_p12)
}
  0x69   : > { %9387 = dma.hbm_to_vmem [thread:$0]  (!%p10093_p5), %s11254_s13, 16, %s10099_s30, [#allocation11]  }
  0x6a   : > { %s9929_s11 = smov [#allocation13]   ;;  %s9930_s20 = smov [#allocation6]  }
  0x6b   : > { %s604_s12 = sshll.u32 %s9929_s11, 4  ;;  %s530_s0 = sshll.u32 %s9930_s20, 4  ;;  %s605_s12 = int_to_ptr.vmem [resolvable:$true] %s604_s12  ;;  %s531_s0 = int_to_ptr.vmem [resolvable:$true] %s530_s0 }
  0x6c   : > { %s9702_s17 = scalar_lea.hbm %s11256_s15, 16 }
  0x6d   : > { %p9703_p13 = scmp.ne.s32.totalorder %s11256_s15, %s9702_s17  ;;  %p9709_p4 = scmp.lt.u32.totalorder %s9702_s17, %s11256_s15 }
  0x6f   : > { %p9705_p0 = pnand %p9703_p13, %p10109_p7 }
  0x71   : > { %p9706_p2 = pneg %p9705_p0 }
  0x73   : > { %p9711_p6 = pnand %p9709_p4, %p9706_p2 }
  0x75   : > { %9714 = shalt.err (!%p9711_p6)
}
  0x76   : > { %s9715_s30 = scalar_lea.vmem %s605_s12, 16  ;;  %s9722_s10 = scalar_lea.vmem %s605_s12, 32 }
  0x77   : > { %p9716_p8 = scmp.ne.s32.totalorder %s605_s12, %s9715_s30  ;;  %p9723_p11 = scmp.lt.s32.totalorder %s605_s12, %s605_s12 }
  0x78   : > { %p9724_p12 = scmp.lt.s32.totalorder %s9722_s10, %s9715_s30 }
  0x79   : > { %p9718_p9 = pnand %p9716_p8, %p10109_p7 }
  0x7a   : > { %p9725_p1 = por %p9724_p12, %p9723_p11 }
  0x7b   : > { %p9719_p10 = pneg %p9718_p9 }
  0x7d   : > { %p9726_p3 = pnand %p9725_p1, %p9719_p10 }
  0x7f   : > { %9729 = shalt.err (!%p9726_p3)
}
  0x80   : > { %9393 = dma.hbm_to_vmem [thread:$0]  (!%p10093_p5), %s11256_s15, 16, %s605_s12, [#allocation14]  }
  0x81   : > { %s11298_s6 = sld [smem:[#allocation27_spill]] }
  0x87   : > { %s9730_s29 = scalar_lea.hbm %s11298_s6, 512 }
  0x88   : > { %p9731_p13 = scmp.ne.s32.totalorder %s11298_s6, %s9730_s29  ;;  %p9737_p3 = scmp.lt.u32.totalorder %s9730_s29, %s11298_s6 }
  0x8a   : > { %p9733_p0 = pnand %p9731_p13, %p10109_p7 }
  0x8c   : > { %p9734_p1 = pneg %p9733_p0 }
  0x8e   : > { %p9739_p2 = pnand %p9737_p3, %p9734_p1 }
  0x90   : > { %9742 = shalt.err (!%p9739_p2)
}
  0x91   : > { %s9743_s30 = scalar_lea.vmem %s531_s0, 512  ;;  %p9751_p9 = scmp.lt.s32.totalorder %s531_s0, %s531_s0 }
  0x92   : > { %p9744_p4 = scmp.ne.s32.totalorder %s531_s0, %s9743_s30  ;;  %p9752_p10 = scmp.lt.s32.totalorder %s9743_s30, %s9743_s30 }
  0x94   : > { %p9746_p6 = pnand %p9744_p4, %p10109_p7  ;;  %p9753_p11 = por %p9752_p10, %p9751_p9 }
  0x96   : > { %p9747_p8 = pneg %p9746_p6 }
  0x98   : > { %p9754_p12 = pnand %p9753_p11, %p9747_p8 }
  0x9a   : > { %9757 = shalt.err (!%p9754_p12)
}
  0x9b   : > { %s11299_s12 = smov 128   ;;  %s9931_s20 = smov [#allocation9]  }
  0x9c   : > { %9378 = dma.hbm_to_vmem [thread:$0]  (!%p10093_p5), %s11298_s6, 512, %s531_s0, [#allocation5], %s11299_s12, %s11299_s12, %s9928_s16  }
  0x9d   : > { %s560_s19 = sshll.u32 %s9931_s20, 4  ;;  %s9932_s21 = smov [#allocation12]   ;;  %s561_s19 = int_to_ptr.vmem [resolvable:$true] %s560_s19 }
  0x9e   : > { %s590_s29 = sshll.u32 %s9932_s21, 4  ;;  %s11300_s9 = sld [smem:[#allocation30_spill]]  ;;  %s591_s29 = int_to_ptr.vmem [resolvable:$true] %s590_s29 }
  0xa4   : > { %s9758_s25 = scalar_lea.hbm %s11300_s9, 16 }
  0xa5   : > { %p9759_p13 = scmp.ne.s32.totalorder %s11300_s9, %s9758_s25  ;;  %p9765_p3 = scmp.lt.u32.totalorder %s9758_s25, %s11300_s9 }
  0xa7   : > { %p9761_p0 = pnand %p9759_p13, %p10109_p7 }
  0xa9   : > { %p9762_p1 = pneg %p9761_p0 }
  0xab   : > { %p9767_p2 = pnand %p9765_p3, %p9762_p1 }
  0xad   : > { %9770 = shalt.err (!%p9767_p2)
}
  0xae   : > { %s9771_s0 = scalar_lea.vmem %s561_s19, 16  ;;  %s9778_s11 = scalar_lea.vmem %s561_s19, 32 }
  0xaf   : > { %p9772_p4 = scmp.ne.s32.totalorder %s561_s19, %s9771_s0  ;;  %p9779_p9 = scmp.lt.s32.totalorder %s561_s19, %s561_s19 }
  0xb0   : > { %p9780_p10 = scmp.lt.s32.totalorder %s9778_s11, %s9771_s0 }
  0xb1   : > { %p9774_p6 = pnand %p9772_p4, %p10109_p7 }
  0xb2   : > { %p9781_p11 = por %p9780_p10, %p9779_p9 }
  0xb3   : > { %p9775_p8 = pneg %p9774_p6 }
  0xb5   : > { %p9782_p12 = pnand %p9781_p11, %p9775_p8 }
  0xb7   : > { %9785 = shalt.err (!%p9782_p12)
}
  0xb8   : > { %9384 = dma.hbm_to_vmem [thread:$0]  (!%p10093_p5), %s11300_s9, 16, %s561_s19, [#allocation8]  }
  0xb9   : > { %s9786_s28 = scalar_lea.hbm %s11255_s14, 512 }
  0xba   : > { %p9787_p13 = scmp.ne.s32.totalorder %s11255_s14, %s9786_s28  ;;  %p9793_p3 = scmp.lt.u32.totalorder %s9786_s28, %s11255_s14 }
  0xbc   : > { %p9789_p0 = pnand %p9787_p13, %p10109_p7 }
  0xbe   : > { %p9790_p1 = pneg %p9789_p0 }
  0xc0   : > { %p9795_p2 = pnand %p9793_p3, %p9790_p1 }
  0xc2   : > { %9798 = shalt.err (!%p9795_p2)
}
  0xc3   : > { %s9799_s0 = scalar_lea.vmem %s591_s29, 512  ;;  %p9807_p9 = scmp.lt.s32.totalorder %s591_s29, %s591_s29 }
  0xc4   : > { %p9800_p4 = scmp.ne.s32.totalorder %s591_s29, %s9799_s0  ;;  %p9808_p10 = scmp.lt.s32.totalorder %s9799_s0, %s9799_s0 }
  0xc6   : > { %p9802_p6 = pnand %p9800_p4, %p10109_p7  ;;  %p9809_p11 = por %p9808_p10, %p9807_p9 }
  0xc8   : > { %p9803_p8 = pneg %p9802_p6 }
  0xca   : > { %p9810_p12 = pnand %p9809_p11, %p9803_p8 }
  0xcc   : > { %9813 = shalt.err (!%p9810_p12)
}
  0xcd   : > { %9390 = dma.hbm_to_vmem [thread:$0]  (!%p10093_p5), %s11255_s14, 512, %s591_s29, [#allocation11], %s11299_s12, %s11299_s12, %s9928_s16  }
  0xce   : > { %s9933_s20 = smov [#allocation15]   ;;  %s9814_s28 = scalar_lea.hbm %s11259_s18, 512 }
  0xcf   : > { %s620_s21 = sshll.u32 %s9933_s20, 4  ;;  %p9815_p13 = scmp.ne.s32.totalorder %s11259_s18, %s9814_s28  ;;  %s621_s21 = int_to_ptr.vmem [resolvable:$true] %s620_s21 }
  0xd0   : > { %p9821_p3 = scmp.lt.u32.totalorder %s9814_s28, %s11259_s18 }
  0xd1   : > { %p9817_p0 = pnand %p9815_p13, %p10109_p7 }
  0xd3   : > { %p9818_p1 = pneg %p9817_p0 }
  0xd5   : > { %p9823_p2 = pnand %p9821_p3, %p9818_p1 }
  0xd7   : > { %9826 = shalt.err (!%p9823_p2)
}
  0xd8   : > { %s9827_s29 = scalar_lea.vmem %s621_s21, 512  ;;  %p9835_p9 = scmp.lt.s32.totalorder %s621_s21, %s621_s21 }
  0xd9   : > { %p9828_p4 = scmp.ne.s32.totalorder %s621_s21, %s9827_s29  ;;  %p9836_p10 = scmp.lt.s32.totalorder %s9827_s29, %s9827_s29 }
  0xdb   : > { %p9830_p6 = pnand %p9828_p4, %p10109_p7  ;;  %p9837_p11 = por %p9836_p10, %p9835_p9 }
  0xdd   : > { %p9831_p8 = pneg %p9830_p6 }
  0xdf   : > { %p9838_p12 = pnand %p9837_p11, %p9831_p8 }
  0xe1   : > { %9841 = shalt.err (!%p9838_p12)
}
  0xe2   : > { %9396 = dma.hbm_to_vmem [thread:$0]  (!%p10093_p5), %s11259_s18, 512, %s621_s21, [#allocation14], %s11299_s12, %s11299_s12, %s9928_s16  }
  0xe3   : > { %s10283_s4 = sadd.s32 1, %s9922_s24   ;;  %s44_s27 = sadd.s32 1, %s9918_s23 }
  0xe4   : > { %s41_s11 = ssub.s32 %s9922_s24, %s10283_s4  ;;  %p51_p7 = scmp.ne.s32.totalorder %s9918_s23, %s9914_s22 }
  0xe5   : > { %p42_p13 = scmp.eq.s32.totalorder %s41_s11, 0  ;;  %p52_p0 = scmp.eq.s32.totalorder %s9922_s24, 0 }
  0xe6   : > { %p57_p1 = scmp.ne.s32.totalorder %s9914_s22, %s9910_s1  ;;  %p9409_p3 = scmp.lt.s32.totalorder %s9922_s24, 2 }
  0xe7   : > { %s10295_s20 = scalar_select %p42_p13, %s9918_s23, %s44_s27  }
  0xe8   : > { %p53_p2 = por %p52_p0, %p51_p7  ;;  %p11301_p4 = scmp.eq.s32.totalorder %s10078_s3, 0 }
  0xe9   : > { %s637_s17 = sand.u32 1, %s9918_s23   ;;  %s8548_s21 = sshll.u32 %s9922_s24, 9 }
  0xea   : > { %p10299_p6 = por %p11301_p4, %p57_p1  ;;  %s8357_s28 = sshll.u32 %s637_s17, 5 }
  0xeb   : > { %s11303_s30 = sld [smem:[#allocation21_spill]]  ;;  %s641_s1 = scalar_lea.vmem [#allocation2], %s8357_s28 }
  0xec   : > { %s648_s29 = sshll.u32 %s641_s1, 4  ;;  %p10310_p5 = pnand %p9409_p3, %p53_p2  ;;  %s10314_s29 = int_to_ptr.vmem [resolvable:$true] %s648_s29 }
  0xed   : > { %s10316_s24 = scalar_lea.sflag [#allocation3], %s637_s17 }
  0xee   : > { %p9844_p9 = pneg %p10310_p5 }
  0xf1   : > { %s10308_s10 = scalar_lea.hbm %s11303_s30, %s8548_s21  ;;  %s9847_s21 = scalar_lea.hbm %s11303_s30, 1024 }
  0xf2   : > { %s9842_s19 = scalar_lea.hbm %s10308_s10, 512  ;;  %p9848_p12 = scmp.lt.u32.totalorder %s10308_s10, %s11303_s30 }
  0xf3   : > { %p9843_p8 = scmp.ne.s32.totalorder %s10308_s10, %s9842_s19  ;;  %p9849_p7 = scmp.lt.u32.totalorder %s9847_s21, %s9842_s19 }
  0xf4   : > { %p9851_p0 = scmp.lt.u32.totalorder %s9842_s19, %s10308_s10 }
  0xf5   : > { %p9845_p10 = pnand %p9844_p9, %p9843_p8  ;;  %p9850_p13 = por %p9849_p7, %p9848_p12 }
  0xf7   : > { %p9846_p11 = pneg %p9845_p10  ;;  %p9852_p1 = por %p9851_p0, %p9850_p13 }
  0xf9   : > { %p9853_p3 = pnand %p9852_p1, %p9846_p11 }
  0xfb   : > { %9856 = shalt.err (!%p9853_p3)
}
  0xfc   : > { %s9857_s17 = scalar_lea.vmem %s10314_s29, 512  ;;  %s9934_s7 = smov [#allocation2]  }
  0xfd   : > { %p9858_p2 = scmp.ne.s32.totalorder %s10314_s29, %s9857_s17  ;;  %s9862_s1 = sshll.u32 %s9934_s7, 4  ;;  %s9863_s1 = int_to_ptr.vmem [resolvable:$false] %s9862_s1 }
  0xfe   : > { %s9864_s27 = scalar_lea.vmem %s9863_s1, 1024  ;;  %p9865_p10 = scmp.lt.s32.totalorder %s10314_s29, %s9863_s1 }
  0xff   : > { %p9860_p4 = pnand %p9858_p2, %p9844_p9  ;;  %p9866_p12 = scmp.lt.s32.totalorder %s9864_s27, %s9857_s17 }
 0x101   : > { %p9861_p8 = pneg %p9860_p4  ;;  %p9867_p7 = por %p9866_p12, %p9865_p10 }
 0x103   : > { %p9868_p13 = pnand %p9867_p7, %p9861_p8 }
 0x105   : > { %9871 = shalt.err (!%p9868_p13)
}
 0x106   : > { %9400 = dma.hbm_to_vmem [thread:$0]  (!%p10310_p5), %s10308_s10, 512, %s10314_s29, %s10316_s24, %s11299_s12, %s11299_s12, %s9928_s16  }
 0x107   : > { %p11305_p9 = scmp.ne.s32.totalorder %s11293_s26, 0 }
 0x108   : > { %s662_s19 = sand.u32 (!%p11305_p9), 1, %s9914_s22  }
 0x109   : > { %660 = sbr.rel (%p11305_p9) target bundleno = 7651 (0x1de3), region = 100  ;;  %s8361_s11 = sshll.u32 (!%p11305_p9), %s662_s19, 5 }
 0x10a   : > { %s663_s21 = scalar_lea.sflag (!%p11305_p9), [#allocation3], %s662_s19  ;;  %s10350_s28 = scalar_lea.vmem (!%p11305_p9), [#allocation2], %s8361_s11 }
 0x110   : > { %9889 = dma.done.wait (%p10299_p6), %s663_s21, 512  }
 0x111   : > { %9891 = vsyncadd (%p10299_p6), %s663_s21, 4294966784  ;;  %p11306_p11 = scmp.eq.s32.totalorder %s10078_s3, 0 }
 0x113   : > { %9893 = dma.done.wait (%p11306_p11), [#allocation5], 1024   ;;  %p11307_p5 = pmov %p11306_p11 }
 0x115   : > { %9895 = vsyncadd (%p11307_p5), [#allocation5], 4294966272  ;;  %p11308_p0 = pmov %p11307_p5 }
 0x117   : > { %9897 = dma.done.wait (%p11308_p0), [#allocation8], 1552   ;;  %p11309_p1 = pmov %p11308_p0 }
 0x118   : > { %p11310_p3 = pmov %p11308_p0 }
 0x119   : > { %9899 = vsyncadd (%p11309_p1), [#allocation8], 4294965744 }
 0x11a   : > { %9901 = dma.done.wait (%p11310_p3), [#allocation11], 528   ;;  %p11311_p2 = pmov %p11308_p0 }
 0x11b   : > { %p11312_p6 = pmov %p11308_p0 }
 0x11c   : > { %9903 = vsyncadd (%p11311_p2), [#allocation11], 4294966768 }
 0x11d   : > { %9905 = dma.done.wait (%p11312_p6), [#allocation14], 528   ;;  %p11313_p4 = pmov %p11308_p0 }
 0x11e   : > { %v9935_v0 = vmov 0.0   ;;  %vm9936_vm0 = vmmov 0   ;;  %vm771_vm1 = vcmask 64512   ;;  %v760_v1 = vld [vmem:[%s10350_s28] sm:$0xff]  ;;  %s11314_s12 = sld [smem:[#allocation23_spill]]  ;;  %v762_v3 = vld [vmem:[%s10350_s28 + $0x10] sm:$0xff] }
 0x11f   : > { %9907 = vsyncadd (%p11313_p4), [#allocation14], 4294966768  ;;  %8762 = vmatprep.subr.mxu0 %v9935_v0  ;;  %8764 = vmatprep.mubr.msk.f32.mxu0 %vm9936_vm0, %v9935_v0  ;;  %v1064_v4 = vld [vmem:[#allocation4] sm:$0xff]  ;;  %v1065_v5 = vld [vmem:[#allocation4 + $0x8] sm:$0xff]  ;;  %vm1075_vm2 = vcmask 261120   ;;  %s11315_s5 = sld [smem:[#allocation26_spill]] }
 0x120   : > { %8767 = vmatprep.subr.mxu1 %v9935_v0  ;;  %8769 = vmatprep.mubr.msk.f32.mxu1 %vm9936_vm0, %v9935_v0  ;;  %v1066_v6 = vld [vmem:[#allocation4 + $0x10] sm:$0xff]  ;;  %v9232_v7 = vpack.c.bf16 %v1065_v5, %v1064_v4  ;;  %v1067_v8 = vld [vmem:[#allocation4 + $0x18] sm:$0xff]  ;;  %v761_v9 = vld [vmem:[%s10350_s28 + $0x8] sm:$0xff]  ;;  %s9937_s29 = smov 96   ;;  %s9938_s0 = smov 64   ;;  %vm4240_vm3 = vcmask 1040384  }
 0x121   : > { %8763 = vmatpush3.msra.mxu0 %v760_v1  ;;  %v9236_v10 = vpack.c.bf16 %v1067_v8, %v1066_v6  ;;  %8768 = vmatpush3.msra.mxu1 %v761_v9  ;;  %v763_v11 = vld [vmem:[%s10350_s28 + $0x18] sm:$0xff]  ;;  %s9939_s24 = smov 88   ;;  %s9940_s25 = smov 120   ;;  %vm4253_vm4 = vcmask 1046528  }
 0x122   : > { %8772 = vmatprep.subr.mxu0 %v9935_v0  ;;  %8777 = vmatprep.subr.mxu1 %v9935_v0  ;;  %s9941_s17 = smov 56   ;;  %s9942_s7 = smov 80  }
 0x123   : > { %s9943_s1 = smov 112   ;;  %s9944_s27 = smov 48  }
 0x124   : > { %v764_v2 = vld [vmem:[%s11314_s12] sm:$0xf]  ;;  %s11272_s19 = smov 104   ;;  %s11274_s11 = smov 72  }
 0x125   : > { %8765 = vmatmul.mubr.msk.f32.vlgmr.msra.gmra.mrb[0].mxu0 %vm771_vm1, %v764_v2  ;;  %8770 = vmatmul.mubr.msk.f32.vlgmr.msra.gmra.mrb[0].mxu1 %vm771_vm1, %v764_v2  ;;  %v8376_v16 = vld [vmem:[%s11315_s5] ss:$0 sm:$0xff]  ;;  %s11270_s21 = smov 40   ;;  %s11316_s16 = sld [smem:[#allocation28_spill]] }
 0x126   : > { %8773 = vmatpush3.msra.mxu0 %v762_v3  ;;  %8774 = vmatprep.mubr.msk.f32.mxu0 %vm9936_vm0, %v9935_v0  ;;  %s11317_s10 = sld [smem:[#allocation33_spill]]  ;;  %s11318_s28 = sld [smem:[#allocation31_spill]] }
 0x127   : > { %9233 = vmatprep.subr.bf16.mxu0 %v9232_v7  ;;  %8778 = vmatpush3.msra.mxu1 %v763_v11  ;;  %s11324_s2 = sld [smem:[#allocation24_spill]]  ;;  %s11325_s12 = sld [smem:[#allocation34_spill]] }
 0x128   : > { %8779 = vmatprep.mubr.msk.f32.mxu1 %vm9936_vm0, %v9935_v0  ;;  %8796 = vmatprep.subr.mxu1 %v9935_v0  ;;  %s11326_s8 = sld [smem:[#allocation35_spill]]  ;;  %p755_p8 = scmp.lt.s32.totalorder %s10078_s3, 1 }
 0x129   : > { %8775 = vmatmul.mubr.msk.f32.vlgmr.msra.gmra.mrb[2].mxu0 %vm771_vm1, %v764_v2  ;;  %8780 = vmatmul.mubr.msk.f32.vlgmr.msra.gmra.mrb[2].mxu1 %vm771_vm1, %v764_v2 }
 0x12a   : > { %9235 = vmatpush3.bf16.msra.mxu0 %v9232_v7  ;;  %8790 = vmatprep.mubr.msk.f32.mxu0 %vm1075_vm2, %v760_v1  ;;  %s11334_s3 = smov (!%p755_p8, %s10078_s3), 1 }
 0x12b   : > { %9237 = vmatprep.subr.bf16.mxu0 %v9236_v10  ;;  %8798 = vmatprep.mubr.msk.f32.mxu1 %vm9936_vm0, %v9935_v0 }
 0x12e   : > { %9239 = vmatpush3.bf16.msra.mxu0 %v9236_v10 }
 0x12f   : > { %8811 = vmatprep.subr.mxu0 %v9935_v0 }
 0x131   : > { %8791 = vmatmul.mubr.msk.f32.vlgmr.msra.gmra.mrb[4].mxu0 %vm1075_vm2, %v761_v9 }
 0x132   : > { %8793 = vmatprep.mubr.msk.f32.mxu0 %vm1075_vm2, %v762_v3 }
 0x135   : > { %8794 = vmatmul.mubr.msk.f32.gmra.mrb[6].mxu0 %vm1075_vm2, %v763_v11 }
 0x136   : > { %8813 = vmatprep.mubr.msk.f32.mxu0 %vm9936_vm0, %v9935_v0 }
 0x1f8   : > { %v10405_v12 = vpop.f32.mrb[0].mxu0  ;;  %v10414_v20 = vpop.f32.mrb[0].mxu1 }
 0x1f9   : > { %v8766_v13 = vpop.f32.mrb[1].mxu0  ;;  %v8771_v21 = vpop.f32.mrb[1].mxu1 }
 0x1fc   : > { %v10407_v14 = vpop.f32.mrb[2].mxu0  ;;  %v10418_v23 = vpop.f32.mrb[2].mxu1 }
 0x1fd   : > { %v8776_v15 = vpop.f32.mrb[3].mxu0  ;;  %v8781_v26 = vpop.f32.mrb[3].mxu1 }
 0x204   : > { %v8792_v17 = vpop.f32.mrb[4].mxu0 }
 0x205   : > { %v1154_v18 = vpop.f32.mrb[5].mxu0  ;;  %v10422_v27 = vadd.f32 %v8792_v17, %v8376_v16 }
 0x206   : > { %v10412_v19 = vadd.f32 %v8376_v16, %v1154_v18 }
 0x208   : > { %v8795_v22 = vpop.f32.mrb[6].mxu0  ;;  %1174 = vrot.lane.b32.xlu0 %v10412_v19, %s9937_s29 }
 0x209   : > { %v10420_v24 = vadd.f32 %v8795_v22, %v8376_v16  ;;  %v1164_v25 = vpop.f32.mrb[7].mxu0 }
 0x20a   : > { %v10428_v28 = vadd.f32 %v8376_v16, %v1164_v25 }
 0x20b   : > { %1405 = vrot.lane.b32.xlu1 %v10420_v24, %s9937_s29 }
 0x20c   : > { %1251 = vrot.lane.b32.xlu0 %v10422_v27, %s9937_s29 }
 0x20f   : > { %1328 = vrot.lane.b32.xlu1 %v10428_v28, %s9937_s29 }
 0x27a   : > { %v1175_v29 = vpop.permute.xlu0 %1174 }
 0x27b   : > { %8797 = vmatpush3.xpose.msk.msra.mxu1 %vm771_vm1, %v1175_v29 }
 0x27c   : > { %8801 = vmatprep.subr.mxu1 %v9935_v0 }
 0x27d   : > { %v1406_v30 = vpop.permute.xlu1 %1405 }
 0x27e   : > { %8799 = vmatmul.mubr.msk.f32.vlgmr.msra.gmra.mrb[4].mxu1 %vm771_vm1, %v10412_v19  ;;  %8812 = vmatpush3.xpose.msk.msra.mxu0 %vm771_vm1, %v1406_v30  ;;  %v1252_v31 = vpop.permute.xlu0 %1251 }
 0x27f   : > { %8802 = vmatpush3.xpose.msk.msra.mxu1 %vm771_vm1, %v1252_v31  ;;  %8803 = vmatprep.mubr.msk.f32.mxu1 %vm9936_vm0, %v9935_v0 }
 0x280   : > { %8806 = vmatprep.subr.mxu1 %v9935_v0  ;;  %8821 = vmatprep.subr.mxu0 %v9935_v0 }
 0x281   : > { %8814 = vmatmul.mubr.msk.f32.vlgmr.msra.gmra.mrb[8].mxu0 %vm771_vm1, %v10420_v24  ;;  %v1329_v32 = vpop.permute.xlu1 %1328 }
 0x282   : > { %8804 = vmatmul.mubr.msk.f32.vlgmr.msra.gmra.mrb[6].mxu1 %vm771_vm1, %v10422_v27  ;;  %8823 = vmatprep.mubr.msk.f32.mxu0 %vm9936_vm0, %v9935_v0 }
 0x283   : > { %8807 = vmatpush3.xpose.msk.msra.mxu1 %vm771_vm1, %v1329_v32  ;;  %8808 = vmatprep.mubr.msk.f32.mxu1 %vm9936_vm0, %v9935_v0 }
 0x284   : > { %8816 = vmatprep.subr.mxu1 %v9935_v0 }
 0x286   : > { %8809 = vmatmul.mubr.msk.f32.vlgmr.msra.gmra.mrb[8].mxu1 %vm771_vm1, %v10428_v28 }
 0x287   : > { %8818 = vmatprep.mubr.msk.f32.mxu1 %vm9936_vm0, %v9935_v0 }
 0x351   : > { %v1246_v33 = vpop.f32.mrb[4].mxu1 }
 0x352   : > { %v8800_v34 = vpop.f32.mrb[5].mxu1  ;;  %v1481_v63 = vmul.f32 0.35355338, %v1246_v33 }
 0x354   : > { %v1477_v35 = vpop.f32.mrb[8].mxu0  ;;  %v1485_v1 = vsel %vm771_vm1, %v1481_v63, -inf }
 0x355   : > { %v1484_v36 = vmul.f32 0.35355338, %v1477_v35  ;;  %v1323_v37 = vpop.f32.mrb[6].mxu1  ;;  %v8815_v38 = vpop.f32.mrb[9].mxu0 }
 0x356   : > { %v1482_v39 = vmul.f32 0.35355338, %v1323_v37  ;;  %v8805_v40 = vpop.f32.mrb[7].mxu1 }
 0x357   : > { %v1494_v41 = vsel %vm771_vm1, %v1484_v36, -inf }
 0x358   : > { %1495 = vmax.xlane.f32.xlu1 %v1494_v41  ;;  %v1488_v42 = vsel %vm771_vm1, %v1482_v39, -inf }
 0x359   : > { %1489 = vmax.xlane.f32.xlu0 %v1488_v42  ;;  %v1400_v43 = vpop.f32.mrb[8].mxu1 }
 0x35a   : > { %v8810_v44 = vpop.f32.mrb[9].mxu1  ;;  %v10466_v45 = vmul.f32 0.35355338, %v1400_v43 }
 0x35c   : > { %v1491_v46 = vsel %vm771_vm1, %v10466_v45, -inf }
 0x369   : > { %1605 = vrot.lane.b32.xlu1 %v10422_v27, %s9938_s0 }
 0x36d   : > { %1914 = vrot.lane.b32.xlu1 %v10422_v27, %s9939_s24 }
 0x371   : > { %1912 = vrot.lane.b32.xlu1 %v10422_v27, %s9940_s25 }
 0x375   : > { %2068 = vrot.lane.b32.xlu1 %v10420_v24, %s9940_s25 }
 0x399   : > { %1492 = vmax.xlane.f32.xlu1 %v1491_v46 }
 0x3aa   : > { %1529 = vrot.lane.b32.xlu1 %v10412_v19, %s9938_s0 }
 0x3ae   : > { %1836 = vrot.lane.b32.xlu1 %v10412_v19, %s9939_s24 }
 0x3b2   : > { %1834 = vrot.lane.b32.xlu1 %v10412_v19, %s9940_s25 }
 0x3b6   : > { %1990 = vrot.lane.b32.xlu1 %v10428_v28, %s9940_s25 }
 0x3e5   : > { %v1496_v47 = vpop.xlane.xlu1 %1495 }
 0x3e6   : > { %v1500_v48 = vsub.f32 %v1484_v36, %v1496_v47  ;;  %v1490_v49 = vpop.xlane.xlu0 %1489 }
 0x3e7   : > { %v1498_v50 = vsub.f32 %v1482_v39, %v1490_v49 }
 0x3e8   : > { %v1507_v51 = vmul.f32 1.442695, %v1500_v48 }
 0x3e9   : > { %v1503_v52 = vmul.f32 1.442695, %v1498_v50  ;;  %v1606_v53 = vpop.permute.xlu1 %1605 }
 0x3ea   : > { %9478 = vpow2.f32 %v1507_v51  ;;  %8822 = vmatpush3.msra.mxu0 %v1606_v53 }
 0x3eb   : > { %8831 = vmatprep.subr.mxu0 %v9935_v0  ;;  %9480 = vpow2.f32 %v1503_v52 }
 0x3ed   : > { %v1915_v58 = vpop.permute.xlu1 %1914 }
 0x3f1   : > { %v1913_v59 = vpop.permute.xlu1 %1912 }
 0x3f4   : > { %v9479_v54 = vpop.eup %9478 }
 0x3f5   : > { %v1518_v55 = vsel %vm771_vm1, %v9479_v54, 0.0  ;;  %v9481_v56 = vpop.eup %9480  ;;  %v2069_v60 = vpop.permute.xlu1 %2068 }
 0x3f6   : > { %1519 = vadd.xlane.f32.xlu0 %v1518_v55  ;;  %v1512_v57 = vsel %vm771_vm1, %v9481_v56, 0.0 }
 0x3fa   : > { %1513 = vadd.xlane.f32.xlu0 %v1512_v57 }
 0x410   : > { %1757 = vrot.lane.b32.xlu0 %v10420_v24, %s9938_s0 }
 0x414   : > { %2070 = vrot.lane.b32.xlu0 %v10420_v24, %s9939_s24 }
 0x426   : > { %v1493_v61 = vpop.xlane.xlu1 %1492 }
 0x427   : > { %v1499_v10 = vsub.f32 %v10466_v45, %v1493_v61 }
 0x429   : > { %v1505_v15 = vmul.f32 1.442695, %v1499_v10 }
 0x42a   : > { %v1530_v62 = vpop.permute.xlu1 %1529 }
 0x42b   : > { %8817 = vmatpush3.msra.mxu1 %v1530_v62 }
 0x42c   : > { %8826 = vmatprep.subr.mxu1 %v9935_v0 }
 0x42e   : > { %v1837_v37 = vpop.permute.xlu1 %1836 }
 0x432   : > { %v1835_v40 = vpop.permute.xlu1 %1834 }
 0x433   : > { %1486 = vmax.xlane.f32.xlu0 %v1485_v1 }
 0x436   : > { %v1991_v48 = vpop.permute.xlu1 %1990 }
 0x483   : > { %v1520_v2 = vpop.xlane.xlu0 %1519 }
 0x487   : > { %v1514_v3 = vpop.xlane.xlu0 %1513 }
 0x488   : > { %9482 = vrcp.f32 %v1514_v3 }
 0x489   : > { %9484 = vrcp.f32 %v1520_v2 }
 0x48b   : > { %v1758_v7 = vpop.permute.xlu0 %1757 }
 0x48f   : > { %v2071_v9 = vpop.permute.xlu0 %2070 }
 0x492   : > { %v9483_v4 = vpop.eup %9482 }
 0x493   : > { %v1526_v5 = vmul.f32 %v9483_v4, %v9481_v56  ;;  %v9485_v6 = vpop.eup %9484 }
 0x494   : > { %v1528_v8 = vmul.f32 %v9485_v6, %v9479_v54 }
 0x495   : > { %8824 = vmatmul.mubr.msk.f32.vlgmr.msra.gmra.mrb[10].mxu0 %vm771_vm1, %v1526_v5 }
 0x496   : > { %8832 = vmatpush3.msra.mxu0 %v1758_v7  ;;  %8833 = vmatprep.mubr.msk.f32.mxu0 %vm9936_vm0, %v9935_v0 }
 0x497   : > { %8841 = vmatprep.subr.mxu0 %v9935_v0 }
 0x499   : > { %8834 = vmatmul.mubr.msk.f32.vlgmr.msra.gmra.mrb[12].mxu0 %vm771_vm1, %v1528_v8 }
 0x49a   : > { %8843 = vmatprep.mubr.msk.f32.mxu0 %vm9936_vm0, %v9935_v0 }
 0x49d   : > { %8842 = vmatpush3.xpose.msk.msra.mxu0 %vm771_vm1, %v1915_v58 }
 0x49e   : > { %8851 = vmatprep.subr.mxu0 %v9935_v0 }
 0x4a0   : > { %8844 = vmatmul.mubr.msk.f32.vlgmr.msra.gmra.mrb[14].mxu0 %vm771_vm1, %v1913_v59 }
 0x4a1   : > { %8852 = vmatpush3.xpose.msk.msra.mxu0 %vm771_vm1, %v2071_v9  ;;  %8853 = vmatprep.mubr.msk.f32.mxu0 %vm9936_vm0, %v9935_v0 }
 0x4a2   : > { %8861 = vmatprep.subr.mxu0 %v9935_v0 }
 0x4a4   : > { %8854 = vmatmul.mubr.msk.f32.vlgmr.msra.gmra.mrb[16].mxu0 %vm771_vm1, %v2069_v60 }
 0x4a5   : > { %8863 = vmatprep.mubr.msk.f32.mxu0 %vm9936_vm0, %v9935_v0 }
 0x4c0   : > { %v1487_v11 = vpop.xlane.xlu0 %1486 }
 0x4c1   : > { %v1497_v13 = vsub.f32 %v1481_v63, %v1487_v11 }
 0x4c3   : > { %v1501_v16 = vmul.f32 1.442695, %v1497_v13 }
 0x4c5   : > { %9486 = vpow2.f32 %v1501_v16 }
 0x4c6   : > { %9488 = vpow2.f32 %v1505_v15 }
 0x4cf   : > { %v9487_v17 = vpop.eup %9486 }
 0x4d0   : > { %v1509_v18 = vsel %vm771_vm1, %v9487_v17, 0.0  ;;  %v9489_v21 = vpop.eup %9488 }
 0x4d1   : > { %1510 = vadd.xlane.f32.xlu0 %v1509_v18  ;;  %v1515_v22 = vsel %vm771_vm1, %v9489_v21, 0.0 }
 0x4d5   : > { %1516 = vadd.xlane.f32.xlu0 %v1515_v22 }
 0x4eb   : > { %1681 = vrot.lane.b32.xlu0 %v10428_v28, %s9938_s0 }
 0x4ef   : > { %1992 = vrot.lane.b32.xlu0 %v10428_v28, %s9939_s24 }
 0x55e   : > { %v1511_v25 = vpop.xlane.xlu0 %1510 }
 0x55f   : > { %9490 = vrcp.f32 %v1511_v25 }
 0x562   : > { %v1517_v26 = vpop.xlane.xlu0 %1516 }
 0x563   : > { %9492 = vrcp.f32 %v1517_v26 }
 0x566   : > { %v1682_v33 = vpop.permute.xlu0 %1681 }
 0x568   : > { %v10511_v29 = vpop.f32.mrb[10].mxu0 }
 0x569   : > { %v9491_v30 = vpop.eup %9490  ;;  %v8825_v31 = vpop.f32.mrb[11].mxu0 }
 0x56a   : > { %v1525_v32 = vmul.f32 %v9491_v30, %v9487_v17  ;;  %v1993_v44 = vpop.permute.xlu0 %1992 }
 0x56c   : > { %8819 = vmatmul.mubr.msk.f32.vlgmr.msra.gmra.mrb[10].mxu1 %vm771_vm1, %v1525_v32  ;;  %v10514_v34 = vpop.f32.mrb[12].mxu0 }
 0x56d   : > { %v9493_v35 = vpop.eup %9492  ;;  %8827 = vmatpush3.msra.mxu1 %v1682_v33  ;;  %v8835_v36 = vpop.f32.mrb[13].mxu0  ;;  %8828 = vmatprep.mubr.msk.f32.mxu1 %vm9936_vm0, %v9935_v0 }
 0x56e   : > { %v1527_v38 = vmul.f32 %v9493_v35, %v9489_v21  ;;  %8836 = vmatprep.subr.mxu1 %v9935_v0 }
 0x570   : > { %8829 = vmatmul.mubr.msk.f32.vlgmr.msra.gmra.mrb[12].mxu1 %vm771_vm1, %v1527_v38 }
 0x571   : > { %8838 = vmatprep.mubr.msk.f32.mxu1 %vm9936_vm0, %v9935_v0 }
 0x573   : > { %v1986_v39 = vpop.f32.mrb[14].mxu0 }
 0x574   : > { %v2147_v41 = vmul.f32 0.35355338, %v1986_v39  ;;  %8837 = vmatpush3.xpose.msk.msra.mxu1 %vm771_vm1, %v1837_v37  ;;  %v8845_v42 = vpop.f32.mrb[15].mxu0 }
 0x575   : > { %8846 = vmatprep.subr.mxu1 %v9935_v0 }
 0x576   : > { %v2153_v43 = vsel %vm771_vm1, %v2147_v41, -inf }
 0x577   : > { %v2142_v45 = vpop.f32.mrb[16].mxu0  ;;  %2154 = vmax.xlane.f32.xlu0 %v2153_v43  ;;  %8839 = vmatmul.mubr.msk.f32.vlgmr.msra.gmra.mrb[14].mxu1 %vm771_vm1, %v1835_v40 }
 0x578   : > { %v2149_v46 = vmul.f32 0.35355338, %v2142_v45  ;;  %8847 = vmatpush3.xpose.msk.msra.mxu1 %vm771_vm1, %v1993_v44  ;;  %v8855_v47 = vpop.f32.mrb[17].mxu0  ;;  %8848 = vmatprep.mubr.msk.f32.mxu1 %vm9936_vm0, %v9935_v0 }
 0x579   : > { %8856 = vmatprep.subr.mxu1 %v9935_v0 }
 0x57a   : > { %v2159_v49 = vsel %vm771_vm1, %v2149_v46, -inf }
 0x57b   : > { %2160 = vmax.xlane.f32.xlu1 %v2159_v49  ;;  %8849 = vmatmul.mubr.msk.f32.vlgmr.msra.gmra.mrb[16].mxu1 %vm771_vm1, %v1991_v48 }
 0x57c   : > { %8858 = vmatprep.mubr.msk.f32.mxu1 %vm9936_vm0, %v9935_v0 }
 0x58c   : > { %2270 = vrot.lane.b32.xlu1 %v10422_v27, %s9941_s17 }
 0x590   : > { %2695 = vrot.lane.b32.xlu1 %v10412_v19, %s9942_s7 }
 0x594   : > { %2693 = vrot.lane.b32.xlu1 %v10412_v19, %s9943_s1 }
 0x598   : > { %2771 = vrot.lane.b32.xlu1 %v10422_v27, %s9943_s1 }
 0x59c   : > { %2849 = vrot.lane.b32.xlu1 %v10428_v28, %s9943_s1 }
 0x5a0   : > { %2927 = vrot.lane.b32.xlu1 %v10420_v24, %s9943_s1 }
 0x604   : > { %v2155_v50 = vpop.xlane.xlu0 %2154 }
 0x605   : > { %v2163_v51 = vsub.f32 %v2147_v41, %v2155_v50 }
 0x607   : > { %v2168_v52 = vmul.f32 1.442695, %v2163_v51 }
 0x608   : > { %v2161_v53 = vpop.xlane.xlu1 %2160 }
 0x609   : > { %9494 = vpow2.f32 %v2168_v52  ;;  %v2165_v54 = vsub.f32 %v2149_v46, %v2161_v53 }
 0x60b   : > { %v2172_v55 = vmul.f32 1.442695, %v2165_v54 }
 0x60c   : > { %v2271_v56 = vpop.permute.xlu1 %2270 }
 0x60d   : > { %9496 = vpow2.f32 %v2172_v55  ;;  %8862 = vmatpush3.msra.mxu0 %v2271_v56 }
 0x60e   : > { %8871 = vmatprep.subr.mxu0 %v9935_v0 }
 0x610   : > { %v2696_v15 = vpop.permute.xlu1 %2695 }
 0x613   : > { %v9495_v57 = vpop.eup %9494 }
 0x614   : > { %v2177_v58 = vsel %vm771_vm1, %v9495_v57, 0.0  ;;  %v2694_v22 = vpop.permute.xlu1 %2693 }
 0x615   : > { %2178 = vadd.xlane.f32.xlu0 %v2177_v58 }
 0x617   : > { %v9497_v59 = vpop.eup %9496 }
 0x618   : > { %v2183_v60 = vsel %vm771_vm1, %v9497_v59, 0.0  ;;  %v2772_v26 = vpop.permute.xlu1 %2771 }
 0x619   : > { %2184 = vadd.xlane.f32.xlu0 %v2183_v60 }
 0x61c   : > { %v2850_v31 = vpop.permute.xlu1 %2849 }
 0x620   : > { %v2928_v33 = vpop.permute.xlu1 %2927 }
 0x62f   : > { %2422 = vrot.lane.b32.xlu0 %v10420_v24, %s9941_s17 }
 0x633   : > { %2773 = vrot.lane.b32.xlu0 %v10422_v27, %s9942_s7 }
 0x637   : > { %2851 = vrot.lane.b32.xlu0 %v10428_v28, %s9942_s7 }
 0x63b   : > { %2929 = vrot.lane.b32.xlu0 %v10420_v24, %s9942_s7 }
 0x63f   : > { %v10557_v61 = vpop.f32.mrb[10].mxu1 }
 0x640   : > { %v8820_v62 = vpop.f32.mrb[11].mxu1 }
 0x643   : > { %v10559_v63 = vpop.f32.mrb[12].mxu1 }
 0x644   : > { %v8830_v1 = vpop.f32.mrb[13].mxu1 }
 0x64a   : > { %v1908_v2 = vpop.f32.mrb[14].mxu1 }
 0x64b   : > { %v8840_v3 = vpop.f32.mrb[15].mxu1  ;;  %v2146_v8 = vmul.f32 0.35355338, %v1908_v2 }
 0x64d   : > { %v2150_v9 = vsel %vm771_vm1, %v2146_v8, -inf }
 0x64e   : > { %v2064_v4 = vpop.f32.mrb[16].mxu1 }
 0x64f   : > { %v2148_v5 = vmul.f32 0.35355338, %v2064_v4  ;;  %v8850_v6 = vpop.f32.mrb[17].mxu1 }
 0x651   : > { %v2156_v7 = vsel %vm771_vm1, %v2148_v5, -inf }
 0x652   : > { %2157 = vmax.xlane.f32.xlu1 %v2156_v7 }
 0x65a   : > { %2151 = vmax.xlane.f32.xlu0 %v2150_v9 }
 0x663   : > { %2194 = vrot.lane.b32.xlu1 %v10412_v19, %s9941_s17 }
 0x6a2   : > { %v2179_v10 = vpop.xlane.xlu0 %2178 }
 0x6a3   : > { %9498 = vrcp.f32 %v2179_v10 }
 0x6a6   : > { %v2185_v11 = vpop.xlane.xlu0 %2184 }
 0x6a7   : > { %9500 = vrcp.f32 %v2185_v11 }
 0x6aa   : > { %v2423_v17 = vpop.permute.xlu0 %2422 }
 0x6ad   : > { %v9499_v13 = vpop.eup %9498 }
 0x6ae   : > { %v2191_v16 = vmul.f32 %v9499_v13, %v9495_v57  ;;  %v2774_v25 = vpop.permute.xlu0 %2773  ;;  %v2498_v13 = vld [vmem:[#allocation6 + $0x8] sm:$0xff] }
 0x6b0   : > { %8864 = vmatmul.mubr.msk.f32.vlgmr.msra.gmra.mrb[18].mxu0 %vm771_vm1, %v2191_v16 }
 0x6b1   : > { %v9501_v18 = vpop.eup %9500  ;;  %8872 = vmatpush3.msra.mxu0 %v2423_v17  ;;  %8873 = vmatprep.mubr.msk.f32.mxu0 %vm9936_vm0, %v9935_v0 }
 0x6b2   : > { %v2193_v21 = vmul.f32 %v9501_v18, %v9497_v59  ;;  %8892 = vmatprep.subr.mxu0 %v9935_v0  ;;  %v2852_v30 = vpop.permute.xlu0 %2851 }
 0x6b4   : > { %8874 = vmatmul.mubr.msk.f32.vlgmr.msra.gmra.mrb[20].mxu0 %vm771_vm1, %v2193_v21 }
 0x6b5   : > { %8894 = vmatprep.mubr.msk.f32.mxu0 %vm9936_vm0, %v9935_v0 }
 0x6b6   : > { %v2930_v32 = vpop.permute.xlu0 %2929 }
 0x6b8   : > { %8893 = vmatpush3.xpose.msk.msra.mxu0 %vm771_vm1, %v2696_v15  ;;  %v1833_v15 = vld [vmem:[#allocation6] sm:$0xff] }
 0x6b9   : > { %8897 = vmatprep.subr.mxu0 %v9935_v0 }
 0x6bb   : > { %8895 = vmatmul.mubr.msk.f32.vlgmr.msra.gmra.mrb[22].mxu0 %vm771_vm1, %v2694_v22 }
 0x6bc   : > { %8898 = vmatpush3.xpose.msk.msra.mxu0 %vm771_vm1, %v2774_v25  ;;  %8899 = vmatprep.mubr.msk.f32.mxu0 %vm9936_vm0, %v9935_v0 }
 0x6bd   : > { %8902 = vmatprep.subr.mxu0 %v9935_v0 }
 0x6bf   : > { %8900 = vmatmul.mubr.msk.f32.vlgmr.msra.gmra.mrb[24].mxu0 %vm771_vm1, %v2772_v26 }
 0x6c0   : > { %8903 = vmatpush3.xpose.msk.msra.mxu0 %vm771_vm1, %v2852_v30  ;;  %8904 = vmatprep.mubr.msk.f32.mxu0 %vm9936_vm0, %v9935_v0 }
 0x6c1   : > { %8907 = vmatprep.subr.mxu0 %v9935_v0 }
 0x6c3   : > { %8905 = vmatmul.mubr.msk.f32.vlgmr.msra.gmra.mrb[26].mxu0 %vm771_vm1, %v2850_v31 }
 0x6c4   : > { %8908 = vmatpush3.xpose.msk.msra.mxu0 %vm771_vm1, %v2930_v32  ;;  %8909 = vmatprep.mubr.msk.f32.mxu0 %vm9936_vm0, %v9935_v0 }
 0x6c5   : > { %8917 = vmatprep.subr.mxu0 %v9935_v0 }
 0x6c7   : > { %8910 = vmatmul.mubr.msk.f32.vlgmr.msra.gmra.mrb[28].mxu0 %vm771_vm1, %v2928_v33 }
 0x6c8   : > { %8919 = vmatprep.mubr.msk.f32.mxu0 %vm9936_vm0, %v9935_v0 }
 0x6df   : > { %v2158_v35 = vpop.xlane.xlu1 %2157 }
 0x6e0   : > { %v2164_v37 = vsub.f32 %v2148_v5, %v2158_v35 }
 0x6e2   : > { %v2170_v40 = vmul.f32 1.442695, %v2164_v37 }
 0x6e3   : > { %v2195_v36 = vpop.permute.xlu1 %2194 }
 0x6e4   : > { %8857 = vmatpush3.msra.mxu1 %v2195_v36 }
 0x6e5   : > { %8866 = vmatprep.subr.mxu1 %v9935_v0 }
 0x6e7   : > { %v2152_v38 = vpop.xlane.xlu0 %2151 }
 0x6e8   : > { %v2162_v39 = vsub.f32 %v2146_v8, %v2152_v38 }
 0x6ea   : > { %v2166_v41 = vmul.f32 1.442695, %v2162_v39 }
 0x6ec   : > { %9502 = vpow2.f32 %v2166_v41 }
 0x6ed   : > { %9504 = vpow2.f32 %v2170_v40 }
 0x6f6   : > { %v9503_v42 = vpop.eup %9502 }
 0x6f7   : > { %v2174_v43 = vsel %vm771_vm1, %v9503_v42, 0.0  ;;  %v9505_v44 = vpop.eup %9504 }
 0x6f8   : > { %2175 = vadd.xlane.f32.xlu0 %v2174_v43  ;;  %v2180_v45 = vsel %vm771_vm1, %v9505_v44, 0.0 }
 0x6fc   : > { %2181 = vadd.xlane.f32.xlu0 %v2180_v45 }
 0x712   : > { %2346 = vrot.lane.b32.xlu0 %v10428_v28, %s9941_s17 }
 0x783   : > { %v10597_v46 = vpop.f32.mrb[18].mxu0 }
 0x784   : > { %v8865_v47 = vpop.f32.mrb[19].mxu0 }
 0x785   : > { %v2176_v48 = vpop.xlane.xlu0 %2175 }
 0x786   : > { %9506 = vrcp.f32 %v2176_v48 }
 0x787   : > { %v10599_v49 = vpop.f32.mrb[20].mxu0 }
 0x788   : > { %v8875_v50 = vpop.f32.mrb[21].mxu0 }
 0x789   : > { %v2182_v51 = vpop.xlane.xlu0 %2181 }
 0x78a   : > { %9508 = vrcp.f32 %v2182_v51 }
 0x78d   : > { %v2347_v59 = vpop.permute.xlu0 %2346 }
 0x78e   : > { %v2767_v52 = vpop.f32.mrb[22].mxu0 }
 0x78f   : > { %v3005_v53 = vmul.f32 0.35355338, %v2767_v52  ;;  %v8896_v54 = vpop.f32.mrb[23].mxu0 }
 0x790   : > { %v9507_v55 = vpop.eup %9506 }
 0x791   : > { %v3009_v56 = vsel %vm771_vm1, %v3005_v53, -inf  ;;  %v2190_v57 = vmul.f32 %v9507_v55, %v9503_v42 }
 0x792   : > { %v2845_v58 = vpop.f32.mrb[24].mxu0  ;;  %3010 = vmax.xlane.f32.xlu1 %v3009_v56 }
 0x793   : > { %v3006_v60 = vmul.f32 0.35355338, %v2845_v58  ;;  %v8901_v62 = vpop.f32.mrb[25].mxu0  ;;  %8859 = vmatmul.mubr.msk.f32.vlgmr.msra.gmra.mrb[18].mxu1 %vm771_vm1, %v2190_v57 }
 0x794   : > { %v9509_v1 = vpop.eup %9508  ;;  %8867 = vmatpush3.msra.mxu1 %v2347_v59  ;;  %8868 = vmatprep.mubr.msk.f32.mxu1 %vm9936_vm0, %v9935_v0 }
 0x795   : > { %v3012_v2 = vsel %vm771_vm1, %v3006_v60, -inf  ;;  %v2192_v3 = vmul.f32 %v9509_v1, %v9505_v44  ;;  %8876 = vmatprep.subr.mxu1 %v2498_v13 }
 0x796   : > { %v2923_v4 = vpop.f32.mrb[26].mxu0  ;;  %3013 = vmax.xlane.f32.xlu0 %v3012_v2 }
 0x797   : > { %v3007_v5 = vmul.f32 0.35355338, %v2923_v4  ;;  %v8906_v6 = vpop.f32.mrb[27].mxu0  ;;  %8869 = vmatmul.mubr.msk.f32.vlgmr.msra.gmra.mrb[20].mxu1 %vm771_vm1, %v2192_v3 }
 0x798   : > { %8877 = vmatpush3.msra.mxu1 %v2498_v13 }
 0x799   : > { %v3015_v7 = vsel %vm771_vm1, %v3007_v5, -inf  ;;  %8884 = vmatprep.subr.mxu1 %v1833_v15 }
 0x79a   : > { %v3001_v8 = vpop.f32.mrb[28].mxu0  ;;  %3016 = vmax.xlane.f32.xlu1 %v3015_v7 }
 0x79b   : > { %v3008_v9 = vmul.f32 0.35355338, %v3001_v8  ;;  %v8911_v10 = vpop.f32.mrb[29].mxu0 }
 0x79d   : > { %v3018_v11 = vsel %vm771_vm1, %v3008_v9, -inf }
 0x79e   : > { %3019 = vmax.xlane.f32.xlu0 %v3018_v11 }
 0x7ab   : > { %3053 = vrot.lane.b32.xlu1 %v10412_v19, %s9944_s27 }
 0x81f   : > { %v3011_v16 = vpop.xlane.xlu1 %3010 }
 0x820   : > { %v3021_v17 = vsub.f32 %v3005_v53, %v3011_v16 }
 0x822   : > { %v3025_v18 = vmul.f32 1.442695, %v3021_v17 }
 0x823   : > { %v3014_v21 = vpop.xlane.xlu0 %3013 }
 0x824   : > { %9510 = vpow2.f32 %v3025_v18  ;;  %v3022_v22 = vsub.f32 %v3006_v60, %v3014_v21 }
 0x826   : > { %v3027_v25 = vmul.f32 1.442695, %v3022_v22 }
 0x827   : > { %v3017_v26 = vpop.xlane.xlu1 %3016 }
 0x828   : > { %9512 = vpow2.f32 %v3027_v25  ;;  %v3023_v30 = vsub.f32 %v3007_v5, %v3017_v26 }
 0x82a   : > { %v3029_v31 = vmul.f32 1.442695, %v3023_v30 }
 0x82b   : > { %v3020_v32 = vpop.xlane.xlu0 %3019  ;;  %v3054_v50 = vpop.permute.xlu1 %3053 }
 0x82c   : > { %9514 = vpow2.f32 %v3029_v31  ;;  %v3024_v33 = vsub.f32 %v3008_v9, %v3020_v32 }
 0x82e   : > { %v9511_v35 = vpop.eup %9510  ;;  %v3031_v36 = vmul.f32 1.442695, %v3024_v33 }
 0x82f   : > { %v3033_v37 = vsel %vm771_vm1, %v9511_v35, 0.0 }
 0x830   : > { %9516 = vpow2.f32 %v3031_v36  ;;  %3034 = vadd.xlane.f32.xlu1 %v3033_v37 }
 0x832   : > { %v9513_v38 = vpop.eup %9512 }
 0x833   : > { %v3036_v39 = vsel %vm771_vm1, %v9513_v38, 0.0 }
 0x834   : > { %3037 = vadd.xlane.f32.xlu0 %v3036_v39 }
 0x836   : > { %v10613_v40 = vpop.eup %9514 }
 0x837   : > { %v3039_v41 = vsel %vm771_vm1, %v10613_v40, 0.0 }
 0x838   : > { %3040 = vadd.xlane.f32.xlu1 %v3039_v41 }
 0x83a   : > { %v10617_v42 = vpop.eup %9516 }
 0x83b   : > { %v3042_v43 = vsel %vm771_vm1, %v10617_v42, 0.0 }
 0x83c   : > { %3043 = vadd.xlane.f32.xlu0 %v3042_v43 }
 0x849   : > { %3205 = vrot.lane.b32.xlu1 %v10428_v28, %s9944_s27 }
 0x84d   : > { %3281 = vrot.lane.b32.xlu1 %v10420_v24, %s9944_s27 }
 0x851   : > { %3459 = vrot.lane.b32.xlu1 %v10412_v19, %s11272_s19 }
 0x852   : > { %3129 = vrot.lane.b32.xlu0 %v10422_v27, %s9944_s27 }
 0x855   : > { %3537 = vrot.lane.b32.xlu1 %v10422_v27, %s11272_s19 }
 0x856   : > { %3461 = vrot.lane.b32.xlu0 %v10412_v19, %s11274_s11 }
 0x859   : > { %3695 = vrot.lane.b32.xlu1 %v10420_v24, %s11274_s11 }
 0x85a   : > { %3539 = vrot.lane.b32.xlu0 %v10422_v27, %s11274_s11 }
 0x85d   : > { %3693 = vrot.lane.b32.xlu1 %v10420_v24, %s11272_s19 }
 0x85e   : > { %3617 = vrot.lane.b32.xlu0 %v10428_v28, %s11274_s11 }
 0x862   : > { %3615 = vrot.lane.b32.xlu0 %v10428_v28, %s11272_s19  ;;  %s9951_s19 = smov 125  }
 0x866   : > { %v2266_v44 = vpop.f32.mrb[18].mxu1 }
 0x867   : > { %v8860_v45 = vpop.f32.mrb[19].mxu1  ;;  %8878 = vmatprep.mubr.msk.f32.mxu1 %vm771_vm1, %v2266_v44 }
 0x868   : > { %8879 = vmatmul.mubr.msk.f32.vlgmr.msra.gmra.mrb[22].mxu1 %vm771_vm1, %v10597_v46 }
 0x869   : > { %8885 = vmatpush3.msra.mxu1 %v1833_v15 }
 0x86a   : > { %v2418_v47 = vpop.f32.mrb[20].mxu1  ;;  %8912 = vmatprep.subr.mxu1 %v9935_v0 }
 0x86b   : > { %v8870_v48 = vpop.f32.mrb[21].mxu1  ;;  %8881 = vmatprep.mubr.msk.f32.mxu1 %vm771_vm1, %v2418_v47 }
 0x86c   : > { %8882 = vmatmul.mubr.msk.f32.gmra.mrb[24].mxu1 %vm771_vm1, %v10599_v49 }
 0x86d   : > { %8886 = vmatprep.mubr.msk.f32.mxu1 %vm771_vm1, %v10557_v61 }
 0x870   : > { %8887 = vmatmul.mubr.msk.f32.vlgmr.msra.gmra.mrb[22].mxu1 %vm771_vm1, %v10511_v29 }
 0x871   : > { %8913 = vmatpush3.msra.mxu1 %v3054_v50  ;;  %8889 = vmatprep.mubr.msk.f32.mxu1 %vm771_vm1, %v10559_v63  ;;  %v3357_v63 = vld [vmem:[#allocation6 + $0x10] sm:$0xff] }
 0x872   : > { %8922 = vmatprep.subr.mxu1 %v9935_v0 }
 0x874   : > { %8890 = vmatmul.mubr.msk.f32.gmra.mrb[24].mxu1 %vm771_vm1, %v10514_v34 }
 0x875   : > { %8914 = vmatprep.mubr.msk.f32.mxu1 %vm9936_vm0, %v9935_v0 }
 0x8bd   : > { %v3035_v46 = vpop.xlane.xlu1 %3034 }
 0x8be   : > { %9518 = vrcp.f32 %v3035_v46 }
 0x8c1   : > { %v3038_v49 = vpop.xlane.xlu0 %3037 }
 0x8c2   : > { %9520 = vrcp.f32 %v3038_v49 }
 0x8c5   : > { %v3041_v61 = vpop.xlane.xlu1 %3040 }
 0x8c6   : > { %9522 = vrcp.f32 %v3041_v61 }
 0x8c8   : > { %v9519_v51 = vpop.eup %9518 }
 0x8c9   : > { %v3049_v29 = vmul.f32 %v9519_v51, %v9511_v35  ;;  %v3044_v52 = vpop.xlane.xlu0 %3043  ;;  %v3206_v53 = vpop.permute.xlu1 %3205 }
 0x8ca   : > { %9524 = vrcp.f32 %v3044_v52 }
 0x8cb   : > { %8915 = vmatmul.mubr.msk.f32.vlgmr.msra.gmra.mrb[26].mxu1 %vm771_vm1, %v3049_v29 }
 0x8cc   : > { %v9521_v54 = vpop.eup %9520  ;;  %8923 = vmatpush3.msra.mxu1 %v3206_v53  ;;  %8924 = vmatprep.mubr.msk.f32.mxu1 %vm9936_vm0, %v9935_v0 }
 0x8cd   : > { %v3130_v34 = vpop.permute.xlu0 %3129  ;;  %v3282_v55 = vpop.permute.xlu1 %3281  ;;  %v3050_v56 = vmul.f32 %v9521_v54, %v9513_v38  ;;  %8932 = vmatprep.subr.mxu1 %v3357_v63 }
 0x8ce   : > { %8918 = vmatpush3.msra.mxu0 %v3130_v34 }
 0x8cf   : > { %8920 = vmatmul.mubr.msk.f32.vlgmr.msra.gmra.mrb[30].mxu0 %vm771_vm1, %v3050_v56  ;;  %8927 = vmatprep.subr.mxu0 %v9935_v0 }
 0x8d0   : > { %v9523_v57 = vpop.eup %9522  ;;  %8928 = vmatpush3.msra.mxu0 %v3282_v55  ;;  %8929 = vmatprep.mubr.msk.f32.mxu0 %vm9936_vm0, %v9935_v0 }
 0x8d1   : > { %v3460_v58 = vpop.permute.xlu1 %3459  ;;  %v3051_v59 = vmul.f32 %v9523_v57, %v10613_v40  ;;  %8940 = vmatprep.subr.mxu0 %v9935_v0  ;;  %v3462_v62 = vpop.permute.xlu0 %3461 }
 0x8d3   : > { %8925 = vmatmul.mubr.msk.f32.vlgmr.msra.gmra.mrb[28].mxu1 %vm771_vm1, %v3051_v59 }
 0x8d4   : > { %v9525_v60 = vpop.eup %9524  ;;  %8933 = vmatpush3.msra.mxu1 %v3357_v63 }
 0x8d5   : > { %v3052_v1 = vmul.f32 %v9525_v60, %v10617_v42  ;;  %8950 = vmatprep.subr.mxu1 %v9935_v0  ;;  %v3538_v2 = vpop.permute.xlu1 %3537  ;;  %v3540_v3 = vpop.permute.xlu0 %3539 }
 0x8d7   : > { %8930 = vmatmul.mubr.msk.f32.vlgmr.msra.gmra.mrb[32].mxu0 %vm771_vm1, %v3052_v1 }
 0x8d8   : > { %8941 = vmatpush3.xpose.msk.msra.mxu0 %vm771_vm1, %v3462_v62  ;;  %8942 = vmatprep.mubr.msk.f32.mxu0 %vm9936_vm0, %v9935_v0  ;;  %v4123_v62 = vld [vmem:[#allocation6 + $0x18] sm:$0xff] }
 0x8d9   : > { %8945 = vmatprep.subr.mxu0 %v9935_v0  ;;  %v3696_v4 = vpop.permute.xlu1 %3695  ;;  %v3618_v9 = vpop.permute.xlu0 %3617 }
 0x8db   : > { %8943 = vmatmul.mubr.msk.f32.vlgmr.msra.gmra.mrb[34].mxu0 %vm771_vm1, %v3460_v58 }
 0x8dc   : > { %8946 = vmatpush3.xpose.msk.msra.mxu0 %vm771_vm1, %v3540_v3  ;;  %8947 = vmatprep.mubr.msk.f32.mxu0 %vm9936_vm0, %v9935_v0 }
 0x8dd   : > { %8955 = vmatprep.subr.mxu0 %v9935_v0  ;;  %v3694_v5 = vpop.permute.xlu1 %3693  ;;  %v3616_v17 = vpop.permute.xlu0 %3615 }
 0x8df   : > { %8948 = vmatmul.mubr.msk.f32.vlgmr.msra.gmra.mrb[36].mxu0 %vm771_vm1, %v3538_v2 }
 0x8e0   : > { %8956 = vmatpush3.xpose.msk.msra.mxu0 %vm771_vm1, %v3696_v4  ;;  %8957 = vmatprep.mubr.msk.f32.mxu0 %vm9936_vm0, %v9935_v0 }
 0x8e1   : > { %8965 = vmatprep.subr.mxu0 %v9935_v0 }
 0x8e3   : > { %8958 = vmatmul.mubr.msk.f32.vlgmr.msra.gmra.mrb[38].mxu0 %vm771_vm1, %v3694_v5 }
 0x8e4   : > { %8967 = vmatprep.mubr.msk.f32.mxu0 %vm9936_vm0, %v9935_v0 }
 0x99e   : > { %v3125_v6 = vpop.f32.mrb[26].mxu1 }
 0x99f   : > { %v8916_v7 = vpop.f32.mrb[27].mxu1  ;;  %8934 = vmatprep.mubr.msk.f32.mxu1 %vm771_vm1, %v3125_v6 }
 0x9a2   : > { %v3201_v8 = vpop.f32.mrb[30].mxu0 }
 0x9a3   : > { %v8921_v10 = vpop.f32.mrb[31].mxu0  ;;  %8935 = vmatmul.mubr.msk.f32.vlgmr.msra.gmra.mrb[22].mxu1 %vm771_vm1, %v3201_v8 }
 0x9a4   : > { %8951 = vmatpush3.xpose.msk.msra.mxu1 %vm771_vm1, %v3618_v9 }
 0x9a5   : > { %8960 = vmatprep.subr.mxu1 %v9935_v0 }
 0x9a6   : > { %v3277_v11 = vpop.f32.mrb[28].mxu1 }
 0x9a7   : > { %v8926_v13 = vpop.f32.mrb[29].mxu1  ;;  %8937 = vmatprep.mubr.msk.f32.mxu1 %vm771_vm1, %v3277_v11 }
 0x9a8   : > { %v4356_v13 = vld [vmem:[#allocation7 + $0x20] sm:$0xff] }
 0x9aa   : > { %v3353_v15 = vpop.f32.mrb[32].mxu0 }
 0x9ab   : > { %v8931_v16 = vpop.f32.mrb[33].mxu0  ;;  %8938 = vmatmul.mubr.msk.f32.gmra.mrb[24].mxu1 %vm771_vm1, %v3353_v15  ;;  %v4357_v15 = vld [vmem:[#allocation7 + $0x28] sm:$0xff] }
 0x9ac   : > { %8952 = vmatprep.mubr.msk.f32.mxu1 %vm9936_vm0, %v9935_v0  ;;  %v9240_v16 = vpack.c.bf16 %v4357_v15, %v4356_v13 }
 0x9ae   : > { %v3533_v18 = vpop.f32.mrb[34].mxu0 }
 0x9af   : > { %v3771_v21 = vmul.f32 0.35355338, %v3533_v18  ;;  %v8944_v22 = vpop.f32.mrb[35].mxu0  ;;  %8953 = vmatmul.mubr.msk.f32.vlgmr.msra.gmra.mrb[30].mxu1 %vm771_vm1, %v3616_v17 }
 0x9b0   : > { %8962 = vmatprep.mubr.msk.f32.mxu1 %vm9936_vm0, %v9935_v0 }
 0x9b1   : > { %v3775_v25 = vsel %vm771_vm1, %v3771_v21, -inf }
 0x9b2   : > { %3776 = vmax.xlane.f32.xlu0 %v3775_v25  ;;  %v3611_v26 = vpop.f32.mrb[36].mxu0 }
 0x9b3   : > { %v3772_v30 = vmul.f32 0.35355338, %v3611_v26  ;;  %v8949_v31 = vpop.f32.mrb[37].mxu0 }
 0x9b4   : > { %v4359_v31 = vld [vmem:[#allocation7 + $0x38] sm:$0xff] }
 0x9b5   : > { %v3778_v32 = vsel %vm771_vm1, %v3772_v30, -inf }
 0x9b6   : > { %3779 = vmax.xlane.f32.xlu1 %v3778_v32  ;;  %v3767_v33 = vpop.f32.mrb[38].mxu0 }
 0x9b7   : > { %v8959_v35 = vpop.f32.mrb[39].mxu0  ;;  %v3774_v48 = vmul.f32 0.35355338, %v3767_v33  ;;  %v4351_v33 = vld [vmem:[#allocation7] sm:$0xff] }
 0x9b8   : > { %v4352_v35 = vld [vmem:[#allocation7 + $0x8] sm:$0xff] }
 0x9b9   : > { %v3784_v46 = vsel %vm771_vm1, %v3774_v48, -inf }
 0xa3f   : > { %v3777_v36 = vpop.xlane.xlu0 %3776 }
 0xa40   : > { %v3787_v37 = vsub.f32 %v3771_v21, %v3777_v36  ;;  %v9248_v36 = vpack.c.bf16 %v4352_v35, %v4351_v33  ;;  %v8458_v35 = vld [vmem:[#allocation9] ss:$0 sm:$0xff] }
 0xa42   : > { %v3791_v38 = vmul.f32 1.442695, %v3787_v37  ;;  %v4266_v37 = vlaneseq }
 0xa43   : > { %v3780_v41 = vpop.xlane.xlu1 %3779 }
 0xa44   : > { %9526 = vpow2.f32 %v3791_v38  ;;  %v3788_v42 = vsub.f32 %v3772_v30, %v3780_v41  ;;  %v4358_v30 = vld [vmem:[#allocation7 + $0x30] sm:$0xff]  ;;  %v8445_v38 = vld [vmem:[%s11316_s16] ss:$0 sm:$0xff]  ;;  %v4354_v41 = vld [vmem:[#allocation7 + $0x18] sm:$0xff]  ;;  %s11319_s16 = sld [smem:[#allocation32_spill]] }
 0xa45   : > { %v9244_v32 = vpack.c.bf16 %v4359_v31, %v4358_v30  ;;  %v4791_v31 = vld [vmem:[%s11317_s10 + $0x10] sm:$0xff] }
 0xa46   : > { %v3793_v43 = vmul.f32 1.442695, %v3788_v42 }
 0xa48   : > { %9528 = vpow2.f32 %v3793_v43 }
 0xa4e   : > { %v9527_v39 = vpop.eup %9526 }
 0xa4f   : > { %v3799_v40 = vsel %vm771_vm1, %v9527_v39, 0.0 }
 0xa50   : > { %3800 = vadd.xlane.f32.xlu1 %v3799_v40  ;;  %v4353_v40 = vld [vmem:[#allocation7 + $0x10] sm:$0xff] }
 0xa52   : > { %v9529_v49 = vpop.eup %9528 }
 0xa61   : > { %3819 = vrot.lane.b32.xlu1 %v10412_v19, %s11270_s21  ;;  %v3802_v19 = vsel %vm771_vm1, %v9529_v49, 0.0 }
 0xa65   : > { %3971 = vrot.lane.b32.xlu1 %v10428_v28, %s11270_s21 }
 0xa82   : > { %v3689_v44 = vpop.f32.mrb[30].mxu1 }
 0xa83   : > { %v3773_v45 = vmul.f32 0.35355338, %v3689_v44  ;;  %v8954_v47 = vpop.f32.mrb[31].mxu1  ;;  %v4267_v44 = vshrl.u32 %v4266_v37, 7  ;;  %v8459_v37 = vld [vmem:[%s11318_s28] ss:$0 sm:$0xff] }
 0xa85   : > { %v3781_v50 = vsel %vm771_vm1, %v3773_v45, -inf }
 0xa86   : > { %3782 = vmax.xlane.f32.xlu0 %v3781_v50  ;;  %v9252_v50 = vpack.c.bf16 %v4354_v41, %v4353_v40  ;;  %v8460_v40 = vld [vmem:[%s11319_s16] ss:$0 sm:$0xff] }
 0xa8a   : > { %3785 = vmax.xlane.f32.xlu0 %v3784_v46 }
 0xa8e   : > { %3803 = vadd.xlane.f32.xlu0 %v3802_v19  ;;  %v4551_v19 = vld [vmem:[#allocation7 + $0x40] sm:$0xff] }
 0xadd   : > { %v3801_v61 = vpop.xlane.xlu1 %3800 }
 0xade   : > { %9530 = vrcp.f32 %v3801_v61  ;;  %v4552_v61 = vld [vmem:[#allocation7 + $0x48] sm:$0xff] }
 0xae1   : > { %v3820_v28 = vpop.permute.xlu1 %3819 }
 0xae2   : > { %8961 = vmatpush3.msra.mxu1 %v3820_v28  ;;  %v4268_v28 = vadd.s32 8, %v4267_v44 }
 0xae3   : > { %8970 = vmatprep.subr.mxu1 %v9935_v0 }
 0xae5   : > { %v3972_v52 = vpop.permute.xlu1 %3971 }
 0xae8   : > { %v9531_v51 = vpop.eup %9530 }
 0xae9   : > { %v3815_v29 = vmul.f32 %v9531_v51, %v9527_v39  ;;  %v4269_v51 = vadd.s32 16, %v4267_v44 }
 0xaeb   : > { %8963 = vmatmul.mubr.msk.f32.vlgmr.msra.gmra.mrb[32].mxu1 %vm771_vm1, %v3815_v29  ;;  %v4275_v29 = vand.u32 7, %v4267_v44 }
 0xaec   : > { %8971 = vmatpush3.msra.mxu1 %v3972_v52  ;;  %8972 = vmatprep.mubr.msk.f32.mxu1 %vm9936_vm0, %v9935_v0 }
 0xaed   : > { %8980 = vmatprep.subr.mxu1 %v4123_v62  ;;  %vm4319_vm5 = vcmp.eq.s32.totalorder %v4275_v29, 0  ;;  %vm4335_vm9 = vcmp.eq.s32.totalorder %v4275_v29, 7 }
 0xb13   : > { %v3783_v53 = vpop.xlane.xlu0 %3782 }
 0xb14   : > { %v3789_v63 = vsub.f32 %v3773_v45, %v3783_v53 }
 0xb16   : > { %v3795_v54 = vmul.f32 1.442695, %v3789_v63  ;;  %v9256_v63 = vpack.c.bf16 %v4552_v61, %v4551_v19 }
 0xb17   : > { %v3786_v34 = vpop.xlane.xlu0 %3785 }
 0xb18   : > { %9532 = vpow2.f32 %v3795_v54  ;;  %v3790_v55 = vsub.f32 %v3774_v48, %v3786_v34 }
 0xb1a   : > { %v3797_v56 = vmul.f32 1.442695, %v3790_v55 }
 0xb1b   : > { %v3804_v1 = vpop.xlane.xlu0 %3803 }
 0xb1c   : > { %9534 = vpow2.f32 %v3797_v56  ;;  %v4282_v56 = vand.u32 7, %v4268_v28 }
 0xb1d   : > { %9536 = vrcp.f32 %v3804_v1 }
 0xb1e   : > { %vm4320_vm6 = vcmp.eq.s32.totalorder %v4282_v56, 0  ;;  %vm4336_vm10 = vcmp.eq.s32.totalorder %v4282_v56, 7 }
 0xb22   : > { %v9533_v57 = vpop.eup %9532 }
 0xb23   : > { %v3805_v58 = vsel %vm771_vm1, %v9533_v57, 0.0 }
 0xb24   : > { %3806 = vadd.xlane.f32.xlu1 %v3805_v58  ;;  %v4270_v58 = vadd.s32 24, %v4267_v44 }
 0xb26   : > { %v9535_v59 = vpop.eup %9534 }
 0xb27   : > { %v3808_v60 = vsel %vm771_vm1, %v9535_v59, 0.0  ;;  %v9537_v4 = vpop.eup %9536 }
 0xb28   : > { %3809 = vadd.xlane.f32.xlu0 %v3808_v60  ;;  %v3816_v6 = vmul.f32 %v9537_v4, %v9529_v49  ;;  %v4553_v4 = vld [vmem:[#allocation7 + $0x50] sm:$0xff] }
 0xb35   : > { %4047 = vrot.lane.b32.xlu1 %v10420_v24, %s11270_s21 }
 0xb3e   : > { %3895 = vrot.lane.b32.xlu0 %v10422_v27, %s11270_s21 }
 0xbb1   : > { %v3807_v2 = vpop.xlane.xlu1 %3806 }
 0xbb2   : > { %9538 = vrcp.f32 %v3807_v2 }
 0xbb5   : > { %v3810_v3 = vpop.xlane.xlu0 %3809  ;;  %v4048_v7 = vpop.permute.xlu1 %4047 }
 0xbb6   : > { %9540 = vrcp.f32 %v3810_v3 }
 0xbb9   : > { %v3896_v5 = vpop.permute.xlu0 %3895 }
 0xbba   : > { %8966 = vmatpush3.msra.mxu0 %v3896_v5  ;;  %v4554_v5 = vld [vmem:[#allocation7 + $0x58] sm:$0xff] }
 0xbbb   : > { %8968 = vmatmul.mubr.msk.f32.vlgmr.msra.gmra.mrb[40].mxu0 %vm771_vm1, %v3816_v6  ;;  %8975 = vmatprep.subr.mxu0 %v9935_v0 }
 0xbbc   : > { %v9539_v24 = vpop.eup %9538  ;;  %8976 = vmatpush3.msra.mxu0 %v4048_v7  ;;  %8977 = vmatprep.mubr.msk.f32.mxu0 %vm9936_vm0, %v9935_v0  ;;  %v4296_v7 = vand.u32 7, %v4270_v58 }
 0xbbd   : > { %v3817_v27 = vmul.f32 %v9539_v24, %v9533_v57  ;;  %9241 = vmatprep.subr.bf16.mxu0 %v9240_v16  ;;  %v4289_v57 = vand.u32 7, %v4269_v51 }
 0xbbe   : > { %v3891_v8 = vpop.f32.mrb[32].mxu1  ;;  %vm4322_vm8 = vcmp.eq.s32.totalorder %v4296_v7, 0  ;;  %vm4338_vm12 = vcmp.eq.s32.totalorder %v4296_v7, 7 }
 0xbbf   : > { %v8964_v9 = vpop.f32.mrb[33].mxu1  ;;  %8973 = vmatmul.mubr.msk.f32.vlgmr.msra.gmra.mrb[34].mxu1 %vm771_vm1, %v3817_v27  ;;  %vm4321_vm7 = vcmp.eq.s32.totalorder %v4289_v57, 0  ;;  %vm4337_vm11 = vcmp.eq.s32.totalorder %v4289_v57, 7 }
 0xbc0   : > { %v9541_v10 = vpop.eup %9540  ;;  %8982 = vmatprep.mubr.msk.f32.mxu1 %vm771_vm1, %v3891_v8  ;;  %8981 = vmatpush3.msra.mxu1 %v4123_v62 }
 0xbc1   : > { %v3818_v11 = vmul.f32 %v9541_v10, %v9535_v59  ;;  %v9260_v10 = vpack.c.bf16 %v4554_v5, %v4553_v4 }
 0xbc3   : > { %8978 = vmatmul.mubr.msk.f32.vlgmr.msra.gmra.mrb[42].mxu0 %vm771_vm1, %v3818_v11 }
 0xbc4   : > { %9243 = vmatpush3.bf16.msra.mxu0 %v9240_v16 }
 0xbc5   : > { %9245 = vmatprep.subr.bf16.mxu0 %v9244_v32 }
 0xbc8   : > { %9247 = vmatpush3.bf16.msra.mxu0 %v9244_v32  ;;  %v4792_v32 = vld [vmem:[%s11317_s10 + $0x18] sm:$0xff] }
 0xbc9   : > { %9249 = vmatprep.subr.bf16.mxu0 %v9248_v36  ;;  %v9268_v33 = vpack.c.bf16 %v4792_v32, %v4791_v31 }
 0xc8e   : > { %v3967_v17 = vpop.f32.mrb[40].mxu0 }
 0xc8f   : > { %v8969_v18 = vpop.f32.mrb[41].mxu0  ;;  %8983 = vmatmul.mubr.msk.f32.vlgmr.msra.gmra.mrb[22].mxu1 %vm771_vm1, %v3967_v17 }
 0xc92   : > { %v4043_v21 = vpop.f32.mrb[34].mxu1 }
 0xc93   : > { %v8974_v22 = vpop.f32.mrb[35].mxu1  ;;  %8985 = vmatprep.mubr.msk.f32.mxu1 %vm771_vm1, %v4043_v21 }
 0xc96   : > { %v4119_v25 = vpop.f32.mrb[42].mxu0 }
 0xc97   : > { %v8979_v26 = vpop.f32.mrb[43].mxu0  ;;  %8986 = vmatmul.mubr.msk.f32.gmra.mrb[24].mxu1 %vm771_vm1, %v4119_v25  ;;  %v4789_v25 = vld [vmem:[%s11317_s10] sm:$0xff] }
 0xc98   : > { %v4790_v26 = vld [vmem:[%s11317_s10 + $0x8] sm:$0xff] }
 0xc99   : > { %v9264_v30 = vpack.c.bf16 %v4790_v26, %v4789_v25 }
 0xc9b   : > { %9265 = vmatprep.subr.bf16.mxu1 %v9264_v30 }
 0xc9c   : > { %9267 = vmatpush3.bf16.msra.mxu1 %v9264_v30 }
 0xc9d   : > { %9269 = vmatprep.subr.bf16.mxu1 %v9268_v33 }
 0xca0   : > { %9271 = vmatpush3.bf16.msra.mxu1 %v9268_v33 }
 0xca1   : > { %9041 = vmatprep.subr.mxu1 %v9935_v0 }
 0xd62   : > { %v8984_v39 = vpop.f32.mrb[22].mxu1 }
 0xd63   : > { %v4233_v42 = vadd.f32 %v8984_v39, %v8445_v38  ;;  %v4202_v43 = vpop.f32.mrb[23].mxu1 }
 0xd64   : > { %v4232_v45 = vadd.f32 %v8445_v38, %v4202_v43 }
 0xd65   : > { %v4242_v47 = vrot.slane %v4233_v42, 7  ;;  %v4255_v48 = vrot.slane %v4233_v42, 1 }
 0xd66   : > { %v4241_v46 = vrot.slane %v4232_v45, 7  ;;  %v4254_v49 = vrot.slane %v4232_v45, 1  ;;  %8996 = vmatprep.mubr.msk.f32.mxu0 %vm1075_vm2, %v4232_v45 }
 0xd67   : > { %8997 = vmatmul.mubr.msk.f32.vlgmr.msra.gmra.mrb[44].mxu0 %vm1075_vm2, %v4233_v42 }
 0xd68   : > { %9251 = vmatpush3.bf16.msra.mxu0 %v9248_v36  ;;  %v4243_v52 = vsel %vm4240_vm3, %v4241_v46, %v4242_v47  ;;  %v4256_v53 = vsel %vm4253_vm4, %v4254_v49, %v4255_v48  ;;  %v4252_v60 = vsel %vm4240_vm3, 0.0, %v4241_v46 }
 0xd69   : > { %9253 = vmatprep.subr.bf16.mxu0 %v9252_v50  ;;  %v4331_v6 = vsel %vm4319_vm5, 0.0, %v4252_v60  ;;  %v4332_v11 = vsel %vm4320_vm6, 0.0, %v4243_v52  ;;  %v4347_v16 = vsel %vm4335_vm9, 0.0, %v4256_v53  ;;  %vm4772_vm6 = vcmask 1041408  }
 0xd6a   : > { %v8987_v54 = vpop.f32.mrb[24].mxu1  ;;  %vm4777_vm9 = vcmask 1044480  }
 0xd6b   : > { %v4235_v34 = vadd.f32 %v8987_v54, %v8445_v38  ;;  %v4212_v55 = vpop.f32.mrb[25].mxu1 }
 0xd6c   : > { %v4234_v59 = vadd.f32 %v8445_v38, %v4212_v55  ;;  %9255 = vmatpush3.bf16.msra.mxu0 %v9252_v50 }
 0xd6d   : > { %v4246_v62 = vrot.slane %v4235_v34, 7  ;;  %v4259_v1 = vrot.slane %v4235_v34, 1  ;;  %9257 = vmatprep.subr.bf16.mxu0 %v9256_v63 }
 0xd6e   : > { %v4244_v2 = vrot.slane %v4234_v59, 7  ;;  %v4257_v3 = vrot.slane %v4234_v59, 1  ;;  %8999 = vmatprep.mubr.msk.f32.mxu0 %vm1075_vm2, %v4234_v59 }
 0xd6f   : > { %9000 = vmatmul.mubr.msk.f32.gmra.mrb[46].mxu0 %vm1075_vm2, %v4235_v34  ;;  %v4265_v21 = vsel %vm4253_vm4, %v4259_v1, 0.0 }
 0xd70   : > { %9010 = vmatprep.mubr.msk.f32.mxu0 %vm1075_vm2, %v4331_v6  ;;  %v4245_v24 = vsel %vm4240_vm3, %v4242_v47, %v4244_v2  ;;  %v4247_v27 = vsel %vm4240_vm3, %v4244_v2, %v4246_v62  ;;  %v4258_v8 = vsel %vm4253_vm4, %v4255_v48, %v4257_v3  ;;  %v4260_v9 = vsel %vm4253_vm4, %v4257_v3, %v4259_v1 }
 0xd71   : > { %v4333_v13 = vsel %vm4321_vm7, 0.0, %v4245_v24  ;;  %v4334_v15 = vsel %vm4322_vm8, 0.0, %v4247_v27  ;;  %v4348_v17 = vsel %vm4336_vm10, 0.0, %v4258_v8  ;;  %v4349_v18 = vsel %vm4337_vm11, 0.0, %v4260_v9 }
 0xd72   : > { %v4350_v22 = vsel %vm4338_vm12, 0.0, %v4265_v21  ;;  %vm4774_vm7 = vcmask 1042432   ;;  %vm1061_vm8 = vcmask 1043456   ;;  %vm4779_vm10 = vcmask 1045504  }
 0xd73   : > { %9011 = vmatmul.mubr.msk.f32.vlgmr.msra.gmra.mrb[44].mxu0 %vm1075_vm2, %v4332_v11 }
 0xd74   : > { %9013 = vmatprep.mubr.msk.f32.mxu0 %vm1075_vm2, %v4333_v13  ;;  %9259 = vmatpush3.bf16.msra.mxu0 %v9256_v63 }
 0xd75   : > { %9261 = vmatprep.subr.bf16.mxu0 %v9260_v10 }
 0xd77   : > { %9014 = vmatmul.mubr.msk.f32.gmra.mrb[46].mxu0 %vm1075_vm2, %v4334_v15 }
 0xd78   : > { %9263 = vmatpush3.bf16.msra.mxu0 %v9260_v10  ;;  %9024 = vmatprep.mubr.msk.f32.mxu0 %vm1075_vm2, %v4347_v16 }
 0xd79   : > { %9066 = vmatprep.subr.mxu0 %v9935_v0 }
 0xd7b   : > { %9025 = vmatmul.mubr.msk.f32.vlgmr.msra.gmra.mrb[44].mxu0 %vm1075_vm2, %v4348_v17 }
 0xd7c   : > { %9027 = vmatprep.mubr.msk.f32.mxu0 %vm1075_vm2, %v4349_v18 }
 0xd7f   : > { %9028 = vmatmul.mubr.msk.f32.gmra.mrb[46].mxu0 %vm1075_vm2, %v4350_v22 }
 0xd80   : > { %9068 = vmatprep.mubr.msk.f32.mxu0 %vm9936_vm0, %v9935_v0 }
 0xe4e   : > { %v9026_v36 = vpop.f32.mrb[44].mxu0 }
 0xe4f   : > { %v4664_v38 = vadd.f32 %v9026_v36, %v8458_v35  ;;  %v4633_v39 = vpop.f32.mrb[45].mxu0 }
 0xe50   : > { %v4663_v41 = vadd.f32 %v8458_v35, %v4633_v39 }
 0xe51   : > { %v4675_v42 = vmul.f32 %v8459_v37, %v4664_v38 }
 0xe52   : > { %v4674_v43 = vmul.f32 %v8459_v37, %v4663_v41  ;;  %v9029_v44 = vpop.f32.mrb[46].mxu0 }
 0xe53   : > { %v4686_v45 = vadd.f32 %v8460_v40, %v4675_v42  ;;  %v4666_v47 = vadd.f32 %v9029_v44, %v8458_v35  ;;  %v4643_v48 = vpop.f32.mrb[47].mxu0 }
 0xe54   : > { %v4685_v50 = vadd.f32 %v8460_v40, %v4674_v43  ;;  %v4665_v46 = vadd.f32 %v8458_v35, %v4643_v48 }
 0xe55   : > { %v4694_v49 = vmin.f32 %v4686_v45, 0.0  ;;  %v4677_v19 = vmul.f32 %v8459_v37, %v4666_v47  ;;  %vm4690_vm13 = vcmp.gt.f32.partialorder %v4686_v45, 0.0 }
 0xe56   : > { %v4693_v61 = vmin.f32 %v4685_v50, 0.0  ;;  %v4676_v28 = vmul.f32 %v8459_v37, %v4665_v46  ;;  %vm4689_vm14 = vcmp.gt.f32.partialorder %v4685_v50, 0.0 }
 0xe57   : > { %v4699_v51 = vmul.f32 1.442695, %v4694_v49  ;;  %v4688_v29 = vadd.f32 %v8460_v40, %v4677_v19 }
 0xe58   : > { %v4697_v52 = vmul.f32 1.442695, %v4693_v61  ;;  %v4687_v53 = vadd.f32 %v8460_v40, %v4676_v28 }
 0xe59   : > { %9542 = vpow2.f32 %v4699_v51  ;;  %v4696_v63 = vmin.f32 %v4688_v29, 0.0  ;;  %vm4692_vm15 = vcmp.gt.f32.partialorder %v4688_v29, 0.0 }
 0xe5a   : > { %9544 = vpow2.f32 %v4697_v52  ;;  %v4695_v54 = vmin.f32 %v4687_v53, 0.0  ;;  %vm4691_vm5 = vcmp.gt.f32.partialorder %v4687_v53, 0.0 }
 0xe5b   : > { %v4703_v34 = vmul.f32 1.442695, %v4696_v63 }
 0xe5c   : > { %v4701_v55 = vmul.f32 1.442695, %v4695_v54 }
 0xe5d   : > { %9546 = vpow2.f32 %v4703_v34 }
 0xe5e   : > { %9548 = vpow2.f32 %v4701_v55 }
 0xe63   : > { %v9543_v56 = vpop.eup %9542 }
 0xe64   : > { %v9545_v57 = vpop.eup %9544  ;;  %v8462_v58 = vadd.f32 -1.0, %v9543_v56 }
 0xe65   : > { %v8461_v59 = vadd.f32 -1.0, %v9545_v57 }
 0xe66   : > { %v4710_v60 = vsel %vm4690_vm13, %v4686_v45, %v8462_v58 }
 0xe67   : > { %v9547_v62 = vpop.eup %9546  ;;  %v4721_v1 = vrot.slane %v4710_v60, 1  ;;  %v4709_v2 = vsel %vm4689_vm14, %v4685_v50, %v8461_v59  ;;  %v4724_v9 = vrot.slane %v4710_v60, 2 }
 0xe68   : > { %v9549_v3 = vpop.eup %9548  ;;  %v4714_v4 = vrot.slane %v4709_v2, 1  ;;  %v8464_v5 = vadd.f32 -1.0, %v9547_v62  ;;  %v4717_v27 = vrot.slane %v4709_v2, 2 }
 0xe69   : > { %v4723_v6 = vmax.f32 %v4710_v60, %v4721_v1  ;;  %v8463_v7 = vadd.f32 -1.0, %v9549_v3 }
 0xe6a   : > { %v4716_v24 = vmax.f32 %v4709_v2, %v4714_v4  ;;  %v4712_v8 = vsel %vm4692_vm15, %v4688_v29, %v8464_v5 }
 0xe6b   : > { %v4735_v10 = vrot.slane %v4712_v8, 1  ;;  %v4711_v11 = vsel %vm4691_vm5, %v4687_v53, %v8463_v7  ;;  %v4726_v18 = vmax.f32 %v4723_v6, %v4724_v9  ;;  %v4738_v30 = vrot.slane %v4712_v8, 2  ;;  %v8465_v53 = vld [vmem:[#allocation10] ss:$0 sm:$0xff] }
 0xe6c   : > { %v4719_v13 = vmax.f32 %v4716_v24, %v4717_v27  ;;  %v4728_v15 = vrot.slane %v4711_v11, 1  ;;  %v4731_v17 = vrot.slane %v4711_v11, 2  ;;  %v4747_v31 = vrot.slane %v4723_v6, 4 }
 0xe6d   : > { %v4737_v16 = vmax.f32 %v4712_v8, %v4735_v10  ;;  %v4750_v36 = vrot.slane %v4726_v18, 4  ;;  %v4752_v37 = vrot.slane %v4726_v18, 5  ;;  %v4754_v43 = vrot.slane %v4726_v18, 6 }
 0xe6e   : > { %v4742_v21 = vrot.slane %v4719_v13, 1  ;;  %v4771_v22 = vsel %vm4240_vm3, %v4716_v24, %v4719_v13  ;;  %v4730_v25 = vmax.f32 %v4711_v11, %v4728_v15  ;;  %v4744_v26 = vrot.slane %v4719_v13, 2 }
 0xe6f   : > { %v4740_v35 = vmax.f32 %v4737_v16, %v4738_v30  ;;  %v4762_v45 = vrot.slane %v4737_v16, 4 }
 0xe70   : > { %v4733_v32 = vmax.f32 %v4730_v25, %v4731_v17  ;;  %v4773_v33 = vsel %vm4772_vm6, %v4771_v22, %v4742_v21 }
 0xe71   : > { %v4775_v38 = vsel %vm4774_vm7, %v4773_v33, %v4744_v26  ;;  %v4765_v50 = vrot.slane %v4740_v35, 4  ;;  %v4767_v19 = vrot.slane %v4740_v35, 5  ;;  %v4769_v51 = vrot.slane %v4740_v35, 6 }
 0xe72   : > { %v4757_v39 = vrot.slane %v4733_v32, 1  ;;  %v4759_v40 = vrot.slane %v4733_v32, 2  ;;  %v4782_v41 = vsel %vm4240_vm3, %v4730_v25, %v4733_v32  ;;  %v4776_v42 = vsel %vm1061_vm8, %v4775_v38, %v4747_v31 }
 0xe73   : > { %v4778_v44 = vsel %vm4777_vm9, %v4776_v42, %v4750_v36  ;;  %vm5193_vm3 = vcmask 27648  }
 0xe74   : > { %v4780_v47 = vsel %vm4779_vm10, %v4778_v44, %v4752_v37  ;;  %v4783_v48 = vsel %vm4772_vm6, %v4782_v41, %v4757_v39 }
 0xe75   : > { %v4781_v46 = vsel %vm4253_vm4, %v4780_v47, %v4754_v43  ;;  %v4784_v49 = vsel %vm4774_vm7, %v4783_v48, %v4759_v40 }
 0xe76   : > { %v4785_v61 = vsel %vm1061_vm8, %v4784_v49, %v4762_v45  ;;  %9038 = vmatprep.mubr.msk.f32.mxu1 %vm1075_vm2, %v4781_v46 }
 0xe77   : > { %v4786_v28 = vsel %vm4777_vm9, %v4785_v61, %v4765_v50 }
 0xe78   : > { %v4787_v29 = vsel %vm4779_vm10, %v4786_v28, %v4767_v19 }
 0xe79   : > { %v4788_v52 = vsel %vm4253_vm4, %v4787_v29, %v4769_v51  ;;  %vm5240_vm4 = vcmask 31744  }
 0xe7a   : > { %9039 = vmatmul.mubr.msk.f32.vlgmr.msra.gmra.mrb[36].mxu1 %vm1075_vm2, %v4788_v52 }
 0xe7b   : > { %9043 = vmatprep.mubr.msk.f32.mxu1 %vm9936_vm0, %v9935_v0 }
 0xf4d   : > { %v9040_v63 = vpop.f32.mrb[36].mxu1 }
 0xf4e   : > { %v4872_v54 = vpop.f32.mrb[37].mxu1  ;;  %v10797_v55 = vadd.f32 %v9040_v63, %v8465_v53 }
 0xf4f   : > { %v10795_v34 = vadd.f32 %v8465_v53, %v4872_v54 }
 0xf50   : > { %v10811_v57 = vcombine.high %v10797_v55, %v10797_v55 }
 0xf51   : > { %4885 = vrot.lane.b32.xlu0 %v10795_v34, %s9937_s29  ;;  %v10803_v56 = vcombine.high %v10795_v34, %v10795_v34 }
 0xf53   : > { %4961 = vrot.lane.b32.xlu1 %v10803_v56, %s9937_s29 }
 0xf55   : > { %5037 = vrot.lane.b32.xlu0 %v10797_v55, %s9937_s29 }
 0xf57   : > { %5113 = vrot.lane.b32.xlu1 %v10811_v57, %s9937_s29  ;;  %s11320_s29 = smov 72  }
 0xf59   : > { %5316 = vrot.lane.b32.xlu0 %v10803_v56, %s9938_s0 }
 0xf5b   : > { %5238 = vrot.lane.b32.xlu1 %v10795_v34, %s9938_s0 }
 0xf5f   : > { %5393 = vrot.lane.b32.xlu1 %v10797_v55, %s9938_s0 }
 0xf63   : > { %5470 = vrot.lane.b32.xlu1 %v10811_v57, %s9938_s0  ;;  %s11321_s0 = smov 104  }
 0xfc3   : > { %v4886_v58 = vpop.permute.xlu0 %4885 }
 0xfc4   : > { %9042 = vmatpush3.xpose.msk.msra.mxu1 %vm771_vm1, %v4886_v58 }
 0xfc5   : > { %9046 = vmatprep.subr.mxu1 %v9935_v0  ;;  %v4962_v59 = vpop.permute.xlu1 %4961 }
 0xfc7   : > { %9044 = vmatmul.mubr.msk.f32.vlgmr.msra.gmra.mrb[38].mxu1 %vm771_vm1, %v10795_v34  ;;  %v5038_v60 = vpop.permute.xlu0 %5037 }
 0xfc8   : > { %9047 = vmatpush3.xpose.msk.msra.mxu1 %vm771_vm1, %v4962_v59  ;;  %9048 = vmatprep.mubr.msk.f32.mxu1 %vm9936_vm0, %v9935_v0 }
 0xfc9   : > { %9051 = vmatprep.subr.mxu1 %v9935_v0  ;;  %v5114_v1 = vpop.permute.xlu1 %5113 }
 0xfcb   : > { %v5317_v62 = vpop.permute.xlu0 %5316  ;;  %9049 = vmatmul.mubr.msk.f32.vlgmr.msra.gmra.mrb[40].mxu1 %vm771_vm1, %v10803_v56 }
 0xfcc   : > { %9052 = vmatpush3.xpose.msk.msra.mxu1 %vm771_vm1, %v5038_v60  ;;  %9067 = vmatpush3.msk.msra.mxu0 %vm1061_vm8, %v5317_v62 }
 0xfcd   : > { %9053 = vmatprep.mubr.msk.f32.mxu1 %vm9936_vm0, %v9935_v0  ;;  %9056 = vmatprep.subr.mxu1 %v9935_v0  ;;  %v5239_v2 = vpop.permute.xlu1 %5238 }
 0xfce   : > { %9076 = vmatprep.subr.mxu0 %v9935_v0 }
 0xfcf   : > { %9054 = vmatmul.mubr.msk.f32.vlgmr.msra.gmra.mrb[42].mxu1 %vm771_vm1, %v10797_v55 }
 0xfd0   : > { %9057 = vmatpush3.xpose.msk.msra.mxu1 %vm771_vm1, %v5114_v1  ;;  %9058 = vmatprep.mubr.msk.f32.mxu1 %vm9936_vm0, %v9935_v0 }
 0xfd1   : > { %9061 = vmatprep.subr.mxu1 %v9935_v0  ;;  %v5394_v21 = vpop.permute.xlu1 %5393 }
 0xfd3   : > { %9059 = vmatmul.mubr.msk.f32.vlgmr.msra.gmra.mrb[44].mxu1 %vm771_vm1, %v10811_v57 }
 0xfd4   : > { %9062 = vmatpush3.msk.msra.mxu1 %vm1061_vm8, %v5239_v2  ;;  %9063 = vmatprep.mubr.msk.f32.mxu1 %vm9936_vm0, %v9935_v0 }
 0xfd5   : > { %9071 = vmatprep.subr.mxu1 %v9935_v0  ;;  %v5471_v22 = vpop.permute.xlu1 %5470 }
0x109a   : > { %v4957_v3 = vpop.f32.mrb[38].mxu1 }
0x109b   : > { %v5189_v4 = vmul.f32 0.35355338, %v4957_v3  ;;  %v9045_v5 = vpop.f32.mrb[39].mxu1 }
0x109d   : > { %v5194_v6 = vsel %vm5193_vm3, %v5189_v4, -inf }
0x109e   : > { %5195 = vmax.xlane.f32.xlu0 %v5194_v6  ;;  %v5033_v7 = vpop.f32.mrb[40].mxu1 }
0x109f   : > { %v5190_v24 = vmul.f32 0.35355338, %v5033_v7  ;;  %v9050_v27 = vpop.f32.mrb[41].mxu1 }
0x10a1   : > { %v5197_v8 = vsel %vm5193_vm3, %v5190_v24, -inf }
0x10a2   : > { %5198 = vmax.xlane.f32.xlu1 %v5197_v8  ;;  %v5109_v9 = vpop.f32.mrb[42].mxu1 }
0x10a3   : > { %v5191_v10 = vmul.f32 0.35355338, %v5109_v9  ;;  %v9055_v11 = vpop.f32.mrb[43].mxu1 }
0x10a5   : > { %v5200_v13 = vsel %vm5193_vm3, %v5191_v10, -inf }
0x10a6   : > { %5201 = vmax.xlane.f32.xlu0 %v5200_v13  ;;  %v5185_v15 = vpop.f32.mrb[44].mxu1 }
0x10a7   : > { %v5192_v16 = vmul.f32 0.35355338, %v5185_v15  ;;  %v9060_v17 = vpop.f32.mrb[45].mxu1 }
0x10a9   : > { %v5203_v18 = vsel %vm5193_vm3, %v5192_v16, -inf }
0x10aa   : > { %5204 = vmax.xlane.f32.xlu0 %v5203_v18 }
0x10b3   : > { %5628 = vrot.lane.b32.xlu1 %v10803_v56, %s9939_s24 }
0x10c0   : > { %5550 = vrot.lane.b32.xlu0 %v10795_v34, %s9939_s24 }
0x112b   : > { %v5196_v25 = vpop.xlane.xlu0 %5195 }
0x112c   : > { %v5206_v26 = vsub.f32 %v5189_v4, %v5196_v25 }
0x112e   : > { %v5210_v30 = vmul.f32 1.442695, %v5206_v26 }
0x112f   : > { %v5199_v31 = vpop.xlane.xlu1 %5198 }
0x1130   : > { %9550 = vpow2.f32 %v5210_v30  ;;  %v5207_v32 = vsub.f32 %v5190_v24, %v5199_v31 }
0x1132   : > { %v5212_v33 = vmul.f32 1.442695, %v5207_v32 }
0x1133   : > { %v5202_v39 = vpop.xlane.xlu0 %5201  ;;  %v5629_v46 = vpop.permute.xlu1 %5628 }
0x1134   : > { %9552 = vpow2.f32 %v5212_v33  ;;  %v5208_v40 = vsub.f32 %v5191_v10, %v5202_v39 }
0x1136   : > { %v5214_v42 = vmul.f32 1.442695, %v5208_v40 }
0x1137   : > { %v5205_v41 = vpop.xlane.xlu0 %5204 }
0x1138   : > { %v5209_v43 = vsub.f32 %v5192_v16, %v5205_v41  ;;  %9554 = vpow2.f32 %v5214_v42 }
0x113a   : > { %v9551_v35 = vpop.eup %9550  ;;  %v5216_v44 = vmul.f32 1.442695, %v5209_v43 }
0x113b   : > { %v5218_v36 = vsel %vm5193_vm3, %v9551_v35, 0.0  ;;  %v5551_v49 = vpop.permute.xlu0 %5550 }
0x113c   : > { %5219 = vadd.xlane.f32.xlu1 %v5218_v36  ;;  %9556 = vpow2.f32 %v5216_v44 }
0x113e   : > { %v9553_v37 = vpop.eup %9552 }
0x113f   : > { %v5221_v38 = vsel %vm5193_vm3, %v9553_v37, 0.0 }
0x1140   : > { %5222 = vadd.xlane.f32.xlu0 %v5221_v38 }
0x1142   : > { %v9555_v45 = vpop.eup %9554 }
0x1143   : > { %v5224_v47 = vsel %vm5193_vm3, %v9555_v45, 0.0 }
0x1146   : > { %v9557_v48 = vpop.eup %9556 }
0x1147   : > { %v5227_v50 = vsel %vm5193_vm3, %v9557_v48, 0.0 }
0x114d   : > { %5626 = vrot.lane.b32.xlu1 %v10803_v56, %s9940_s25 }
0x1156   : > { %5548 = vrot.lane.b32.xlu0 %v10795_v34, %s9940_s25 }
0x1171   : > { %5225 = vadd.xlane.f32.xlu1 %v5224_v47 }
0x1175   : > { %5228 = vadd.xlane.f32.xlu0 %v5227_v50 }
0x1182   : > { %5784 = vrot.lane.b32.xlu1 %v10811_v57, %s9939_s24 }
0x1186   : > { %5782 = vrot.lane.b32.xlu1 %v10811_v57, %s9940_s25 }
0x118b   : > { %5706 = vrot.lane.b32.xlu0 %v10797_v55, %s9939_s24  ;;  %s11322_s24 = smov 40  }
0x118f   : > { %5704 = vrot.lane.b32.xlu0 %v10797_v55, %s9940_s25 }
0x11c9   : > { %v5220_v19 = vpop.xlane.xlu1 %5219 }
0x11ca   : > { %9558 = vrcp.f32 %v5220_v19 }
0x11cd   : > { %v5223_v61 = vpop.xlane.xlu0 %5222  ;;  %v5627_v53 = vpop.permute.xlu1 %5626 }
0x11ce   : > { %9560 = vrcp.f32 %v5223_v61 }
0x11d1   : > { %v5549_v63 = vpop.permute.xlu0 %5548 }
0x11d4   : > { %v9559_v28 = vpop.eup %9558 }
0x11d5   : > { %v5234_v51 = vmul.f32 %v9559_v28, %v9551_v35 }
0x11d7   : > { %9064 = vmatmul.mubr.msk.f32.vlgmr.msra.gmra.mrb[46].mxu1 %vm5240_vm4, %v5234_v51 }
0x11d8   : > { %v9561_v29 = vpop.eup %9560  ;;  %9072 = vmatpush3.msk.msra.mxu1 %vm1061_vm8, %v5394_v21  ;;  %9073 = vmatprep.mubr.msk.f32.mxu1 %vm9936_vm0, %v9935_v0 }
0x11d9   : > { %v5235_v52 = vmul.f32 %v9561_v29, %v9553_v37  ;;  %9081 = vmatprep.subr.mxu1 %v9935_v0 }
0x11db   : > { %9069 = vmatmul.mubr.msk.f32.vlgmr.msra.gmra.mrb[48].mxu0 %vm5240_vm4, %v5235_v52 }
0x11dc   : > { %9077 = vmatpush3.msk.msra.mxu0 %vm1061_vm8, %v5471_v22  ;;  %9078 = vmatprep.mubr.msk.f32.mxu0 %vm9936_vm0, %v9935_v0 }
0x11dd   : > { %9086 = vmatprep.subr.mxu0 %v9935_v0 }
0x11fe   : > { %v5226_v54 = vpop.xlane.xlu1 %5225 }
0x11ff   : > { %9562 = vrcp.f32 %v5226_v54 }
0x1202   : > { %v5229_v58 = vpop.xlane.xlu0 %5228  ;;  %v5785_v3 = vpop.permute.xlu1 %5784 }
0x1203   : > { %9564 = vrcp.f32 %v5229_v58 }
0x1206   : > { %v5707_v1 = vpop.permute.xlu0 %5706  ;;  %v5783_v5 = vpop.permute.xlu1 %5782 }
0x1209   : > { %v9563_v59 = vpop.eup %9562 }
0x120a   : > { %v5236_v60 = vmul.f32 %v9563_v59, %v9555_v45  ;;  %v5705_v4 = vpop.permute.xlu0 %5704 }
0x120c   : > { %9074 = vmatmul.mubr.msk.f32.vlgmr.msra.gmra.mrb[48].mxu1 %vm5240_vm4, %v5236_v60 }
0x120d   : > { %v9565_v62 = vpop.eup %9564  ;;  %9082 = vmatpush3.xpose.msk.msra.mxu1 %vm771_vm1, %v5551_v49  ;;  %9083 = vmatprep.mubr.msk.f32.mxu1 %vm9936_vm0, %v9935_v0 }
0x120e   : > { %v5237_v2 = vmul.f32 %v9565_v62, %v9557_v48  ;;  %9091 = vmatprep.subr.mxu1 %v9935_v0 }
0x1210   : > { %9079 = vmatmul.mubr.msk.f32.vlgmr.msra.gmra.mrb[50].mxu0 %vm5240_vm4, %v5237_v2  ;;  %9084 = vmatmul.mubr.msk.f32.vlgmr.msra.gmra.mrb[50].mxu1 %vm771_vm1, %v5549_v63 }
0x1211   : > { %9087 = vmatpush3.xpose.msk.msra.mxu0 %vm771_vm1, %v5629_v46  ;;  %9092 = vmatpush3.xpose.msk.msra.mxu1 %vm771_vm1, %v5707_v1 }
0x1212   : > { %9088 = vmatprep.mubr.msk.f32.mxu0 %vm9936_vm0, %v9935_v0  ;;  %9093 = vmatprep.mubr.msk.f32.mxu1 %vm9936_vm0, %v9935_v0 }
0x1213   : > { %9096 = vmatprep.subr.mxu0 %v9935_v0  ;;  %9101 = vmatprep.subr.mxu1 %v9935_v0 }
0x1214   : > { %9089 = vmatmul.mubr.msk.f32.vlgmr.msra.gmra.mrb[52].mxu0 %vm771_vm1, %v5627_v53  ;;  %9094 = vmatmul.mubr.msk.f32.vlgmr.msra.gmra.mrb[52].mxu1 %vm771_vm1, %v5705_v4 }
0x1215   : > { %9097 = vmatpush3.xpose.msk.msra.mxu0 %vm771_vm1, %v5785_v3  ;;  %9098 = vmatprep.mubr.msk.f32.mxu0 %vm9936_vm0, %v9935_v0 }
0x1216   : > { %9106 = vmatprep.subr.mxu0 %v9935_v0  ;;  %9103 = vmatprep.mubr.msk.f32.mxu1 %vm9936_vm0, %v9935_v0 }
0x1218   : > { %9099 = vmatmul.mubr.msk.f32.vlgmr.msra.gmra.mrb[54].mxu0 %vm771_vm1, %v5783_v5 }
0x1219   : > { %9108 = vmatprep.mubr.msk.f32.mxu0 %vm9936_vm0, %v9935_v0 }
0x12aa   : > { %v10911_v6 = vpop.f32.mrb[46].mxu1 }
0x12ab   : > { %v9065_v7 = vpop.f32.mrb[47].mxu1 }
0x12ae   : > { %v10913_v24 = vpop.f32.mrb[48].mxu0 }
0x12af   : > { %v6306_v27 = vcombine.low %v10911_v6, %v10913_v24  ;;  %v9070_v8 = vpop.f32.mrb[49].mxu0 }
0x12df   : > { %v10917_v9 = vpop.f32.mrb[48].mxu1 }
0x12e0   : > { %v9075_v10 = vpop.f32.mrb[49].mxu1 }
0x12e3   : > { %v10919_v11 = vpop.f32.mrb[50].mxu0  ;;  %v5622_v13 = vpop.f32.mrb[50].mxu1 }
0x12e4   : > { %v6307_v15 = vcombine.low %v10917_v9, %v10919_v11  ;;  %v5860_v16 = vmul.f32 0.35355338, %v5622_v13  ;;  %v9080_v17 = vpop.f32.mrb[51].mxu0  ;;  %v9085_v18 = vpop.f32.mrb[51].mxu1 }
0x12e6   : > { %v5864_v21 = vsel %vm5193_vm3, %v5860_v16, -inf }
0x12e7   : > { %v5700_v22 = vpop.f32.mrb[52].mxu0  ;;  %5865 = vmax.xlane.f32.xlu0 %v5864_v21  ;;  %v5778_v25 = vpop.f32.mrb[52].mxu1 }
0x12e8   : > { %v5861_v26 = vmul.f32 0.35355338, %v5700_v22  ;;  %v5862_v30 = vmul.f32 0.35355338, %v5778_v25  ;;  %v9090_v31 = vpop.f32.mrb[53].mxu0  ;;  %v9095_v32 = vpop.f32.mrb[53].mxu1 }
0x12e9   : > { %v6216_v32 = vld [vmem:[#allocation12 + $0x8] sm:$0xff] }
0x12ea   : > { %v5867_v33 = vsel %vm5193_vm3, %v5861_v26, -inf  ;;  %v5870_v35 = vsel %vm5193_vm3, %v5862_v30, -inf }
0x12eb   : > { %5868 = vmax.xlane.f32.xlu1 %v5867_v33  ;;  %5871 = vmax.xlane.f32.xlu0 %v5870_v35  ;;  %v5856_v36 = vpop.f32.mrb[54].mxu0  ;;  %v5547_v33 = vld [vmem:[#allocation12] sm:$0xff] }
0x12ec   : > { %v5863_v37 = vmul.f32 0.35355338, %v5856_v36  ;;  %v9100_v38 = vpop.f32.mrb[55].mxu0 }
0x12ee   : > { %v5873_v39 = vsel %vm5193_vm3, %v5863_v37, -inf }
0x12ef   : > { %5874 = vmax.xlane.f32.xlu0 %v5873_v39 }
0x12fc   : > { %5908 = vrot.lane.b32.xlu1 %v10795_v34, %s9941_s17 }
0x1374   : > { %v5866_v40 = vpop.xlane.xlu0 %5865 }
0x1375   : > { %v5876_v41 = vsub.f32 %v5860_v16, %v5866_v40 }
0x1377   : > { %v5880_v42 = vmul.f32 1.442695, %v5876_v41 }
0x1378   : > { %v5872_v43 = vpop.xlane.xlu0 %5871  ;;  %v5869_v44 = vpop.xlane.xlu1 %5868 }
0x1379   : > { %9566 = vpow2.f32 %v5880_v42  ;;  %v5878_v45 = vsub.f32 %v5862_v30, %v5872_v43  ;;  %v5877_v47 = vsub.f32 %v5861_v26, %v5869_v44 }
0x137b   : > { %v5884_v48 = vmul.f32 1.442695, %v5878_v45  ;;  %v5882_v50 = vmul.f32 1.442695, %v5877_v47 }
0x137c   : > { %v5875_v46 = vpop.xlane.xlu0 %5874  ;;  %v5909_v49 = vpop.permute.xlu1 %5908 }
0x137d   : > { %9568 = vpow2.f32 %v5884_v48  ;;  %v5879_v19 = vsub.f32 %v5863_v37, %v5875_v46  ;;  %9102 = vmatpush3.msk.msra.mxu1 %vm1061_vm8, %v5909_v49 }
0x137e   : > { %9570 = vpow2.f32 %v5882_v50  ;;  %9111 = vmatprep.subr.mxu1 %v9935_v0 }
0x137f   : > { %v5886_v61 = vmul.f32 1.442695, %v5879_v19 }
0x1381   : > { %9572 = vpow2.f32 %v5886_v61 }
0x1383   : > { %v9567_v28 = vpop.eup %9566 }
0x1384   : > { %v5888_v51 = vsel %vm5193_vm3, %v9567_v28, 0.0 }
0x1385   : > { %5889 = vadd.xlane.f32.xlu1 %v5888_v51 }
0x1387   : > { %v9569_v29 = vpop.eup %9568 }
0x1388   : > { %v9571_v52 = vpop.eup %9570  ;;  %v5894_v53 = vsel %vm5193_vm3, %v9569_v29, 0.0 }
0x1389   : > { %5895 = vadd.xlane.f32.xlu1 %v5894_v53  ;;  %v5891_v63 = vsel %vm5193_vm3, %v9571_v52, 0.0 }
0x138a   : > { %5892 = vadd.xlane.f32.xlu0 %v5891_v63 }
0x138b   : > { %v9573_v54 = vpop.eup %9572 }
0x138c   : > { %v5897_v58 = vsel %vm5193_vm3, %v9573_v54, 0.0 }
0x138e   : > { %5898 = vadd.xlane.f32.xlu0 %v5897_v58 }
0x139a   : > { %6062 = vrot.lane.b32.xlu1 %v10797_v55, %s9941_s17 }
0x139e   : > { %6139 = vrot.lane.b32.xlu1 %v10811_v57, %s9941_s17 }
0x13a2   : > { %6387 = vrot.lane.b32.xlu1 %v10795_v34, %s9943_s1 }
0x13a4   : > { %5985 = vrot.lane.b32.xlu0 %v10803_v56, %s9941_s17 }
0x13a6   : > { %6465 = vrot.lane.b32.xlu1 %v10803_v56, %s9943_s1 }
0x13a8   : > { %6389 = vrot.lane.b32.xlu0 %v10795_v34, %s9942_s7 }
0x13aa   : > { %6623 = vrot.lane.b32.xlu1 %v10811_v57, %s9942_s7 }
0x13ac   : > { %6467 = vrot.lane.b32.xlu0 %v10803_v56, %s9942_s7 }
0x13ae   : > { %6621 = vrot.lane.b32.xlu1 %v10811_v57, %s9943_s1 }
0x13b0   : > { %6545 = vrot.lane.b32.xlu0 %v10797_v55, %s9942_s7  ;;  %s11323_s7 = sld [smem:[#allocation22_spill]] }
0x13b4   : > { %6543 = vrot.lane.b32.xlu0 %v10797_v55, %s9943_s1  ;;  %s9948_s1 = smov 126  }
0x1412   : > { %v5890_v59 = vpop.xlane.xlu1 %5889 }
0x1413   : > { %9574 = vrcp.f32 %v5890_v59 }
0x1416   : > { %v5896_v60 = vpop.xlane.xlu1 %5895 }
0x1417   : > { %v5893_v62 = vpop.xlane.xlu0 %5892  ;;  %9576 = vrcp.f32 %v5896_v60 }
0x1418   : > { %9578 = vrcp.f32 %v5893_v62 }
0x141a   : > { %v6063_v1 = vpop.permute.xlu1 %6062 }
0x141b   : > { %v5899_v2 = vpop.xlane.xlu0 %5898 }
0x141c   : > { %9580 = vrcp.f32 %v5899_v2 }
0x141d   : > { %v9575_v3 = vpop.eup %9574 }
0x141e   : > { %v5904_v4 = vmul.f32 %v9575_v3, %v9567_v28  ;;  %v6140_v7 = vpop.permute.xlu1 %6139 }
0x141f   : > { %v5986_v5 = vpop.permute.xlu0 %5985 }
0x1420   : > { %9107 = vmatpush3.msk.msra.mxu0 %vm1061_vm8, %v5986_v5  ;;  %9104 = vmatmul.mubr.msk.f32.vlgmr.msra.gmra.mrb[54].mxu1 %vm5240_vm4, %v5904_v4 }
0x1421   : > { %v9577_v8 = vpop.eup %9576  ;;  %9112 = vmatpush3.msk.msra.mxu1 %vm1061_vm8, %v6063_v1  ;;  %9113 = vmatprep.mubr.msk.f32.mxu1 %vm9936_vm0, %v9935_v0 }
0x1422   : > { %v9579_v10 = vpop.eup %9578  ;;  %v5906_v13 = vmul.f32 %v9577_v8, %v9569_v29  ;;  %9116 = vmatprep.subr.mxu0 %v9935_v0  ;;  %v6388_v17 = vpop.permute.xlu1 %6387  ;;  %9121 = vmatprep.subr.mxu1 %v6216_v32 }
0x1423   : > { %v5905_v16 = vmul.f32 %v9579_v10, %v9571_v52  ;;  %v6390_v22 = vpop.permute.xlu0 %6389 }
0x1424   : > { %9114 = vmatmul.mubr.msk.f32.vlgmr.msra.gmra.mrb[56].mxu1 %vm5240_vm4, %v5906_v13 }
0x1425   : > { %9109 = vmatmul.mubr.msk.f32.vlgmr.msra.gmra.mrb[56].mxu0 %vm5240_vm4, %v5905_v16  ;;  %9122 = vmatpush3.msra.mxu1 %v6216_v32 }
0x1426   : > { %v9581_v18 = vpop.eup %9580  ;;  %9117 = vmatpush3.msk.msra.mxu0 %vm1061_vm8, %v6140_v7  ;;  %9118 = vmatprep.mubr.msk.f32.mxu0 %vm9936_vm0, %v9935_v0  ;;  %v6466_v25 = vpop.permute.xlu1 %6465 }
0x1427   : > { %v5907_v21 = vmul.f32 %v9581_v18, %v9573_v54  ;;  %9131 = vmatprep.subr.mxu0 %v9935_v0  ;;  %v6468_v26 = vpop.permute.xlu0 %6467  ;;  %9126 = vmatprep.subr.mxu1 %v5547_v33 }
0x1429   : > { %9119 = vmatmul.mubr.msk.f32.vlgmr.msra.gmra.mrb[58].mxu0 %vm5240_vm4, %v5907_v21 }
0x142a   : > { %9133 = vmatprep.mubr.msk.f32.mxu0 %vm9936_vm0, %v9935_v0  ;;  %v6624_v30 = vpop.permute.xlu1 %6623 }
0x142b   : > { %v6546_v47 = vpop.permute.xlu0 %6545 }
0x142d   : > { %9132 = vmatpush3.xpose.msk.msra.mxu0 %vm771_vm1, %v6390_v22 }
0x142e   : > { %9136 = vmatprep.subr.mxu0 %v9935_v0  ;;  %v6622_v31 = vpop.permute.xlu1 %6621 }
0x142f   : > { %v6544_v6 = vpop.permute.xlu0 %6543 }
0x1430   : > { %9134 = vmatmul.mubr.msk.f32.vlgmr.msra.gmra.mrb[60].mxu0 %vm771_vm1, %v6388_v17 }
0x1431   : > { %9137 = vmatpush3.xpose.msk.msra.mxu0 %vm771_vm1, %v6468_v26  ;;  %9138 = vmatprep.mubr.msk.f32.mxu0 %vm9936_vm0, %v9935_v0 }
0x1432   : > { %9146 = vmatprep.subr.mxu0 %v9935_v0 }
0x1434   : > { %9139 = vmatmul.mubr.msk.f32.vlgmr.msra.gmra.mrb[62].mxu0 %vm771_vm1, %v6466_v25 }
0x1435   : > { %9147 = vmatpush3.xpose.msk.msra.mxu0 %vm771_vm1, %v6624_v30  ;;  %9148 = vmatprep.mubr.msk.f32.mxu0 %vm9936_vm0, %v9935_v0 }
0x1436   : > { %9156 = vmatprep.subr.mxu0 %v9935_v0 }
0x1438   : > { %9149 = vmatmul.mubr.msk.f32.vlgmr.msra.gmra.mrb[64].mxu0 %vm771_vm1, %v6622_v31 }
0x1439   : > { %9158 = vmatprep.mubr.msk.f32.mxu0 %vm9936_vm0, %v9935_v0 }
0x14f3   : > { %v5981_v35 = vpop.f32.mrb[54].mxu1 }
0x14f4   : > { %v9105_v36 = vpop.f32.mrb[55].mxu1 }
0x14f7   : > { %v6135_v37 = vpop.f32.mrb[56].mxu1 }
0x14f8   : > { %v6058_v38 = vpop.f32.mrb[56].mxu0  ;;  %v9115_v39 = vpop.f32.mrb[57].mxu1 }
0x14f9   : > { %v6221_v40 = vcombine.low %v5981_v35, %v6058_v38  ;;  %v9110_v41 = vpop.f32.mrb[57].mxu0 }
0x14fb   : > { %9123 = vmatprep.mubr.msk.f32.mxu1 %vm771_vm1, %v6221_v40 }
0x14fc   : > { %v6212_v42 = vpop.f32.mrb[58].mxu0 }
0x14fd   : > { %v6222_v43 = vcombine.low %v6135_v37, %v6212_v42  ;;  %v9120_v44 = vpop.f32.mrb[59].mxu0 }
0x14ff   : > { %9124 = vmatmul.mubr.msk.f32.vlgmr.msra.gmra.mrb[58].mxu1 %vm771_vm1, %v6222_v43 }
0x1500   : > { %9127 = vmatpush3.msra.mxu1 %v5547_v33  ;;  %9128 = vmatprep.mubr.msk.f32.mxu1 %vm771_vm1, %v6306_v27 }
0x1501   : > { %9141 = vmatprep.subr.mxu1 %v9935_v0 }
0x1503   : > { %v6461_v45 = vpop.f32.mrb[60].mxu0 }
0x1504   : > { %v6699_v48 = vmul.f32 0.35355338, %v6461_v45  ;;  %v9135_v50 = vpop.f32.mrb[61].mxu0 }
0x1506   : > { %v6703_v46 = vsel %vm5193_vm3, %v6699_v48, -inf }
0x1507   : > { %6704 = vmax.xlane.f32.xlu0 %v6703_v46  ;;  %v6539_v49 = vpop.f32.mrb[62].mxu0  ;;  %9129 = vmatmul.mubr.msk.f32.vlgmr.msra.gmra.mrb[58].mxu1 %vm771_vm1, %v6307_v15 }
0x1508   : > { %v6700_v19 = vmul.f32 0.35355338, %v6539_v49  ;;  %v9140_v61 = vpop.f32.mrb[63].mxu0  ;;  %9142 = vmatpush3.xpose.msk.msra.mxu1 %vm771_vm1, %v6546_v47  ;;  %9143 = vmatprep.mubr.msk.f32.mxu1 %vm9936_vm0, %v9935_v0  ;;  %v7055_v49 = vld [vmem:[#allocation12 + $0x10] sm:$0xff] }
0x1509   : > { %9151 = vmatprep.subr.mxu1 %v9935_v0 }
0x150a   : > { %v6706_v24 = vsel %vm5193_vm3, %v6700_v19, -inf }
0x150b   : > { %6707 = vmax.xlane.f32.xlu1 %v6706_v24  ;;  %v6695_v27 = vpop.f32.mrb[64].mxu0  ;;  %9144 = vmatmul.mubr.msk.f32.vlgmr.msra.gmra.mrb[60].mxu1 %vm771_vm1, %v6544_v6 }
0x150c   : > { %v9150_v28 = vpop.f32.mrb[65].mxu0  ;;  %9153 = vmatprep.mubr.msk.f32.mxu1 %vm9936_vm0, %v9935_v0  ;;  %v6702_v60 = vmul.f32 0.35355338, %v6695_v27 }
0x150e   : > { %v6712_v1 = vsel %vm5193_vm3, %v6702_v60, -inf }
0x1594   : > { %v6705_v9 = vpop.xlane.xlu0 %6704 }
0x1595   : > { %v6715_v11 = vsub.f32 %v6699_v48, %v6705_v9 }
0x1597   : > { %v6719_v15 = vmul.f32 1.442695, %v6715_v11 }
0x1598   : > { %v6708_v52 = vpop.xlane.xlu1 %6707 }
0x1599   : > { %9582 = vpow2.f32 %v6719_v15  ;;  %v6716_v53 = vsub.f32 %v6700_v19, %v6708_v52 }
0x159b   : > { %v6721_v63 = vmul.f32 1.442695, %v6716_v53 }
0x159d   : > { %9584 = vpow2.f32 %v6721_v63 }
0x15a3   : > { %v9583_v51 = vpop.eup %9582 }
0x15a4   : > { %v6727_v29 = vsel %vm5193_vm3, %v9583_v51, 0.0 }
0x15a5   : > { %6728 = vadd.xlane.f32.xlu1 %v6727_v29 }
0x15a7   : > { %v9585_v2 = vpop.eup %9584 }
0x15a8   : > { %v6730_v3 = vsel %vm5193_vm3, %v9585_v2, 0.0 }
0x15b6   : > { %6747 = vrot.lane.b32.xlu1 %v10795_v34, %s9944_s27 }
0x15ba   : > { %6901 = vrot.lane.b32.xlu1 %v10797_v55, %s9944_s27 }
0x15de   : > { %v6617_v54 = vpop.f32.mrb[60].mxu1 }
0x15df   : > { %v6701_v58 = vmul.f32 0.35355338, %v6617_v54  ;;  %v9145_v59 = vpop.f32.mrb[61].mxu1 }
0x15e1   : > { %v6709_v62 = vsel %vm5193_vm3, %v6701_v58, -inf }
0x15e2   : > { %6710 = vmax.xlane.f32.xlu0 %v6709_v62 }
0x15e6   : > { %6713 = vmax.xlane.f32.xlu0 %v6712_v1 }
0x15ea   : > { %6731 = vadd.xlane.f32.xlu0 %v6730_v3 }
0x1632   : > { %v6729_v4 = vpop.xlane.xlu1 %6728 }
0x1633   : > { %9586 = vrcp.f32 %v6729_v4 }
0x1636   : > { %v6748_v5 = vpop.permute.xlu1 %6747 }
0x1637   : > { %9152 = vmatpush3.msk.msra.mxu1 %vm1061_vm8, %v6748_v5 }
0x1638   : > { %9161 = vmatprep.subr.mxu1 %v9935_v0 }
0x163a   : > { %v6902_v10 = vpop.permute.xlu1 %6901 }
0x163d   : > { %v9587_v7 = vpop.eup %9586 }
0x163e   : > { %v6743_v8 = vmul.f32 %v9587_v7, %v9583_v51 }
0x1640   : > { %9154 = vmatmul.mubr.msk.f32.vlgmr.msra.gmra.mrb[62].mxu1 %vm5240_vm4, %v6743_v8 }
0x1641   : > { %9162 = vmatpush3.msk.msra.mxu1 %vm1061_vm8, %v6902_v10  ;;  %9163 = vmatprep.mubr.msk.f32.mxu1 %vm9936_vm0, %v9935_v0 }
0x1642   : > { %9171 = vmatprep.subr.mxu1 %v7055_v49 }
0x166f   : > { %v6711_v13 = vpop.xlane.xlu0 %6710 }
0x1670   : > { %v6717_v16 = vsub.f32 %v6701_v58, %v6711_v13 }
0x1672   : > { %v6723_v17 = vmul.f32 1.442695, %v6717_v16 }
0x1673   : > { %v6714_v18 = vpop.xlane.xlu0 %6713 }
0x1674   : > { %9588 = vpow2.f32 %v6723_v17  ;;  %v6718_v21 = vsub.f32 %v6702_v60, %v6714_v18 }
0x1676   : > { %v6725_v22 = vmul.f32 1.442695, %v6718_v21 }
0x1677   : > { %v6732_v32 = vpop.xlane.xlu0 %6731 }
0x1678   : > { %9590 = vpow2.f32 %v6725_v22 }
0x1679   : > { %9592 = vrcp.f32 %v6732_v32 }
0x167e   : > { %v9589_v25 = vpop.eup %9588 }
0x167f   : > { %v6733_v26 = vsel %vm5193_vm3, %v9589_v25, 0.0 }
0x1680   : > { %6734 = vadd.xlane.f32.xlu1 %v6733_v26 }
0x1682   : > { %v9591_v30 = vpop.eup %9590 }
0x1683   : > { %v6736_v31 = vsel %vm5193_vm3, %v9591_v30, 0.0  ;;  %v9593_v36 = vpop.eup %9592 }
0x1684   : > { %6737 = vadd.xlane.f32.xlu0 %v6736_v31  ;;  %v6744_v39 = vmul.f32 %v9593_v36, %v9585_v2 }
0x1691   : > { %6978 = vrot.lane.b32.xlu1 %v10811_v57, %s9944_s27 }
0x1695   : > { %7223 = vrot.lane.b32.xlu1 %v10803_v56, %s11320_s29 }
0x1699   : > { %7221 = vrot.lane.b32.xlu1 %v10803_v56, %s11321_s0 }
0x169a   : > { %6824 = vrot.lane.b32.xlu0 %v10803_v56, %s9944_s27  ;;  %s9949_s27 = smov 127  }
0x169d   : > { %7379 = vrot.lane.b32.xlu1 %v10811_v57, %s11320_s29 }
0x169e   : > { %7145 = vrot.lane.b32.xlu0 %v10795_v34, %s11320_s29 }
0x16a1   : > { %7377 = vrot.lane.b32.xlu1 %v10811_v57, %s11321_s0 }
0x16a2   : > { %7143 = vrot.lane.b32.xlu0 %v10795_v34, %s11321_s0 }
0x16a6   : > { %7301 = vrot.lane.b32.xlu0 %v10797_v55, %s11320_s29 }
0x16aa   : > { %7299 = vrot.lane.b32.xlu0 %v10797_v55, %s11321_s0 }
0x170d   : > { %v6735_v33 = vpop.xlane.xlu1 %6734 }
0x170e   : > { %9594 = vrcp.f32 %v6735_v33 }
0x1711   : > { %v6738_v35 = vpop.xlane.xlu0 %6737  ;;  %v6979_v41 = vpop.permute.xlu1 %6978 }
0x1712   : > { %9596 = vrcp.f32 %v6738_v35 }
0x1713   : > { %v6820_v37 = vpop.f32.mrb[62].mxu1 }
0x1714   : > { %v9155_v38 = vpop.f32.mrb[63].mxu1 }
0x1715   : > { %v6825_v40 = vpop.permute.xlu0 %6824  ;;  %v7224_v19 = vpop.permute.xlu1 %7223 }
0x1716   : > { %9157 = vmatpush3.msk.msra.mxu0 %vm1061_vm8, %v6825_v40 }
0x1717   : > { %9159 = vmatmul.mubr.msk.f32.vlgmr.msra.gmra.mrb[66].mxu0 %vm5240_vm4, %v6744_v39  ;;  %9166 = vmatprep.subr.mxu0 %v9935_v0 }
0x1718   : > { %v9595_v42 = vpop.eup %9594  ;;  %9167 = vmatpush3.msk.msra.mxu0 %vm1061_vm8, %v6979_v41  ;;  %9168 = vmatprep.mubr.msk.f32.mxu0 %vm9936_vm0, %v9935_v0 }
0x1719   : > { %v6745_v43 = vmul.f32 %v9595_v42, %v9589_v25  ;;  %v7146_v44 = vpop.permute.xlu0 %7145  ;;  %9176 = vmatprep.subr.mxu0 %v9935_v0  ;;  %v7222_v9 = vpop.permute.xlu1 %7221 }
0x171b   : > { %9164 = vmatmul.mubr.msk.f32.vlgmr.msra.gmra.mrb[64].mxu1 %vm5240_vm4, %v6745_v43 }
0x171c   : > { %v9597_v45 = vpop.eup %9596  ;;  %9172 = vmatpush3.msra.mxu1 %v7055_v49 }
0x171d   : > { %v6746_v47 = vmul.f32 %v9597_v45, %v9591_v30  ;;  %v7144_v48 = vpop.permute.xlu0 %7143  ;;  %9181 = vmatprep.subr.mxu1 %v9935_v0  ;;  %v7380_v29 = vpop.permute.xlu1 %7379 }
0x171f   : > { %9169 = vmatmul.mubr.msk.f32.vlgmr.msra.gmra.mrb[68].mxu0 %vm5240_vm4, %v6746_v47 }
0x1720   : > { %9177 = vmatpush3.xpose.msk.msra.mxu0 %vm771_vm1, %v7146_v44  ;;  %9178 = vmatprep.mubr.msk.f32.mxu0 %vm9936_vm0, %v9935_v0 }
0x1721   : > { %v7302_v50 = vpop.permute.xlu0 %7301  ;;  %9186 = vmatprep.subr.mxu0 %v9935_v0  ;;  %v7378_v62 = vpop.permute.xlu1 %7377 }
0x1723   : > { %9179 = vmatmul.mubr.msk.f32.vlgmr.msra.gmra.mrb[70].mxu0 %vm771_vm1, %v7144_v48 }
0x1724   : > { %9187 = vmatpush3.xpose.msk.msra.mxu0 %vm771_vm1, %v7302_v50  ;;  %9188 = vmatprep.mubr.msk.f32.mxu0 %vm9936_vm0, %v9935_v0 }
0x1725   : > { %v7300_v46 = vpop.permute.xlu0 %7299  ;;  %9196 = vmatprep.subr.mxu0 %v9935_v0 }
0x1727   : > { %9189 = vmatmul.mubr.msk.f32.vlgmr.msra.gmra.mrb[72].mxu0 %vm771_vm1, %v7300_v46 }
0x1728   : > { %9198 = vmatprep.mubr.msk.f32.mxu0 %vm9936_vm0, %v9935_v0 }
0x17ea   : > { %v6897_v61 = vpop.f32.mrb[66].mxu0 }
0x17eb   : > { %v7060_v6 = vcombine.low %v6820_v37, %v6897_v61  ;;  %v9160_v24 = vpop.f32.mrb[67].mxu0 }
0x17ed   : > { %9173 = vmatprep.mubr.msk.f32.mxu1 %vm771_vm1, %v7060_v6 }
0x17ee   : > { %v6974_v27 = vpop.f32.mrb[64].mxu1 }
0x17ef   : > { %v9165_v28 = vpop.f32.mrb[65].mxu1 }
0x17f2   : > { %v7051_v11 = vpop.f32.mrb[68].mxu0 }
0x17f3   : > { %v7061_v15 = vcombine.low %v6974_v27, %v7051_v11  ;;  %v9170_v51 = vpop.f32.mrb[69].mxu0 }
0x17f4   : > { %v7811_v51 = vld [vmem:[#allocation12 + $0x18] sm:$0xff] }
0x17f5   : > { %9174 = vmatmul.mubr.msk.f32.vlgmr.msra.gmra.mrb[58].mxu1 %vm771_vm1, %v7061_v15 }
0x17f6   : > { %9182 = vmatpush3.xpose.msk.msra.mxu1 %vm771_vm1, %v7224_v19  ;;  %v7217_v52 = vpop.f32.mrb[70].mxu0  ;;  %9183 = vmatprep.mubr.msk.f32.mxu1 %vm9936_vm0, %v9935_v0 }
0x17f7   : > { %v7455_v53 = vmul.f32 0.35355338, %v7217_v52  ;;  %v9180_v63 = vpop.f32.mrb[71].mxu0  ;;  %9191 = vmatprep.subr.mxu1 %v9935_v0 }
0x17f9   : > { %9184 = vmatmul.mubr.msk.f32.vlgmr.msra.gmra.mrb[66].mxu1 %vm771_vm1, %v7222_v9  ;;  %v7459_v54 = vsel %vm5193_vm3, %v7455_v53, -inf }
0x17fa   : > { %9192 = vmatpush3.xpose.msk.msra.mxu1 %vm771_vm1, %v7380_v29  ;;  %7460 = vmax.xlane.f32.xlu0 %v7459_v54  ;;  %v7373_v58 = vpop.f32.mrb[72].mxu0 }
0x17fb   : > { %v7457_v59 = vmul.f32 0.35355338, %v7373_v58  ;;  %v9190_v60 = vpop.f32.mrb[73].mxu0  ;;  %9193 = vmatprep.mubr.msk.f32.mxu1 %vm9936_vm0, %v9935_v0  ;;  %9201 = vmatprep.subr.mxu1 %v9935_v0 }
0x17fd   : > { %9194 = vmatmul.mubr.msk.f32.vlgmr.msra.gmra.mrb[68].mxu1 %vm771_vm1, %v7378_v62  ;;  %v7465_v1 = vsel %vm5193_vm3, %v7457_v59, -inf }
0x17fe   : > { %7466 = vmax.xlane.f32.xlu0 %v7465_v1  ;;  %9203 = vmatprep.mubr.msk.f32.mxu1 %vm9936_vm0, %v9935_v0 }
0x1887   : > { %v7461_v2 = vpop.xlane.xlu0 %7460 }
0x1888   : > { %v7471_v3 = vsub.f32 %v7455_v53, %v7461_v2 }
0x188a   : > { %v7475_v5 = vmul.f32 1.442695, %v7471_v3 }
0x188b   : > { %v7467_v4 = vpop.xlane.xlu0 %7466 }
0x188c   : > { %v7473_v7 = vsub.f32 %v7457_v59, %v7467_v4  ;;  %9598 = vpow2.f32 %v7475_v5  ;;  %v8540_v59 = vld [vmem:[#allocation13] ss:$0 sm:$0xff] }
0x188e   : > { %v7479_v8 = vmul.f32 1.442695, %v7473_v7  ;;  %v9950_v7 = vmov 0  }
0x188f   : > { %9477 = vset.pattern.permute.xlu0 %v9950_v7 }
0x1890   : > { %9600 = vpow2.f32 %v7479_v8 }
0x1896   : > { %v9599_v18 = vpop.eup %9598 }
0x1897   : > { %v7483_v26 = vsel %vm5193_vm3, %v9599_v18, 0.0 }
0x189a   : > { %v9601_v31 = vpop.eup %9600 }
0x189b   : > { %v7489_v32 = vsel %vm5193_vm3, %v9601_v31, 0.0 }
0x18cc   : > { %v7295_v10 = vpop.f32.mrb[66].mxu1 }
0x18cd   : > { %v7456_v13 = vmul.f32 0.35355338, %v7295_v10  ;;  %v9185_v16 = vpop.f32.mrb[67].mxu1 }
0x18cf   : > { %v7462_v17 = vsel %vm5193_vm3, %v7456_v13, -inf }
0x18d0   : > { %7463 = vmax.xlane.f32.xlu1 %v7462_v17  ;;  %v7451_v21 = vpop.f32.mrb[68].mxu1 }
0x18d1   : > { %v7458_v22 = vmul.f32 0.35355338, %v7451_v21  ;;  %v9195_v25 = vpop.f32.mrb[69].mxu1 }
0x18d3   : > { %v7468_v30 = vsel %vm5193_vm3, %v7458_v22, -inf }
0x18d4   : > { %7484 = vadd.xlane.f32.xlu1 %v7483_v26  ;;  %7469 = vmax.xlane.f32.xlu0 %v7468_v30 }
0x18d8   : > { %7490 = vadd.xlane.f32.xlu1 %v7489_v32 }
0x18e9   : > { %7503 = vrot.lane.b32.xlu1 %v10795_v34, %s11322_s24 }
0x18ed   : > { %7657 = vrot.lane.b32.xlu1 %v10797_v55, %s11322_s24 }
0x18f1   : > { %7734 = vrot.lane.b32.xlu1 %v10811_v57, %s11322_s24 }
0x195d   : > { %v7464_v33 = vpop.xlane.xlu1 %7463 }
0x195e   : > { %v7472_v35 = vsub.f32 %v7456_v13, %v7464_v33 }
0x1960   : > { %v7477_v36 = vmul.f32 1.442695, %v7472_v35 }
0x1961   : > { %v7470_v37 = vpop.xlane.xlu0 %7469  ;;  %v7485_v38 = vpop.xlane.xlu1 %7484 }
0x1962   : > { %9602 = vpow2.f32 %v7477_v36  ;;  %v7474_v39 = vsub.f32 %v7458_v22, %v7470_v37 }
0x1963   : > { %9604 = vrcp.f32 %v7485_v38 }
0x1964   : > { %v7481_v40 = vmul.f32 1.442695, %v7474_v39 }
0x1965   : > { %v7491_v41 = vpop.xlane.xlu1 %7490 }
0x1966   : > { %9606 = vpow2.f32 %v7481_v40 }
0x1967   : > { %9608 = vrcp.f32 %v7491_v41 }
0x1969   : > { %v7504_v42 = vpop.permute.xlu1 %7503 }
0x196a   : > { %9197 = vmatpush3.msk.msra.mxu0 %vm1061_vm8, %v7504_v42 }
0x196b   : > { %9206 = vmatprep.subr.mxu0 %v9935_v0 }
0x196c   : > { %v9603_v34 = vpop.eup %9602 }
0x196d   : > { %v9605_v55 = vpop.eup %9604  ;;  %v7486_v57 = vsel %vm5193_vm3, %v9603_v34, 0.0  ;;  %v7658_v44 = vpop.permute.xlu1 %7657 }
0x196e   : > { %v7499_v43 = vmul.f32 %v9605_v55, %v9599_v18  ;;  %7487 = vadd.xlane.f32.xlu0 %v7486_v57  ;;  %v765_v57 = vld [vmem:[%s11324_s2] sm:$0xf] }
0x1970   : > { %v9607_v45 = vpop.eup %9606  ;;  %9199 = vmatmul.mubr.msk.f32.vlgmr.msra.gmra.mrb[74].mxu0 %vm5240_vm4, %v7499_v43  ;;  %v8090_v43 = vld [vmem:[#allocation15] sm:$0xff] }
0x1971   : > { %v9609_v47 = vpop.eup %9608  ;;  %9207 = vmatpush3.msk.msra.mxu0 %vm1061_vm8, %v7658_v44  ;;  %v7492_v48 = vsel %vm5193_vm3, %v9607_v45, 0.0  ;;  %9208 = vmatprep.mubr.msk.f32.mxu0 %vm9936_vm0, %v9935_v0  ;;  %v7735_v24 = vpop.permute.xlu1 %7734  ;;  %v8091_v44 = vld [vmem:[#allocation15 + $0x8] sm:$0xff] }
0x1972   : > { %v7501_v50 = vmul.f32 %v9609_v47, %v9601_v31  ;;  %7493 = vadd.xlane.f32.xlu0 %v7492_v48  ;;  %v9272_v47 = vpack.c.bf16 %v8091_v44, %v8090_v43  ;;  %v8093_v48 = vld [vmem:[#allocation15 + $0x18] sm:$0xff] }
0x1974   : > { %9209 = vmatmul.mubr.msk.f32.vlgmr.msra.gmra.mrb[76].mxu0 %vm5240_vm4, %v7501_v50  ;;  %9273 = vmatprep.subr.bf16.mxu0 %v9272_v47 }
0x1975   : > { %9275 = vmatpush3.bf16.msra.mxu0 %v9272_v47 }
0x1988   : > { %7580 = vrot.lane.b32.xlu0 %v10803_v56, %s11322_s24 }
0x19fb   : > { %v7488_v46 = vpop.xlane.xlu0 %7487 }
0x19fc   : > { %9610 = vrcp.f32 %v7488_v46 }
0x19ff   : > { %v7494_v49 = vpop.xlane.xlu0 %7493 }
0x1a00   : > { %9612 = vrcp.f32 %v7494_v49 }
0x1a03   : > { %v7581_v19 = vpop.permute.xlu0 %7580 }
0x1a04   : > { %9202 = vmatpush3.msk.msra.mxu1 %vm1061_vm8, %v7581_v19 }
0x1a05   : > { %9211 = vmatprep.subr.mxu1 %v9935_v0 }
0x1a06   : > { %v9611_v61 = vpop.eup %9610 }
0x1a07   : > { %v7500_v6 = vmul.f32 %v9611_v61, %v9603_v34 }
0x1a09   : > { %9204 = vmatmul.mubr.msk.f32.vlgmr.msra.gmra.mrb[70].mxu1 %vm5240_vm4, %v7500_v6 }
0x1a0a   : > { %v9613_v27 = vpop.eup %9612  ;;  %9212 = vmatpush3.msk.msra.mxu1 %vm1061_vm8, %v7735_v24  ;;  %9213 = vmatprep.mubr.msk.f32.mxu1 %vm9936_vm0, %v9935_v0  ;;  %v7953_v0 = vld [vmem:[%s11323_s7] sm:$0xf]  ;;  %vm8198_vm0 = vcmask 257024  }
0x1a0b   : > { %v7502_v56 = vmul.f32 %v9613_v27, %v9607_v45  ;;  %9216 = vmatprep.subr.mxu1 %v7811_v51  ;;  %9306 = vpush %v7953_v0  ;;  %v7986_v5 = vrot.slane %v7953_v0, 1  ;;  %v8018_v8 = vrot.slane %v7953_v0, 2  ;;  %v8050_v10 = vrot.slane %v7953_v0, 3  ;;  %v8092_v45 = vld [vmem:[#allocation15 + $0x10] sm:$0xff] }
0x1a0c   : > { %v9276_v50 = vpack.c.bf16 %v8093_v48, %v8092_v45 }
0x1a0d   : > { %9214 = vmatmul.mubr.msk.f32.vlgmr.msra.gmra.mrb[72].mxu1 %vm5240_vm4, %v7502_v56 }
0x1a0e   : > { %9217 = vmatpush3.msra.mxu1 %v7811_v51  ;;  %9277 = vmatprep.subr.bf16.mxu0 %v9276_v50 }
0x1a0f   : > { %9279 = vmatpush3.bf16.msra.mxu0 %v9276_v50 }
0x1a3c   : > { %s11129_s28 = spop %9306 }
0x1a43   : > { %v7576_v28 = vpop.f32.mrb[74].mxu0 }
0x1a44   : > { %v9200_v9 = vpop.f32.mrb[75].mxu0 }
0x1a47   : > { %v7730_v11 = vpop.f32.mrb[76].mxu0 }
0x1a48   : > { %v9210_v15 = vpop.f32.mrb[77].mxu0 }
0x1adc   : > { %v7653_v29 = vpop.f32.mrb[70].mxu1 }
0x1add   : > { %v7816_v52 = vcombine.low %v7576_v28, %v7653_v29  ;;  %v9205_v53 = vpop.f32.mrb[71].mxu1 }
0x1ade   : > { %v8542_v53 = vld [vmem:[%s11326_s8] ss:$0 sm:$0xff] }
0x1adf   : > { %9218 = vmatprep.mubr.msk.f32.mxu1 %vm771_vm1, %v7816_v52 }
0x1ae0   : > { %v7807_v63 = vpop.f32.mrb[72].mxu1 }
0x1ae1   : > { %v7817_v54 = vcombine.low %v7730_v11, %v7807_v63  ;;  %v9215_v58 = vpop.f32.mrb[73].mxu1 }
0x1ae2   : > { %v7956_v58 = vstv %s11129_s28  ;;  %s8549_s28 = sshll.u32 %s11334_s3, 4 }
0x1ae3   : > { %9219 = vmatmul.mubr.msk.f32.vlgmr.msra.gmra.mrb[58].mxu1 %vm771_vm1, %v7817_v54 }
0x1bb6   : > { %v9220_v60 = vpop.f32.mrb[58].mxu1 }
0x1bb7   : > { %v7907_v62 = vadd.f32 %v9220_v60, %v8540_v59  ;;  %v7888_v1 = vpop.f32.mrb[59].mxu1 }
0x1bb8   : > { %v7906_v2 = vadd.f32 %v8540_v59, %v7888_v1 }
0x1bb9   : > { %v7911_v3 = vsel %vm1075_vm2, %v7907_v62, 0.0 }
0x1bba   : > { %7912 = vadd.xlane.f32.xlu1 %v7911_v3  ;;  %v7908_v4 = vsel %vm1075_vm2, %v7906_v2, 0.0 }
0x1bbb   : > { %7909 = vadd.xlane.f32.xlu0 %v7908_v4 }
0x1bcb   : > { %7969 = vrot.lane.b32.xlu1 %v7953_v0, %s9948_s1 }
0x1bcf   : > { %7991 = vrot.lane.b32.xlu1 %v7986_v5, %s9949_s27 }
0x1bd1   : > { %7959 = vrot.lane.b32.xlu0 %v7953_v0, %s9949_s27 }
0x1bd3   : > { %8008 = vrot.lane.b32.xlu1 %v7986_v5, %s9951_s19 }
0x1bd5   : > { %7976 = vrot.lane.b32.xlu0 %v7953_v0, %s9951_s19 }
0x1bd7   : > { %8033 = vrot.lane.b32.xlu1 %v8018_v8, %s9948_s1 }
0x1bd9   : > { %8001 = vrot.lane.b32.xlu0 %v7986_v5, %s9948_s1 }
0x1bdb   : > { %8055 = vrot.lane.b32.xlu1 %v8050_v10, %s9949_s27 }
0x1bdd   : > { %8023 = vrot.lane.b32.xlu0 %v8018_v8, %s9949_s27 }
0x1bdf   : > { %8072 = vrot.lane.b32.xlu1 %v8050_v10, %s9951_s19 }
0x1be1   : > { %8040 = vrot.lane.b32.xlu0 %v8018_v8, %s9951_s19 }
0x1be5   : > { %8065 = vrot.lane.b32.xlu0 %v8050_v10, %s9948_s1 }
0x1c47   : > { %v7913_v13 = vpop.xlane.xlu1 %7912 }
0x1c48   : > { %v7916_v16 = vmul.f32 0.03125, %v7913_v13  ;;  %v7910_v17 = vpop.xlane.xlu0 %7909 }
0x1c49   : > { %v7915_v18 = vmul.f32 0.03125, %v7910_v17 }
0x1c4a   : > { %v11116_v21 = vsub.f32 %v7907_v62, %v7916_v16 }
0x1c4b   : > { %v11118_v22 = vsub.f32 %v7906_v2, %v7915_v18  ;;  %v7970_v25 = vpop.permute.xlu1 %7969 }
0x1c4c   : > { %v7920_v26 = vmul.f32 %v11116_v21, %v11116_v21  ;;  %v7960_v30 = vpop.permute.xlu0 %7959 }
0x1c4d   : > { %v7919_v31 = vmul.f32 %v11118_v22, %v11118_v22  ;;  %9308 = vpush %v7960_v30 }
0x1c4e   : > { %v7924_v32 = vsel %vm1075_vm2, %v7920_v26, 0.0  ;;  %9310 = vpush %v7970_v25 }
0x1c4f   : > { %7925 = vadd.xlane.f32.xlu1 %v7924_v32  ;;  %v7921_v33 = vsel %vm1075_vm2, %v7919_v31, 0.0  ;;  %v7992_v35 = vpop.permute.xlu1 %7991 }
0x1c50   : > { %7922 = vadd.xlane.f32.xlu0 %v7921_v33  ;;  %v7977_v36 = vpop.permute.xlu0 %7976 }
0x1c51   : > { %9312 = vpush %v7977_v36 }
0x1c52   : > { %9314 = vpush %v7986_v5 }
0x1c53   : > { %9316 = vpush %v7992_v35  ;;  %v8009_v37 = vpop.permute.xlu1 %8008 }
0x1c54   : > { %v8002_v38 = vpop.permute.xlu0 %8001 }
0x1c55   : > { %9318 = vpush %v8002_v38 }
0x1c56   : > { %9320 = vpush %v8009_v37 }
0x1c57   : > { %v8034_v39 = vpop.permute.xlu1 %8033  ;;  %9322 = vpush %v8018_v8 }
0x1c58   : > { %v8024_v40 = vpop.permute.xlu0 %8023 }
0x1c59   : > { %9324 = vpush %v8024_v40 }
0x1c5a   : > { %9326 = vpush %v8034_v39 }
0x1c5b   : > { %v8056_v41 = vpop.permute.xlu1 %8055 }
0x1c5c   : > { %v8041_v42 = vpop.permute.xlu0 %8040 }
0x1c5d   : > { %9328 = vpush %v8041_v42 }
0x1c5e   : > { %9330 = vpush %v8050_v10 }
0x1c5f   : > { %9332 = vpush %v8056_v41  ;;  %v8073_v34 = vpop.permute.xlu1 %8072 }
0x1c60   : > { %v8066_v55 = vpop.permute.xlu0 %8065 }
0x1c61   : > { %9334 = vpush %v8066_v55 }
0x1c62   : > { %9336 = vpush %v8073_v34 }
0x1c66   : > { %768 = vperm.xlu0 %9477, %v765_v57  }
0x1c7e   : > { %s11131_s21 = spop %9308 }
0x1c7f   : > { %s11133_s26 = spop %9310  ;;  %v7962_v59 = vstv %s11131_s21 }
0x1c80   : > { %v7972_v60 = vstv %s11133_s26 }
0x1c82   : > { %s11135_s16 = spop %9312 }
0x1c83   : > { %s11137_s29 = spop %9314  ;;  %v7979_v62 = vstv %s11135_s16  ;;  %s11328_s16 = sld [smem:[#allocation37_spill]] }
0x1c84   : > { %s11139_s0 = spop %9316  ;;  %v7988_v2 = vstv %s11137_s29 }
0x1c85   : > { %v7994_v3 = vstv %s11139_s0 }
0x1c86   : > { %s11141_s24 = spop %9318 }
0x1c87   : > { %s11143_s25 = spop %9320  ;;  %v8004_v4 = vstv %s11141_s24 }
0x1c88   : > { %s11145_s17 = spop %9322  ;;  %v8011_v7 = vstv %s11143_s25 }
0x1c89   : > { %v8020_v8 = vstv %s11145_s17  ;;  %s759_s29 = scalar_lea.vmem %s11328_s16, %s8549_s28 }
0x1c8a   : > { %s11149_s7 = spop %9324 }
0x1c8b   : > { %s11153_s1 = spop %9326  ;;  %v8026_v10 = vstv %s11149_s7 }
0x1c8c   : > { %v8036_v13 = vstv %s11153_s1 }
0x1c8e   : > { %s11155_s27 = spop %9328 }
0x1c8f   : > { %s11166_s2 = spop %9330  ;;  %v8043_v16 = vstv %s11155_s27 }
0x1c90   : > { %s11173_s9 = spop %9332  ;;  %v8052_v17 = vstv %s11166_s2 }
0x1c92   : > { %s11176_s19 = spop %9334 }
0x1c93   : > { %s9337_s5 = spop %9336  ;;  %v8068_v45 = vstv %s11176_s19 }
0x1c94   : > { %v8075_v25 = vstv %s9337_s5 }
0x1cdc   : > { %v7926_v46 = vpop.xlane.xlu1 %7925 }
0x1cdd   : > { %v7928_v49 = vmul.f32 0.03125, %v7926_v46  ;;  %v7923_v19 = vpop.xlane.xlu0 %7922 }
0x1cde   : > { %v7927_v61 = vmul.f32 0.03125, %v7923_v19 }
0x1cdf   : > { %v7930_v6 = vadd.f32 1e-05, %v7928_v49 }
0x1ce0   : > { %v7929_v24 = vadd.f32 1e-05, %v7927_v61 }
0x1ce1   : > { %9614 = vrsqrt.f32 %v7930_v6 }
0x1ce2   : > { %9616 = vrsqrt.f32 %v7929_v24 }
0x1ce5   : > { %v769_v27 = vpop.permute.xlu0 %768 }
0x1ce6   : > { %v912_v56 = vadd.f32 %v10414_v20, %v769_v27  ;;  %v1052_v28 = vadd.f32 %v10418_v23, %v769_v27  ;;  %v842_v9 = vadd.f32 %v10405_v12, %v769_v27  ;;  %v982_v11 = vadd.f32 %v10407_v14, %v769_v27  ;;  %v8541_v12 = vld [vmem:[%s11325_s12] ss:$0 sm:$0xff] }
0x1ce8   : > { %v1056_v15 = vrot.slane %v912_v56, 4  ;;  %v1059_v51 = vrot.slane %v1052_v28, 4 }
0x1cea   : > { %v11158_v29 = vsel %vm1061_vm8, %v982_v11, %v1059_v51  ;;  %v11161_v20 = vsel %vm1061_vm8, %v842_v9, %v1056_v15 }
0x1ceb   : > { %v9615_v23 = vpop.eup %9614 }
0x1cec   : > { %v9617_v14 = vpop.eup %9616  ;;  %v7934_v52 = vmul.f32 %v9615_v23, %v11116_v21 }
0x1ced   : > { %v7933_v63 = vmul.f32 %v9617_v14, %v11118_v22  ;;  %v8058_v22 = vstv %s11173_s9  ;;  %s11327_s9 = sld [smem:[#allocation36_spill]] }
0x1cee   : > { %v7943_v54 = vmul.f32 %v8541_v12, %v7934_v52 }
0x1cef   : > { %v7942_v0 = vmul.f32 %v8541_v12, %v7933_v63 }
0x1cf0   : > { %v11181_v1 = vadd.f32 %v8542_v53, %v7943_v54 }
0x1cf1   : > { %v11186_v5 = vadd.f32 %v8542_v53, %v7942_v0 }
0x1cf2   : > { %v8013_v26 = vmul.f32 %v8011_v7, %v11181_v1  ;;  %v7974_v36 = vmul.f32 %v7972_v60, %v11181_v1  ;;  %v7981_v41 = vmul.f32 %v7979_v62, %v11181_v1  ;;  %v8006_v34 = vmul.f32 %v8004_v4, %v11181_v1 }
0x1cf3   : > { %v7964_v18 = vmul.f32 %v7962_v59, %v11186_v5  ;;  %v7996_v21 = vmul.f32 %v7994_v3, %v11186_v5  ;;  %v8028_v30 = vmul.f32 %v8026_v10, %v11186_v5  ;;  %v7958_v31 = vmul.f32 %v7956_v58, %v11186_v5  ;;  %v8543_v53 = vld [vmem:[%s11327_s9] ss:$0 sm:$0xff] }
0x1cf4   : > { %v7990_v33 = vmul.f32 %v7988_v2, %v11186_v5  ;;  %v8022_v37 = vmul.f32 %v8020_v8, %v11186_v5  ;;  %v8060_v39 = vmul.f32 %v8058_v22, %v11186_v5  ;;  %v8054_v57 = vmul.f32 %v8052_v17, %v11186_v5 }
0x1cf5   : > { %v7966_v32 = vrot.slane %v7964_v18, 4  ;;  %v7998_v35 = vrot.slane %v7996_v21, 4  ;;  %v8030_v38 = vrot.slane %v8028_v30, 4  ;;  %v8077_v44 = vmul.f32 %v8075_v25, %v11181_v1 }
0x1cf6   : > { %v8062_v43 = vrot.slane %v8060_v39, 4  ;;  %v8015_v50 = vrot.slane %v8013_v26, 4  ;;  %v8038_v46 = vmul.f32 %v8036_v13, %v11181_v1  ;;  %v8045_v49 = vmul.f32 %v8043_v16, %v11181_v1 }
0x1cf7   : > { %v7968_v40 = vadd.f32 %v7966_v32, %v7958_v31  ;;  %v8000_v42 = vadd.f32 %v7998_v35, %v7990_v33  ;;  %v8032_v55 = vadd.f32 %v8030_v38, %v8022_v37  ;;  %v8070_v61 = vmul.f32 %v8068_v45, %v11181_v1 }
0x1cf8   : > { %v8064_v19 = vadd.f32 %v8062_v43, %v8054_v57  ;;  %v7983_v6 = vrot.slane %v7981_v41, 4  ;;  %v8079_v28 = vrot.slane %v8077_v44, 4  ;;  %v8047_v15 = vrot.slane %v8045_v49, 4 }
0x1cf9   : > { %v7975_v47 = vadd.f32 %v7974_v36, %v7968_v40  ;;  %v8007_v48 = vadd.f32 %v8006_v34, %v8000_v42  ;;  %v8039_v27 = vadd.f32 %v8038_v46, %v8032_v55  ;;  %v8185_v62 = vmul.f32 0.5, %v11181_v1 }
0x1cfa   : > { %v8071_v56 = vadd.f32 %v8070_v61, %v8064_v19  ;;  %v8184_v3 = vmul.f32 0.5, %v11186_v5 }
0x1cfb   : > { %v8017_v24 = vadd.f32 %v8015_v50, %v8007_v48  ;;  %v7985_v9 = vadd.f32 %v7983_v6, %v7975_v47  ;;  %v8049_v12 = vadd.f32 %v8047_v15, %v8039_v27 }
0x1cfc   : > { %v8081_v51 = vadd.f32 %v8079_v28, %v8071_v56 }
0x1cfd   : > { %v8083_v11 = vrot.slane %v8017_v24, 4 }
0x1cfe   : > { %v8086_v14 = vrot.slane %v8081_v51, 4 }
0x1cff   : > { %v8088_v23 = vsel %vm1061_vm8, %v7985_v9, %v8083_v11 }
0x1d00   : > { %9229 = vmatprep.mubr.msk.f32.mxu0 %vm1075_vm2, %v8088_v23  ;;  %v8089_v52 = vsel %vm1061_vm8, %v8049_v12, %v8086_v14 }
0x1d01   : > { %9230 = vmatmul.mubr.msk.f32.vlgmr.msra.gmra.mrb[78].mxu0 %vm1075_vm2, %v8089_v52 }
0x1dd4   : > { %v9231_v63 = vpop.f32.mrb[78].mxu0 }
0x1dd5   : > { %v8179_v54 = vadd.f32 %v9231_v63, %v8543_v53  ;;  %v8173_v58 = vpop.f32.mrb[79].mxu0 }
0x1dd6   : > { %v8174_v0 = vadd.f32 %v8543_v53, %v8173_v58 }
0x1dd7   : > { %v8183_v59 = vmax.f32 %v8179_v54, 0.0 }
0x1dd8   : > { %v8182_v60 = vmax.f32 %v8174_v0, 0.0 }
0x1dd9   : > { %v8187_v2 = vmul.f32 0.5, %v8183_v59 }
0x1dda   : > { %v8186_v4 = vmul.f32 0.5, %v8182_v60 }
0x1ddb   : > { %v8189_v7 = vadd.f32 %v8187_v2, %v8185_v62 }
0x1ddc   : > { %v8188_v8 = vadd.f32 %v8186_v4, %v8184_v3 }
0x1ddd   : > { %v8191_v10 = vadd.f32 %v8189_v7, %v11158_v29 }
0x1dde   : > { %v8190_v13 = vadd.f32 %v8188_v8, %v11161_v20 }
0x1ddf   : > { %v8195_v16 = vcombine.high %v8191_v10, %v8191_v10  ;;  %8201 = vst.msk [vmem:[%s759_s29 + $0x8] sm:$0xf] %vm8198_vm0, %v8191_v10 }
0x1de0   : > { %v8194_v17 = vcombine.high %v8190_v13, %v8190_v13  ;;  %8199 = vst.msk [vmem:[%s759_s29] sm:$0xf] %vm8198_vm0, %v8190_v13 }
0x1de1   : > { %8202 = vst.msk [vmem:[%s759_s29 + $0xc] sm:$0xf] %vm8198_vm0, %v8195_v16 }
0x1de2   : > { %8200 = vst.msk [vmem:[%s759_s29 + $0x4] sm:$0xf] %vm8198_vm0, %v8194_v17 }
0x1de3 PF: > { %p34_p10 = scmp.ge.s32.totalorder %s10283_s4, 4   ;;  %s11329_s1 = smov %s9914_s22 }
0x1de4   : > { %s11330_s22 = smov %s9918_s23  ;;  %s11331_s23 = smov %s10295_s20 }
0x1de5   : > { %s11332_s24 = smov %s10283_s4  ;;  %36 = sbr.rel (!%p34_p10) target bundleno = 25 (0x19), region = 174 }
0x1dec   :  { %8224 = vsyncpa [#allocation3], 1 }
0x1ded   :  { %8226 = vsyncpa [#allocation3 + $0x1], 1 }
0x1dee   :  { %8227 = vsyncpa [#allocation5], 1 }
0x1def   :  { %8228 = vsyncpa [#allocation8], 1 }
0x1df0   :  { %8229 = vsyncpa [#allocation11], 1 }
0x1df1   :  { %8230 = vsyncpa [#allocation14], 1 }

// kernel: encoder_forward.3
= control target key start
LH: loop header
LB: loop body
LE: loop exit
PB: predicated region body
PF: predicated region fallthrough
CT: control target
= control target key end

     0   :  { %s10343_s0 = inlined_call_operand.vmem [shape: f32[2,4,4,32], index: 0, kind: input, shape index: {}]   ;;  %s10344_s1 = inlined_call_operand.vmem [shape: f32[4,4], index: 1, kind: input, shape index: {}]   ;;  %s10345_s2 = inlined_call_operand.vmem [shape: f32[2,4], index: 2, kind: input, shape index: {}]   ;;  %s10346_s3 = inlined_call_operand.vmem [shape: f32[2,1], index: 3, kind: input, shape index: {}]   ;;  %s10347_s4 = inlined_call_operand.vmem [shape: f32[32,96], index: 4, kind: input, shape index: {}]   ;;  %s10348_s5 = inlined_call_operand.vmem [shape: f32[1,96], index: 5, kind: input, shape index: {}]   ;;  %s10349_s6 = inlined_call_operand.vmem [shape: f32[32,32], index: 6, kind: input, shape index: {}]   ;;  %s10350_s7 = inlined_call_operand.vmem [shape: f32[1,32], index: 7, kind: input, shape index: {}]   ;;  %s10351_s8 = inlined_call_operand.vmem [shape: f32[3,32,32], index: 8, kind: input, shape index: {}]   ;;  %s10352_s9 = inlined_call_operand.vmem [shape: f32[1,32], index: 9, kind: input, shape index: {}]   ;;  %s10353_s10 = inlined_call_operand.vmem [shape: f32[1,32], index: 10, kind: input, shape index: {}]   ;;  %s10354_s11 = inlined_call_operand.vmem [shape: f32[1,32], index: 11, kind: input, shape index: {}]   ;;  %s10355_s12 = inlined_call_operand.vmem [shape: f32[32,96], index: 12, kind: input, shape index: {}]   ;;  %s10356_s13 = inlined_call_operand.vmem [shape: f32[1,96], index: 13, kind: input, shape index: {}]   ;;  %s10357_s14 = inlined_call_operand.vmem [shape: f32[32,32], index: 14, kind: input, shape index: {}]   ;;  %s10358_s15 = inlined_call_operand.vmem [shape: f32[1,32], index: 15, kind: input, shape index: {}]   ;;  %s10359_s16 = inlined_call_operand.vmem [shape: f32[1,32], index: 16, kind: input, shape index: {}]   ;;  %s10360_s17 = inlined_call_operand.vmem [shape: f32[1,32], index: 17, kind: input, shape index: {}]   ;;  %s10361_s18 = inlined_call_operand.vmem [shape: f32[32,32], index: 18, kind: input, shape index: {}]   ;;  %s10362_s19 = inlined_call_operand.vmem [shape: f32[1,32], index: 19, kind: input, shape index: {}]   ;;  %s10363_s20 = inlined_call_operand.hbm [shape: f32[2,4,2,32], index: 20, kind: output, shape index: {}]  }
   0x1   :  { %10386 = sst [smem:[#allocation12_spill]] %s10343_s0 }
   0x2   :  { %10387 = sst [smem:[#allocation13_spill]] %s10344_s1 }
   0x3   :  { %10388 = sst [smem:[#allocation14_spill]] %s10345_s2 }
   0x4   :  { %10389 = sst [smem:[#allocation15_spill]] %s10346_s3 }
   0x5   :  { %10390 = sst [smem:[#allocation16_spill]] %s10347_s4 }
   0x6   :  { %10391 = sst [smem:[#allocation17_spill]] %s10348_s5 }
   0x7   :  { %10392 = sst [smem:[#allocation18_spill]] %s10349_s6 }
   0x8   :  { %10393 = sst [smem:[#allocation19_spill]] %s10350_s7 }
   0x9   :  { %10394 = sst [smem:[#allocation20_spill]] %s10351_s8 }
   0xa   :  { %10395 = sst [smem:[#allocation21_spill]] %s10352_s9 }
   0xb   :  { %10396 = sst [smem:[#allocation22_spill]] %s10363_s20 }
   0xc   :  { %25 = vsyncpa [#allocation3], 0 }
   0xd   :  { %27 = vsyncpa [#allocation3 + $0x1], 0  ;;  %s9323_s1 = smov 0   ;;  %s9325_s22 = smov 0  }
   0xe   :  { %s9327_s23 = smov 0   ;;  %s9329_s24 = smov 0  }
   0xf LB: > { %10397 = sst [smem:[#allocation5_spill]] %s9182_s1  ;;  %s9344_s2 = sadd.s32 4294967295, %s9194_s24   ;;  %s9194_s24 = sphi %s9329_s24, %s10428_s24   ;;  %s9190_s23 = sphi %s9327_s23, %s10430_s23   ;;  %s9186_s22 = sphi %s9325_s22, %s10432_s22   ;;  %s9182_s1 = sphi %s9323_s1, %s10431_s1  }
  0x10   : > { %10398 = sst [smem:[#allocation6_spill]] %s9190_s23  ;;  %s8021_s25 = sadd.s32 4294967294, %s9194_s24  }
  0x11   : > { %10399 = sst [smem:[#allocation7_spill]] %s9194_s24  ;;  %s9348_s3 = sadd.s32 1, %s9194_s24  }
  0x12   : > { %10400 = sst [smem:[#allocation8_spill]] %s9348_s3  ;;  %s465_s26 = sadd.s32 1, %s9190_s23 }
  0x13   : > { %s462_s27 = ssub.s32 %s9194_s24, %s9348_s3  ;;  %p475_p0 = scmp.ne.s32.totalorder %s9190_s23, %s9186_s22 }
  0x14   : > { %p463_p1 = scmp.eq.s32.totalorder %s462_s27, 0  ;;  %p476_p2 = scmp.eq.s32.totalorder %s9344_s2, 1 }
  0x15   : > { %p481_p3 = scmp.ne.s32.totalorder %s9186_s22, %s9182_s1  ;;  %p482_p4 = scmp.eq.s32.totalorder %s8021_s25, 1 }
  0x16   : > { %s9359_s28 = scalar_select %p463_p1, %s9190_s23, %s465_s26  }
  0x17   : > { %p9361_p5 = por %p476_p2, %p475_p0  ;;  %p9365_p6 = por %p482_p4, %p481_p3 }
  0x18   : > { %10401 = sst [smem:[#allocation9_spill]] %s9359_s28  ;;  %p8024_p7 = scmp.ge.s32.totalorder %s9194_s24, 1 }
  0x19   : > { %s10402_s4 = scalar_select %p9361_p5, 1, 0 }
  0x1a   : > { %s10404_s29 = scalar_select %p9365_p6, 1, 0 }
  0x1b   : > { %10403 = sst [smem:[#allocation10_spill]] %s10402_s4  ;;  %p565_p8 = scmp.lt.s32.totalorder %s9194_s24, 3 }
  0x1c   : > { %10405 = sst [smem:[#allocation11_spill]] %s10404_s29 }
  0x1d   : > { %p566_p9 = pnand %p8024_p7, %p565_p8 }
  0x1e   : > { %p623_p10 = scmp.lt.s32.totalorder (!%p566_p9), %s9344_s2, 1  ;;  %v9196_v0 = vmov (!%p566_p9), 0.0   ;;  %vm9197_vm0 = vmmov (!%p566_p9), 0   ;;  %s10406_s21 = sld [smem:[#allocation16_spill]] (!%p566_p9)  ;;  %vm643_vm1 = vcmask (!%p566_p9), 1043456   ;;  %vm639_vm2 = vcmask (!%p566_p9), 31744  }
  0x1f   : > { %569 = sbr.rel (%p566_p9) target bundleno = 7691 (0x1e0b), region = 100  ;;  %8413 = vmatprep.subr.mxu0 (!%p566_p9), %v9196_v0  ;;  %8415 = vmatprep.mubr.msk.f32.mxu0 (!%p566_p9), %vm9197_vm0, %v9196_v0  ;;  %s10407_s26 = sld [smem:[#allocation12_spill]] (!%p566_p9)  ;;  %vm963_vm3 = vcmask (!%p566_p9), 261120   ;;  %vm1049_vm4 = vcmask (!%p566_p9), 64512   ;;  %vm1356_vm5 = vcmask (!%p566_p9), 27648   ;;  %vm4072_vm6 = vcmask (!%p566_p9), 1040384  }
  0x20   : > { %8403 = vmatprep.subr.mxu1 (!%p566_p9), %v9196_v0  ;;  %8405 = vmatprep.mubr.msk.f32.mxu1 (!%p566_p9), %vm9197_vm0, %v9196_v0  ;;  %s10408_s4 = sld [smem:[#allocation14_spill]] (!%p566_p9)  ;;  %s10409_s5 = sld [smem:[#allocation17_spill]] (!%p566_p9)  ;;  %vm4079_vm7 = vcmask (!%p566_p9), 1046528   ;;  %vm945_vm14 = vcmask (!%p566_p9), 1041408   ;;  %vm4457_vm15 = vcmask (!%p566_p9), 1042432  }
  0x21   : > { %s9198_s23 = smov (!%p566_p9), 96   ;;  %s9199_s24 = smov (!%p566_p9), 64  }
  0x22   : > { %s9200_s3 = smov (!%p566_p9), 88   ;;  %s9201_s28 = smov (!%p566_p9), 120  }
  0x23   : > { %s10382_s29 = smov (!%p566_p9), 112   ;;  %s10410_s6 = sld [smem:[#allocation18_spill]] (!%p566_p9) }
  0x24   : > { %v950_v1 = vld [vmem:[%s10406_s21] sm:$0xff] (!%p566_p9)  ;;  %v951_v2 = vld [vmem:[%s10406_s21 + $0x8] sm:$0xff] (!%p566_p9)  ;;  %v952_v3 = vld [vmem:[%s10406_s21 + $0x10] sm:$0xff] (!%p566_p9)  ;;  %s10380_s20 = smov (!%p566_p9), 48   ;;  %s10411_s8 = sld [smem:[#allocation20_spill]] (!%p566_p9) }
  0x25   : > { %v953_v4 = vld [vmem:[%s10406_s21 + $0x18] sm:$0xff] (!%p566_p9)  ;;  %v8849_v5 = vpack.c.bf16 (!%p566_p9), %v951_v2, %v950_v1  ;;  %s10412_s7 = sld [smem:[#allocation19_spill]] (!%p566_p9)  ;;  %s10413_s9 = sld [smem:[#allocation21_spill]] (!%p566_p9) }
  0x26   : > { %s624_s27 = scalar_select %p623_p10, %s9344_s2, 1  ;;  %v632_v6 = vld [vmem:[%s10408_s4] sm:$0x3]  ;;  %v8853_v8 = vpack.c.bf16 %v953_v4, %v952_v3 }
  0x27   : > { %v8036_v16 = vld [vmem:[%s10409_s5] ss:$0 sm:$0xff]  ;;  %s9202_s4 = smov 56   ;;  %s10419_s0 = smov 40  }
  0x28   : > { %s8211_s30 = sshll.u32 %s624_s27, 4  ;;  %s10384_s27 = smov 80  }
  0x29   : > { %s627_s1 = scalar_lea.vmem %s10407_s26, %s8211_s30  ;;  %s10376_s30 = smov 104  }
  0x2a   : > { %v630_v7 = vld [vmem:[%s627_s1 + $0x8] sm:$0xf]  ;;  %v628_v9 = vld [vmem:[%s627_s1] sm:$0xf]  ;;  %v629_v10 = vld [vmem:[%s627_s1 + $0x4] sm:$0xf] }
  0x2b   : > { %8414 = vmatpush3.msk.msra.mxu0 %vm643_vm1, %v630_v7  ;;  %8404 = vmatpush3.msk.msra.mxu1 %vm643_vm1, %v628_v9  ;;  %v961_v11 = vcombine.low %v628_v9, %v629_v10  ;;  %v631_v12 = vld [vmem:[%s627_s1 + $0xc] sm:$0xf]  ;;  %s10378_s1 = smov 72   ;;  %s10374_s26 = smov 40  }
  0x2c   : > { %8416 = vmatmul.mubr.msk.f32.vlgmr.msra.gmra.mrb[0].mxu0 %vm639_vm2, %v632_v6  ;;  %8850 = vmatprep.subr.bf16.mxu0 %v8849_v5  ;;  %v962_v13 = vcombine.low %v630_v7, %v631_v12 }
  0x2d   : > { %8852 = vmatpush3.bf16.msra.mxu0 %v8849_v5  ;;  %8406 = vmatmul.mubr.msk.f32.vlgmr.msra.gmra.mrb[0].mxu1 %vm639_vm2, %v632_v6 }
  0x2e   : > { %8854 = vmatprep.subr.bf16.mxu0 %v8853_v8  ;;  %8431 = vmatprep.mubr.msk.f32.mxu0 %vm963_vm3, %v961_v11 }
  0x2f   : > { %8408 = vmatprep.subr.mxu1 %v9196_v0  ;;  %8410 = vmatprep.mubr.msk.f32.mxu1 %vm9197_vm0, %v9196_v0 }
  0x30   : > { %8409 = vmatpush3.msk.msra.mxu1 %vm643_vm1, %v629_v10 }
  0x31   : > { %8856 = vmatpush3.bf16.msra.mxu0 %v8853_v8  ;;  %8411 = vmatmul.mubr.msk.f32.vlgmr.msra.gmra.mrb[2].mxu1 %vm639_vm2, %v632_v6 }
  0x32   : > { %8418 = vmatprep.subr.mxu1 %v9196_v0  ;;  %8420 = vmatprep.mubr.msk.f32.mxu1 %vm9197_vm0, %v9196_v0 }
  0x33   : > { %8419 = vmatpush3.msk.msra.mxu1 %vm643_vm1, %v631_v12  ;;  %8444 = vmatprep.subr.mxu0 %v9196_v0 }
  0x34   : > { %8432 = vmatmul.mubr.msk.f32.vlgmr.msra.gmra.mrb[2].mxu0 %vm963_vm3, %v962_v13  ;;  %8434 = vmatprep.subr.mxu1 %v9196_v0 }
  0x35   : > { %8421 = vmatmul.mubr.msk.f32.vlgmr.msra.gmra.mrb[4].mxu1 %vm639_vm2, %v632_v6  ;;  %8446 = vmatprep.mubr.msk.f32.mxu0 %vm9197_vm0, %v9196_v0 }
  0x36   : > { %8436 = vmatprep.mubr.msk.f32.mxu1 %vm9197_vm0, %v9196_v0 }
  0xff   : > { %v9419_v14 = vpop.f32.mrb[0].mxu0 }
 0x100   : > { %v8417_v15 = vpop.f32.mrb[1].mxu0  ;;  %v9428_v21 = vpop.f32.mrb[0].mxu1 }
 0x101   : > { %v8407_v22 = vpop.f32.mrb[1].mxu1 }
 0x104   : > { %v9434_v23 = vpop.f32.mrb[2].mxu1 }
 0x105   : > { %v8412_v25 = vpop.f32.mrb[3].mxu1 }
 0x107   : > { %v8433_v17 = vpop.f32.mrb[2].mxu0 }
 0x108   : > { %v9424_v18 = vadd.f32 %v8433_v17, %v8036_v16  ;;  %v1034_v19 = vpop.f32.mrb[3].mxu0  ;;  %v9444_v27 = vpop.f32.mrb[4].mxu1 }
 0x109   : > { %v9426_v20 = vadd.f32 %v8036_v16, %v1034_v19  ;;  %v8422_v28 = vpop.f32.mrb[5].mxu1 }
 0x10a   : > { %1200 = vrot.lane.b32.xlu1 %v9424_v18, %s9198_s23  ;;  %v9438_v24 = vcombine.high %v9424_v18, %v9424_v18 }
 0x10b   : > { %1047 = vrot.lane.b32.xlu0 %v9426_v20, %s9198_s23  ;;  %v9442_v26 = vcombine.high %v9426_v20, %v9426_v20 }
 0x10e   : > { %1276 = vrot.lane.b32.xlu1 %v9438_v24, %s9198_s23 }
 0x10f   : > { %1124 = vrot.lane.b32.xlu0 %v9442_v26, %s9198_s23 }
 0x17c   : > { %v1201_v29 = vpop.permute.xlu1 %1200 }
 0x17d   : > { %8445 = vmatpush3.xpose.msk.msra.mxu0 %vm1049_vm4, %v1201_v29  ;;  %v1048_v30 = vpop.permute.xlu0 %1047 }
 0x17e   : > { %8435 = vmatpush3.xpose.msk.msra.mxu1 %vm1049_vm4, %v1048_v30  ;;  %8454 = vmatprep.subr.mxu0 %v9196_v0 }
 0x17f   : > { %8439 = vmatprep.subr.mxu1 %v9196_v0 }
 0x180   : > { %8447 = vmatmul.mubr.msk.f32.vlgmr.msra.gmra.mrb[4].mxu0 %vm1049_vm4, %v9424_v18  ;;  %v1277_v32 = vpop.permute.xlu1 %1276 }
 0x181   : > { %v1125_v31 = vpop.permute.xlu0 %1124  ;;  %8437 = vmatmul.mubr.msk.f32.vlgmr.msra.gmra.mrb[6].mxu1 %vm1049_vm4, %v9426_v20  ;;  %8456 = vmatprep.mubr.msk.f32.mxu0 %vm9197_vm0, %v9196_v0 }
 0x182   : > { %8440 = vmatpush3.xpose.msk.msra.mxu1 %vm1049_vm4, %v1125_v31  ;;  %8441 = vmatprep.mubr.msk.f32.mxu1 %vm9197_vm0, %v9196_v0 }
 0x183   : > { %8449 = vmatprep.subr.mxu1 %v9196_v0 }
 0x185   : > { %8442 = vmatmul.mubr.msk.f32.vlgmr.msra.gmra.mrb[8].mxu1 %vm1049_vm4, %v9442_v26 }
 0x186   : > { %8450 = vmatpush3.xpose.msk.msra.mxu1 %vm1049_vm4, %v1277_v32  ;;  %8451 = vmatprep.mubr.msk.f32.mxu1 %vm9197_vm0, %v9196_v0 }
 0x187   : > { %8459 = vmatprep.subr.mxu1 %v9196_v0 }
 0x189   : > { %8452 = vmatmul.mubr.msk.f32.vlgmr.msra.gmra.mrb[10].mxu1 %vm1049_vm4, %v9438_v24 }
 0x18a   : > { %8461 = vmatprep.mubr.msk.f32.mxu1 %vm9197_vm0, %v9196_v0 }
 0x253   : > { %v1272_v33 = vpop.f32.mrb[4].mxu0 }
 0x254   : > { %v1120_v34 = vpop.f32.mrb[6].mxu1  ;;  %v8448_v35 = vpop.f32.mrb[5].mxu0  ;;  %v1354_v38 = vmul.f32 0.35355338, %v1272_v33 }
 0x255   : > { %v1352_v36 = vmul.f32 0.35355338, %v1120_v34  ;;  %v8438_v37 = vpop.f32.mrb[7].mxu1 }
 0x256   : > { %v1363_v43 = vsel %vm1356_vm5, %v1354_v38, -inf }
 0x257   : > { %v1357_v39 = vsel %vm1356_vm5, %v1352_v36, -inf }
 0x258   : > { %1358 = vmax.xlane.f32.xlu0 %v1357_v39  ;;  %v1196_v40 = vpop.f32.mrb[8].mxu1 }
 0x259   : > { %v1353_v41 = vmul.f32 0.35355338, %v1196_v40  ;;  %v8443_v42 = vpop.f32.mrb[9].mxu1 }
 0x25b   : > { %v1360_v44 = vsel %vm1356_vm5, %v1353_v41, -inf }
 0x25c   : > { %1364 = vmax.xlane.f32.xlu0 %v1363_v43  ;;  %1361 = vmax.xlane.f32.xlu1 %v1360_v44  ;;  %v1348_v45 = vpop.f32.mrb[10].mxu1 }
 0x25d   : > { %v8453_v46 = vpop.f32.mrb[11].mxu1  ;;  %v1355_v47 = vmul.f32 0.35355338, %v1348_v45 }
 0x25f   : > { %v1366_v48 = vsel %vm1356_vm5, %v1355_v47, -inf }
 0x26d   : > { %1401 = vrot.lane.b32.xlu1 %v9426_v20, %s9199_s24 }
 0x271   : > { %1555 = vrot.lane.b32.xlu1 %v9424_v18, %s9199_s24 }
 0x272   : > { %1478 = vrot.lane.b32.xlu0 %v9442_v26, %s9199_s24 }
 0x275   : > { %1632 = vrot.lane.b32.xlu1 %v9438_v24, %s9199_s24 }
 0x279   : > { %1790 = vrot.lane.b32.xlu1 %v9442_v26, %s9200_s3 }
 0x291   : > { %1367 = vmax.xlane.f32.xlu0 %v1366_v48 }
 0x2a7   : > { %1712 = vrot.lane.b32.xlu0 %v9426_v20, %s9200_s3 }
 0x2e5   : > { %v1359_v49 = vpop.xlane.xlu0 %1358 }
 0x2e6   : > { %v1369_v50 = vsub.f32 %v1352_v36, %v1359_v49 }
 0x2e8   : > { %v1373_v55 = vmul.f32 1.442695, %v1369_v50 }
 0x2e9   : > { %v1365_v51 = vpop.xlane.xlu0 %1364  ;;  %v1362_v52 = vpop.xlane.xlu1 %1361 }
 0x2ea   : > { %v1371_v53 = vsub.f32 %v1354_v38, %v1365_v51  ;;  %v1370_v54 = vsub.f32 %v1353_v41, %v1362_v52 }
 0x2ec   : > { %v1377_v56 = vmul.f32 1.442695, %v1371_v53  ;;  %v1375_v57 = vmul.f32 1.442695, %v1370_v54 }
 0x2ed   : > { %v1479_v58 = vpop.permute.xlu0 %1478  ;;  %v1402_v59 = vpop.permute.xlu1 %1401 }
 0x2ee   : > { %8998 = vpow2.f32 %v1377_v56  ;;  %8455 = vmatpush3.msk.msra.mxu0 %vm643_vm1, %v1402_v59  ;;  %8460 = vmatpush3.msk.msra.mxu1 %vm643_vm1, %v1479_v58 }
 0x2ef   : > { %9000 = vpow2.f32 %v1375_v57  ;;  %8469 = vmatprep.subr.mxu1 %v9196_v0  ;;  %8464 = vmatprep.subr.mxu0 %v9196_v0 }
 0x2f0   : > { %9002 = vpow2.f32 %v1373_v55 }
 0x2f1   : > { %v1556_v8 = vpop.permute.xlu1 %1555 }
 0x2f5   : > { %v1633_v9 = vpop.permute.xlu1 %1632 }
 0x2f8   : > { %v8999_v60 = vpop.eup %8998 }
 0x2f9   : > { %v9001_v61 = vpop.eup %9000  ;;  %v1387_v62 = vsel %vm1356_vm5, %v8999_v60, 0.0  ;;  %v1791_v10 = vpop.permute.xlu1 %1790 }
 0x2fa   : > { %v9003_v63 = vpop.eup %9002  ;;  %1388 = vadd.xlane.f32.xlu1 %v1387_v62  ;;  %v1384_v1 = vsel %vm1356_vm5, %v9001_v61, 0.0 }
 0x2fb   : > { %1385 = vadd.xlane.f32.xlu0 %v1384_v1  ;;  %v1381_v2 = vsel %vm1356_vm5, %v9003_v63, 0.0 }
 0x2fe   : > { %1382 = vadd.xlane.f32.xlu1 %v1381_v2 }
 0x30f   : > { %1788 = vrot.lane.b32.xlu1 %v9442_v26, %s9201_s28 }
 0x311   : > { %1710 = vrot.lane.b32.xlu0 %v9426_v20, %s9201_s28 }
 0x313   : > { %1946 = vrot.lane.b32.xlu1 %v9438_v24, %s9200_s3 }
 0x317   : > { %1944 = vrot.lane.b32.xlu1 %v9438_v24, %s9201_s28 }
 0x31e   : > { %v1368_v3 = vpop.xlane.xlu0 %1367 }
 0x31f   : > { %v1372_v4 = vsub.f32 %v1355_v47, %v1368_v3 }
 0x321   : > { %v1379_v5 = vmul.f32 1.442695, %v1372_v4 }
 0x322   : > { %v1713_v11 = vpop.permute.xlu0 %1712 }
 0x323   : > { %9004 = vpow2.f32 %v1379_v5 }
 0x32d   : > { %v9005_v6 = vpop.eup %9004 }
 0x32e   : > { %v1390_v7 = vsel %vm1356_vm5, %v9005_v6, 0.0 }
 0x330   : > { %1391 = vadd.xlane.f32.xlu0 %v1390_v7 }
 0x346   : > { %1868 = vrot.lane.b32.xlu0 %v9424_v18, %s9200_s3 }
 0x34a   : > { %1866 = vrot.lane.b32.xlu0 %v9424_v18, %s9201_s28 }
 0x387   : > { %v1389_v12 = vpop.xlane.xlu1 %1388 }
 0x388   : > { %v1386_v13 = vpop.xlane.xlu0 %1385 }
 0x389   : > { %9006 = vrcp.f32 %v1386_v13 }
 0x38b   : > { %v1383_v15 = vpop.xlane.xlu1 %1382 }
 0x38c   : > { %9008 = vrcp.f32 %v1383_v15  ;;  %v1711_v29 = vpop.permute.xlu0 %1710 }
 0x38d   : > { %9010 = vrcp.f32 %v1389_v12 }
 0x38f   : > { %v1789_v33 = vpop.permute.xlu1 %1788 }
 0x393   : > { %v9007_v16 = vpop.eup %9006  ;;  %v1947_v36 = vpop.permute.xlu1 %1946 }
 0x394   : > { %v1398_v17 = vmul.f32 %v9007_v16, %v9001_v61 }
 0x396   : > { %v9009_v19 = vpop.eup %9008  ;;  %8462 = vmatmul.mubr.msk.f32.vlgmr.msra.gmra.mrb[12].mxu1 %vm639_vm2, %v1398_v17 }
 0x397   : > { %8470 = vmatpush3.msk.msra.mxu1 %vm643_vm1, %v1633_v9  ;;  %v1397_v22 = vmul.f32 %v9009_v19, %v9003_v63  ;;  %8471 = vmatprep.mubr.msk.f32.mxu1 %vm9197_vm0, %v9196_v0  ;;  %v9011_v25 = vpop.eup %9010  ;;  %v1945_v37 = vpop.permute.xlu1 %1944 }
 0x398   : > { %8479 = vmatprep.subr.mxu1 %v9196_v0  ;;  %v1399_v28 = vmul.f32 %v9011_v25, %v8999_v60 }
 0x399   : > { %8457 = vmatmul.mubr.msk.f32.vlgmr.msra.gmra.mrb[6].mxu0 %vm639_vm2, %v1397_v22 }
 0x39a   : > { %8465 = vmatpush3.msk.msra.mxu0 %vm643_vm1, %v1556_v8  ;;  %8466 = vmatprep.mubr.msk.f32.mxu0 %vm9197_vm0, %v9196_v0 }
 0x39b   : > { %8474 = vmatprep.subr.mxu0 %v9196_v0 }
 0x39d   : > { %8467 = vmatmul.mubr.msk.f32.vlgmr.msra.gmra.mrb[8].mxu0 %vm639_vm2, %v1399_v28 }
 0x39e   : > { %8476 = vmatprep.mubr.msk.f32.mxu0 %vm9197_vm0, %v9196_v0 }
 0x3a1   : > { %8475 = vmatpush3.xpose.msk.msra.mxu0 %vm1049_vm4, %v1713_v11 }
 0x3a2   : > { %8484 = vmatprep.subr.mxu0 %v9196_v0 }
 0x3a4   : > { %8477 = vmatmul.mubr.msk.f32.vlgmr.msra.gmra.mrb[10].mxu0 %vm1049_vm4, %v1711_v29 }
 0x3a5   : > { %8486 = vmatprep.mubr.msk.f32.mxu0 %vm9197_vm0, %v9196_v0 }
 0x3bd   : > { %v1392_v30 = vpop.xlane.xlu0 %1391 }
 0x3be   : > { %9012 = vrcp.f32 %v1392_v30 }
 0x3c1   : > { %v1869_v31 = vpop.permute.xlu0 %1868 }
 0x3c2   : > { %8485 = vmatpush3.xpose.msk.msra.mxu0 %vm1049_vm4, %v1869_v31 }
 0x3c3   : > { %8494 = vmatprep.subr.mxu0 %v9196_v0 }
 0x3c5   : > { %v1867_v32 = vpop.permute.xlu0 %1866 }
 0x3c6   : > { %8487 = vmatmul.mubr.msk.f32.vlgmr.msra.gmra.mrb[12].mxu0 %vm1049_vm4, %v1867_v32 }
 0x3c7   : > { %8496 = vmatprep.mubr.msk.f32.mxu0 %vm9197_vm0, %v9196_v0 }
 0x3c8   : > { %v9013_v34 = vpop.eup %9012 }
 0x3c9   : > { %v1400_v35 = vmul.f32 %v9013_v34, %v9005_v6 }
 0x3cb   : > { %8472 = vmatmul.mubr.msk.f32.vlgmr.msra.gmra.mrb[14].mxu1 %vm639_vm2, %v1400_v35 }
 0x3cc   : > { %8480 = vmatpush3.xpose.msk.msra.mxu1 %vm1049_vm4, %v1791_v10  ;;  %8481 = vmatprep.mubr.msk.f32.mxu1 %vm9197_vm0, %v9196_v0 }
 0x3cd   : > { %8489 = vmatprep.subr.mxu1 %v9196_v0 }
 0x3cf   : > { %8482 = vmatmul.mubr.msk.f32.vlgmr.msra.gmra.mrb[16].mxu1 %vm1049_vm4, %v1789_v33 }
 0x3d0   : > { %8490 = vmatpush3.xpose.msk.msra.mxu1 %vm1049_vm4, %v1947_v36  ;;  %8491 = vmatprep.mubr.msk.f32.mxu1 %vm9197_vm0, %v9196_v0 }
 0x3d1   : > { %8499 = vmatprep.subr.mxu1 %v9196_v0 }
 0x3d3   : > { %8492 = vmatmul.mubr.msk.f32.vlgmr.msra.gmra.mrb[18].mxu1 %vm1049_vm4, %v1945_v37 }
 0x3d4   : > { %8501 = vmatprep.mubr.msk.f32.mxu1 %vm9197_vm0, %v9196_v0 }
 0x469   : > { %v9546_v38 = vpop.f32.mrb[12].mxu1 }
 0x46a   : > { %v8463_v39 = vpop.f32.mrb[13].mxu1 }
 0x46c   : > { %v9548_v40 = vpop.f32.mrb[6].mxu0 }
 0x46d   : > { %v2468_v41 = vcombine.low %v9548_v40, %v9546_v38  ;;  %v8458_v42 = vpop.f32.mrb[7].mxu0 }
 0x470   : > { %v9552_v43 = vpop.f32.mrb[8].mxu0 }
 0x471   : > { %v8468_v44 = vpop.f32.mrb[9].mxu0 }
 0x477   : > { %v1784_v45 = vpop.f32.mrb[10].mxu0 }
 0x478   : > { %v2022_v46 = vmul.f32 0.35355338, %v1784_v45  ;;  %v8478_v47 = vpop.f32.mrb[11].mxu0 }
 0x47a   : > { %v2026_v48 = vsel %vm1356_vm5, %v2022_v46, -inf }
 0x47b   : > { %2027 = vmax.xlane.f32.xlu0 %v2026_v48 }
 0x499   : > { %v1940_v49 = vpop.f32.mrb[12].mxu0 }
 0x49a   : > { %v2024_v50 = vmul.f32 0.35355338, %v1940_v49  ;;  %v8488_v51 = vpop.f32.mrb[13].mxu0 }
 0x49c   : > { %v2032_v52 = vsel %vm1356_vm5, %v2024_v50, -inf }
 0x49d   : > { %2033 = vmax.xlane.f32.xlu0 %v2032_v52 }
 0x49e   : > { %v9556_v53 = vpop.f32.mrb[14].mxu1 }
 0x49f   : > { %v2469_v54 = vcombine.low %v9552_v43, %v9556_v53  ;;  %v8473_v55 = vpop.f32.mrb[15].mxu1 }
 0x4a2   : > { %v1862_v56 = vpop.f32.mrb[16].mxu1 }
 0x4a3   : > { %v2023_v57 = vmul.f32 0.35355338, %v1862_v56  ;;  %v8483_v58 = vpop.f32.mrb[17].mxu1 }
 0x4a4   : > { %v1709_v58 = vld [vmem:[%s10410_s6] sm:$0xff] }
 0x4a5   : > { %v2029_v59 = vsel %vm1356_vm5, %v2023_v57, -inf }
 0x4a6   : > { %2030 = vmax.xlane.f32.xlu1 %v2029_v59  ;;  %v2018_v60 = vpop.f32.mrb[18].mxu1 }
 0x4a7   : > { %v2025_v61 = vmul.f32 0.35355338, %v2018_v60  ;;  %v8493_v62 = vpop.f32.mrb[19].mxu1 }
 0x4a9   : > { %v2035_v63 = vsel %vm1356_vm5, %v2025_v61, -inf }
 0x4aa   : > { %2036 = vmax.xlane.f32.xlu0 %v2035_v63 }
 0x4b7   : > { %2070 = vrot.lane.b32.xlu1 %v9426_v20, %s9202_s4 }
 0x508   : > { %v2028_v1 = vpop.xlane.xlu0 %2027 }
 0x509   : > { %v2038_v2 = vsub.f32 %v2022_v46, %v2028_v1 }
 0x50b   : > { %v2042_v3 = vmul.f32 1.442695, %v2038_v2 }
 0x50d   : > { %9014 = vpow2.f32 %v2042_v3 }
 0x517   : > { %v9015_v4 = vpop.eup %9014 }
 0x518   : > { %v2050_v5 = vsel %vm1356_vm5, %v9015_v4, 0.0 }
 0x519   : > { %2051 = vadd.xlane.f32.xlu1 %v2050_v5 }
 0x52a   : > { %v2034_v6 = vpop.xlane.xlu0 %2033 }
 0x52b   : > { %v2040_v7 = vsub.f32 %v2024_v50, %v2034_v6 }
 0x52d   : > { %v2046_v8 = vmul.f32 1.442695, %v2040_v7 }
 0x52f   : > { %9016 = vpow2.f32 %v2046_v8 }
 0x533   : > { %v2031_v9 = vpop.xlane.xlu1 %2030 }
 0x534   : > { %v2039_v10 = vsub.f32 %v2023_v57, %v2031_v9  ;;  %v2378_v57 = vld [vmem:[%s10410_s6 + $0x8] sm:$0xff] }
 0x536   : > { %v2044_v11 = vmul.f32 1.442695, %v2039_v10 }
 0x537   : > { %v2071_v12 = vpop.permute.xlu1 %2070  ;;  %v2037_v13 = vpop.xlane.xlu0 %2036 }
 0x538   : > { %9018 = vpow2.f32 %v2044_v11  ;;  %v2041_v15 = vsub.f32 %v2025_v61, %v2037_v13  ;;  %8495 = vmatpush3.msk.msra.mxu0 %vm643_vm1, %v2071_v12 }
 0x539   : > { %v9017_v16 = vpop.eup %9016  ;;  %8504 = vmatprep.subr.mxu0 %v9196_v0 }
 0x53a   : > { %v2048_v17 = vmul.f32 1.442695, %v2041_v15  ;;  %v2056_v19 = vsel %vm1356_vm5, %v9017_v16, 0.0 }
 0x53b   : > { %2057 = vadd.xlane.f32.xlu1 %v2056_v19 }
 0x53c   : > { %9020 = vpow2.f32 %v2048_v17 }
 0x542   : > { %v9019_v22 = vpop.eup %9018 }
 0x543   : > { %v2053_v25 = vsel %vm1356_vm5, %v9019_v22, 0.0 }
 0x544   : > { %2054 = vadd.xlane.f32.xlu0 %v2053_v25 }
 0x546   : > { %v9021_v28 = vpop.eup %9020 }
 0x547   : > { %v2059_v29 = vsel %vm1356_vm5, %v9021_v28, 0.0 }
 0x548   : > { %2060 = vadd.xlane.f32.xlu0 %v2059_v29 }
 0x54c   : > { %2224 = vrot.lane.b32.xlu1 %v9424_v18, %s9202_s4 }
 0x550   : > { %2301 = vrot.lane.b32.xlu1 %v9438_v24, %s9202_s4 }
 0x554   : > { %2549 = vrot.lane.b32.xlu1 %v9426_v20, %s10382_s29 }
 0x558   : > { %2627 = vrot.lane.b32.xlu1 %v9442_v26, %s10382_s29 }
 0x55c   : > { %2785 = vrot.lane.b32.xlu1 %v9438_v24, %s10384_s27 }
 0x55e   : > { %2147 = vrot.lane.b32.xlu0 %v9442_v26, %s9202_s4 }
 0x560   : > { %2783 = vrot.lane.b32.xlu1 %v9438_v24, %s10382_s29 }
 0x562   : > { %2551 = vrot.lane.b32.xlu0 %v9426_v20, %s10384_s27 }
 0x566   : > { %2629 = vrot.lane.b32.xlu0 %v9442_v26, %s10384_s27 }
 0x56a   : > { %2707 = vrot.lane.b32.xlu0 %v9424_v18, %s10384_s27  ;;  %s10416_s27 = smov 48  }
 0x56e   : > { %2705 = vrot.lane.b32.xlu0 %v9424_v18, %s10382_s29  ;;  %s9213_s29 = smov 126  }
 0x5a6   : > { %v2052_v30 = vpop.xlane.xlu1 %2051 }
 0x5a7   : > { %9022 = vrcp.f32 %v2052_v30 }
 0x5b1   : > { %v9023_v31 = vpop.eup %9022 }
 0x5b2   : > { %v2066_v32 = vmul.f32 %v9023_v31, %v9015_v4 }
 0x5b4   : > { %8497 = vmatmul.mubr.msk.f32.vlgmr.msra.gmra.mrb[14].mxu0 %vm639_vm2, %v2066_v32 }
 0x5b5   : > { %8506 = vmatprep.mubr.msk.f32.mxu0 %vm9197_vm0, %v9196_v0 }
 0x5c8   : > { %v2058_v33 = vpop.xlane.xlu1 %2057 }
 0x5c9   : > { %9024 = vrcp.f32 %v2058_v33 }
 0x5cc   : > { %v2225_v34 = vpop.permute.xlu1 %2224 }
 0x5cd   : > { %8505 = vmatpush3.msk.msra.mxu0 %vm643_vm1, %v2225_v34 }
 0x5ce   : > { %8514 = vmatprep.subr.mxu0 %v2378_v57 }
 0x5d0   : > { %v2302_v42 = vpop.permute.xlu1 %2301 }
 0x5d1   : > { %v2055_v35 = vpop.xlane.xlu0 %2054 }
 0x5d2   : > { %9026 = vrcp.f32 %v2055_v35 }
 0x5d3   : > { %v9025_v36 = vpop.eup %9024 }
 0x5d4   : > { %v2068_v37 = vmul.f32 %v9025_v36, %v9017_v16  ;;  %v2550_v47 = vpop.permute.xlu1 %2549 }
 0x5d5   : > { %v2061_v39 = vpop.xlane.xlu0 %2060 }
 0x5d6   : > { %9028 = vrcp.f32 %v2061_v39  ;;  %8507 = vmatmul.mubr.msk.f32.vlgmr.msra.gmra.mrb[16].mxu0 %vm639_vm2, %v2068_v37 }
 0x5d7   : > { %8515 = vmatpush3.msra.mxu0 %v2378_v57 }
 0x5d8   : > { %v2628_v51 = vpop.permute.xlu1 %2627  ;;  %8519 = vmatprep.subr.mxu0 %v1709_v58 }
 0x5d9   : > { %v2148_v44 = vpop.permute.xlu0 %2147 }
 0x5da   : > { %8500 = vmatpush3.msk.msra.mxu1 %vm643_vm1, %v2148_v44 }
 0x5db   : > { %8509 = vmatprep.subr.mxu1 %v9196_v0 }
 0x5dc   : > { %v9027_v45 = vpop.eup %9026  ;;  %v2786_v55 = vpop.permute.xlu1 %2785 }
 0x5dd   : > { %v2067_v46 = vmul.f32 %v9027_v45, %v9019_v22  ;;  %v2552_v50 = vpop.permute.xlu0 %2551 }
 0x5df   : > { %8502 = vmatmul.mubr.msk.f32.vlgmr.msra.gmra.mrb[20].mxu1 %vm639_vm2, %v2067_v46 }
 0x5e0   : > { %v9029_v48 = vpop.eup %9028  ;;  %8510 = vmatpush3.msk.msra.mxu1 %vm643_vm1, %v2302_v42  ;;  %8511 = vmatprep.mubr.msk.f32.mxu1 %vm9197_vm0, %v9196_v0  ;;  %v2784_v56 = vpop.permute.xlu1 %2783 }
 0x5e1   : > { %v2069_v49 = vmul.f32 %v9029_v48, %v9021_v28  ;;  %8524 = vmatprep.subr.mxu1 %v9196_v0  ;;  %v2630_v52 = vpop.permute.xlu0 %2629 }
 0x5e3   : > { %8512 = vmatmul.mubr.msk.f32.vlgmr.msra.gmra.mrb[22].mxu1 %vm639_vm2, %v2069_v49 }
 0x5e4   : > { %8526 = vmatprep.mubr.msk.f32.mxu1 %vm9197_vm0, %v9196_v0 }
 0x5e5   : > { %v2708_v7 = vpop.permute.xlu0 %2707 }
 0x5e7   : > { %8525 = vmatpush3.xpose.msk.msra.mxu1 %vm1049_vm4, %v2552_v50 }
 0x5e8   : > { %8529 = vmatprep.subr.mxu1 %v9196_v0 }
 0x5e9   : > { %v2706_v38 = vpop.permute.xlu0 %2705 }
 0x5ea   : > { %8527 = vmatmul.mubr.msk.f32.vlgmr.msra.gmra.mrb[24].mxu1 %vm1049_vm4, %v2550_v47 }
 0x5eb   : > { %8530 = vmatpush3.xpose.msk.msra.mxu1 %vm1049_vm4, %v2630_v52  ;;  %8531 = vmatprep.mubr.msk.f32.mxu1 %vm9197_vm0, %v9196_v0 }
 0x5ec   : > { %8539 = vmatprep.subr.mxu1 %v9196_v0 }
 0x5ee   : > { %8532 = vmatmul.mubr.msk.f32.vlgmr.msra.gmra.mrb[26].mxu1 %vm1049_vm4, %v2628_v51 }
 0x5ef   : > { %8540 = vmatpush3.xpose.msk.msra.mxu1 %vm1049_vm4, %v2786_v55  ;;  %8541 = vmatprep.mubr.msk.f32.mxu1 %vm9197_vm0, %v9196_v0 }
 0x5f0   : > { %8549 = vmatprep.subr.mxu1 %v9196_v0 }
 0x5f2   : > { %8542 = vmatmul.mubr.msk.f32.vlgmr.msra.gmra.mrb[28].mxu1 %vm1049_vm4, %v2784_v56 }
 0x5f3   : > { %8551 = vmatprep.mubr.msk.f32.mxu1 %vm9197_vm0, %v9196_v0 }
 0x687   : > { %v2143_v59 = vpop.f32.mrb[14].mxu0 }
 0x688   : > { %v8498_v60 = vpop.f32.mrb[15].mxu0 }
 0x6a9   : > { %v2297_v61 = vpop.f32.mrb[16].mxu0 }
 0x6aa   : > { %v8508_v62 = vpop.f32.mrb[17].mxu0 }
 0x6b2   : > { %v2220_v63 = vpop.f32.mrb[20].mxu1 }
 0x6b3   : > { %v2383_v1 = vcombine.low %v2143_v59, %v2220_v63  ;;  %v8503_v2 = vpop.f32.mrb[21].mxu1 }
 0x6b5   : > { %8516 = vmatprep.mubr.msk.f32.mxu0 %vm1049_vm4, %v2383_v1 }
 0x6b6   : > { %v2374_v3 = vpop.f32.mrb[22].mxu1 }
 0x6b7   : > { %v2384_v4 = vcombine.low %v2297_v61, %v2374_v3  ;;  %v8513_v5 = vpop.f32.mrb[23].mxu1 }
 0x6b9   : > { %8517 = vmatmul.mubr.msk.f32.vlgmr.msra.gmra.mrb[18].mxu0 %vm1049_vm4, %v2384_v4 }
 0x6ba   : > { %8520 = vmatpush3.msra.mxu0 %v1709_v58  ;;  %8521 = vmatprep.mubr.msk.f32.mxu0 %vm1049_vm4, %v2468_v41 }
 0x6bb   : > { %8534 = vmatprep.subr.mxu0 %v9196_v0 }
 0x6bd   : > { %v2623_v6 = vpop.f32.mrb[24].mxu1 }
 0x6be   : > { %v2861_v8 = vmul.f32 0.35355338, %v2623_v6  ;;  %v8528_v9 = vpop.f32.mrb[25].mxu1 }
 0x6c0   : > { %v2865_v10 = vsel %vm1356_vm5, %v2861_v8, -inf }
 0x6c1   : > { %2866 = vmax.xlane.f32.xlu0 %v2865_v10  ;;  %v2701_v11 = vpop.f32.mrb[26].mxu1  ;;  %8522 = vmatmul.mubr.msk.f32.vlgmr.msra.gmra.mrb[18].mxu0 %vm1049_vm4, %v2469_v54 }
 0x6c2   : > { %v2862_v12 = vmul.f32 0.35355338, %v2701_v11  ;;  %v8533_v13 = vpop.f32.mrb[27].mxu1  ;;  %8535 = vmatpush3.xpose.msk.msra.mxu0 %vm1049_vm4, %v2708_v7  ;;  %8536 = vmatprep.mubr.msk.f32.mxu0 %vm9197_vm0, %v9196_v0  ;;  %v3217_v11 = vld [vmem:[%s10410_s6 + $0x10] sm:$0xff] }
 0x6c3   : > { %8544 = vmatprep.subr.mxu0 %v9196_v0 }
 0x6c4   : > { %v2868_v40 = vsel %vm1356_vm5, %v2862_v12, -inf }
 0x6c5   : > { %2869 = vmax.xlane.f32.xlu1 %v2868_v40  ;;  %v2857_v41 = vpop.f32.mrb[28].mxu1  ;;  %8537 = vmatmul.mubr.msk.f32.vlgmr.msra.gmra.mrb[20].mxu0 %vm1049_vm4, %v2706_v38 }
 0x6c6   : > { %v8543_v15 = vpop.f32.mrb[29].mxu1  ;;  %8546 = vmatprep.mubr.msk.f32.mxu0 %vm9197_vm0, %v9196_v0  ;;  %v2864_v31 = vmul.f32 0.35355338, %v2857_v41 }
 0x6c8   : > { %v2874_v33 = vsel %vm1356_vm5, %v2864_v31, -inf }
 0x74e   : > { %v2867_v43 = vpop.xlane.xlu0 %2866 }
 0x74f   : > { %v2877_v53 = vsub.f32 %v2861_v8, %v2867_v43 }
 0x751   : > { %v2881_v54 = vmul.f32 1.442695, %v2877_v53 }
 0x752   : > { %v2870_v19 = vpop.xlane.xlu1 %2869 }
 0x753   : > { %9030 = vpow2.f32 %v2881_v54  ;;  %v2878_v22 = vsub.f32 %v2862_v12, %v2870_v19 }
 0x755   : > { %v2883_v25 = vmul.f32 1.442695, %v2878_v22 }
 0x757   : > { %9032 = vpow2.f32 %v2883_v25 }
 0x75d   : > { %v9031_v16 = vpop.eup %9030 }
 0x75e   : > { %v2889_v17 = vsel %vm1356_vm5, %v9031_v16, 0.0 }
 0x75f   : > { %2890 = vadd.xlane.f32.xlu1 %v2889_v17 }
 0x761   : > { %v9033_v34 = vpop.eup %9032 }
 0x762   : > { %v2892_v35 = vsel %vm1356_vm5, %v9033_v34, 0.0 }
 0x770   : > { %2909 = vrot.lane.b32.xlu1 %v9426_v20, %s10380_s20 }
 0x774   : > { %3063 = vrot.lane.b32.xlu1 %v9424_v18, %s10380_s20 }
 0x798   : > { %v2779_v28 = vpop.f32.mrb[20].mxu0 }
 0x799   : > { %v2863_v29 = vmul.f32 0.35355338, %v2779_v28  ;;  %v8538_v30 = vpop.f32.mrb[21].mxu0 }
 0x79b   : > { %v2871_v32 = vsel %vm1356_vm5, %v2863_v29, -inf }
 0x79c   : > { %2872 = vmax.xlane.f32.xlu0 %v2871_v32 }
 0x7a0   : > { %2875 = vmax.xlane.f32.xlu0 %v2874_v33 }
 0x7a4   : > { %2893 = vadd.xlane.f32.xlu0 %v2892_v35 }
 0x7ec   : > { %v2891_v36 = vpop.xlane.xlu1 %2890 }
 0x7ed   : > { %9034 = vrcp.f32 %v2891_v36 }
 0x7f0   : > { %v2910_v37 = vpop.permute.xlu1 %2909 }
 0x7f1   : > { %8545 = vmatpush3.msk.msra.mxu0 %vm643_vm1, %v2910_v37 }
 0x7f2   : > { %8554 = vmatprep.subr.mxu0 %v9196_v0 }
 0x7f4   : > { %v3064_v44 = vpop.permute.xlu1 %3063 }
 0x7f7   : > { %v9035_v39 = vpop.eup %9034 }
 0x7f8   : > { %v2905_v42 = vmul.f32 %v9035_v39, %v9031_v16 }
 0x7fa   : > { %8547 = vmatmul.mubr.msk.f32.vlgmr.msra.gmra.mrb[22].mxu0 %vm639_vm2, %v2905_v42 }
 0x7fb   : > { %8555 = vmatpush3.msk.msra.mxu0 %vm643_vm1, %v3064_v44  ;;  %8556 = vmatprep.mubr.msk.f32.mxu0 %vm9197_vm0, %v9196_v0 }
 0x7fc   : > { %8564 = vmatprep.subr.mxu0 %v3217_v11 }
 0x829   : > { %v2873_v45 = vpop.xlane.xlu0 %2872 }
 0x82a   : > { %v2879_v46 = vsub.f32 %v2863_v29, %v2873_v45 }
 0x82c   : > { %v2885_v47 = vmul.f32 1.442695, %v2879_v46 }
 0x82d   : > { %v2876_v48 = vpop.xlane.xlu0 %2875 }
 0x82e   : > { %9036 = vpow2.f32 %v2885_v47  ;;  %v2880_v49 = vsub.f32 %v2864_v31, %v2876_v48 }
 0x830   : > { %v2887_v50 = vmul.f32 1.442695, %v2880_v49 }
 0x831   : > { %v2894_v57 = vpop.xlane.xlu0 %2893 }
 0x832   : > { %9038 = vpow2.f32 %v2887_v50 }
 0x833   : > { %9040 = vrcp.f32 %v2894_v57 }
 0x838   : > { %v9037_v51 = vpop.eup %9036 }
 0x839   : > { %v2895_v52 = vsel %vm1356_vm5, %v9037_v51, 0.0 }
 0x83a   : > { %2896 = vadd.xlane.f32.xlu1 %v2895_v52 }
 0x83c   : > { %v9039_v55 = vpop.eup %9038 }
 0x83d   : > { %v2898_v56 = vsel %vm1356_vm5, %v9039_v55, 0.0  ;;  %v9041_v60 = vpop.eup %9040 }
 0x83e   : > { %2899 = vadd.xlane.f32.xlu0 %v2898_v56  ;;  %v2906_v1 = vmul.f32 %v9041_v60, %v9033_v34 }
 0x84b   : > { %3140 = vrot.lane.b32.xlu1 %v9438_v24, %s10380_s20 }
 0x84f   : > { %3385 = vrot.lane.b32.xlu1 %v9442_v26, %s10378_s1 }
 0x853   : > { %3383 = vrot.lane.b32.xlu1 %v9442_v26, %s10376_s30 }
 0x854   : > { %2986 = vrot.lane.b32.xlu0 %v9442_v26, %s10380_s20 }
 0x857   : > { %3541 = vrot.lane.b32.xlu1 %v9438_v24, %s10378_s1 }
 0x858   : > { %3307 = vrot.lane.b32.xlu0 %v9426_v20, %s10378_s1 }
 0x85b   : > { %3539 = vrot.lane.b32.xlu1 %v9438_v24, %s10376_s30 }
 0x85c   : > { %3305 = vrot.lane.b32.xlu0 %v9426_v20, %s10376_s30 }
 0x860   : > { %3463 = vrot.lane.b32.xlu0 %v9424_v18, %s10378_s1 }
 0x864   : > { %3461 = vrot.lane.b32.xlu0 %v9424_v18, %s10376_s30  ;;  %s10417_s30 = smov 72  }
 0x8c7   : > { %v2897_v58 = vpop.xlane.xlu1 %2896 }
 0x8c8   : > { %9042 = vrcp.f32 %v2897_v58 }
 0x8cb   : > { %v2900_v59 = vpop.xlane.xlu0 %2899  ;;  %v3141_v2 = vpop.permute.xlu1 %3140 }
 0x8cc   : > { %9044 = vrcp.f32 %v2900_v59 }
 0x8cd   : > { %v2982_v61 = vpop.f32.mrb[22].mxu0 }
 0x8ce   : > { %v8548_v62 = vpop.f32.mrb[23].mxu0 }
 0x8cf   : > { %v2987_v63 = vpop.permute.xlu0 %2986  ;;  %v3386_v12 = vpop.permute.xlu1 %3385 }
 0x8d0   : > { %8550 = vmatpush3.msk.msra.mxu1 %vm643_vm1, %v2987_v63 }
 0x8d1   : > { %8552 = vmatmul.mubr.msk.f32.vlgmr.msra.gmra.mrb[30].mxu1 %vm639_vm2, %v2906_v1  ;;  %8559 = vmatprep.subr.mxu1 %v9196_v0 }
 0x8d2   : > { %v9043_v3 = vpop.eup %9042  ;;  %8560 = vmatpush3.msk.msra.mxu1 %vm643_vm1, %v3141_v2  ;;  %8561 = vmatprep.mubr.msk.f32.mxu1 %vm9197_vm0, %v9196_v0 }
 0x8d3   : > { %v3308_v4 = vpop.permute.xlu0 %3307  ;;  %v2907_v5 = vmul.f32 %v9043_v3, %v9037_v51  ;;  %8569 = vmatprep.subr.mxu1 %v9196_v0  ;;  %v3384_v43 = vpop.permute.xlu1 %3383 }
 0x8d5   : > { %8557 = vmatmul.mubr.msk.f32.vlgmr.msra.gmra.mrb[24].mxu0 %vm639_vm2, %v2907_v5 }
 0x8d6   : > { %v9045_v6 = vpop.eup %9044  ;;  %8565 = vmatpush3.msra.mxu0 %v3217_v11 }
 0x8d7   : > { %v3306_v7 = vpop.permute.xlu0 %3305  ;;  %v2908_v8 = vmul.f32 %v9045_v6, %v9039_v55  ;;  %8574 = vmatprep.subr.mxu0 %v9196_v0  ;;  %v3542_v17 = vpop.permute.xlu1 %3541 }
 0x8d9   : > { %8562 = vmatmul.mubr.msk.f32.vlgmr.msra.gmra.mrb[32].mxu1 %vm639_vm2, %v2908_v8 }
 0x8da   : > { %8570 = vmatpush3.xpose.msk.msra.mxu1 %vm1049_vm4, %v3308_v4  ;;  %8571 = vmatprep.mubr.msk.f32.mxu1 %vm9197_vm0, %v9196_v0 }
 0x8db   : > { %v3464_v9 = vpop.permute.xlu0 %3463  ;;  %8579 = vmatprep.subr.mxu1 %v9196_v0  ;;  %v3540_v32 = vpop.permute.xlu1 %3539 }
 0x8dd   : > { %8572 = vmatmul.mubr.msk.f32.vlgmr.msra.gmra.mrb[34].mxu1 %vm1049_vm4, %v3306_v7 }
 0x8de   : > { %8580 = vmatpush3.xpose.msk.msra.mxu1 %vm1049_vm4, %v3464_v9  ;;  %8581 = vmatprep.mubr.msk.f32.mxu1 %vm9197_vm0, %v9196_v0 }
 0x8df   : > { %v3462_v10 = vpop.permute.xlu0 %3461  ;;  %8589 = vmatprep.subr.mxu1 %v9196_v0 }
 0x8e1   : > { %8582 = vmatmul.mubr.msk.f32.vlgmr.msra.gmra.mrb[36].mxu1 %vm1049_vm4, %v3462_v10 }
 0x8e2   : > { %8591 = vmatprep.mubr.msk.f32.mxu1 %vm9197_vm0, %v9196_v0 }
 0x9a4   : > { %v3059_v13 = vpop.f32.mrb[30].mxu1 }
 0x9a5   : > { %v3222_v38 = vcombine.low %v2982_v61, %v3059_v13  ;;  %v8553_v40 = vpop.f32.mrb[31].mxu1 }
 0x9a7   : > { %8566 = vmatprep.mubr.msk.f32.mxu0 %vm1049_vm4, %v3222_v38 }
 0x9a8   : > { %v3136_v41 = vpop.f32.mrb[24].mxu0 }
 0x9a9   : > { %v8558_v15 = vpop.f32.mrb[25].mxu0 }
 0x9ac   : > { %v3213_v53 = vpop.f32.mrb[32].mxu1 }
 0x9ad   : > { %v3223_v54 = vcombine.low %v3136_v41, %v3213_v53  ;;  %v8563_v16 = vpop.f32.mrb[33].mxu1 }
 0x9ae   : > { %v3973_v16 = vld [vmem:[%s10410_s6 + $0x18] sm:$0xff] }
 0x9af   : > { %8567 = vmatmul.mubr.msk.f32.vlgmr.msra.gmra.mrb[18].mxu0 %vm1049_vm4, %v3223_v54 }
 0x9b0   : > { %8575 = vmatpush3.xpose.msk.msra.mxu0 %vm1049_vm4, %v3386_v12  ;;  %v3379_v19 = vpop.f32.mrb[34].mxu1  ;;  %8576 = vmatprep.mubr.msk.f32.mxu0 %vm9197_vm0, %v9196_v0 }
 0x9b1   : > { %v3617_v22 = vmul.f32 0.35355338, %v3379_v19  ;;  %v8573_v25 = vpop.f32.mrb[35].mxu1  ;;  %8584 = vmatprep.subr.mxu0 %v9196_v0  ;;  %v8113_v19 = vld [vmem:[%s10411_s8 + $0x28] sm:$0xff] }
 0x9b3   : > { %8577 = vmatmul.mubr.msk.f32.vlgmr.msra.gmra.mrb[26].mxu0 %vm1049_vm4, %v3384_v43  ;;  %v3621_v28 = vsel %vm1356_vm5, %v3617_v22, -inf }
 0x9b4   : > { %8585 = vmatpush3.xpose.msk.msra.mxu0 %vm1049_vm4, %v3542_v17  ;;  %3622 = vmax.xlane.f32.xlu0 %v3621_v28  ;;  %v3535_v29 = vpop.f32.mrb[36].mxu1  ;;  %v8112_v17 = vld [vmem:[%s10411_s8 + $0x20] sm:$0xff] }
 0x9b5   : > { %v3619_v30 = vmul.f32 0.35355338, %v3535_v29  ;;  %v8583_v31 = vpop.f32.mrb[37].mxu1  ;;  %8586 = vmatprep.mubr.msk.f32.mxu0 %vm9197_vm0, %v9196_v0  ;;  %8594 = vmatprep.subr.mxu0 %v9196_v0 }
 0x9b7   : > { %8587 = vmatmul.mubr.msk.f32.vlgmr.msra.gmra.mrb[28].mxu0 %vm1049_vm4, %v3540_v32  ;;  %v3627_v33 = vsel %vm1356_vm5, %v3619_v30, -inf }
 0x9b8   : > { %3628 = vmax.xlane.f32.xlu0 %v3627_v33  ;;  %8596 = vmatprep.mubr.msk.f32.mxu0 %vm9197_vm0, %v9196_v0  ;;  %v8114_v33 = vld [vmem:[%s10411_s8 + $0x30] sm:$0xff] }
 0xa41   : > { %v3623_v34 = vpop.xlane.xlu0 %3622 }
 0xa42   : > { %v3633_v35 = vsub.f32 %v3617_v22, %v3623_v34  ;;  %v8857_v22 = vpack.c.bf16 %v8113_v19, %v8112_v17  ;;  %v8115_v34 = vld [vmem:[%s10411_s8 + $0x38] sm:$0xff] }
 0xa44   : > { %v3637_v37 = vmul.f32 1.442695, %v3633_v35  ;;  %v8861_v35 = vpack.c.bf16 %v8115_v34, %v8114_v33 }
 0xa45   : > { %v3629_v36 = vpop.xlane.xlu0 %3628 }
 0xa46   : > { %v3635_v39 = vsub.f32 %v3619_v30, %v3629_v36  ;;  %9046 = vpow2.f32 %v3637_v37  ;;  %v4129_v36 = vld [vmem:[%s10411_s8] sm:$0xff]  ;;  %v4130_v37 = vld [vmem:[%s10411_s8 + $0x8] sm:$0xff] }
 0xa48   : > { %v3641_v42 = vmul.f32 1.442695, %v3635_v39  ;;  %v8865_v39 = vpack.c.bf16 %v4130_v37, %v4129_v36 }
 0xa4a   : > { %9048 = vpow2.f32 %v3641_v42  ;;  %v4086_v42 = vlaneseq }
 0xa50   : > { %v9047_v48 = vpop.eup %9046 }
 0xa51   : > { %v3645_v52 = vsel %vm1356_vm5, %v9047_v48, 0.0 }
 0xa54   : > { %v9049_v56 = vpop.eup %9048 }
 0xa55   : > { %v3651_v57 = vsel %vm1356_vm5, %v9049_v56, 0.0 }
 0xa86   : > { %v3457_v44 = vpop.f32.mrb[26].mxu0 }
 0xa87   : > { %v3618_v45 = vmul.f32 0.35355338, %v3457_v44  ;;  %v8578_v46 = vpop.f32.mrb[27].mxu0  ;;  %v9778_v44 = vshrl.u32 %v4086_v42, 7 }
 0xa89   : > { %v3624_v47 = vsel %vm1356_vm5, %v3618_v45, -inf }
 0xa8a   : > { %3625 = vmax.xlane.f32.xlu1 %v3624_v47  ;;  %v3613_v49 = vpop.f32.mrb[28].mxu0  ;;  %v4093_v47 = vand.u32 3, %v9778_v44 }
 0xa8b   : > { %v3620_v50 = vmul.f32 0.35355338, %v3613_v49  ;;  %v8588_v51 = vpop.f32.mrb[29].mxu0  ;;  %v4132_v49 = vld [vmem:[%s10411_s8 + $0x18] sm:$0xff] }
 0xa8c   : > { %vm4113_vm8 = vcmp.eq.s32.totalorder %v4093_v47, 0  ;;  %vm4121_vm10 = vcmp.eq.s32.totalorder %v4093_v47, 3 }
 0xa8d   : > { %v3630_v55 = vsel %vm1356_vm5, %v3620_v50, -inf }
 0xa8e   : > { %3646 = vadd.xlane.f32.xlu1 %v3645_v52  ;;  %3631 = vmax.xlane.f32.xlu0 %v3630_v55  ;;  %v4088_v52 = vadd.s32 8, %v9778_v44 }
 0xa92   : > { %3652 = vadd.xlane.f32.xlu1 %v3651_v57 }
 0xaa3   : > { %3665 = vrot.lane.b32.xlu1 %v9426_v20, %s10374_s26 }
 0xaa7   : > { %3819 = vrot.lane.b32.xlu1 %v9424_v18, %s10374_s26 }
 0xaab   : > { %3896 = vrot.lane.b32.xlu1 %v9438_v24, %s10374_s26 }
 0xb17   : > { %v3626_v58 = vpop.xlane.xlu1 %3625 }
 0xb18   : > { %v3634_v59 = vsub.f32 %v3618_v45, %v3626_v58  ;;  %v8111_v45 = vld [vmem:[%s10412_s7] ss:$0 sm:$0xff] }
 0xb1a   : > { %v3639_v60 = vmul.f32 1.442695, %v3634_v59 }
 0xb1b   : > { %v3647_v61 = vpop.xlane.xlu1 %3646  ;;  %v3632_v62 = vpop.xlane.xlu0 %3631 }
 0xb1c   : > { %9050 = vpow2.f32 %v3639_v60  ;;  %v3636_v63 = vsub.f32 %v3620_v50, %v3632_v62  ;;  %v8121_v62 = vld [vmem:[%s10411_s8 + $0x48] sm:$0xff] }
 0xb1d   : > { %9052 = vrcp.f32 %v3647_v61  ;;  %v8120_v61 = vld [vmem:[%s10411_s8 + $0x40] sm:$0xff] }
 0xb1e   : > { %v3643_v1 = vmul.f32 1.442695, %v3636_v63  ;;  %v4100_v63 = vand.u32 3, %v4088_v52 }
 0xb1f   : > { %v3653_v2 = vpop.xlane.xlu1 %3652 }
 0xb20   : > { %9054 = vpow2.f32 %v3643_v1  ;;  %vm4114_vm9 = vcmp.eq.s32.totalorder %v4100_v63, 0  ;;  %vm4122_vm11 = vcmp.eq.s32.totalorder %v4100_v63, 3 }
 0xb21   : > { %9056 = vrcp.f32 %v3653_v2 }
 0xb23   : > { %v3666_v3 = vpop.permute.xlu1 %3665 }
 0xb24   : > { %8590 = vmatpush3.msk.msra.mxu1 %vm643_vm1, %v3666_v3 }
 0xb25   : > { %8599 = vmatprep.subr.mxu1 %v9196_v0 }
 0xb26   : > { %v9051_v18 = vpop.eup %9050 }
 0xb27   : > { %v9053_v20 = vpop.eup %9052  ;;  %v3648_v24 = vsel %vm1356_vm5, %v9051_v18, 0.0  ;;  %v3820_v4 = vpop.permute.xlu1 %3819 }
 0xb28   : > { %3649 = vadd.xlane.f32.xlu0 %v3648_v24  ;;  %v3661_v5 = vmul.f32 %v9053_v20, %v9047_v48  ;;  %v4131_v48 = vld [vmem:[%s10411_s8 + $0x10] sm:$0xff]  ;;  %v8873_v20 = vpack.c.bf16 %v8121_v62, %v8120_v61 }
 0xb29   : > { %v8869_v58 = vpack.c.bf16 %v4132_v49, %v4131_v48  ;;  %v8122_v24 = vld [vmem:[%s10411_s8 + $0x50] sm:$0xff] }
 0xb2a   : > { %v9055_v6 = vpop.eup %9054  ;;  %8592 = vmatmul.mubr.msk.f32.vlgmr.msra.gmra.mrb[38].mxu1 %vm639_vm2, %v3661_v5 }
 0xb2b   : > { %v9057_v7 = vpop.eup %9056  ;;  %8600 = vmatpush3.msk.msra.mxu1 %vm643_vm1, %v3820_v4  ;;  %8601 = vmatprep.mubr.msk.f32.mxu1 %vm9197_vm0, %v9196_v0  ;;  %v3654_v8 = vsel %vm1356_vm5, %v9055_v6, 0.0  ;;  %v3897_v40 = vpop.permute.xlu1 %3896  ;;  %v8123_v4 = vld [vmem:[%s10411_s8 + $0x58] sm:$0xff]  ;;  %vm948_vm5 = vcmask 1045504  }
 0xb2c   : > { %3655 = vadd.xlane.f32.xlu0 %v3654_v8  ;;  %v3663_v9 = vmul.f32 %v9057_v7, %v9049_v56  ;;  %8858 = vmatprep.subr.bf16.mxu1 %v8857_v22  ;;  %v8877_v5 = vpack.c.bf16 %v8123_v4, %v8122_v24  ;;  %v8131_v4 = vld [vmem:[%s10356_s13] ss:$0 sm:$0xff] }
 0xb2e   : > { %8602 = vmatmul.mubr.msk.f32.vlgmr.msra.gmra.mrb[40].mxu1 %vm639_vm2, %v3663_v9 }
 0xb2f   : > { %8860 = vmatpush3.bf16.msra.mxu1 %v8857_v22 }
 0xb30   : > { %8862 = vmatprep.subr.bf16.mxu1 %v8861_v35 }
 0xb33   : > { %8864 = vmatpush3.bf16.msra.mxu1 %v8861_v35 }
 0xb34   : > { %8866 = vmatprep.subr.bf16.mxu1 %v8865_v39 }
 0xb42   : > { %3742 = vrot.lane.b32.xlu0 %v9442_v26, %s10374_s26  ;;  %s10418_s26 = smov 104  }
 0xbb5   : > { %v3650_v10 = vpop.xlane.xlu0 %3649 }
 0xbb6   : > { %9058 = vrcp.f32 %v3650_v10  ;;  %v4464_v10 = vld [vmem:[%s10355_s12] sm:$0xff] }
 0xbb9   : > { %v3656_v11 = vpop.xlane.xlu0 %3655 }
 0xbba   : > { %9060 = vrcp.f32 %v3656_v11  ;;  %v4465_v11 = vld [vmem:[%s10355_s12 + $0x8] sm:$0xff] }
 0xbbd   : > { %v3743_v12 = vpop.permute.xlu0 %3742 }
 0xbbe   : > { %8595 = vmatpush3.msk.msra.mxu0 %vm643_vm1, %v3743_v12  ;;  %v8882_v12 = vpack.c.bf16 %v4465_v11, %v4464_v10 }
 0xbbf   : > { %8604 = vmatprep.subr.mxu0 %v9196_v0 }
 0xbc0   : > { %v9059_v13 = vpop.eup %9058 }
 0xbc1   : > { %v3662_v38 = vmul.f32 %v9059_v13, %v9051_v18  ;;  %v4466_v13 = vld [vmem:[%s10355_s12 + $0x10] sm:$0xff] }
 0xbc3   : > { %8597 = vmatmul.mubr.msk.f32.vlgmr.msra.gmra.mrb[30].mxu0 %vm639_vm2, %v3662_v38  ;;  %v4467_v38 = vld [vmem:[%s10355_s12 + $0x18] sm:$0xff] }
 0xbc4   : > { %v9061_v41 = vpop.eup %9060  ;;  %8605 = vmatpush3.msk.msra.mxu0 %vm643_vm1, %v3897_v40  ;;  %8606 = vmatprep.mubr.msk.f32.mxu0 %vm9197_vm0, %v9196_v0  ;;  %v9209_v40 = vmov 0.0|0.0  }
 0xbc5   : > { %v3664_v26 = vmul.f32 %v9061_v41, %v9055_v6  ;;  %8609 = vmatprep.subr.mxu0 %v3973_v16  ;;  %v8885_v41 = vpack.c.bf16 %v4467_v38, %v4466_v13 }
 0xbc7   : > { %8607 = vmatmul.mubr.msk.f32.vlgmr.msra.gmra.mrb[32].mxu0 %vm639_vm2, %v3664_v26  ;;  %v8126_v26 = vld [vmem:[%s10413_s9] ss:$0 sm:$0xff]  ;;  %vm4460_vm2 = vcmask 1044480  }
 0xbc8   : > { %8610 = vmatpush3.msra.mxu0 %v3973_v16  ;;  %v8128_v16 = vld [vmem:[%s10354_s11] ss:$0 sm:$0xff] }
 0xbc9   : > { %8881 = vmatprep.subr.bf16.mxu0 %v9209_v40 }
 0xbfd   : > { %v3738_v15 = vpop.f32.mrb[38].mxu1 }
 0xbfe   : > { %v8593_v43 = vpop.f32.mrb[39].mxu1 }
 0xbff   : > { %v8127_v43 = vld [vmem:[%s10353_s10] ss:$0 sm:$0xff] }
 0xc01   : > { %v3892_v53 = vpop.f32.mrb[40].mxu1 }
 0xc02   : > { %v8603_v54 = vpop.f32.mrb[41].mxu1 }
 0xc96   : > { %v3815_v25 = vpop.f32.mrb[30].mxu0 }
 0xc97   : > { %v3978_v28 = vcombine.low %v3738_v15, %v3815_v25  ;;  %v8598_v29 = vpop.f32.mrb[31].mxu0 }
 0xc99   : > { %8611 = vmatprep.mubr.msk.f32.mxu0 %vm1049_vm4, %v3978_v28 }
 0xc9a   : > { %v3969_v30 = vpop.f32.mrb[32].mxu0 }
 0xc9b   : > { %v3979_v31 = vcombine.low %v3892_v53, %v3969_v30  ;;  %v8608_v32 = vpop.f32.mrb[33].mxu0 }
 0xc9d   : > { %8612 = vmatmul.mubr.msk.f32.vlgmr.msra.gmra.mrb[18].mxu0 %vm1049_vm4, %v3979_v31 }
 0xc9e   : > { %8655 = vmatprep.mubr.msk.f32.mxu0 %vm9197_vm0, %v9196_v0  ;;  %8883 = vmatpush3.bf16.msra.mxu0 %v8882_v12 }
 0xc9f   : > { %8884 = vmatprep.subr.bf16.mxu0 %v9209_v40 }
 0xca2   : > { %8886 = vmatpush3.bf16.msra.mxu0 %v8885_v41 }
 0xca3   : > { %8658 = vmatprep.subr.mxu0 %v9196_v0 }
 0xd70   : > { %v8613_v46 = vpop.f32.mrb[18].mxu0 }
 0xd71   : > { %v4069_v50 = vadd.f32 %v8613_v46, %v8111_v45  ;;  %v4050_v51 = vpop.f32.mrb[19].mxu0 }
 0xd72   : > { %v4068_v55 = vadd.f32 %v8111_v45, %v4050_v51 }
 0xd73   : > { %v4074_v56 = vrot.slane %v4069_v50, 7  ;;  %v4081_v57 = vrot.slane %v4069_v50, 1 }
 0xd74   : > { %v4073_v59 = vrot.slane %v4068_v55, 7  ;;  %v4080_v60 = vrot.slane %v4068_v55, 1  ;;  %8622 = vmatprep.mubr.msk.f32.mxu1 %vm963_vm3, %v4068_v55 }
 0xd75   : > { %8623 = vmatmul.mubr.msk.f32.vlgmr.msra.gmra.mrb[42].mxu1 %vm963_vm3, %v4069_v50  ;;  %v4085_v8 = vsel %vm4079_vm7, %v4081_v57, 0.0 }
 0xd76   : > { %8868 = vmatpush3.bf16.msra.mxu1 %v8865_v39  ;;  %v4078_v1 = vsel %vm4072_vm6, 0.0, %v4073_v59  ;;  %v4075_v2 = vsel %vm4072_vm6, %v4073_v59, %v4074_v56  ;;  %v4082_v3 = vsel %vm4079_vm7, %v4080_v60, %v4081_v57  ;;  %v4128_v9 = vsel %vm4122_vm11, 0.0, %v4085_v8 }
 0xd77   : > { %v4119_v18 = vsel %vm4113_vm8, 0.0, %v4078_v1  ;;  %8870 = vmatprep.subr.bf16.mxu1 %v8869_v58  ;;  %v4120_v6 = vsel %vm4114_vm9, 0.0, %v4075_v2  ;;  %v4127_v7 = vsel %vm4121_vm10, 0.0, %v4082_v3 }
 0xd78   : > { %8633 = vmatprep.mubr.msk.f32.mxu1 %vm963_vm3, %v4119_v18  ;;  %v9210_v18 = vmov 1983009808  }
 0xd7a   : > { %8872 = vmatpush3.bf16.msra.mxu1 %v8869_v58 }
 0xd7b   : > { %8874 = vmatprep.subr.bf16.mxu1 %v8873_v20 }
 0xd7d   : > { %8634 = vmatmul.mubr.msk.f32.vlgmr.msra.gmra.mrb[42].mxu1 %vm963_vm3, %v4120_v6 }
 0xd7e   : > { %8876 = vmatpush3.bf16.msra.mxu1 %v8873_v20  ;;  %8644 = vmatprep.mubr.msk.f32.mxu1 %vm963_vm3, %v4127_v7  ;;  %v4551_v20 = vunpack.c.l.s4 %v9210_v18 }
 0xd7f   : > { %8878 = vmatprep.subr.bf16.mxu1 %v8877_v5 }
 0xd80   : > { %v4552_v24 = vunpack.c.0.s8 %v4551_v20 }
 0xd82   : > { %8880 = vmatpush3.bf16.msra.mxu1 %v8877_v5  ;;  %v9852_v5 = vsub.s32 %v4552_v24, %v9778_v44 }
 0xd83   : > { %8673 = vmatprep.subr.mxu1 %v9196_v0 }
 0xd85   : > { %8645 = vmatmul.mubr.msk.f32.vlgmr.msra.gmra.mrb[42].mxu1 %vm963_vm3, %v4128_v9 }
 0xd86   : > { %8675 = vmatprep.mubr.msk.f32.mxu1 %vm9197_vm0, %v9196_v0 }
 0xe58   : > { %v8646_v15 = vpop.f32.mrb[42].mxu1 }
 0xe59   : > { %v4394_v53 = vadd.f32 %v8646_v15, %v8126_v26  ;;  %v4375_v54 = vpop.f32.mrb[43].mxu1 }
 0xe5a   : > { %v4393_v17 = vadd.f32 %v8126_v26, %v4375_v54 }
 0xe5b   : > { %v4403_v19 = vmul.f32 %v8127_v43, %v4394_v53 }
 0xe5c   : > { %v4402_v22 = vmul.f32 %v8127_v43, %v4393_v17 }
 0xe5d   : > { %v4412_v25 = vadd.f32 %v8128_v16, %v4403_v19 }
 0xe5e   : > { %v4411_v28 = vadd.f32 %v8128_v16, %v4402_v22 }
 0xe5f   : > { %v4416_v29 = vmin.f32 %v4412_v25, 0.0  ;;  %vm4414_vm12 = vcmp.gt.f32.partialorder %v4412_v25, 0.0 }
 0xe60   : > { %v4415_v30 = vmin.f32 %v4411_v28, 0.0  ;;  %vm4413_vm13 = vcmp.gt.f32.partialorder %v4411_v28, 0.0 }
 0xe61   : > { %v4419_v31 = vmul.f32 1.442695, %v4416_v29 }
 0xe62   : > { %v4417_v32 = vmul.f32 1.442695, %v4415_v30 }
 0xe63   : > { %9062 = vpow2.f32 %v4419_v31 }
 0xe64   : > { %9064 = vpow2.f32 %v4417_v32 }
 0xe6d   : > { %v9063_v33 = vpop.eup %9062 }
 0xe6e   : > { %v9065_v34 = vpop.eup %9064  ;;  %v8130_v35 = vadd.f32 -1.0, %v9063_v33 }
 0xe6f   : > { %v8129_v36 = vadd.f32 -1.0, %v9065_v34 }
 0xe70   : > { %v4424_v37 = vsel %vm4414_vm12, %v4412_v25, %v8130_v35 }
 0xe71   : > { %v4433_v39 = vrot.slane %v4424_v37, 1  ;;  %v4423_v42 = vsel %vm4413_vm13, %v4411_v28, %v8129_v36  ;;  %v4436_v47 = vrot.slane %v4424_v37, 2 }
 0xe72   : > { %v4426_v45 = vrot.slane %v4423_v42, 1  ;;  %v4429_v49 = vrot.slane %v4423_v42, 2 }
 0xe73   : > { %v4435_v46 = vmax.f32 %v4424_v37, %v4433_v39 }
 0xe74   : > { %v4428_v48 = vmax.f32 %v4423_v42, %v4426_v45 }
 0xe75   : > { %v4438_v52 = vmax.f32 %v4435_v46, %v4436_v47  ;;  %v4446_v57 = vrot.slane %v4435_v46, 4  ;;  %v4451_v61 = vrot.slane %v4435_v46, 6 }
 0xe76   : > { %v4431_v50 = vmax.f32 %v4428_v48, %v4429_v49  ;;  %v4440_v51 = vrot.slane %v4428_v48, 2 }
 0xe77   : > { %v4449_v59 = vrot.slane %v4438_v52, 4  ;;  %v4453_v63 = vrot.slane %v4438_v52, 6 }
 0xe78   : > { %v4443_v55 = vrot.slane %v4431_v50, 2  ;;  %v4455_v56 = vsel %vm4072_vm6, %v4428_v48, %v4431_v50  ;;  %vm4902_vm6 = vcmask 9216  }
 0xe79   : > { %v4456_v58 = vsel %vm945_vm14, %v4455_v56, %v4440_v51 }
 0xe7a   : > { %v4458_v60 = vsel %vm4457_vm15, %v4456_v58, %v4443_v55 }
 0xe7b   : > { %v4459_v62 = vsel %vm643_vm1, %v4458_v60, %v4446_v57 }
 0xe7c   : > { %v4461_v1 = vsel %vm4460_vm2, %v4459_v62, %v4449_v59 }
 0xe7d   : > { %v4462_v2 = vsel %vm948_vm5, %v4461_v1, %v4451_v61 }
 0xe7e   : > { %v4463_v3 = vsel %vm4079_vm7, %v4462_v2, %v4453_v63  ;;  %vm4949_vm7 = vcmask 15360  }
 0xe7f   : > { %8656 = vmatmul.mubr.msk.f32.vlgmr.msra.gmra.mrb[34].mxu0 %vm963_vm3, %v4463_v3 }
 0xe80   : > { %8660 = vmatprep.mubr.msk.f32.mxu0 %vm9197_vm0, %v9196_v0 }
 0xf52   : > { %v4544_v6 = vpop.f32.mrb[34].mxu0 }
 0xf53   : > { %v4545_v7 = vadd.f32 %v8131_v4, %v4544_v6  ;;  %v8657_v8 = vpop.f32.mrb[35].mxu0 }
 0xf55   : > { %v4549_v9 = vcombine.high %v4545_v7, %v4545_v7  ;;  %v4556_v10 = vrot.slane %v4545_v7, %v9852_v5 }
 0xf57   : > { %v4563_v11 = vrot.slane %v4549_v9, %v9852_v5  ;;  %v4564_v12 = vcombine.high %v4556_v10, %v4556_v10  ;;  %v9857_v13 = vrot.slane %v4556_v10, %v9852_v5 }
 0xf59   : > { %v4565_v38 = vcombine.high %v4563_v11, %v4563_v11  ;;  %v9860_v41 = vrot.slane %v4564_v12, %v9852_v5  ;;  %4573 = vrot.lane.b32.xlu0 %v9857_v13, %s9198_s23  ;;  %v9865_v44 = vrot.slane %v4563_v11, %v9852_v5 }
 0xf5b   : > { %4656 = vrot.lane.b32.xlu1 %v9860_v41, %s9198_s23  ;;  %v9870_v26 = vrot.slane %v4565_v38, %v9852_v5 }
 0xf5d   : > { %4739 = vrot.lane.b32.xlu0 %v9865_v44, %s9198_s23 }
 0xf5f   : > { %4822 = vrot.lane.b32.xlu1 %v9870_v26, %s9198_s23  ;;  %s10414_s23 = smov 80  }
 0xf61   : > { %5025 = vrot.lane.b32.xlu0 %v9860_v41, %s9199_s24 }
 0xf63   : > { %4947 = vrot.lane.b32.xlu1 %v9857_v13, %s9199_s24 }
 0xf67   : > { %5102 = vrot.lane.b32.xlu1 %v9865_v44, %s9199_s24 }
 0xf6b   : > { %5179 = vrot.lane.b32.xlu1 %v9870_v26, %s9199_s24  ;;  %s10415_s24 = smov 112  }
 0xfcb   : > { %v4574_v15 = vpop.permute.xlu0 %4573 }
 0xfcc   : > { %8659 = vmatpush3.xpose.msk.msra.mxu0 %vm1049_vm4, %v4574_v15 }
 0xfcd   : > { %v4657_v43 = vpop.permute.xlu1 %4656  ;;  %8663 = vmatprep.subr.mxu0 %v9196_v0 }
 0xfcf   : > { %8661 = vmatmul.mubr.msk.f32.vlgmr.msra.gmra.mrb[36].mxu0 %vm1049_vm4, %v4556_v10  ;;  %v4740_v53 = vpop.permute.xlu0 %4739 }
 0xfd0   : > { %8664 = vmatpush3.xpose.msk.msra.mxu0 %vm1049_vm4, %v4657_v43  ;;  %8665 = vmatprep.mubr.msk.f32.mxu0 %vm9197_vm0, %v9196_v0 }
 0xfd1   : > { %v4823_v54 = vpop.permute.xlu1 %4822  ;;  %8668 = vmatprep.subr.mxu0 %v9196_v0 }
 0xfd2   : > { %8674 = vmatpush3.xpose.msk.msra.mxu1 %vm1049_vm4, %v4823_v54 }
 0xfd3   : > { %8666 = vmatmul.mubr.msk.f32.vlgmr.msra.gmra.mrb[38].mxu0 %vm1049_vm4, %v4564_v12  ;;  %8683 = vmatprep.subr.mxu1 %v9196_v0  ;;  %v5026_v16 = vpop.permute.xlu0 %5025 }
 0xfd4   : > { %8669 = vmatpush3.xpose.msk.msra.mxu0 %vm1049_vm4, %v4740_v53  ;;  %8670 = vmatprep.mubr.msk.f32.mxu0 %vm9197_vm0, %v9196_v0 }
 0xfd5   : > { %8676 = vmatmul.mubr.msk.f32.vlgmr.msra.gmra.mrb[44].mxu1 %vm1049_vm4, %v4565_v38  ;;  %8678 = vmatprep.subr.mxu0 %v9196_v0  ;;  %v4948_v17 = vpop.permute.xlu1 %4947 }
 0xfd6   : > { %8684 = vmatpush3.msk.msra.mxu1 %vm945_vm14, %v5026_v16  ;;  %8685 = vmatprep.mubr.msk.f32.mxu1 %vm9197_vm0, %v9196_v0 }
 0xfd7   : > { %8671 = vmatmul.mubr.msk.f32.vlgmr.msra.gmra.mrb[40].mxu0 %vm1049_vm4, %v4563_v11  ;;  %8693 = vmatprep.subr.mxu1 %v9196_v0 }
 0xfd8   : > { %8679 = vmatpush3.msk.msra.mxu0 %vm945_vm14, %v4948_v17  ;;  %8680 = vmatprep.mubr.msk.f32.mxu0 %vm9197_vm0, %v9196_v0 }
 0xfd9   : > { %8688 = vmatprep.subr.mxu0 %v9196_v0  ;;  %v5103_v46 = vpop.permute.xlu1 %5102 }
 0xfdd   : > { %v5180_v47 = vpop.permute.xlu1 %5179 }
0x10a2   : > { %v4645_v19 = vpop.f32.mrb[36].mxu0 }
0x10a3   : > { %v4898_v22 = vmul.f32 0.35355338, %v4645_v19  ;;  %v8662_v25 = vpop.f32.mrb[37].mxu0 }
0x10a5   : > { %v4903_v28 = vsel %vm4902_vm6, %v4898_v22, -inf }
0x10a6   : > { %4904 = vmax.xlane.f32.xlu0 %v4903_v28  ;;  %v4728_v29 = vpop.f32.mrb[38].mxu0 }
0x10a7   : > { %v4899_v30 = vmul.f32 0.35355338, %v4728_v29  ;;  %v8667_v31 = vpop.f32.mrb[39].mxu0 }
0x10a8   : > { %v4894_v32 = vpop.f32.mrb[44].mxu1 }
0x10a9   : > { %v4901_v33 = vmul.f32 0.35355338, %v4894_v32  ;;  %v8677_v34 = vpop.f32.mrb[45].mxu1  ;;  %v4906_v35 = vsel %vm4902_vm6, %v4899_v30, -inf }
0x10aa   : > { %4907 = vmax.xlane.f32.xlu1 %v4906_v35  ;;  %v4811_v36 = vpop.f32.mrb[40].mxu0 }
0x10ab   : > { %v4900_v37 = vmul.f32 0.35355338, %v4811_v36  ;;  %v8672_v39 = vpop.f32.mrb[41].mxu0  ;;  %v4912_v42 = vsel %vm4902_vm6, %v4901_v33, -inf }
0x10ac   : > { %4913 = vmax.xlane.f32.xlu0 %v4912_v42 }
0x10ad   : > { %v4909_v45 = vsel %vm4902_vm6, %v4900_v37, -inf }
0x10b0   : > { %4910 = vmax.xlane.f32.xlu0 %v4909_v45 }
0x10bb   : > { %5337 = vrot.lane.b32.xlu1 %v9860_v41, %s9200_s3 }
0x10c6   : > { %5259 = vrot.lane.b32.xlu0 %v9857_v13, %s9200_s3 }
0x1133   : > { %v4905_v48 = vpop.xlane.xlu0 %4904 }
0x1134   : > { %v4915_v49 = vsub.f32 %v4898_v22, %v4905_v48 }
0x1136   : > { %v4919_v50 = vmul.f32 1.442695, %v4915_v49 }
0x1137   : > { %v4908_v51 = vpop.xlane.xlu1 %4907 }
0x1138   : > { %9066 = vpow2.f32 %v4919_v50  ;;  %v4916_v52 = vsub.f32 %v4899_v30, %v4908_v51 }
0x1139   : > { %v4914_v60 = vpop.xlane.xlu0 %4913 }
0x113a   : > { %v4921_v55 = vmul.f32 1.442695, %v4916_v52  ;;  %v4918_v62 = vsub.f32 %v4901_v33, %v4914_v60 }
0x113b   : > { %v5338_v4 = vpop.permute.xlu1 %5337 }
0x113c   : > { %9068 = vpow2.f32 %v4921_v55  ;;  %v4925_v1 = vmul.f32 1.442695, %v4918_v62 }
0x113d   : > { %v4911_v61 = vpop.xlane.xlu0 %4910 }
0x113e   : > { %v4917_v63 = vsub.f32 %v4900_v37, %v4911_v61  ;;  %9070 = vpow2.f32 %v4925_v1 }
0x1140   : > { %v4923_v2 = vmul.f32 1.442695, %v4917_v63 }
0x1141   : > { %v5260_v6 = vpop.permute.xlu0 %5259 }
0x1142   : > { %v9067_v56 = vpop.eup %9066  ;;  %9072 = vpow2.f32 %v4923_v2 }
0x1143   : > { %v4927_v57 = vsel %vm4902_vm6, %v9067_v56, 0.0 }
0x1144   : > { %4928 = vadd.xlane.f32.xlu1 %v4927_v57 }
0x1146   : > { %v9069_v58 = vpop.eup %9068 }
0x1147   : > { %v4930_v59 = vsel %vm4902_vm6, %v9069_v58, 0.0 }
0x1148   : > { %4931 = vadd.xlane.f32.xlu0 %v4930_v59  ;;  %v9071_v3 = vpop.eup %9070 }
0x1149   : > { %v4936_v20 = vsel %vm4902_vm6, %v9071_v3, 0.0 }
0x114c   : > { %v9073_v18 = vpop.eup %9072 }
0x114d   : > { %v4933_v24 = vsel %vm4902_vm6, %v9073_v18, 0.0 }
0x1155   : > { %5335 = vrot.lane.b32.xlu1 %v9860_v41, %s9201_s28 }
0x1159   : > { %5493 = vrot.lane.b32.xlu1 %v9870_v26, %s9200_s3 }
0x115e   : > { %5257 = vrot.lane.b32.xlu0 %v9857_v13, %s9201_s28 }
0x117d   : > { %4937 = vadd.xlane.f32.xlu0 %v4936_v20  ;;  %4934 = vadd.xlane.f32.xlu1 %v4933_v24 }
0x118e   : > { %5491 = vrot.lane.b32.xlu1 %v9870_v26, %s9201_s28 }
0x1193   : > { %5415 = vrot.lane.b32.xlu0 %v9865_v44, %s9200_s3 }
0x1197   : > { %5413 = vrot.lane.b32.xlu0 %v9865_v44, %s9201_s28  ;;  %s10420_s28 = sld [smem:[#allocation13_spill]] }
0x11d1   : > { %v4929_v7 = vpop.xlane.xlu1 %4928 }
0x11d2   : > { %9074 = vrcp.f32 %v4929_v7 }
0x11d5   : > { %v4932_v8 = vpop.xlane.xlu0 %4931  ;;  %v5336_v38 = vpop.permute.xlu1 %5335 }
0x11d6   : > { %9076 = vrcp.f32 %v4932_v8 }
0x11d9   : > { %v5494_v15 = vpop.permute.xlu1 %5493  ;;  %v5258_v43 = vpop.permute.xlu0 %5257 }
0x11dc   : > { %v9075_v9 = vpop.eup %9074 }
0x11dd   : > { %v4943_v10 = vmul.f32 %v9075_v9, %v9067_v56 }
0x11df   : > { %8681 = vmatmul.mubr.msk.f32.vlgmr.msra.gmra.mrb[42].mxu0 %vm4949_vm7, %v4943_v10 }
0x11e0   : > { %v9077_v11 = vpop.eup %9076  ;;  %8689 = vmatpush3.msk.msra.mxu0 %vm945_vm14, %v5103_v46  ;;  %8690 = vmatprep.mubr.msk.f32.mxu0 %vm9197_vm0, %v9196_v0 }
0x11e1   : > { %v4944_v12 = vmul.f32 %v9077_v11, %v9069_v58  ;;  %8698 = vmatprep.subr.mxu0 %v9196_v0 }
0x11e3   : > { %8686 = vmatmul.mubr.msk.f32.vlgmr.msra.gmra.mrb[46].mxu1 %vm4949_vm7, %v4944_v12 }
0x11e4   : > { %8694 = vmatpush3.msk.msra.mxu1 %vm945_vm14, %v5180_v47  ;;  %8695 = vmatprep.mubr.msk.f32.mxu1 %vm9197_vm0, %v9196_v0 }
0x11e5   : > { %8703 = vmatprep.subr.mxu1 %v9196_v0 }
0x120a   : > { %v4935_v53 = vpop.xlane.xlu1 %4934  ;;  %v4938_v54 = vpop.xlane.xlu0 %4937 }
0x120b   : > { %9078 = vrcp.f32 %v4935_v53 }
0x120c   : > { %9080 = vrcp.f32 %v4938_v54 }
0x120e   : > { %v5416_v25 = vpop.permute.xlu0 %5415  ;;  %v5492_v29 = vpop.permute.xlu1 %5491 }
0x1212   : > { %v5414_v28 = vpop.permute.xlu0 %5413 }
0x1215   : > { %v9079_v16 = vpop.eup %9078 }
0x1216   : > { %v9081_v17 = vpop.eup %9080  ;;  %v4945_v19 = vmul.f32 %v9079_v16, %v9073_v18 }
0x1217   : > { %v4946_v22 = vmul.f32 %v9081_v17, %v9071_v3 }
0x1218   : > { %8691 = vmatmul.mubr.msk.f32.vlgmr.msra.gmra.mrb[44].mxu0 %vm4949_vm7, %v4945_v19 }
0x1219   : > { %8696 = vmatmul.mubr.msk.f32.vlgmr.msra.gmra.mrb[48].mxu1 %vm4949_vm7, %v4946_v22  ;;  %8699 = vmatpush3.xpose.msk.msra.mxu0 %vm1049_vm4, %v5260_v6 }
0x121a   : > { %8704 = vmatpush3.xpose.msk.msra.mxu1 %vm1049_vm4, %v5338_v4  ;;  %8700 = vmatprep.mubr.msk.f32.mxu0 %vm9197_vm0, %v9196_v0 }
0x121b   : > { %8705 = vmatprep.mubr.msk.f32.mxu1 %vm9197_vm0, %v9196_v0  ;;  %8708 = vmatprep.subr.mxu0 %v9196_v0 }
0x121c   : > { %8713 = vmatprep.subr.mxu1 %v9196_v0  ;;  %8701 = vmatmul.mubr.msk.f32.vlgmr.msra.gmra.mrb[46].mxu0 %vm1049_vm4, %v5258_v43 }
0x121d   : > { %8706 = vmatmul.mubr.msk.f32.vlgmr.msra.gmra.mrb[50].mxu1 %vm1049_vm4, %v5336_v38  ;;  %8709 = vmatpush3.xpose.msk.msra.mxu0 %vm1049_vm4, %v5416_v25 }
0x121e   : > { %8714 = vmatpush3.xpose.msk.msra.mxu1 %vm1049_vm4, %v5494_v15  ;;  %8710 = vmatprep.mubr.msk.f32.mxu0 %vm9197_vm0, %v9196_v0 }
0x121f   : > { %8715 = vmatprep.mubr.msk.f32.mxu1 %vm9197_vm0, %v9196_v0  ;;  %8718 = vmatprep.subr.mxu0 %v9196_v0 }
0x1220   : > { %8711 = vmatmul.mubr.msk.f32.vlgmr.msra.gmra.mrb[48].mxu0 %vm1049_vm4, %v5414_v28  ;;  %8723 = vmatprep.subr.mxu1 %v9196_v0 }
0x1221   : > { %8716 = vmatmul.mubr.msk.f32.vlgmr.msra.gmra.mrb[52].mxu1 %vm1049_vm4, %v5492_v29  ;;  %8720 = vmatprep.mubr.msk.f32.mxu0 %vm9197_vm0, %v9196_v0 }
0x1222   : > { %8725 = vmatprep.mubr.msk.f32.mxu1 %vm9197_vm0, %v9196_v0 }
0x12b2   : > { %v5021_v30 = vpop.f32.mrb[42].mxu0 }
0x12b3   : > { %v8682_v31 = vpop.f32.mrb[43].mxu0 }
0x12b6   : > { %v5098_v32 = vpop.f32.mrb[46].mxu1 }
0x12b7   : > { %v6023_v33 = vcombine.low %v5021_v30, %v5098_v32  ;;  %v8687_v34 = vpop.f32.mrb[47].mxu1 }
0x12b9   : > { %v9969_v45 = vrot.slane %v6023_v33, %v9852_v5 }
0x12eb   : > { %v5175_v35 = vpop.f32.mrb[44].mxu0 }
0x12ec   : > { %v5252_v36 = vpop.f32.mrb[48].mxu1  ;;  %v8692_v37 = vpop.f32.mrb[45].mxu0 }
0x12ed   : > { %v6024_v39 = vcombine.low %v5175_v35, %v5252_v36  ;;  %v8697_v42 = vpop.f32.mrb[49].mxu1 }
0x12ef   : > { %v9972_v46 = vrot.slane %v6024_v39, %v9852_v5  ;;  %v5331_v47 = vpop.f32.mrb[46].mxu0 }
0x12f0   : > { %v5569_v48 = vmul.f32 0.35355338, %v5331_v47  ;;  %v5409_v49 = vpop.f32.mrb[50].mxu1  ;;  %v8702_v50 = vpop.f32.mrb[47].mxu0 }
0x12f1   : > { %v6039_v51 = vcombine.low %v9969_v45, %v9972_v46  ;;  %v5570_v52 = vmul.f32 0.35355338, %v5409_v49  ;;  %v8707_v55 = vpop.f32.mrb[51].mxu1  ;;  %v5256_v50 = vld [vmem:[%s10357_s14] sm:$0xff]  ;;  %v5925_v46 = vld [vmem:[%s10357_s14 + $0x8] sm:$0xff] }
0x12f2   : > { %v5573_v56 = vsel %vm4902_vm6, %v5569_v48, -inf }
0x12f3   : > { %v5576_v57 = vsel %vm4902_vm6, %v5570_v52, -inf  ;;  %5574 = vmax.xlane.f32.xlu0 %v5573_v56  ;;  %v5487_v58 = vpop.f32.mrb[48].mxu0 }
0x12f4   : > { %5577 = vmax.xlane.f32.xlu1 %v5576_v57  ;;  %v5565_v59 = vpop.f32.mrb[52].mxu1  ;;  %v5571_v60 = vmul.f32 0.35355338, %v5487_v58  ;;  %v8712_v61 = vpop.f32.mrb[49].mxu0 }
0x12f5   : > { %v8717_v62 = vpop.f32.mrb[53].mxu1  ;;  %v5572_v63 = vmul.f32 0.35355338, %v5565_v59 }
0x12f6   : > { %v5579_v1 = vsel %vm4902_vm6, %v5571_v60, -inf }
0x12f7   : > { %5580 = vmax.xlane.f32.xlu0 %v5579_v1  ;;  %v5582_v2 = vsel %vm4902_vm6, %v5572_v63, -inf }
0x12fb   : > { %5583 = vmax.xlane.f32.xlu0 %v5582_v2 }
0x1305   : > { %5617 = vrot.lane.b32.xlu1 %v9857_v13, %s9202_s4 }
0x1380   : > { %v5575_v3 = vpop.xlane.xlu0 %5574 }
0x1381   : > { %v5578_v18 = vpop.xlane.xlu1 %5577  ;;  %v5585_v20 = vsub.f32 %v5569_v48, %v5575_v3 }
0x1382   : > { %v5586_v24 = vsub.f32 %v5570_v52, %v5578_v18 }
0x1383   : > { %v5589_v4 = vmul.f32 1.442695, %v5585_v20 }
0x1384   : > { %v5591_v6 = vmul.f32 1.442695, %v5586_v24  ;;  %v5581_v7 = vpop.xlane.xlu0 %5580 }
0x1385   : > { %9082 = vpow2.f32 %v5589_v4  ;;  %v5618_v8 = vpop.permute.xlu1 %5617  ;;  %v5587_v9 = vsub.f32 %v5571_v60, %v5581_v7 }
0x1386   : > { %9084 = vpow2.f32 %v5591_v6  ;;  %8719 = vmatpush3.msk.msra.mxu0 %vm945_vm14, %v5618_v8 }
0x1387   : > { %v5593_v10 = vmul.f32 1.442695, %v5587_v9  ;;  %8728 = vmatprep.subr.mxu0 %v9196_v0 }
0x1388   : > { %v5584_v11 = vpop.xlane.xlu0 %5583 }
0x1389   : > { %9086 = vpow2.f32 %v5593_v10  ;;  %v5588_v12 = vsub.f32 %v5572_v63, %v5584_v11 }
0x138b   : > { %v5595_v38 = vmul.f32 1.442695, %v5588_v12 }
0x138d   : > { %9088 = vpow2.f32 %v5595_v38 }
0x138f   : > { %v9083_v15 = vpop.eup %9082 }
0x1390   : > { %v9085_v43 = vpop.eup %9084  ;;  %v5597_v53 = vsel %vm4902_vm6, %v9083_v15, 0.0 }
0x1391   : > { %5598 = vadd.xlane.f32.xlu1 %v5597_v53  ;;  %v5600_v54 = vsel %vm4902_vm6, %v9085_v43, 0.0 }
0x1392   : > { %5601 = vadd.xlane.f32.xlu0 %v5600_v54 }
0x1393   : > { %v9087_v16 = vpop.eup %9086 }
0x1394   : > { %v5603_v17 = vsel %vm4902_vm6, %v9087_v16, 0.0 }
0x1395   : > { %5604 = vadd.xlane.f32.xlu1 %v5603_v17 }
0x1397   : > { %v9089_v19 = vpop.eup %9088 }
0x1398   : > { %v5606_v22 = vsel %vm4902_vm6, %v9089_v19, 0.0 }
0x1399   : > { %5607 = vadd.xlane.f32.xlu0 %v5606_v22 }
0x13a6   : > { %5771 = vrot.lane.b32.xlu1 %v9865_v44, %s9202_s4 }
0x13aa   : > { %5848 = vrot.lane.b32.xlu1 %v9870_v26, %s9202_s4 }
0x13ae   : > { %6192 = vrot.lane.b32.xlu1 %v9860_v41, %s10414_s23 }
0x13af   : > { %5694 = vrot.lane.b32.xlu0 %v9860_v41, %s9202_s4  ;;  %s9212_s4 = smov 127  }
0x13b2   : > { %6190 = vrot.lane.b32.xlu1 %v9860_v41, %s10415_s24 }
0x13b3   : > { %6114 = vrot.lane.b32.xlu0 %v9857_v13, %s10414_s23 }
0x13b6   : > { %6348 = vrot.lane.b32.xlu1 %v9870_v26, %s10414_s23 }
0x13b7   : > { %6112 = vrot.lane.b32.xlu0 %v9857_v13, %s10415_s24 }
0x13ba   : > { %6346 = vrot.lane.b32.xlu1 %v9870_v26, %s10415_s24 }
0x13bb   : > { %6270 = vrot.lane.b32.xlu0 %v9865_v44, %s10414_s23 }
0x13bf   : > { %6268 = vrot.lane.b32.xlu0 %v9865_v44, %s10415_s24 }
0x141e   : > { %v5599_v25 = vpop.xlane.xlu1 %5598 }
0x141f   : > { %9090 = vrcp.f32 %v5599_v25  ;;  %v5602_v28 = vpop.xlane.xlu0 %5601 }
0x1420   : > { %9092 = vrcp.f32 %v5602_v28 }
0x1422   : > { %v5605_v29 = vpop.xlane.xlu1 %5604 }
0x1423   : > { %9094 = vrcp.f32 %v5605_v29 }
0x1426   : > { %v5772_v30 = vpop.permute.xlu1 %5771  ;;  %v5608_v31 = vpop.xlane.xlu0 %5607 }
0x1427   : > { %9096 = vrcp.f32 %v5608_v31 }
0x1429   : > { %v9091_v32 = vpop.eup %9090 }
0x142a   : > { %v9093_v33 = vpop.eup %9092  ;;  %v5613_v34 = vmul.f32 %v9091_v32, %v9083_v15  ;;  %v5849_v35 = vpop.permute.xlu1 %5848 }
0x142b   : > { %v5695_v36 = vpop.permute.xlu0 %5694  ;;  %v5614_v37 = vmul.f32 %v9093_v33, %v9085_v43 }
0x142c   : > { %8724 = vmatpush3.msk.msra.mxu1 %vm945_vm14, %v5695_v36  ;;  %8721 = vmatmul.mubr.msk.f32.vlgmr.msra.gmra.mrb[50].mxu0 %vm4949_vm7, %v5613_v34 }
0x142d   : > { %8733 = vmatprep.subr.mxu1 %v9196_v0  ;;  %v9095_v39 = vpop.eup %9094  ;;  %8726 = vmatmul.mubr.msk.f32.vlgmr.msra.gmra.mrb[54].mxu1 %vm4949_vm7, %v5614_v37 }
0x142e   : > { %8729 = vmatpush3.msk.msra.mxu0 %vm945_vm14, %v5772_v30  ;;  %v5615_v42 = vmul.f32 %v9095_v39, %v9087_v16  ;;  %8734 = vmatpush3.msk.msra.mxu1 %vm945_vm14, %v5849_v35  ;;  %v6193_v47 = vpop.permute.xlu1 %6192 }
0x142f   : > { %8730 = vmatprep.mubr.msk.f32.mxu0 %vm9197_vm0, %v9196_v0  ;;  %8735 = vmatprep.mubr.msk.f32.mxu1 %vm9197_vm0, %v9196_v0  ;;  %v6115_v60 = vpop.permute.xlu0 %6114 }
0x1430   : > { %8743 = vmatprep.subr.mxu1 %v9196_v0  ;;  %8731 = vmatmul.mubr.msk.f32.vlgmr.msra.gmra.mrb[52].mxu0 %vm4949_vm7, %v5615_v42 }
0x1431   : > { %8738 = vmatprep.subr.mxu0 %v9196_v0  ;;  %v9097_v48 = vpop.eup %9096  ;;  %8740 = vmatprep.mubr.msk.f32.mxu0 %vm9197_vm0, %v9196_v0 }
0x1432   : > { %v5616_v49 = vmul.f32 %v9097_v48, %v9089_v19  ;;  %v6191_v52 = vpop.permute.xlu1 %6190  ;;  %8739 = vmatpush3.msra.mxu0 %v5925_v46 }
0x1433   : > { %8748 = vmatprep.subr.mxu0 %v9196_v0  ;;  %v6113_v3 = vpop.permute.xlu0 %6112 }
0x1434   : > { %8736 = vmatmul.mubr.msk.f32.vlgmr.msra.gmra.mrb[56].mxu1 %vm4949_vm7, %v5616_v49 }
0x1435   : > { %8744 = vmatpush3.msra.mxu1 %v5256_v50  ;;  %8745 = vmatprep.mubr.msk.f32.mxu1 %vm9197_vm0, %v9196_v0 }
0x1436   : > { %8753 = vmatprep.subr.mxu1 %v9196_v0  ;;  %v6349_v55 = vpop.permute.xlu1 %6348 }
0x1437   : > { %v6271_v7 = vpop.permute.xlu0 %6270 }
0x1438   : > { %8746 = vmatmul.mubr.msk.f32.vlgmr.msra.gmra.mrb[58].mxu1 %vm1049_vm4, %v6039_v51 }
0x1439   : > { %8755 = vmatprep.mubr.msk.f32.mxu1 %vm9197_vm0, %v9196_v0 }
0x143a   : > { %v6347_v45 = vpop.permute.xlu1 %6346 }
0x143b   : > { %v6269_v11 = vpop.permute.xlu0 %6268 }
0x143c   : > { %8754 = vmatpush3.xpose.msk.msra.mxu1 %vm1049_vm4, %v6193_v47 }
0x143d   : > { %8763 = vmatprep.subr.mxu1 %v9196_v0 }
0x143f   : > { %8756 = vmatmul.mubr.msk.f32.vlgmr.msra.gmra.mrb[60].mxu1 %vm1049_vm4, %v6191_v52 }
0x1440   : > { %8764 = vmatpush3.xpose.msk.msra.mxu1 %vm1049_vm4, %v6349_v55  ;;  %8765 = vmatprep.mubr.msk.f32.mxu1 %vm9197_vm0, %v9196_v0 }
0x1441   : > { %8773 = vmatprep.subr.mxu1 %v9196_v0 }
0x1443   : > { %8766 = vmatmul.mubr.msk.f32.vlgmr.msra.gmra.mrb[62].mxu1 %vm1049_vm4, %v6347_v45 }
0x1444   : > { %8775 = vmatprep.mubr.msk.f32.mxu1 %vm9197_vm0, %v9196_v0 }
0x14ff   : > { %v5690_v51 = vpop.f32.mrb[50].mxu0 }
0x1500   : > { %v5767_v56 = vpop.f32.mrb[54].mxu1  ;;  %v8722_v57 = vpop.f32.mrb[51].mxu0 }
0x1501   : > { %v5930_v58 = vcombine.low %v5690_v51, %v5767_v56  ;;  %v8727_v59 = vpop.f32.mrb[55].mxu1 }
0x1503   : > { %v5844_v61 = vpop.f32.mrb[52].mxu0  ;;  %v5938_v18 = vrot.slane %v5930_v58, %v9852_v5 }
0x1504   : > { %v8732_v62 = vpop.f32.mrb[53].mxu0 }
0x1507   : > { %v5921_v63 = vpop.f32.mrb[56].mxu1 }
0x1508   : > { %v5931_v1 = vcombine.low %v5844_v61, %v5921_v63  ;;  %v8737_v2 = vpop.f32.mrb[57].mxu1 }
0x150a   : > { %v5945_v20 = vrot.slane %v5931_v1, %v9852_v5 }
0x150b   : > { %v6108_v24 = vpop.f32.mrb[58].mxu1 }
0x150c   : > { %v5946_v4 = vcombine.low %v5938_v18, %v5945_v20  ;;  %v8747_v6 = vpop.f32.mrb[59].mxu1 }
0x150e   : > { %8741 = vmatmul.mubr.msk.f32.vlgmr.msra.gmra.mrb[54].mxu0 %vm1049_vm4, %v5946_v4 }
0x150f   : > { %8749 = vmatpush3.xpose.msk.msra.mxu0 %vm1049_vm4, %v6115_v60  ;;  %8750 = vmatprep.mubr.msk.f32.mxu0 %vm9197_vm0, %v9196_v0 }
0x1510   : > { %8758 = vmatprep.subr.mxu0 %v9196_v0 }
0x1512   : > { %v6264_v8 = vpop.f32.mrb[60].mxu1  ;;  %8751 = vmatmul.mubr.msk.f32.vlgmr.msra.gmra.mrb[56].mxu0 %vm1049_vm4, %v6113_v3 }
0x1513   : > { %v6425_v9 = vmul.f32 0.35355338, %v6264_v8  ;;  %v8757_v10 = vpop.f32.mrb[61].mxu1  ;;  %8759 = vmatpush3.xpose.msk.msra.mxu0 %vm1049_vm4, %v6271_v7  ;;  %8760 = vmatprep.mubr.msk.f32.mxu0 %vm9197_vm0, %v9196_v0 }
0x1514   : > { %8768 = vmatprep.subr.mxu0 %v9196_v0 }
0x1515   : > { %v6431_v12 = vsel %vm4902_vm6, %v6425_v9, -inf }
0x1516   : > { %6432 = vmax.xlane.f32.xlu1 %v6431_v12  ;;  %v6420_v38 = vpop.f32.mrb[62].mxu1  ;;  %8761 = vmatmul.mubr.msk.f32.vlgmr.msra.gmra.mrb[58].mxu0 %vm1049_vm4, %v6269_v11 }
0x1517   : > { %v8767_v15 = vpop.f32.mrb[63].mxu1  ;;  %8770 = vmatprep.mubr.msk.f32.mxu0 %vm9197_vm0, %v9196_v0  ;;  %v6427_v34 = vmul.f32 0.35355338, %v6420_v38 }
0x1519   : > { %v6437_v36 = vsel %vm4902_vm6, %v6427_v34, -inf }
0x1527   : > { %6472 = vrot.lane.b32.xlu1 %v9857_v13, %s10416_s27 }
0x152b   : > { %6626 = vrot.lane.b32.xlu1 %v9865_v44, %s10416_s27 }
0x15a3   : > { %v6433_v43 = vpop.xlane.xlu1 %6432 }
0x15a4   : > { %v6441_v54 = vsub.f32 %v6425_v9, %v6433_v43  ;;  %v6780_v43 = vld [vmem:[%s10357_s14 + $0x10] sm:$0xff] }
0x15a6   : > { %v6446_v22 = vmul.f32 1.442695, %v6441_v54 }
0x15a7   : > { %v6473_v53 = vpop.permute.xlu1 %6472 }
0x15a8   : > { %8769 = vmatpush3.msk.msra.mxu0 %vm945_vm14, %v6473_v53  ;;  %9098 = vpow2.f32 %v6446_v22 }
0x15a9   : > { %8778 = vmatprep.subr.mxu0 %v9196_v0 }
0x15ab   : > { %v6627_v61 = vpop.permute.xlu1 %6626 }
0x15b2   : > { %v9099_v37 = vpop.eup %9098 }
0x15b3   : > { %v6455_v39 = vsel %vm4902_vm6, %v9099_v37, 0.0 }
0x15e1   : > { %v6015_v16 = vpop.f32.mrb[54].mxu0 }
0x15e2   : > { %v10074_v17 = vadd.f32 %v6108_v24, %v6015_v16  ;;  %v8742_v19 = vpop.f32.mrb[55].mxu0 }
0x15e5   : > { %v6186_v25 = vpop.f32.mrb[56].mxu0 }
0x15e6   : > { %v6424_v28 = vmul.f32 0.35355338, %v6186_v25  ;;  %v8752_v29 = vpop.f32.mrb[57].mxu0 }
0x15e8   : > { %v6428_v30 = vsel %vm4902_vm6, %v6424_v28, -inf }
0x15e9   : > { %6429 = vmax.xlane.f32.xlu0 %v6428_v30  ;;  %v6342_v31 = vpop.f32.mrb[58].mxu0 }
0x15ea   : > { %v6426_v32 = vmul.f32 0.35355338, %v6342_v31  ;;  %v8762_v33 = vpop.f32.mrb[59].mxu0 }
0x15ec   : > { %v6434_v35 = vsel %vm4902_vm6, %v6426_v32, -inf }
0x15ed   : > { %6435 = vmax.xlane.f32.xlu0 %v6434_v35 }
0x15f1   : > { %6438 = vmax.xlane.f32.xlu0 %v6437_v36 }
0x15f5   : > { %6456 = vadd.xlane.f32.xlu0 %v6455_v39 }
0x1676   : > { %v6430_v42 = vpop.xlane.xlu0 %6429 }
0x1677   : > { %v6440_v47 = vsub.f32 %v6424_v28, %v6430_v42 }
0x1679   : > { %v6444_v48 = vmul.f32 1.442695, %v6440_v47 }
0x167a   : > { %v6436_v49 = vpop.xlane.xlu0 %6435 }
0x167b   : > { %9100 = vpow2.f32 %v6444_v48  ;;  %v6442_v50 = vsub.f32 %v6426_v32, %v6436_v49 }
0x167d   : > { %v6448_v52 = vmul.f32 1.442695, %v6442_v50 }
0x167e   : > { %v6439_v55 = vpop.xlane.xlu0 %6438 }
0x167f   : > { %9102 = vpow2.f32 %v6448_v52  ;;  %v6443_v45 = vsub.f32 %v6427_v34, %v6439_v55 }
0x1681   : > { %v6450_v46 = vmul.f32 1.442695, %v6443_v45 }
0x1682   : > { %v6457_v62 = vpop.xlane.xlu0 %6456 }
0x1683   : > { %9104 = vpow2.f32 %v6450_v46 }
0x1684   : > { %9106 = vrcp.f32 %v6457_v62 }
0x1685   : > { %v9101_v51 = vpop.eup %9100 }
0x1686   : > { %v6452_v56 = vsel %vm4902_vm6, %v9101_v51, 0.0 }
0x1687   : > { %6453 = vadd.xlane.f32.xlu1 %v6452_v56 }
0x1689   : > { %v9103_v57 = vpop.eup %9102 }
0x168a   : > { %v6458_v58 = vsel %vm4902_vm6, %v9103_v57, 0.0 }
0x168b   : > { %6459 = vadd.xlane.f32.xlu1 %v6458_v58 }
0x168d   : > { %v9105_v59 = vpop.eup %9104 }
0x168e   : > { %v6461_v60 = vsel %vm4902_vm6, %v9105_v59, 0.0  ;;  %v9107_v3 = vpop.eup %9106 }
0x168f   : > { %6462 = vadd.xlane.f32.xlu0 %v6461_v60  ;;  %v6469_v20 = vmul.f32 %v9107_v3, %v9099_v37 }
0x169c   : > { %6703 = vrot.lane.b32.xlu1 %v9870_v26, %s10416_s27 }
0x16a0   : > { %6955 = vrot.lane.b32.xlu1 %v9860_v41, %s10417_s30 }
0x16a4   : > { %6953 = vrot.lane.b32.xlu1 %v9860_v41, %s10418_s26 }
0x16a5   : > { %6549 = vrot.lane.b32.xlu0 %v9860_v41, %s10416_s27  ;;  %s9214_s27 = smov 125  }
0x16a8   : > { %7111 = vrot.lane.b32.xlu1 %v9870_v26, %s10417_s30 }
0x16a9   : > { %6877 = vrot.lane.b32.xlu0 %v9857_v13, %s10417_s30 }
0x16ac   : > { %7109 = vrot.lane.b32.xlu1 %v9870_v26, %s10418_s26 }
0x16ad   : > { %6875 = vrot.lane.b32.xlu0 %v9857_v13, %s10418_s26 }
0x16b1   : > { %7033 = vrot.lane.b32.xlu0 %v9865_v44, %s10417_s30 }
0x16b5   : > { %7031 = vrot.lane.b32.xlu0 %v9865_v44, %s10418_s26 }
0x1714   : > { %v6454_v63 = vpop.xlane.xlu1 %6453 }
0x1715   : > { %9108 = vrcp.f32 %v6454_v63 }
0x1718   : > { %v6460_v1 = vpop.xlane.xlu1 %6459 }
0x1719   : > { %9110 = vrcp.f32 %v6460_v1 }
0x171c   : > { %v6463_v2 = vpop.xlane.xlu0 %6462  ;;  %v6704_v7 = vpop.permute.xlu1 %6703 }
0x171d   : > { %9112 = vrcp.f32 %v6463_v2 }
0x171f   : > { %v9109_v18 = vpop.eup %9108 }
0x1720   : > { %v6468_v24 = vmul.f32 %v9109_v18, %v9101_v51  ;;  %v6550_v4 = vpop.permute.xlu0 %6549  ;;  %v6956_v25 = vpop.permute.xlu1 %6955 }
0x1721   : > { %8774 = vmatpush3.msk.msra.mxu1 %vm945_vm14, %v6550_v4 }
0x1722   : > { %8771 = vmatmul.mubr.msk.f32.vlgmr.msra.gmra.mrb[60].mxu0 %vm4949_vm7, %v6468_v24  ;;  %8776 = vmatmul.mubr.msk.f32.vlgmr.msra.gmra.mrb[64].mxu1 %vm4949_vm7, %v6469_v20 }
0x1723   : > { %v9111_v6 = vpop.eup %9110  ;;  %8779 = vmatpush3.msk.msra.mxu0 %vm945_vm14, %v6627_v61  ;;  %8783 = vmatprep.subr.mxu1 %v9196_v0 }
0x1724   : > { %v6470_v8 = vmul.f32 %v9111_v6, %v9103_v57  ;;  %8784 = vmatpush3.msk.msra.mxu1 %vm945_vm14, %v6704_v7  ;;  %v6878_v9 = vpop.permute.xlu0 %6877  ;;  %8780 = vmatprep.mubr.msk.f32.mxu0 %vm9197_vm0, %v9196_v0  ;;  %v6954_v33 = vpop.permute.xlu1 %6953 }
0x1725   : > { %8785 = vmatprep.mubr.msk.f32.mxu1 %vm9197_vm0, %v9196_v0  ;;  %8793 = vmatprep.subr.mxu1 %v9196_v0 }
0x1726   : > { %8781 = vmatmul.mubr.msk.f32.vlgmr.msra.gmra.mrb[62].mxu0 %vm4949_vm7, %v6470_v8  ;;  %8788 = vmatprep.subr.mxu0 %v9196_v0 }
0x1727   : > { %v9113_v10 = vpop.eup %9112  ;;  %8790 = vmatprep.mubr.msk.f32.mxu0 %vm9197_vm0, %v9196_v0  ;;  %8789 = vmatpush3.msra.mxu0 %v6780_v43 }
0x1728   : > { %v6471_v11 = vmul.f32 %v9113_v10, %v9105_v59  ;;  %v6876_v12 = vpop.permute.xlu0 %6875  ;;  %8798 = vmatprep.subr.mxu0 %v9196_v0  ;;  %v7112_v48 = vpop.permute.xlu1 %7111 }
0x172a   : > { %8786 = vmatmul.mubr.msk.f32.vlgmr.msra.gmra.mrb[66].mxu1 %vm4949_vm7, %v6471_v11 }
0x172b   : > { %8794 = vmatpush3.xpose.msk.msra.mxu1 %vm1049_vm4, %v6878_v9  ;;  %8795 = vmatprep.mubr.msk.f32.mxu1 %vm9197_vm0, %v9196_v0 }
0x172c   : > { %v7034_v38 = vpop.permute.xlu0 %7033  ;;  %8803 = vmatprep.subr.mxu1 %v9196_v0  ;;  %v7110_v45 = vpop.permute.xlu1 %7109 }
0x172e   : > { %8796 = vmatmul.mubr.msk.f32.vlgmr.msra.gmra.mrb[68].mxu1 %vm1049_vm4, %v6876_v12 }
0x172f   : > { %8804 = vmatpush3.xpose.msk.msra.mxu1 %vm1049_vm4, %v7034_v38  ;;  %8805 = vmatprep.mubr.msk.f32.mxu1 %vm9197_vm0, %v9196_v0 }
0x1730   : > { %v7032_v15 = vpop.permute.xlu0 %7031  ;;  %8813 = vmatprep.subr.mxu1 %v9196_v0 }
0x1732   : > { %8806 = vmatmul.mubr.msk.f32.vlgmr.msra.gmra.mrb[70].mxu1 %vm1049_vm4, %v7032_v15 }
0x1733   : > { %8815 = vmatprep.mubr.msk.f32.mxu1 %vm9197_vm0, %v9196_v0 }
0x17f5   : > { %v6545_v53 = vpop.f32.mrb[60].mxu0  ;;  %v6622_v54 = vpop.f32.mrb[64].mxu1 }
0x17f6   : > { %v6785_v16 = vcombine.low %v6545_v53, %v6622_v54  ;;  %v8772_v19 = vpop.f32.mrb[61].mxu0  ;;  %v8777_v22 = vpop.f32.mrb[65].mxu1 }
0x17f8   : > { %v6793_v34 = vrot.slane %v6785_v16, %v9852_v5 }
0x17f9   : > { %v6699_v28 = vpop.f32.mrb[62].mxu0 }
0x17fa   : > { %v8782_v29 = vpop.f32.mrb[63].mxu0 }
0x17fd   : > { %v6776_v30 = vpop.f32.mrb[66].mxu1 }
0x17fe   : > { %v6786_v31 = vcombine.low %v6699_v28, %v6776_v30  ;;  %v8787_v32 = vpop.f32.mrb[67].mxu1 }
0x1800   : > { %v6800_v35 = vrot.slane %v6786_v31, %v9852_v5 }
0x1801   : > { %v6949_v36 = vpop.f32.mrb[68].mxu1 }
0x1802   : > { %v6801_v37 = vcombine.low %v6793_v34, %v6800_v35  ;;  %v7187_v39 = vmul.f32 0.35355338, %v6949_v36  ;;  %v8797_v42 = vpop.f32.mrb[69].mxu1 }
0x1804   : > { %8791 = vmatmul.mubr.msk.f32.vlgmr.msra.gmra.mrb[64].mxu0 %vm1049_vm4, %v6801_v37  ;;  %v7191_v47 = vsel %vm4902_vm6, %v7187_v39, -inf }
0x1805   : > { %8799 = vmatpush3.xpose.msk.msra.mxu0 %vm1049_vm4, %v6956_v25  ;;  %7192 = vmax.xlane.f32.xlu0 %v7191_v47  ;;  %v7105_v49 = vpop.f32.mrb[70].mxu1 }
0x1806   : > { %v7189_v50 = vmul.f32 0.35355338, %v7105_v49  ;;  %v8807_v52 = vpop.f32.mrb[71].mxu1  ;;  %8800 = vmatprep.mubr.msk.f32.mxu0 %vm9197_vm0, %v9196_v0  ;;  %8808 = vmatprep.subr.mxu0 %v9196_v0 }
0x1808   : > { %8801 = vmatmul.mubr.msk.f32.vlgmr.msra.gmra.mrb[66].mxu0 %vm1049_vm4, %v6954_v33  ;;  %v7197_v55 = vsel %vm4902_vm6, %v7189_v50, -inf }
0x1809   : > { %8809 = vmatpush3.xpose.msk.msra.mxu0 %vm1049_vm4, %v7112_v48  ;;  %7198 = vmax.xlane.f32.xlu0 %v7197_v55  ;;  %v7543_v48 = vld [vmem:[%s10357_s14 + $0x18] sm:$0xff] }
0x180a   : > { %8810 = vmatprep.mubr.msk.f32.mxu0 %vm9197_vm0, %v9196_v0  ;;  %8818 = vmatprep.subr.mxu0 %v9196_v0 }
0x180c   : > { %8811 = vmatmul.mubr.msk.f32.vlgmr.msra.gmra.mrb[68].mxu0 %vm1049_vm4, %v7110_v45 }
0x180d   : > { %8820 = vmatprep.mubr.msk.f32.mxu0 %vm9197_vm0, %v9196_v0 }
0x1892   : > { %v7193_v46 = vpop.xlane.xlu0 %7192 }
0x1893   : > { %v7203_v51 = vsub.f32 %v7187_v39, %v7193_v46 }
0x1895   : > { %v7207_v57 = vmul.f32 1.442695, %v7203_v51 }
0x1896   : > { %v7199_v56 = vpop.xlane.xlu0 %7198 }
0x1897   : > { %v7205_v58 = vsub.f32 %v7189_v50, %v7199_v56  ;;  %9114 = vpow2.f32 %v7207_v57  ;;  %v7676_v57 = vld [vmem:[%s10420_s28] sm:$0xf] }
0x1898   : > { %8903 = vpush %v7676_v57 }
0x1899   : > { %v7211_v59 = vmul.f32 1.442695, %v7205_v58  ;;  %v9211_v58 = vmov 0  }
0x189a   : > { %8995 = vset.pattern.permute.xlu0 %v9211_v58 }
0x189b   : > { %9116 = vpow2.f32 %v7211_v59  ;;  %v7712_v59 = vrot.slane %v7676_v57, 1 }
0x18a1   : > { %v9115_v18 = vpop.eup %9114 }
0x18a2   : > { %v7215_v6 = vsel %vm4902_vm6, %v9115_v18, 0.0 }
0x18a5   : > { %v9117_v8 = vpop.eup %9116 }
0x18c9   : > { %s10229_s30 = spop %8903 }
0x18d7   : > { %v6870_v60 = vpop.f32.mrb[64].mxu0 }
0x18d8   : > { %v10153_v61 = vadd.f32 %v6870_v60, %v10074_v17  ;;  %v8792_v62 = vpop.f32.mrb[65].mxu0  ;;  %v7221_v17 = vsel %vm4902_vm6, %v9117_v8, 0.0  ;;  %v7747_v60 = vrot.slane %v7676_v57, 2 }
0x18d9   : > { %v7782_v62 = vrot.slane %v7676_v57, 3 }
0x18db   : > { %v7027_v63 = vpop.f32.mrb[66].mxu0 }
0x18dc   : > { %v7188_v1 = vmul.f32 0.35355338, %v7027_v63  ;;  %v8802_v2 = vpop.f32.mrb[67].mxu0 }
0x18de   : > { %v7194_v3 = vsel %vm4902_vm6, %v7188_v1, -inf }
0x18df   : > { %7195 = vmax.xlane.f32.xlu1 %v7194_v3  ;;  %v7183_v20 = vpop.f32.mrb[68].mxu0 }
0x18e0   : > { %v7190_v24 = vmul.f32 0.35355338, %v7183_v20  ;;  %v8812_v4 = vpop.f32.mrb[69].mxu0 }
0x18e2   : > { %v7200_v7 = vsel %vm4902_vm6, %v7190_v24, -inf }
0x18e3   : > { %7216 = vadd.xlane.f32.xlu1 %v7215_v6  ;;  %7201 = vmax.xlane.f32.xlu0 %v7200_v7 }
0x18e7   : > { %7222 = vadd.xlane.f32.xlu1 %v7221_v17 }
0x18f8   : > { %7235 = vrot.lane.b32.xlu1 %v9857_v13, %s10419_s0 }
0x18fc   : > { %7389 = vrot.lane.b32.xlu1 %v9865_v44, %s10419_s0 }
0x1900   : > { %7466 = vrot.lane.b32.xlu1 %v9870_v26, %s10419_s0 }
0x1904   : > { %7682 = vrot.lane.b32.xlu1 %v7676_v57, %s9212_s4 }
0x1908   : > { %7692 = vrot.lane.b32.xlu1 %v7676_v57, %s9213_s29 }
0x190c   : > { %7702 = vrot.lane.b32.xlu1 %v7676_v57, %s9214_s27 }
0x1910   : > { %7717 = vrot.lane.b32.xlu1 %v7712_v59, %s9212_s4 }
0x1914   : > { %7727 = vrot.lane.b32.xlu1 %v7712_v59, %s9213_s29 }
0x1918   : > { %7737 = vrot.lane.b32.xlu1 %v7712_v59, %s9214_s27 }
0x191c   : > { %7752 = vrot.lane.b32.xlu1 %v7747_v60, %s9212_s4 }
0x1920   : > { %7762 = vrot.lane.b32.xlu1 %v7747_v60, %s9213_s29 }
0x1924   : > { %7787 = vrot.lane.b32.xlu1 %v7782_v62, %s9212_s4 }
0x1928   : > { %7797 = vrot.lane.b32.xlu1 %v7782_v62, %s9213_s29 }
0x192c   : > { %7807 = vrot.lane.b32.xlu1 %v7782_v62, %s9214_s27 }
0x196c   : > { %v7196_v9 = vpop.xlane.xlu1 %7195 }
0x196d   : > { %v7204_v10 = vsub.f32 %v7188_v1, %v7196_v9  ;;  %v8201_v1 = vld [vmem:[%s10358_s15] ss:$0 sm:$0xff] }
0x196f   : > { %v7209_v11 = vmul.f32 1.442695, %v7204_v10 }
0x1970   : > { %v7217_v12 = vpop.xlane.xlu1 %7216  ;;  %v7202_v38 = vpop.xlane.xlu0 %7201 }
0x1971   : > { %9118 = vpow2.f32 %v7209_v11  ;;  %v7206_v15 = vsub.f32 %v7190_v24, %v7202_v38 }
0x1972   : > { %9120 = vrcp.f32 %v7217_v12 }
0x1973   : > { %v7213_v43 = vmul.f32 1.442695, %v7206_v15 }
0x1974   : > { %v7223_v53 = vpop.xlane.xlu1 %7222 }
0x1975   : > { %9122 = vpow2.f32 %v7213_v43 }
0x1976   : > { %9124 = vrcp.f32 %v7223_v53 }
0x1978   : > { %v7236_v54 = vpop.permute.xlu1 %7235 }
0x1979   : > { %8814 = vmatpush3.msk.msra.mxu1 %vm945_vm14, %v7236_v54 }
0x197a   : > { %8823 = vmatprep.subr.mxu1 %v9196_v0 }
0x197b   : > { %v9119_v13 = vpop.eup %9118 }
0x197c   : > { %v9121_v44 = vpop.eup %9120  ;;  %v7218_v26 = vsel %vm4902_vm6, %v9119_v13, 0.0  ;;  %v7390_v19 = vpop.permute.xlu1 %7389 }
0x197d   : > { %v7231_v16 = vmul.f32 %v9121_v44, %v9115_v18  ;;  %7219 = vadd.xlane.f32.xlu0 %v7218_v26 }
0x197f   : > { %v9123_v22 = vpop.eup %9122  ;;  %8816 = vmatmul.mubr.msk.f32.vlgmr.msra.gmra.mrb[72].mxu1 %vm4949_vm7, %v7231_v16 }
0x1980   : > { %v9125_v25 = vpop.eup %9124  ;;  %8824 = vmatpush3.msk.msra.mxu1 %vm945_vm14, %v7390_v19  ;;  %8825 = vmatprep.mubr.msk.f32.mxu1 %vm9197_vm0, %v9196_v0  ;;  %v7224_v28 = vsel %vm4902_vm6, %v9123_v22, 0.0  ;;  %v7467_v35 = vpop.permute.xlu1 %7466 }
0x1981   : > { %v7233_v29 = vmul.f32 %v9125_v25, %v9117_v8  ;;  %7225 = vadd.xlane.f32.xlu0 %v7224_v28  ;;  %8833 = vmatprep.subr.mxu1 %v9196_v0 }
0x1983   : > { %8826 = vmatmul.mubr.msk.f32.vlgmr.msra.gmra.mrb[74].mxu1 %vm4949_vm7, %v7233_v29 }
0x1984   : > { %8835 = vmatprep.mubr.msk.f32.mxu1 %vm9197_vm0, %v9196_v0  ;;  %8834 = vmatpush3.msra.mxu1 %v7543_v48  ;;  %v7683_v4 = vpop.permute.xlu1 %7682  ;;  %v7679_v48 = vstv %s10229_s30 }
0x1985   : > { %8905 = vpush %v7683_v4 }
0x1988   : > { %v7693_v6 = vpop.permute.xlu1 %7692 }
0x1989   : > { %8907 = vpush %v7693_v6 }
0x198c   : > { %v7703_v7 = vpop.permute.xlu1 %7702 }
0x198d   : > { %8909 = vpush %v7703_v7 }
0x198e   : > { %8911 = vpush %v7712_v59 }
0x1990   : > { %v7718_v8 = vpop.permute.xlu1 %7717 }
0x1991   : > { %8913 = vpush %v7718_v8 }
0x1997   : > { %7312 = vrot.lane.b32.xlu0 %v9860_v41, %s10419_s0  ;;  %s10421_s0 = sld [smem:[#allocation15_spill]] }
0x199d   : > { %v633_v24 = vld [vmem:[%s10421_s0] sm:$0x3] }
0x19b6   : > { %s10231_s26 = spop %8905 }
0x19ba   : > { %s10233_s20 = spop %8907 }
0x19be   : > { %s10235_s1 = spop %8909 }
0x19bf   : > { %s10237_s0 = spop %8911 }
0x19c2   : > { %s10239_s25 = spop %8913 }
0x1a0a   : > { %v7220_v30 = vpop.xlane.xlu0 %7219 }
0x1a0b   : > { %9126 = vrcp.f32 %v7220_v30 }
0x1a0e   : > { %v7226_v31 = vpop.xlane.xlu0 %7225 }
0x1a0f   : > { %9128 = vrcp.f32 %v7226_v31 }
0x1a12   : > { %v7313_v32 = vpop.permute.xlu0 %7312 }
0x1a13   : > { %8819 = vmatpush3.msk.msra.mxu0 %vm945_vm14, %v7313_v32 }
0x1a14   : > { %8828 = vmatprep.subr.mxu0 %v9196_v0 }
0x1a15   : > { %v9127_v33 = vpop.eup %9126 }
0x1a16   : > { %v7232_v34 = vmul.f32 %v9127_v33, %v9119_v13 }
0x1a18   : > { %8821 = vmatmul.mubr.msk.f32.vlgmr.msra.gmra.mrb[70].mxu0 %vm4949_vm7, %v7232_v34  ;;  %v7832_v34 = vld [vmem:[%s10361_s18 + $0x18] sm:$0xff] }
0x1a19   : > { %v9129_v36 = vpop.eup %9128  ;;  %8829 = vmatpush3.msk.msra.mxu0 %vm945_vm14, %v7467_v35  ;;  %8830 = vmatprep.mubr.msk.f32.mxu0 %vm9197_vm0, %v9196_v0 }
0x1a1a   : > { %v7234_v41 = vmul.f32 %v9129_v36, %v9123_v22  ;;  %8887 = vmatprep.subr.bf16.mxu0 %v9209_v40 }
0x1a1c   : > { %8831 = vmatmul.mubr.msk.f32.vlgmr.msra.gmra.mrb[72].mxu0 %vm4949_vm7, %v7234_v41 }
0x1a1d   : > { %8846 = vmatprep.mubr.msk.f32.mxu0 %vm9197_vm0, %v9196_v0  ;;  %vm7940_vm0 = vcmask 254976  }
0x1a52   : > { %v7308_v37 = vpop.f32.mrb[72].mxu1 }
0x1a53   : > { %v8817_v39 = vpop.f32.mrb[73].mxu1 }
0x1a54   : > { %v8202_v39 = vld [vmem:[%s10359_s16] ss:$0 sm:$0xff] }
0x1a56   : > { %v7462_v42 = vpop.f32.mrb[74].mxu1 }
0x1a57   : > { %v8827_v47 = vpop.f32.mrb[75].mxu1 }
0x1a58   : > { %v8203_v47 = vld [vmem:[%s10360_s17] ss:$0 sm:$0xff] }
0x1aeb   : > { %v7385_v49 = vpop.f32.mrb[70].mxu0 }
0x1aec   : > { %v7548_v50 = vcombine.low %v7308_v37, %v7385_v49  ;;  %v8822_v52 = vpop.f32.mrb[71].mxu0  ;;  %v7685_v49 = vstv %s10231_s26 }
0x1aed   : > { %v7695_v52 = vstv %s10233_s20  ;;  %s8212_s20 = sshll.u32 %s9344_s2, 7 }
0x1aee   : > { %v7556_v51 = vrot.slane %v7548_v50, %v9852_v5 }
0x1aef   : > { %v7539_v55 = vpop.f32.mrb[72].mxu0 }
0x1af0   : > { %v7549_v45 = vcombine.low %v7462_v42, %v7539_v55  ;;  %v8832_v46 = vpop.f32.mrb[73].mxu0  ;;  %v7705_v55 = vstv %s10235_s1 }
0x1af1   : > { %v7720_v46 = vstv %s10239_s25 }
0x1af2   : > { %v7563_v56 = vrot.slane %v7549_v45, %v9852_v5  ;;  %v7714_v45 = vstv %s10237_s0 }
0x1af4   : > { %v7564_v0 = vcombine.low %v7556_v51, %v7563_v56 }
0x1af6   : > { %8836 = vmatmul.mubr.msk.f32.vlgmr.msra.gmra.mrb[76].mxu1 %vm1049_vm4, %v7564_v0 }
0x1bc9   : > { %v7633_v63 = vpop.f32.mrb[76].mxu1 }
0x1bca   : > { %v7637_v2 = vadd.f32 %v7633_v63, %v10153_v61  ;;  %v8837_v3 = vpop.f32.mrb[77].mxu1  ;;  %v7728_v61 = vpop.permute.xlu1 %7727 }
0x1bcb   : > { %8915 = vpush %v7728_v61 }
0x1bcc   : > { %v7645_v18 = vadd.f32 %v8201_v1, %v7637_v2 }
0x1bce   : > { %v7646_v20 = vsel %vm963_vm3, %v7645_v18, 0.0  ;;  %v7738_v17 = vpop.permute.xlu1 %7737 }
0x1bcf   : > { %7647 = vadd.xlane.f32.xlu0 %v7646_v20  ;;  %8917 = vpush %v7738_v17 }
0x1bd0   : > { %8919 = vpush %v7747_v60 }
0x1bd2   : > { %v7753_v9 = vpop.permute.xlu1 %7752 }
0x1bd3   : > { %8921 = vpush %v7753_v9 }
0x1bd6   : > { %v7763_v10 = vpop.permute.xlu1 %7762 }
0x1bd7   : > { %8923 = vpush %v7763_v10 }
0x1bda   : > { %v7788_v11 = vpop.permute.xlu1 %7787 }
0x1bde   : > { %v7798_v38 = vpop.permute.xlu1 %7797 }
0x1be2   : > { %v7808_v13 = vpop.permute.xlu1 %7807 }
0x1be5   : > { %7772 = vrot.lane.b32.xlu0 %v7747_v60, %s9214_s27 }
0x1be9   : > { %636 = vperm.xlu0 %8995, %v633_v24  }
0x1bfc   : > { %s10241_s23 = spop %8915 }
0x1bfd   : > { %v7730_v51 = vstv %s10241_s23 }
0x1c00   : > { %s10243_s24 = spop %8917 }
0x1c01   : > { %s10245_s3 = spop %8919  ;;  %v7740_v56 = vstv %s10243_s24  ;;  %s10423_s24 = sld [smem:[#allocation22_spill]] }
0x1c02   : > { %v7749_v0 = vstv %s10245_s3 }
0x1c04   : > { %s10247_s28 = spop %8921 }
0x1c05   : > { %v7755_v58 = vstv %s10247_s28 }
0x1c07   : > { %s10424_s3 = smov %s10423_s24  ;;  %s10298_s28 = scalar_lea.hbm %s10423_s24, %s8212_s20 }
0x1c08   : > { %s10249_s4 = spop %8923 }
0x1c09   : > { %v7765_v59 = vstv %s10249_s4 }
0x1c5c   : > { %v7648_v12 = vpop.xlane.xlu0 %7647 }
0x1c5d   : > { %v7650_v15 = vmul.f32 0.03125, %v7648_v12 }
0x1c5f   : > { %v7651_v43 = vsub.f32 %v7645_v18, %v7650_v15 }
0x1c60   : > { %v7773_v53 = vpop.permute.xlu0 %7772 }
0x1c61   : > { %v7652_v54 = vmul.f32 %v7651_v43, %v7651_v43  ;;  %8925 = vpush %v7773_v53 }
0x1c62   : > { %8927 = vpush %v7782_v62 }
0x1c63   : > { %v7653_v44 = vsel %vm963_vm3, %v7652_v54, 0.0  ;;  %8929 = vpush %v7788_v11 }
0x1c64   : > { %7654 = vadd.xlane.f32.xlu1 %v7653_v44  ;;  %8931 = vpush %v7798_v38 }
0x1c65   : > { %8933 = vpush %v7808_v13 }
0x1c68   : > { %v637_v26 = vpop.permute.xlu0 %636 }
0x1c69   : > { %v787_v16 = vadd.f32 %v9434_v23, %v637_v26  ;;  %v860_v19 = vadd.f32 %v9419_v14, %v637_v26  ;;  %v933_v22 = vadd.f32 %v9444_v27, %v637_v26  ;;  %v714_v25 = vadd.f32 %v9428_v21, %v637_v26  ;;  %v7829_v23 = vld [vmem:[%s10361_s18] sm:$0xff]  ;;  %v7830_v14 = vld [vmem:[%s10361_s18 + $0x8] sm:$0xff]  ;;  %v7831_v21 = vld [vmem:[%s10361_s18 + $0x10] sm:$0xff] }
0x1c6a   : > { %v8888_v27 = vpack.c.bf16 %v7830_v14, %v7829_v23  ;;  %v8891_v35 = vpack.c.bf16 %v7832_v34, %v7831_v21 }
0x1c6b   : > { %v937_v28 = vrot.slane %v787_v16, 6  ;;  %v940_v29 = vrot.slane %v860_v19, 4  ;;  %v943_v30 = vrot.slane %v933_v22, 2 }
0x1c6c   : > { %8889 = vmatpush3.bf16.msra.mxu0 %v8888_v27 }
0x1c6d   : > { %v946_v31 = vsel %vm945_vm14, %v714_v25, %v937_v28  ;;  %8890 = vmatprep.subr.bf16.mxu0 %v9209_v40 }
0x1c6e   : > { %v947_v32 = vsel %vm643_vm1, %v946_v31, %v940_v29 }
0x1c6f   : > { %v10214_v33 = vsel %vm948_vm5, %v947_v32, %v943_v30 }
0x1c70   : > { %8892 = vmatpush3.bf16.msra.mxu0 %v8891_v35 }
0x1c92   : > { %s10251_s29 = spop %8925 }
0x1c93   : > { %s10256_s6 = spop %8927  ;;  %v7775_v60 = vstv %s10251_s29  ;;  %s9215_s29 = smov [#allocation2]  }
0x1c94   : > { %s10263_s9 = spop %8929  ;;  %v7784_v62 = vstv %s10256_s6  ;;  %s9136_s27 = sshll.u32 %s9215_s29, 4  ;;  %s9137_s27 = int_to_ptr.vmem [resolvable:$false] %s9136_s27 }
0x1c95   : > { %s10269_s5 = spop %8931  ;;  %v7790_v63 = vstv %s10263_s9  ;;  %s620_s9 = sand.u32 1, %s9186_s22  }
0x1c96   : > { %s10274_s7 = spop %8933  ;;  %v7800_v1 = vstv %s10269_s5  ;;  %s8025_s30 = sshll.u32 %s620_s9, 3 }
0x1c97   : > { %v7810_v18 = vstv %s10274_s7  ;;  %s622_s1 = scalar_lea.vmem [#allocation2], %s8025_s30  ;;  %s10302_s2 = scalar_lea.sflag [#allocation3], %s620_s9 }
0x1c98   : > { %s7959_s0 = sshll.u32 %s622_s1, 4  ;;  %s9138_s5 = scalar_lea.vmem %s9137_s27, 256  ;;  %s10300_s0 = int_to_ptr.vmem [resolvable:$true] %s7959_s0 }
0x1c99   : > { %s9132_s4 = scalar_lea.vmem %s10300_s0, 128  ;;  %p9139_p0 = scmp.lt.s32.totalorder %s10300_s0, %s9137_s27 }
0x1c9a   : > { %p9133_p11 = scmp.ne.s32.totalorder %s10300_s0, %s9132_s4  ;;  %p9140_p1 = scmp.lt.s32.totalorder %s9138_s5, %s9132_s4 }
0x1c9c   : > { %p9134_p12 = pnand %p9133_p11, %p9361_p5  ;;  %p9141_p2 = por %p9140_p1, %p9139_p0 }
0x1c9e   : > { %p9135_p13 = pneg %p9134_p12 }
0x1ca0   : > { %p9142_p3 = pnand %p9141_p2, %p9135_p13 }
0x1cf1   : > { %v7655_v36 = vpop.xlane.xlu1 %7654 }
0x1cf2   : > { %v7656_v41 = vmul.f32 0.03125, %v7655_v36 }
0x1cf4   : > { %v7657_v37 = vadd.f32 1e-05, %v7656_v41 }
0x1cf6   : > { %9130 = vrsqrt.f32 %v7657_v37 }
0x1d00   : > { %v9131_v40 = vpop.eup %9130 }
0x1d01   : > { %v7659_v42 = vmul.f32 %v9131_v40, %v7651_v43 }
0x1d03   : > { %v7667_v50 = vmul.f32 %v8202_v39, %v7659_v42 }
0x1d05   : > { %v7675_v57 = vadd.f32 %v8203_v47, %v7667_v50  ;;  %v8204_v50 = vld [vmem:[%s10362_s19] ss:$0 sm:$0xff] }
0x1d07   : > { %v7687_v2 = vmul.f32 %v7685_v49, %v7675_v57  ;;  %v7697_v3 = vmul.f32 %v7695_v52, %v7675_v57  ;;  %v7681_v20 = vmul.f32 %v7679_v48, %v7675_v57  ;;  %v7722_v24 = vmul.f32 %v7720_v46, %v7675_v57 }
0x1d08   : > { %v7732_v4 = vmul.f32 %v7730_v51, %v7675_v57  ;;  %v7707_v7 = vmul.f32 %v7705_v55, %v7675_v57  ;;  %v7716_v8 = vmul.f32 %v7714_v45, %v7675_v57  ;;  %v7742_v61 = vmul.f32 %v7740_v56, %v7675_v57 }
0x1d09   : > { %v7689_v6 = vrot.slane %v7687_v2, 2  ;;  %v7699_v17 = vrot.slane %v7697_v3, 4  ;;  %v7724_v9 = vrot.slane %v7722_v24, 2  ;;  %v7751_v10 = vmul.f32 %v7749_v0, %v7675_v57 }
0x1d0a   : > { %v7757_v11 = vmul.f32 %v7755_v58, %v7675_v57  ;;  %v7734_v38 = vrot.slane %v7732_v4, 4  ;;  %v7767_v15 = vmul.f32 %v7765_v59, %v7675_v57  ;;  %v7777_v43 = vmul.f32 %v7775_v60, %v7675_v57 }
0x1d0b   : > { %v7691_v12 = vadd.f32 %v7689_v6, %v7681_v20  ;;  %v7726_v53 = vadd.f32 %v7724_v9, %v7716_v8  ;;  %v7792_v13 = vmul.f32 %v7790_v63, %v7675_v57  ;;  %v7802_v44 = vmul.f32 %v7800_v1, %v7675_v57 }
0x1d0c   : > { %v7759_v54 = vrot.slane %v7757_v11, 2  ;;  %v7744_v16 = vrot.slane %v7742_v61, 6  ;;  %v7769_v19 = vrot.slane %v7767_v15, 4  ;;  %v7786_v22 = vmul.f32 %v7784_v62, %v7675_v57 }
0x1d0d   : > { %v7701_v26 = vadd.f32 %v7699_v17, %v7691_v12  ;;  %v7736_v25 = vadd.f32 %v7734_v38, %v7726_v53  ;;  %v7794_v29 = vrot.slane %v7792_v13, 2  ;;  %v7812_v30 = vmul.f32 %v7810_v18, %v7675_v57 }
0x1d0e   : > { %v7761_v28 = vadd.f32 %v7759_v54, %v7751_v10  ;;  %v7709_v31 = vrot.slane %v7707_v7, 6  ;;  %v7779_v32 = vrot.slane %v7777_v43, 6  ;;  %v7804_v27 = vrot.slane %v7802_v44, 4 }
0x1d0f   : > { %v7746_v23 = vadd.f32 %v7744_v16, %v7736_v25  ;;  %v7796_v21 = vadd.f32 %v7794_v29, %v7786_v22  ;;  %v7814_v41 = vrot.slane %v7812_v30, 6  ;;  %v7914_v51 = vmul.f32 0.5, %v7675_v57 }
0x1d10   : > { %v7771_v14 = vadd.f32 %v7769_v19, %v7761_v28  ;;  %v7711_v34 = vadd.f32 %v7709_v31, %v7701_v26 }
0x1d11   : > { %v7806_v36 = vadd.f32 %v7804_v27, %v7796_v21  ;;  %v7818_v37 = vrot.slane %v7746_v23, 6 }
0x1d12   : > { %v7781_v35 = vadd.f32 %v7779_v32, %v7771_v14 }
0x1d13   : > { %v7816_v40 = vadd.f32 %v7814_v41, %v7806_v36  ;;  %v7826_v42 = vsel %vm945_vm14, %v7711_v34, %v7818_v37 }
0x1d14   : > { %v7821_v39 = vrot.slane %v7781_v35, 4 }
0x1d15   : > { %v7824_v47 = vrot.slane %v7816_v40, 2 }
0x1d16   : > { %v7827_v48 = vsel %vm643_vm1, %v7826_v42, %v7821_v39 }
0x1d17   : > { %v7828_v49 = vsel %vm948_vm5, %v7827_v48, %v7824_v47 }
0x1d18   : > { %8847 = vmatmul.mubr.msk.f32.vlgmr.msra.gmra.mrb[74].mxu0 %vm963_vm3, %v7828_v49 }
0x1deb   : > { %v7909_v52 = vpop.f32.mrb[74].mxu0 }
0x1dec   : > { %v7910_v55 = vadd.f32 %v8204_v50, %v7909_v52  ;;  %v8848_v45 = vpop.f32.mrb[75].mxu0 }
0x1dee   : > { %v7913_v46 = vmax.f32 %v7910_v55, 0.0 }
0x1df0   : > { %v7915_v56 = vmul.f32 0.5, %v7913_v46 }
0x1df2   : > { %v7916_v0 = vadd.f32 %v7915_v56, %v7914_v51 }
0x1df4   : > { %v7917_v58 = vadd.f32 %v7916_v0, %v10214_v33 }
0x1df6   : > { %v7919_v59 = vcombine.high %v7917_v58, %v7917_v58  ;;  %v7926_v60 = vrot.slane %v7917_v58, %v9852_v5 }
0x1df8   : > { %v7933_v62 = vrot.slane %v7919_v59, %v9852_v5  ;;  %v7934_v63 = vcombine.high %v7926_v60, %v7926_v60  ;;  %7941 = vst.msk [vmem:[%s622_s1] sm:$0x3] %vm7940_vm0, %v7926_v60 }
0x1dfa   : > { %v7935_v33 = vcombine.high %v7933_v62, %v7933_v62  ;;  %7942 = vst.msk [vmem:[%s622_s1 + $0x2] sm:$0x3] %vm7940_vm0, %v7934_v63  ;;  %7943 = vst.msk [vmem:[%s622_s1 + $0x4] sm:$0x3] %vm7940_vm0, %v7933_v62 }
0x1dfc   : > { %7944 = vst.msk [vmem:[%s622_s1 + $0x6] sm:$0x3] %vm7940_vm0, %v7935_v33 }
0x1dfd   : > { %9145 = shalt.err (!%p9142_p3)
}
0x1dfe   : > { %s9146_s7 = scalar_lea.hbm %s10298_s28, 128  ;;  %s9150_s9 = scalar_lea.hbm %s10424_s3, 256 }
0x1dff   : > { %p9147_p4 = scmp.ne.s32.totalorder %s10298_s28, %s9146_s7  ;;  %p9151_p9 = scmp.lt.u32.totalorder %s10298_s28, %s10424_s3 }
0x1e00   : > { %p9152_p10 = scmp.lt.u32.totalorder %s9150_s9, %s9146_s7  ;;  %p9154_p12 = scmp.lt.u32.totalorder %s9146_s7, %s10298_s28 }
0x1e01   : > { %p9148_p7 = pnand %p9147_p4, %p9361_p5 }
0x1e02   : > { %p9153_p11 = por %p9152_p10, %p9151_p9 }
0x1e03   : > { %p9149_p8 = pneg %p9148_p7 }
0x1e04   : > { %p9155_p13 = por %p9154_p12, %p9153_p11 }
0x1e06   : > { %p9156_p0 = pnand %p9155_p13, %p9149_p8 }
0x1e08   : > { %9159 = shalt.err (!%p9156_p0)
}
0x1e09   : > { %s9216_s1 = smov 32   ;;  %s9217_s25 = smov 2  }
0x1e0a   : > { %8935 = dma.vmem_to_hbm [thread:$0]  (%p9361_p5), %s10300_s0, 128, %s10298_s28, %s10302_s2, %s9216_s1, %s9216_s1, %s9217_s25  }
0x1e0b PF: > { %s10425_s23 = sld [smem:[#allocation7_spill]]  ;;  %s10426_s24 = sld [smem:[#allocation5_spill]] }
0x1e11   : > { %p8941_p1 = scmp.ge.s32.totalorder %s10425_s23, 2  ;;  %s7974_s29 = sand.u32 1, %s10426_s24  }
0x1e12   : > { %s7975_s27 = scalar_lea.sflag [#allocation3], %s7974_s29 }
0x1e13   : > { %p8938_p2 = pnand %p8941_p1, %p9365_p6 }
0x1e15   : > { %9177 = dma.done.wait (!%p8938_p2), %s7975_s27, 128  }
0x1e16   : > { %9179 = vsyncadd (!%p8938_p2), %s7975_s27, 4294967168  ;;  %s10428_s24 = sld [smem:[#allocation8_spill]]  ;;  %s10429_s5 = sld [smem:[#allocation6_spill]] }
0x1e17   : > { %s10430_s23 = sld [smem:[#allocation9_spill]]  ;;  %s10431_s1 = smov %s9186_s22 }
0x1e1c   : > { %p30_p3 = scmp.ge.s32.totalorder %s10428_s24, 4   ;;  %s10432_s22 = smov %s10429_s5 }
0x1e1e   :  { %32 = sbr.rel (!%p30_p3) target bundleno = 15 (0xf), region = 137 }
0x1e25   :  { %7980 = vsyncpa [#allocation3], 1 }
0x1e26   :  { %7982 = vsyncpa [#allocation3 + $0x1], 1 }

</bundles_post_ra>
